<compile_context>
chip_gen: v7x
topology: tpu7x:2x2x1
jax: 0.10.0
libtpu: 0.0.40
codegen_flags: <defaults>
</compile_context>

<pallas_src>
import functools

import numpy as np
import jax
import jax.numpy as jnp
from jax.experimental import pallas as pl
from jax.experimental.pallas import tpu as pltpu


# ---------------------------------------------------------------------------
# Boundary masks for the 9 taps of a 3x3 "same" conv on a flattened image,
# tiled over the images folded into the lane axis and pre-broadcast over the
# (max) channel count so the masking multiply is a full-slab VPU op.
# ---------------------------------------------------------------------------
def make_tap_masks(H, W, images_per_group, c_max):
    hh, ww = np.meshgrid(np.arange(H), np.arange(W), indexing="ij")
    m = np.zeros((9, H * W), np.float32)
    k = 0
    for dy in (-1, 0, 1):
        for dx in (-1, 0, 1):
            valid = ((hh + dy >= 0) & (hh + dy < H) &
                     (ww + dx >= 0) & (ww + dx < W))
            m[k] = valid.reshape(-1).astype(np.float32)
            k += 1
    m = np.tile(m, (1, images_per_group))                       # (9, Bg*HW)
    m = np.broadcast_to(m[:, None, :], (9, c_max, m.shape[-1])).copy()
    return jnp.asarray(m)                                        # (9, Cmax, Bg*HW)


# ---------------------------------------------------------------------------
# Fused kernel: the whole L-layer ConvLSTM stack for one (group, timestep).
# ---------------------------------------------------------------------------
def _stack_kernel(*refs, L, W, Cs, Hds):
    # refs layout:
    #   [x, mask, (wx_0, wh_0, b_0), ..., (wx_{L-1}, wh_{L-1}, b_{L-1}),
    #    h_seq_out, h_last_out, c_last_out,
    #    patch_scratch, (h_s_0, c_s_0), ..., (h_s_{L-1}, c_s_{L-1})]
    x_ref = refs[0]
    mask_ref = refs[1]
    w_refs = refs[2:2 + 3 * L]
    h_seq_ref, h_last_ref, c_last_ref = refs[2 + 3 * L:5 + 3 * L]
    pat_s = refs[5 + 3 * L]
    state = refs[6 + 3 * L:]

    t = pl.program_id(1)

    @pl.when(t == 0)
    def _init():                       # zero-init (h, c) of every layer
        for s in state:
            s[...] = jnp.zeros_like(s)

    def build_patches(img, C):
        """img: (C, NL) value -> writes rows [0, 9*C) of pat_s (tap-major,
        channel-minor) and returns them.  Spatial shifts are lane rotations;
        the pre-broadcast masks zero out-of-image (and cross-image) sources."""
        NL = img.shape[1]
        k = 0
        for dy in (-1, 0, 1):
            for dx in (-1, 0, 1):
                off = dy * W + dx
                shifted = img if off == 0 else pltpu.roll(img, (-off) % NL, axis=1)
                pat_s[k * C:(k + 1) * C, :] = shifted * mask_ref[k, 0:C, :]
                k += 1
        return pat_s[0:9 * C, :]

    cur = x_ref[0, 0]                                           # (C0p, NL)
    last_c = None
    for l in range(L):
        C, Hd = Cs[l], Hds[l]
        wx_ref, wh_ref, b_ref = w_refs[3 * l], w_refs[3 * l + 1], w_refs[3 * l + 2]
        h_s, c_s = state[2 * l], state[2 * l + 1]

        # input->gates and hidden->gates convs as two matmuls into one acc
        acc = jnp.dot(wx_ref[...], build_patches(cur, C),
                      preferred_element_type=jnp.float32)
        acc = acc + jnp.dot(wh_ref[...], build_patches(h_s[...], Hd),
                            preferred_element_type=jnp.float32)
        acc = acc + b_ref[...]                                   # (4*Hd, NL)

        i = jax.nn.sigmoid(acc[0 * Hd:1 * Hd, :])
        f = jax.nn.sigmoid(acc[1 * Hd:2 * Hd, :])
        o = jax.nn.sigmoid(acc[2 * Hd:3 * Hd, :])
        g = jnp.tanh(acc[3 * Hd:4 * Hd, :])

        c_next = f * c_s[...] + i * g
        h_next = o * jnp.tanh(c_next)

        c_s[...] = c_next
        h_s[...] = h_next
        cur = h_next
        last_c = c_next

    h_seq_ref[0, 0] = cur              # last layer's h_t (lane-dense store)
    h_last_ref[0] = cur                # resident block; final write = t == T-1
    c_last_ref[0] = last_c


# ---------------------------------------------------------------------------
# Weight conversion: PyTorch Conv2d layout -> tap-major im2col layout
# ---------------------------------------------------------------------------
def _prep_layer_weights(w, b, cin, cin_pad, hd):
    """w: (4*hd, cin+hd, 3, 3), b: (4*hd,)  ->  wx (4hd, 9*cin_pad),
    wh (4hd, 9*hd), bias (4hd, 1).  Columns ordered (ky, kx, channel) to
    match the patch rows; split along in-channels == torch.cat([x, h], 1)."""
    G = 4 * hd
    wx = w[:, :cin]
    wh = w[:, cin:]
    if cin_pad > cin:
        wx = jnp.pad(wx, ((0, 0), (0, cin_pad - cin), (0, 0), (0, 0)))
    wx = jnp.transpose(wx, (0, 2, 3, 1)).reshape(G, 9 * cin_pad)
    wh = jnp.transpose(wh, (0, 2, 3, 1)).reshape(G, 9 * hd)
    return wx, wh, b.reshape(G, 1)


# ---------------------------------------------------------------------------
# Wrapper: layout folding, single fused pallas_call, un-folding
# ---------------------------------------------------------------------------
def convlstm_forward(x, weights, biases, hidden_dims, *, parallel_groups=1):
    """ConvLSTM forward (batch_first=True, zero-init states).

    x: (B, T, C_in, H, W) f32.  weights[l]/biases[l] in PyTorch Conv2d layout.
    Returns ([h_seq], [(h_last, c_last)]) for the last layer, mirroring the
    PyTorch module with return_all_layers=False."""
    B, T, Cin, H, W = x.shape
    L = len(hidden_dims)
    Gp = parallel_groups
    assert B % Gp == 0, "batch must be divisible by parallel_groups"
    Bg = B // Gp
    HW = H * W
    NL = Bg * HW                                   # folded lane width
    C0p = ((Cin + 7) // 8) * 8                     # pad input ch to sublane tile
    Cs = [C0p] + [hidden_dims[l - 1] for l in range(1, L)]
    Hds = list(hidden_dims)
    Cmax = max(Cs + Hds)
    Hd_last = Hds[-1]

    # Fold: (B,T,Cin,H,W) -> (Gp, T, C0p, Bg*HW), channels on sublanes,
    # (image-in-group, spatial) on lanes.
    xp = jnp.pad(x.reshape(B, T, Cin, HW),
                 ((0, 0), (0, 0), (0, C0p - Cin), (0, 0)))
    xf = (xp.reshape(Gp, Bg, T, C0p, HW)
            .transpose(0, 2, 3, 1, 4)
            .reshape(Gp, T, C0p, NL))

    mask = make_tap_masks(H, W, Bg, Cmax)          # (9, Cmax, NL)

    flat_w = []
    in_specs = [
        pl.BlockSpec((1, 1, C0p, NL), lambda g, t: (g, t, 0, 0)),
        pl.BlockSpec((9, Cmax, NL), lambda g, t: (0, 0, 0)),     # resident
    ]
    cin = Cin
    for l in range(L):
        hd = Hds[l]
        wx, wh, bb = _prep_layer_weights(weights[l], biases[l], cin, Cs[l], hd)
        flat_w += [wx, wh, bb]
        in_specs += [
            pl.BlockSpec(wx.shape, lambda g, t: (0, 0)),          # resident
            pl.BlockSpec(wh.shape, lambda g, t: (0, 0)),          # resident
            pl.BlockSpec(bb.shape, lambda g, t: (0, 0)),          # resident
        ]
        cin = hd

    out_shape = (
        jax.ShapeDtypeStruct((Gp, T, Hd_last, NL), jnp.float32),  # h sequence
        jax.ShapeDtypeStruct((Gp, Hd_last, NL), jnp.float32),     # last h
        jax.ShapeDtypeStruct((Gp, Hd_last, NL), jnp.float32),     # last c
    )
    out_specs = (
        pl.BlockSpec((1, 1, Hd_last, NL), lambda g, t: (g, t, 0, 0)),
        pl.BlockSpec((1, Hd_last, NL), lambda g, t: (g, 0, 0)),
        pl.BlockSpec((1, Hd_last, NL), lambda g, t: (g, 0, 0)),
    )

    scratch = [pltpu.VMEM((9 * Cmax, NL), jnp.float32)]           # shared patches
    for l in range(L):
        scratch += [pltpu.VMEM((Hds[l], NL), jnp.float32),        # h state
                    pltpu.VMEM((Hds[l], NL), jnp.float32)]        # c state

    kernel = functools.partial(_stack_kernel, L=L, W=W,
                               Cs=tuple(Cs), Hds=tuple(Hds))

    h_seq_f, h_last_f, c_last_f = pl.pallas_call(
        kernel,
        grid=(Gp, T),
        in_specs=in_specs,
        out_specs=out_specs,
        out_shape=out_shape,
        scratch_shapes=scratch,
        compiler_params=pltpu.CompilerParams(
            dimension_semantics=("parallel", "arbitrary")),
    )(xf, mask, *flat_w)

    # Un-fold back to the PyTorch layouts.
    h_seq = (h_seq_f.reshape(Gp, T, Hd_last, Bg, HW)
             .transpose(0, 3, 1, 2, 4)
             .reshape(B, T, Hd_last, H, W))
    h_last = (h_last_f.reshape(Gp, Hd_last, Bg, HW)
              .transpose(0, 2, 1, 3)
              .reshape(B, Hd_last, H, W))
    c_last = (c_last_f.reshape(Gp, Hd_last, Bg, HW)
              .transpose(0, 2, 1, 3)
              .reshape(B, Hd_last, H, W))
    return [h_seq], [(h_last, c_last)]


# ---------------------------------------------------------------------------
# Pure-JAX reference (mirrors the PyTorch ConvLSTM forward) for validation
# ---------------------------------------------------------------------------
def ref_convlstm_forward(x, weights, biases, hidden_dims):
    B, T, Cin, H, W = x.shape
    cur = x
    h = c = None
    for l, hd in enumerate(hidden_dims):
        w, b = weights[l], biases[l]
        h = jnp.zeros((B, hd, H, W), jnp.float32)
        c = jnp.zeros((B, hd, H, W), jnp.float32)
        outs = []
        for t in range(T):
            comb = jnp.concatenate([cur[:, t], h], axis=1)
            conv = jax.lax.conv_general_dilated(
                comb, w, window_strides=(1, 1), padding="SAME",
                dimension_numbers=("NCHW", "OIHW", "NCHW"),
                precision=jax.lax.Precision.HIGHEST) + b[None, :, None, None]
            i = jax.nn.sigmoid(conv[:, 0 * hd:1 * hd])
            f = jax.nn.sigmoid(conv[:, 1 * hd:2 * hd])
            o = jax.nn.sigmoid(conv[:, 2 * hd:3 * hd])
            g = jnp.tanh(conv[:, 3 * hd:4 * hd])
            c = f * c + i * g
            h = o * jnp.tanh(c)
            outs.append(h)
        cur = jnp.stack(outs, axis=1)
    return [cur], [(h, c)]


if __name__ == "__main__":
    # Small shapes: (B, T, C, H, W) = (4, 8, 4, 16, 16), 3 layers of hidden 16.
    # parallel_groups=2 -> 2 images folded into each group's lanes (exercises
    # the cross-image masking) AND a parallel grid axis of extent 2 for v7x.
    B, T, Cin, H, W = 4, 8, 4, 16, 16
    hidden_dims = (16, 16, 16)                      # multiples of 8 (alignment)

    key = jax.random.PRNGKey(0)
    kx, kw = jax.random.split(key)
    x = jax.random.normal(kx, (B, T, Cin, H, W), jnp.float32)

    weights, biases = [], []
    cin = Cin
    ks = jax.random.split(kw, 2 * len(hidden_dims))
    for l, hd in enumerate(hidden_dims):
        weights.append(0.1 * jax.random.normal(ks[2 * l], (4 * hd, cin + hd, 3, 3),
                                               jnp.float32))
        biases.append(0.01 * jax.random.normal(ks[2 * l + 1], (4 * hd,),
                                               jnp.float32))
        cin = hd

    fwd = jax.jit(functools.partial(convlstm_forward, hidden_dims=hidden_dims,
                                    parallel_groups=2))
    layer_outputs, last_states = fwd(x, weights, biases)
    h_seq = layer_outputs[0]
    h_last, c_last = last_states[0]
    jax.block_until_ready((h_seq, h_last, c_last))

    assert h_seq.shape == (B, T, hidden_dims[-1], H, W), h_seq.shape
    assert h_last.shape == (B, hidden_dims[-1], H, W), h_last.shape
    assert c_last.shape == (B, hidden_dims[-1], H, W), c_last.shape
    assert h_seq.dtype == jnp.float32

    ref_outputs, ref_states = jax.jit(functools.partial(
        ref_convlstm_forward, hidden_dims=hidden_dims))(x, weights, biases)
    err = max(
        float(jnp.max(jnp.abs(h_seq - ref_outputs[0]))),
        float(jnp.max(jnp.abs(h_last - ref_states[0][0]))),
        float(jnp.max(jnp.abs(c_last - ref_states[0][1]))),
    )
    # Loose tolerance: Pallas matmuls run at default MXU precision, the
    # reference at Precision.HIGHEST.
    assert err < 3e-2, f"max abs error vs pure-JAX reference: {err}"
    print("KERNEL_OK")
</pallas_src>

<mosaic_0001>
module attributes {stable_mosaic.version = 11 : i64} {
  func.func @_stack_kernel(%arg0: i32, %arg1: i32, %arg2: memref<1x1x8x512xf32, #tpu.memory_space<vmem>>, %arg3: memref<9x16x512xf32, #tpu.memory_space<vmem>>, %arg4: memref<64x72xf32, #tpu.memory_space<vmem>>, %arg5: memref<64x144xf32, #tpu.memory_space<vmem>>, %arg6: memref<64x1xf32, #tpu.memory_space<vmem>>, %arg7: memref<64x144xf32, #tpu.memory_space<vmem>>, %arg8: memref<64x144xf32, #tpu.memory_space<vmem>>, %arg9: memref<64x1xf32, #tpu.memory_space<vmem>>, %arg10: memref<64x144xf32, #tpu.memory_space<vmem>>, %arg11: memref<64x144xf32, #tpu.memory_space<vmem>>, %arg12: memref<64x1xf32, #tpu.memory_space<vmem>>, %arg13: memref<1x1x16x512xf32, #tpu.memory_space<vmem>>, %arg14: memref<1x16x512xf32, #tpu.memory_space<vmem>>, %arg15: memref<1x16x512xf32, #tpu.memory_space<vmem>>, %arg16: memref<144x512xf32, #tpu.memory_space<vmem>>, %arg17: memref<16x512xf32, #tpu.memory_space<vmem>>, %arg18: memref<16x512xf32, #tpu.memory_space<vmem>>, %arg19: memref<16x512xf32, #tpu.memory_space<vmem>>, %arg20: memref<16x512xf32, #tpu.memory_space<vmem>>, %arg21: memref<16x512xf32, #tpu.memory_space<vmem>>, %arg22: memref<16x512xf32, #tpu.memory_space<vmem>>) attributes {dimension_semantics = [#tpu.dimension_semantics<parallel>, #tpu.dimension_semantics<arbitrary>], iteration_bounds = array<i64: 2, 8>, scalar_prefetch = 0 : i64, scratch_operands = 7 : i64, tpu.core_type = #tpu.core_type<tc>, window_params = [{transform_indices = @transform_0, window_bounds = array<i64: 1, 1, 8, 512>}, {pipeline_mode = #tpu.pipeline_mode<synchronous>, transform_indices = @transform_1, window_bounds = array<i64: 9, 16, 512>}, {pipeline_mode = #tpu.pipeline_mode<synchronous>, transform_indices = @transform_2, window_bounds = array<i64: 64, 72>}, {pipeline_mode = #tpu.pipeline_mode<synchronous>, transform_indices = @transform_3, window_bounds = array<i64: 64, 144>}, {pipeline_mode = #tpu.pipeline_mode<synchronous>, transform_indices = @transform_4, window_bounds = array<i64: 64, 1>}, {pipeline_mode = #tpu.pipeline_mode<synchronous>, transform_indices = @transform_5, window_bounds = array<i64: 64, 144>}, {pipeline_mode = #tpu.pipeline_mode<synchronous>, transform_indices = @transform_6, window_bounds = array<i64: 64, 144>}, {pipeline_mode = #tpu.pipeline_mode<synchronous>, transform_indices = @transform_7, window_bounds = array<i64: 64, 1>}, {pipeline_mode = #tpu.pipeline_mode<synchronous>, transform_indices = @transform_8, window_bounds = array<i64: 64, 144>}, {pipeline_mode = #tpu.pipeline_mode<synchronous>, transform_indices = @transform_9, window_bounds = array<i64: 64, 144>}, {pipeline_mode = #tpu.pipeline_mode<synchronous>, transform_indices = @transform_10, window_bounds = array<i64: 64, 1>}, {transform_indices = @transform_11, window_bounds = array<i64: 1, 1, 16, 512>}, {transform_indices = @transform_12, window_bounds = array<i64: 1, 16, 512>}, {transform_indices = @transform_13, window_bounds = array<i64: 1, 16, 512>}]} {
    %c0_i32 = arith.constant 0 : i32
    %0 = arith.cmpi eq, %arg1, %c0_i32 : i32
    %1 = arith.extui %0 : i1 to i32
    %c0_i32_0 = arith.constant 0 : i32
    %2 = arith.cmpi ne, %1, %c0_i32_0 : i32
    scf.if %2 {
      %cst_373 = arith.constant 0.000000e+00 : f32
      %395 = vector.broadcast %cst_373 : f32 to vector<16x512xf32>
      %c0_374 = arith.constant 0 : index
      %c0_375 = arith.constant 0 : index
      %396 = vector.load %arg17[%c0_374, %c0_375] : memref<16x512xf32, #tpu.memory_space<vmem>>, vector<16x512xf32>
      tpu.vector_store %arg17[%c0_374, %c0_375], %395 {strides = array<i32>} : memref<16x512xf32, #tpu.memory_space<vmem>>, vector<16x512xf32>,
      %cst_376 = arith.constant 0.000000e+00 : f32
      %397 = vector.broadcast %cst_376 : f32 to vector<16x512xf32>
      %c0_377 = arith.constant 0 : index
      %c0_378 = arith.constant 0 : index
      %398 = vector.load %arg18[%c0_377, %c0_378] : memref<16x512xf32, #tpu.memory_space<vmem>>, vector<16x512xf32>
      tpu.vector_store %arg18[%c0_377, %c0_378], %397 {strides = array<i32>} : memref<16x512xf32, #tpu.memory_space<vmem>>, vector<16x512xf32>,
      %cst_379 = arith.constant 0.000000e+00 : f32
      %399 = vector.broadcast %cst_379 : f32 to vector<16x512xf32>
      %c0_380 = arith.constant 0 : index
      %c0_381 = arith.constant 0 : index
      %400 = vector.load %arg19[%c0_380, %c0_381] : memref<16x512xf32, #tpu.memory_space<vmem>>, vector<16x512xf32>
      tpu.vector_store %arg19[%c0_380, %c0_381], %399 {strides = array<i32>} : memref<16x512xf32, #tpu.memory_space<vmem>>, vector<16x512xf32>,
      %cst_382 = arith.constant 0.000000e+00 : f32
      %401 = vector.broadcast %cst_382 : f32 to vector<16x512xf32>
      %c0_383 = arith.constant 0 : index
      %c0_384 = arith.constant 0 : index
      %402 = vector.load %arg20[%c0_383, %c0_384] : memref<16x512xf32, #tpu.memory_space<vmem>>, vector<16x512xf32>
      tpu.vector_store %arg20[%c0_383, %c0_384], %401 {strides = array<i32>} : memref<16x512xf32, #tpu.memory_space<vmem>>, vector<16x512xf32>,
      %cst_385 = arith.constant 0.000000e+00 : f32
      %403 = vector.broadcast %cst_385 : f32 to vector<16x512xf32>
      %c0_386 = arith.constant 0 : index
      %c0_387 = arith.constant 0 : index
      %404 = vector.load %arg21[%c0_386, %c0_387] : memref<16x512xf32, #tpu.memory_space<vmem>>, vector<16x512xf32>
      tpu.vector_store %arg21[%c0_386, %c0_387], %403 {strides = array<i32>} : memref<16x512xf32, #tpu.memory_space<vmem>>, vector<16x512xf32>,
      %cst_388 = arith.constant 0.000000e+00 : f32
      %405 = vector.broadcast %cst_388 : f32 to vector<16x512xf32>
      %c0_389 = arith.constant 0 : index
      %c0_390 = arith.constant 0 : index
      %406 = vector.load %arg22[%c0_389, %c0_390] : memref<16x512xf32, #tpu.memory_space<vmem>>, vector<16x512xf32>
      tpu.vector_store %arg22[%c0_389, %c0_390], %405 {strides = array<i32>} : memref<16x512xf32, #tpu.memory_space<vmem>>, vector<16x512xf32>,
    } else {
    }
    %c0 = arith.constant 0 : index
    %c0_1 = arith.constant 0 : index
    %c0_2 = arith.constant 0 : index
    %c0_3 = arith.constant 0 : index
    %3 = vector.load %arg2[%c0, %c0_1, %c0_2, %c0_3] : memref<1x1x8x512xf32, #tpu.memory_space<vmem>>, vector<1x1x8x512xf32>
    %4 = vector.shape_cast %3 : vector<1x1x8x512xf32> to vector<8x512xf32>
    %c0_4 = arith.constant 0 : index
    %c0_5 = arith.constant 0 : index
    %5 = vector.load %arg4[%c0_4, %c0_5] : memref<64x72xf32, #tpu.memory_space<vmem>>, vector<64x72xf32>
    %c17_i32 = arith.constant 17 : i32
    %6 = tpu.dynamic_rotate %4 by %c17_i32 dim 1 : vector<8x512xf32>, i32 -> vector<8x512xf32>
    %c0_6 = arith.constant 0 : index
    %c0_7 = arith.constant 0 : index
    %c0_8 = arith.constant 0 : index
    %7 = vector.load %arg3[%c0_6, %c0_7, %c0_8] : memref<9x16x512xf32, #tpu.memory_space<vmem>>, vector<1x8x512xf32>
    %8 = vector.shape_cast %7 : vector<1x8x512xf32> to vector<8x512xf32>
    %9 = arith.mulf %6, %8 : vector<8x512xf32>
    %c0_9 = arith.constant 0 : index
    %c0_10 = arith.constant 0 : index
    %10 = vector.load %arg16[%c0_9, %c0_10] : memref<144x512xf32, #tpu.memory_space<vmem>>, vector<8x512xf32>
    tpu.vector_store %arg16[%c0_9, %c0_10], %9 {strides = array<i32>} : memref<144x512xf32, #tpu.memory_space<vmem>>, vector<8x512xf32>,
    %c16_i32 = arith.constant 16 : i32
    %11 = tpu.dynamic_rotate %4 by %c16_i32 dim 1 : vector<8x512xf32>, i32 -> vector<8x512xf32>
    %c1 = arith.constant 1 : index
    %c0_11 = arith.constant 0 : index
    %c0_12 = arith.constant 0 : index
    %12 = vector.load %arg3[%c1, %c0_11, %c0_12] : memref<9x16x512xf32, #tpu.memory_space<vmem>>, vector<1x8x512xf32>
    %13 = vector.shape_cast %12 : vector<1x8x512xf32> to vector<8x512xf32>
    %14 = arith.mulf %11, %13 : vector<8x512xf32>
    %c8 = arith.constant 8 : index
    %c0_13 = arith.constant 0 : index
    %15 = vector.load %arg16[%c8, %c0_13] : memref<144x512xf32, #tpu.memory_space<vmem>>, vector<8x512xf32>
    tpu.vector_store %arg16[%c8, %c0_13], %14 {strides = array<i32>} : memref<144x512xf32, #tpu.memory_space<vmem>>, vector<8x512xf32>,
    %c15_i32 = arith.constant 15 : i32
    %16 = tpu.dynamic_rotate %4 by %c15_i32 dim 1 : vector<8x512xf32>, i32 -> vector<8x512xf32>
    %c2 = arith.constant 2 : index
    %c0_14 = arith.constant 0 : index
    %c0_15 = arith.constant 0 : index
    %17 = vector.load %arg3[%c2, %c0_14, %c0_15] : memref<9x16x512xf32, #tpu.memory_space<vmem>>, vector<1x8x512xf32>
    %18 = vector.shape_cast %17 : vector<1x8x512xf32> to vector<8x512xf32>
    %19 = arith.mulf %16, %18 : vector<8x512xf32>
    %c16 = arith.constant 16 : index
    %c0_16 = arith.constant 0 : index
    %20 = vector.load %arg16[%c16, %c0_16] : memref<144x512xf32, #tpu.memory_space<vmem>>, vector<8x512xf32>
    tpu.vector_store %arg16[%c16, %c0_16], %19 {strides = array<i32>} : memref<144x512xf32, #tpu.memory_space<vmem>>, vector<8x512xf32>,
    %c1_i32 = arith.constant 1 : i32
    %21 = tpu.dynamic_rotate %4 by %c1_i32 dim 1 : vector<8x512xf32>, i32 -> vector<8x512xf32>
    %c3 = arith.constant 3 : index
    %c0_17 = arith.constant 0 : index
    %c0_18 = arith.constant 0 : index
    %22 = vector.load %arg3[%c3, %c0_17, %c0_18] : memref<9x16x512xf32, #tpu.memory_space<vmem>>, vector<1x8x512xf32>
    %23 = vector.shape_cast %22 : vector<1x8x512xf32> to vector<8x512xf32>
    %24 = arith.mulf %21, %23 : vector<8x512xf32>
    %c24 = arith.constant 24 : index
    %c0_19 = arith.constant 0 : index
    %25 = vector.load %arg16[%c24, %c0_19] : memref<144x512xf32, #tpu.memory_space<vmem>>, vector<8x512xf32>
    tpu.vector_store %arg16[%c24, %c0_19], %24 {strides = array<i32>} : memref<144x512xf32, #tpu.memory_space<vmem>>, vector<8x512xf32>,
    %c4 = arith.constant 4 : index
    %c0_20 = arith.constant 0 : index
    %c0_21 = arith.constant 0 : index
    %26 = vector.load %arg3[%c4, %c0_20, %c0_21] : memref<9x16x512xf32, #tpu.memory_space<vmem>>, vector<1x8x512xf32>
    %27 = vector.shape_cast %26 : vector<1x8x512xf32> to vector<8x512xf32>
    %28 = arith.mulf %4, %27 : vector<8x512xf32>
    %c32 = arith.constant 32 : index
    %c0_22 = arith.constant 0 : index
    %29 = vector.load %arg16[%c32, %c0_22] : memref<144x512xf32, #tpu.memory_space<vmem>>, vector<8x512xf32>
    tpu.vector_store %arg16[%c32, %c0_22], %28 {strides = array<i32>} : memref<144x512xf32, #tpu.memory_space<vmem>>, vector<8x512xf32>,
    %c511_i32 = arith.constant 511 : i32
    %30 = tpu.dynamic_rotate %4 by %c511_i32 dim 1 : vector<8x512xf32>, i32 -> vector<8x512xf32>
    %c5 = arith.constant 5 : index
    %c0_23 = arith.constant 0 : index
    %c0_24 = arith.constant 0 : index
    %31 = vector.load %arg3[%c5, %c0_23, %c0_24] : memref<9x16x512xf32, #tpu.memory_space<vmem>>, vector<1x8x512xf32>
    %32 = vector.shape_cast %31 : vector<1x8x512xf32> to vector<8x512xf32>
    %33 = arith.mulf %30, %32 : vector<8x512xf32>
    %c40 = arith.constant 40 : index
    %c0_25 = arith.constant 0 : index
    %34 = vector.load %arg16[%c40, %c0_25] : memref<144x512xf32, #tpu.memory_space<vmem>>, vector<8x512xf32>
    tpu.vector_store %arg16[%c40, %c0_25], %33 {strides = array<i32>} : memref<144x512xf32, #tpu.memory_space<vmem>>, vector<8x512xf32>,
    %c497_i32 = arith.constant 497 : i32
    %35 = tpu.dynamic_rotate %4 by %c497_i32 dim 1 : vector<8x512xf32>, i32 -> vector<8x512xf32>
    %c6 = arith.constant 6 : index
    %c0_26 = arith.constant 0 : index
    %c0_27 = arith.constant 0 : index
    %36 = vector.load %arg3[%c6, %c0_26, %c0_27] : memref<9x16x512xf32, #tpu.memory_space<vmem>>, vector<1x8x512xf32>
    %37 = vector.shape_cast %36 : vector<1x8x512xf32> to vector<8x512xf32>
    %38 = arith.mulf %35, %37 : vector<8x512xf32>
    %c48 = arith.constant 48 : index
    %c0_28 = arith.constant 0 : index
    %39 = vector.load %arg16[%c48, %c0_28] : memref<144x512xf32, #tpu.memory_space<vmem>>, vector<8x512xf32>
    tpu.vector_store %arg16[%c48, %c0_28], %38 {strides = array<i32>} : memref<144x512xf32, #tpu.memory_space<vmem>>, vector<8x512xf32>,
    %c496_i32 = arith.constant 496 : i32
    %40 = tpu.dynamic_rotate %4 by %c496_i32 dim 1 : vector<8x512xf32>, i32 -> vector<8x512xf32>
    %c7 = arith.constant 7 : index
    %c0_29 = arith.constant 0 : index
    %c0_30 = arith.constant 0 : index
    %41 = vector.load %arg3[%c7, %c0_29, %c0_30] : memref<9x16x512xf32, #tpu.memory_space<vmem>>, vector<1x8x512xf32>
    %42 = vector.shape_cast %41 : vector<1x8x512xf32> to vector<8x512xf32>
    %43 = arith.mulf %40, %42 : vector<8x512xf32>
    %c56 = arith.constant 56 : index
    %c0_31 = arith.constant 0 : index
    %44 = vector.load %arg16[%c56, %c0_31] : memref<144x512xf32, #tpu.memory_space<vmem>>, vector<8x512xf32>
    tpu.vector_store %arg16[%c56, %c0_31], %43 {strides = array<i32>} : memref<144x512xf32, #tpu.memory_space<vmem>>, vector<8x512xf32>,
    %c495_i32 = arith.constant 495 : i32
    %45 = tpu.dynamic_rotate %4 by %c495_i32 dim 1 : vector<8x512xf32>, i32 -> vector<8x512xf32>
    %c8_32 = arith.constant 8 : index
    %c0_33 = arith.constant 0 : index
    %c0_34 = arith.constant 0 : index
    %46 = vector.load %arg3[%c8_32, %c0_33, %c0_34] : memref<9x16x512xf32, #tpu.memory_space<vmem>>, vector<1x8x512xf32>
    %47 = vector.shape_cast %46 : vector<1x8x512xf32> to vector<8x512xf32>
    %48 = arith.mulf %45, %47 : vector<8x512xf32>
    %c64 = arith.constant 64 : index
    %c0_35 = arith.constant 0 : index
    %49 = vector.load %arg16[%c64, %c0_35] : memref<144x512xf32, #tpu.memory_space<vmem>>, vector<8x512xf32>
    tpu.vector_store %arg16[%c64, %c0_35], %48 {strides = array<i32>} : memref<144x512xf32, #tpu.memory_space<vmem>>, vector<8x512xf32>,
    %c0_36 = arith.constant 0 : index
    %c0_37 = arith.constant 0 : index
    %50 = vector.load %arg16[%c0_36, %c0_37] : memref<144x512xf32, #tpu.memory_space<vmem>>, vector<72x512xf32>
    %cst = arith.constant dense<0.000000e+00> : vector<64x512xf32>
    %51 = tpu.matmul %5, %50, %cst {dimension_numbers = #tpu.dot_dimension_numbers<[1], [0], [0], [1], [0, 0, 1, 1], [], []>} : vector<64x72xf32>, vector<72x512xf32>, vector<64x512xf32> -> vector<64x512xf32>
    %c0_38 = arith.constant 0 : index
    %c0_39 = arith.constant 0 : index
    %52 = vector.load %arg5[%c0_38, %c0_39] : memref<64x144xf32, #tpu.memory_space<vmem>>, vector<64x144xf32>
    %c0_40 = arith.constant 0 : index
    %c0_41 = arith.constant 0 : index
    %53 = vector.load %arg17[%c0_40, %c0_41] : memref<16x512xf32, #tpu.memory_space<vmem>>, vector<16x512xf32>
    %c17_i32_42 = arith.constant 17 : i32
    %54 = tpu.dynamic_rotate %53 by %c17_i32_42 dim 1 : vector<16x512xf32>, i32 -> vector<16x512xf32>
    %c0_43 = arith.constant 0 : index
    %c0_44 = arith.constant 0 : index
    %c0_45 = arith.constant 0 : index
    %55 = vector.load %arg3[%c0_43, %c0_44, %c0_45] : memref<9x16x512xf32, #tpu.memory_space<vmem>>, vector<1x16x512xf32>
    %56 = vector.shape_cast %55 : vector<1x16x512xf32> to vector<16x512xf32>
    %57 = arith.mulf %54, %56 : vector<16x512xf32>
    %c0_46 = arith.constant 0 : index
    %c0_47 = arith.constant 0 : index
    %58 = vector.load %arg16[%c0_46, %c0_47] : memref<144x512xf32, #tpu.memory_space<vmem>>, vector<16x512xf32>
    tpu.vector_store %arg16[%c0_46, %c0_47], %57 {strides = array<i32>} : memref<144x512xf32, #tpu.memory_space<vmem>>, vector<16x512xf32>,
    %c16_i32_48 = arith.constant 16 : i32
    %59 = tpu.dynamic_rotate %53 by %c16_i32_48 dim 1 : vector<16x512xf32>, i32 -> vector<16x512xf32>
    %c1_49 = arith.constant 1 : index
    %c0_50 = arith.constant 0 : index
    %c0_51 = arith.constant 0 : index
    %60 = vector.load %arg3[%c1_49, %c0_50, %c0_51] : memref<9x16x512xf32, #tpu.memory_space<vmem>>, vector<1x16x512xf32>
    %61 = vector.shape_cast %60 : vector<1x16x512xf32> to vector<16x512xf32>
    %62 = arith.mulf %59, %61 : vector<16x512xf32>
    %c16_52 = arith.constant 16 : index
    %c0_53 = arith.constant 0 : index
    %63 = vector.load %arg16[%c16_52, %c0_53] : memref<144x512xf32, #tpu.memory_space<vmem>>, vector<16x512xf32>
    tpu.vector_store %arg16[%c16_52, %c0_53], %62 {strides = array<i32>} : memref<144x512xf32, #tpu.memory_space<vmem>>, vector<16x512xf32>,
    %c15_i32_54 = arith.constant 15 : i32
    %64 = tpu.dynamic_rotate %53 by %c15_i32_54 dim 1 : vector<16x512xf32>, i32 -> vector<16x512xf32>
    %c2_55 = arith.constant 2 : index
    %c0_56 = arith.constant 0 : index
    %c0_57 = arith.constant 0 : index
    %65 = vector.load %arg3[%c2_55, %c0_56, %c0_57] : memref<9x16x512xf32, #tpu.memory_space<vmem>>, vector<1x16x512xf32>
    %66 = vector.shape_cast %65 : vector<1x16x512xf32> to vector<16x512xf32>
    %67 = arith.mulf %64, %66 : vector<16x512xf32>
    %c32_58 = arith.constant 32 : index
    %c0_59 = arith.constant 0 : index
    %68 = vector.load %arg16[%c32_58, %c0_59] : memref<144x512xf32, #tpu.memory_space<vmem>>, vector<16x512xf32>
    tpu.vector_store %arg16[%c32_58, %c0_59], %67 {strides = array<i32>} : memref<144x512xf32, #tpu.memory_space<vmem>>, vector<16x512xf32>,
    %c1_i32_60 = arith.constant 1 : i32
    %69 = tpu.dynamic_rotate %53 by %c1_i32_60 dim 1 : vector<16x512xf32>, i32 -> vector<16x512xf32>
    %c3_61 = arith.constant 3 : index
    %c0_62 = arith.constant 0 : index
    %c0_63 = arith.constant 0 : index
    %70 = vector.load %arg3[%c3_61, %c0_62, %c0_63] : memref<9x16x512xf32, #tpu.memory_space<vmem>>, vector<1x16x512xf32>
    %71 = vector.shape_cast %70 : vector<1x16x512xf32> to vector<16x512xf32>
    %72 = arith.mulf %69, %71 : vector<16x512xf32>
    %c48_64 = arith.constant 48 : index
    %c0_65 = arith.constant 0 : index
    %73 = vector.load %arg16[%c48_64, %c0_65] : memref<144x512xf32, #tpu.memory_space<vmem>>, vector<16x512xf32>
    tpu.vector_store %arg16[%c48_64, %c0_65], %72 {strides = array<i32>} : memref<144x512xf32, #tpu.memory_space<vmem>>, vector<16x512xf32>,
    %c4_66 = arith.constant 4 : index
    %c0_67 = arith.constant 0 : index
    %c0_68 = arith.constant 0 : index
    %74 = vector.load %arg3[%c4_66, %c0_67, %c0_68] : memref<9x16x512xf32, #tpu.memory_space<vmem>>, vector<1x16x512xf32>
    %75 = vector.shape_cast %74 : vector<1x16x512xf32> to vector<16x512xf32>
    %76 = arith.mulf %53, %75 : vector<16x512xf32>
    %c64_69 = arith.constant 64 : index
    %c0_70 = arith.constant 0 : index
    %77 = vector.load %arg16[%c64_69, %c0_70] : memref<144x512xf32, #tpu.memory_space<vmem>>, vector<16x512xf32>
    tpu.vector_store %arg16[%c64_69, %c0_70], %76 {strides = array<i32>} : memref<144x512xf32, #tpu.memory_space<vmem>>, vector<16x512xf32>,
    %c511_i32_71 = arith.constant 511 : i32
    %78 = tpu.dynamic_rotate %53 by %c511_i32_71 dim 1 : vector<16x512xf32>, i32 -> vector<16x512xf32>
    %c5_72 = arith.constant 5 : index
    %c0_73 = arith.constant 0 : index
    %c0_74 = arith.constant 0 : index
    %79 = vector.load %arg3[%c5_72, %c0_73, %c0_74] : memref<9x16x512xf32, #tpu.memory_space<vmem>>, vector<1x16x512xf32>
    %80 = vector.shape_cast %79 : vector<1x16x512xf32> to vector<16x512xf32>
    %81 = arith.mulf %78, %80 : vector<16x512xf32>
    %c80 = arith.constant 80 : index
    %c0_75 = arith.constant 0 : index
    %82 = vector.load %arg16[%c80, %c0_75] : memref<144x512xf32, #tpu.memory_space<vmem>>, vector<16x512xf32>
    tpu.vector_store %arg16[%c80, %c0_75], %81 {strides = array<i32>} : memref<144x512xf32, #tpu.memory_space<vmem>>, vector<16x512xf32>,
    %c497_i32_76 = arith.constant 497 : i32
    %83 = tpu.dynamic_rotate %53 by %c497_i32_76 dim 1 : vector<16x512xf32>, i32 -> vector<16x512xf32>
    %c6_77 = arith.constant 6 : index
    %c0_78 = arith.constant 0 : index
    %c0_79 = arith.constant 0 : index
    %84 = vector.load %arg3[%c6_77, %c0_78, %c0_79] : memref<9x16x512xf32, #tpu.memory_space<vmem>>, vector<1x16x512xf32>
    %85 = vector.shape_cast %84 : vector<1x16x512xf32> to vector<16x512xf32>
    %86 = arith.mulf %83, %85 : vector<16x512xf32>
    %c96 = arith.constant 96 : index
    %c0_80 = arith.constant 0 : index
    %87 = vector.load %arg16[%c96, %c0_80] : memref<144x512xf32, #tpu.memory_space<vmem>>, vector<16x512xf32>
    tpu.vector_store %arg16[%c96, %c0_80], %86 {strides = array<i32>} : memref<144x512xf32, #tpu.memory_space<vmem>>, vector<16x512xf32>,
    %c496_i32_81 = arith.constant 496 : i32
    %88 = tpu.dynamic_rotate %53 by %c496_i32_81 dim 1 : vector<16x512xf32>, i32 -> vector<16x512xf32>
    %c7_82 = arith.constant 7 : index
    %c0_83 = arith.constant 0 : index
    %c0_84 = arith.constant 0 : index
    %89 = vector.load %arg3[%c7_82, %c0_83, %c0_84] : memref<9x16x512xf32, #tpu.memory_space<vmem>>, vector<1x16x512xf32>
    %90 = vector.shape_cast %89 : vector<1x16x512xf32> to vector<16x512xf32>
    %91 = arith.mulf %88, %90 : vector<16x512xf32>
    %c112 = arith.constant 112 : index
    %c0_85 = arith.constant 0 : index
    %92 = vector.load %arg16[%c112, %c0_85] : memref<144x512xf32, #tpu.memory_space<vmem>>, vector<16x512xf32>
    tpu.vector_store %arg16[%c112, %c0_85], %91 {strides = array<i32>} : memref<144x512xf32, #tpu.memory_space<vmem>>, vector<16x512xf32>,
    %c495_i32_86 = arith.constant 495 : i32
    %93 = tpu.dynamic_rotate %53 by %c495_i32_86 dim 1 : vector<16x512xf32>, i32 -> vector<16x512xf32>
    %c8_87 = arith.constant 8 : index
    %c0_88 = arith.constant 0 : index
    %c0_89 = arith.constant 0 : index
    %94 = vector.load %arg3[%c8_87, %c0_88, %c0_89] : memref<9x16x512xf32, #tpu.memory_space<vmem>>, vector<1x16x512xf32>
    %95 = vector.shape_cast %94 : vector<1x16x512xf32> to vector<16x512xf32>
    %96 = arith.mulf %93, %95 : vector<16x512xf32>
    %c128 = arith.constant 128 : index
    %c0_90 = arith.constant 0 : index
    %97 = vector.load %arg16[%c128, %c0_90] : memref<144x512xf32, #tpu.memory_space<vmem>>, vector<16x512xf32>
    tpu.vector_store %arg16[%c128, %c0_90], %96 {strides = array<i32>} : memref<144x512xf32, #tpu.memory_space<vmem>>, vector<16x512xf32>,
    %c0_91 = arith.constant 0 : index
    %c0_92 = arith.constant 0 : index
    %98 = vector.load %arg16[%c0_91, %c0_92] : memref<144x512xf32, #tpu.memory_space<vmem>>, vector<144x512xf32>
    %cst_93 = arith.constant dense<0.000000e+00> : vector<64x512xf32>
    %99 = tpu.matmul %52, %98, %cst_93 {dimension_numbers = #tpu.dot_dimension_numbers<[1], [0], [0], [1], [0, 0, 1, 1], [], []>} : vector<64x144xf32>, vector<144x512xf32>, vector<64x512xf32> -> vector<64x512xf32>
    %100 = arith.addf %51, %99 : vector<64x512xf32>
    %c0_94 = arith.constant 0 : index
    %c0_95 = arith.constant 0 : index
    %101 = vector.load %arg6[%c0_94, %c0_95] : memref<64x1xf32, #tpu.memory_space<vmem>>, vector<64x1xf32>
    %102 = vector.broadcast %101 : vector<64x1xf32> to vector<64x512xf32>
    %103 = arith.addf %100, %102 : vector<64x512xf32>
    %104 = vector.extract_strided_slice %103 {offsets = [0, 0], sizes = [16, 512], strides = [1, 1]} : vector<64x512xf32> to vector<16x512xf32>
    %105 = arith.negf %104 : vector<16x512xf32>
    %106 = math.exp %105 : vector<16x512xf32>
    %cst_96 = arith.constant 1.000000e+00 : f32
    %107 = vector.broadcast %cst_96 : f32 to vector<16x512xf32>
    %108 = arith.addf %107, %106 : vector<16x512xf32>
    %109 = arith.divf %107, %108 : vector<16x512xf32>
    %110 = vector.extract_strided_slice %103 {offsets = [16, 0], sizes = [16, 512], strides = [1, 1]} : vector<64x512xf32> to vector<16x512xf32>
    %111 = arith.negf %110 : vector<16x512xf32>
    %112 = math.exp %111 : vector<16x512xf32>
    %cst_97 = arith.constant 1.000000e+00 : f32
    %113 = vector.broadcast %cst_97 : f32 to vector<16x512xf32>
    %114 = arith.addf %113, %112 : vector<16x512xf32>
    %115 = arith.divf %113, %114 : vector<16x512xf32>
    %116 = vector.extract_strided_slice %103 {offsets = [32, 0], sizes = [16, 512], strides = [1, 1]} : vector<64x512xf32> to vector<16x512xf32>
    %117 = arith.negf %116 : vector<16x512xf32>
    %118 = math.exp %117 : vector<16x512xf32>
    %cst_98 = arith.constant 1.000000e+00 : f32
    %119 = vector.broadcast %cst_98 : f32 to vector<16x512xf32>
    %120 = arith.addf %119, %118 : vector<16x512xf32>
    %121 = arith.divf %119, %120 : vector<16x512xf32>
    %122 = vector.extract_strided_slice %103 {offsets = [48, 0], sizes = [16, 512], strides = [1, 1]} : vector<64x512xf32> to vector<16x512xf32>
    %123 = math.tanh %122 : vector<16x512xf32>
    %c0_99 = arith.constant 0 : index
    %c0_100 = arith.constant 0 : index
    %124 = vector.load %arg18[%c0_99, %c0_100] : memref<16x512xf32, #tpu.memory_space<vmem>>, vector<16x512xf32>
    %125 = arith.mulf %115, %124 : vector<16x512xf32>
    %126 = arith.mulf %109, %123 : vector<16x512xf32>
    %127 = arith.addf %125, %126 : vector<16x512xf32>
    %128 = math.tanh %127 : vector<16x512xf32>
    %129 = arith.mulf %121, %128 : vector<16x512xf32>
    %c0_101 = arith.constant 0 : index
    %c0_102 = arith.constant 0 : index
    %130 = vector.load %arg18[%c0_101, %c0_102] : memref<16x512xf32, #tpu.memory_space<vmem>>, vector<16x512xf32>
    tpu.vector_store %arg18[%c0_101, %c0_102], %127 {strides = array<i32>} : memref<16x512xf32, #tpu.memory_space<vmem>>, vector<16x512xf32>,
    %c0_103 = arith.constant 0 : index
    %c0_104 = arith.constant 0 : index
    %131 = vector.load %arg17[%c0_103, %c0_104] : memref<16x512xf32, #tpu.memory_space<vmem>>, vector<16x512xf32>
    tpu.vector_store %arg17[%c0_103, %c0_104], %129 {strides = array<i32>} : memref<16x512xf32, #tpu.memory_space<vmem>>, vector<16x512xf32>,
    %c0_105 = arith.constant 0 : index
    %c0_106 = arith.constant 0 : index
    %132 = vector.load %arg7[%c0_105, %c0_106] : memref<64x144xf32, #tpu.memory_space<vmem>>, vector<64x144xf32>
    %c17_i32_107 = arith.constant 17 : i32
    %133 = tpu.dynamic_rotate %129 by %c17_i32_107 dim 1 : vector<16x512xf32>, i32 -> vector<16x512xf32>
    %c0_108 = arith.constant 0 : index
    %c0_109 = arith.constant 0 : index
    %c0_110 = arith.constant 0 : index
    %134 = vector.load %arg3[%c0_108, %c0_109, %c0_110] : memref<9x16x512xf32, #tpu.memory_space<vmem>>, vector<1x16x512xf32>
    %135 = vector.shape_cast %134 : vector<1x16x512xf32> to vector<16x512xf32>
    %136 = arith.mulf %133, %135 : vector<16x512xf32>
    %c0_111 = arith.constant 0 : index
    %c0_112 = arith.constant 0 : index
    %137 = vector.load %arg16[%c0_111, %c0_112] : memref<144x512xf32, #tpu.memory_space<vmem>>, vector<16x512xf32>
    tpu.vector_store %arg16[%c0_111, %c0_112], %136 {strides = array<i32>} : memref<144x512xf32, #tpu.memory_space<vmem>>, vector<16x512xf32>,
    %c16_i32_113 = arith.constant 16 : i32
    %138 = tpu.dynamic_rotate %129 by %c16_i32_113 dim 1 : vector<16x512xf32>, i32 -> vector<16x512xf32>
    %c1_114 = arith.constant 1 : index
    %c0_115 = arith.constant 0 : index
    %c0_116 = arith.constant 0 : index
    %139 = vector.load %arg3[%c1_114, %c0_115, %c0_116] : memref<9x16x512xf32, #tpu.memory_space<vmem>>, vector<1x16x512xf32>
    %140 = vector.shape_cast %139 : vector<1x16x512xf32> to vector<16x512xf32>
    %141 = arith.mulf %138, %140 : vector<16x512xf32>
    %c16_117 = arith.constant 16 : index
    %c0_118 = arith.constant 0 : index
    %142 = vector.load %arg16[%c16_117, %c0_118] : memref<144x512xf32, #tpu.memory_space<vmem>>, vector<16x512xf32>
    tpu.vector_store %arg16[%c16_117, %c0_118], %141 {strides = array<i32>} : memref<144x512xf32, #tpu.memory_space<vmem>>, vector<16x512xf32>,
    %c15_i32_119 = arith.constant 15 : i32
    %143 = tpu.dynamic_rotate %129 by %c15_i32_119 dim 1 : vector<16x512xf32>, i32 -> vector<16x512xf32>
    %c2_120 = arith.constant 2 : index
    %c0_121 = arith.constant 0 : index
    %c0_122 = arith.constant 0 : index
    %144 = vector.load %arg3[%c2_120, %c0_121, %c0_122] : memref<9x16x512xf32, #tpu.memory_space<vmem>>, vector<1x16x512xf32>
    %145 = vector.shape_cast %144 : vector<1x16x512xf32> to vector<16x512xf32>
    %146 = arith.mulf %143, %145 : vector<16x512xf32>
    %c32_123 = arith.constant 32 : index
    %c0_124 = arith.constant 0 : index
    %147 = vector.load %arg16[%c32_123, %c0_124] : memref<144x512xf32, #tpu.memory_space<vmem>>, vector<16x512xf32>
    tpu.vector_store %arg16[%c32_123, %c0_124], %146 {strides = array<i32>} : memref<144x512xf32, #tpu.memory_space<vmem>>, vector<16x512xf32>,
    %c1_i32_125 = arith.constant 1 : i32
    %148 = tpu.dynamic_rotate %129 by %c1_i32_125 dim 1 : vector<16x512xf32>, i32 -> vector<16x512xf32>
    %c3_126 = arith.constant 3 : index
    %c0_127 = arith.constant 0 : index
    %c0_128 = arith.constant 0 : index
    %149 = vector.load %arg3[%c3_126, %c0_127, %c0_128] : memref<9x16x512xf32, #tpu.memory_space<vmem>>, vector<1x16x512xf32>
    %150 = vector.shape_cast %149 : vector<1x16x512xf32> to vector<16x512xf32>
    %151 = arith.mulf %148, %150 : vector<16x512xf32>
    %c48_129 = arith.constant 48 : index
    %c0_130 = arith.constant 0 : index
    %152 = vector.load %arg16[%c48_129, %c0_130] : memref<144x512xf32, #tpu.memory_space<vmem>>, vector<16x512xf32>
    tpu.vector_store %arg16[%c48_129, %c0_130], %151 {strides = array<i32>} : memref<144x512xf32, #tpu.memory_space<vmem>>, vector<16x512xf32>,
    %c4_131 = arith.constant 4 : index
    %c0_132 = arith.constant 0 : index
    %c0_133 = arith.constant 0 : index
    %153 = vector.load %arg3[%c4_131, %c0_132, %c0_133] : memref<9x16x512xf32, #tpu.memory_space<vmem>>, vector<1x16x512xf32>
    %154 = vector.shape_cast %153 : vector<1x16x512xf32> to vector<16x512xf32>
    %155 = arith.mulf %129, %154 : vector<16x512xf32>
    %c64_134 = arith.constant 64 : index
    %c0_135 = arith.constant 0 : index
    %156 = vector.load %arg16[%c64_134, %c0_135] : memref<144x512xf32, #tpu.memory_space<vmem>>, vector<16x512xf32>
    tpu.vector_store %arg16[%c64_134, %c0_135], %155 {strides = array<i32>} : memref<144x512xf32, #tpu.memory_space<vmem>>, vector<16x512xf32>,
    %c511_i32_136 = arith.constant 511 : i32
    %157 = tpu.dynamic_rotate %129 by %c511_i32_136 dim 1 : vector<16x512xf32>, i32 -> vector<16x512xf32>
    %c5_137 = arith.constant 5 : index
    %c0_138 = arith.constant 0 : index
    %c0_139 = arith.constant 0 : index
    %158 = vector.load %arg3[%c5_137, %c0_138, %c0_139] : memref<9x16x512xf32, #tpu.memory_space<vmem>>, vector<1x16x512xf32>
    %159 = vector.shape_cast %158 : vector<1x16x512xf32> to vector<16x512xf32>
    %160 = arith.mulf %157, %159 : vector<16x512xf32>
    %c80_140 = arith.constant 80 : index
    %c0_141 = arith.constant 0 : index
    %161 = vector.load %arg16[%c80_140, %c0_141] : memref<144x512xf32, #tpu.memory_space<vmem>>, vector<16x512xf32>
    tpu.vector_store %arg16[%c80_140, %c0_141], %160 {strides = array<i32>} : memref<144x512xf32, #tpu.memory_space<vmem>>, vector<16x512xf32>,
    %c497_i32_142 = arith.constant 497 : i32
    %162 = tpu.dynamic_rotate %129 by %c497_i32_142 dim 1 : vector<16x512xf32>, i32 -> vector<16x512xf32>
    %c6_143 = arith.constant 6 : index
    %c0_144 = arith.constant 0 : index
    %c0_145 = arith.constant 0 : index
    %163 = vector.load %arg3[%c6_143, %c0_144, %c0_145] : memref<9x16x512xf32, #tpu.memory_space<vmem>>, vector<1x16x512xf32>
    %164 = vector.shape_cast %163 : vector<1x16x512xf32> to vector<16x512xf32>
    %165 = arith.mulf %162, %164 : vector<16x512xf32>
    %c96_146 = arith.constant 96 : index
    %c0_147 = arith.constant 0 : index
    %166 = vector.load %arg16[%c96_146, %c0_147] : memref<144x512xf32, #tpu.memory_space<vmem>>, vector<16x512xf32>
    tpu.vector_store %arg16[%c96_146, %c0_147], %165 {strides = array<i32>} : memref<144x512xf32, #tpu.memory_space<vmem>>, vector<16x512xf32>,
    %c496_i32_148 = arith.constant 496 : i32
    %167 = tpu.dynamic_rotate %129 by %c496_i32_148 dim 1 : vector<16x512xf32>, i32 -> vector<16x512xf32>
    %c7_149 = arith.constant 7 : index
    %c0_150 = arith.constant 0 : index
    %c0_151 = arith.constant 0 : index
    %168 = vector.load %arg3[%c7_149, %c0_150, %c0_151] : memref<9x16x512xf32, #tpu.memory_space<vmem>>, vector<1x16x512xf32>
    %169 = vector.shape_cast %168 : vector<1x16x512xf32> to vector<16x512xf32>
    %170 = arith.mulf %167, %169 : vector<16x512xf32>
    %c112_152 = arith.constant 112 : index
    %c0_153 = arith.constant 0 : index
    %171 = vector.load %arg16[%c112_152, %c0_153] : memref<144x512xf32, #tpu.memory_space<vmem>>, vector<16x512xf32>
    tpu.vector_store %arg16[%c112_152, %c0_153], %170 {strides = array<i32>} : memref<144x512xf32, #tpu.memory_space<vmem>>, vector<16x512xf32>,
    %c495_i32_154 = arith.constant 495 : i32
    %172 = tpu.dynamic_rotate %129 by %c495_i32_154 dim 1 : vector<16x512xf32>, i32 -> vector<16x512xf32>
    %c8_155 = arith.constant 8 : index
    %c0_156 = arith.constant 0 : index
    %c0_157 = arith.constant 0 : index
    %173 = vector.load %arg3[%c8_155, %c0_156, %c0_157] : memref<9x16x512xf32, #tpu.memory_space<vmem>>, vector<1x16x512xf32>
    %174 = vector.shape_cast %173 : vector<1x16x512xf32> to vector<16x512xf32>
    %175 = arith.mulf %172, %174 : vector<16x512xf32>
    %c128_158 = arith.constant 128 : index
    %c0_159 = arith.constant 0 : index
    %176 = vector.load %arg16[%c128_158, %c0_159] : memref<144x512xf32, #tpu.memory_space<vmem>>, vector<16x512xf32>
    tpu.vector_store %arg16[%c128_158, %c0_159], %175 {strides = array<i32>} : memref<144x512xf32, #tpu.memory_space<vmem>>, vector<16x512xf32>,
    %c0_160 = arith.constant 0 : index
    %c0_161 = arith.constant 0 : index
    %177 = vector.load %arg16[%c0_160, %c0_161] : memref<144x512xf32, #tpu.memory_space<vmem>>, vector<144x512xf32>
    %cst_162 = arith.constant dense<0.000000e+00> : vector<64x512xf32>
    %178 = tpu.matmul %132, %177, %cst_162 {dimension_numbers = #tpu.dot_dimension_numbers<[1], [0], [0], [1], [0, 0, 1, 1], [], []>} : vector<64x144xf32>, vector<144x512xf32>, vector<64x512xf32> -> vector<64x512xf32>
    %c0_163 = arith.constant 0 : index
    %c0_164 = arith.constant 0 : index
    %179 = vector.load %arg8[%c0_163, %c0_164] : memref<64x144xf32, #tpu.memory_space<vmem>>, vector<64x144xf32>
    %c0_165 = arith.constant 0 : index
    %c0_166 = arith.constant 0 : index
    %180 = vector.load %arg19[%c0_165, %c0_166] : memref<16x512xf32, #tpu.memory_space<vmem>>, vector<16x512xf32>
    %c17_i32_167 = arith.constant 17 : i32
    %181 = tpu.dynamic_rotate %180 by %c17_i32_167 dim 1 : vector<16x512xf32>, i32 -> vector<16x512xf32>
    %c0_168 = arith.constant 0 : index
    %c0_169 = arith.constant 0 : index
    %c0_170 = arith.constant 0 : index
    %182 = vector.load %arg3[%c0_168, %c0_169, %c0_170] : memref<9x16x512xf32, #tpu.memory_space<vmem>>, vector<1x16x512xf32>
    %183 = vector.shape_cast %182 : vector<1x16x512xf32> to vector<16x512xf32>
    %184 = arith.mulf %181, %183 : vector<16x512xf32>
    %c0_171 = arith.constant 0 : index
    %c0_172 = arith.constant 0 : index
    %185 = vector.load %arg16[%c0_171, %c0_172] : memref<144x512xf32, #tpu.memory_space<vmem>>, vector<16x512xf32>
    tpu.vector_store %arg16[%c0_171, %c0_172], %184 {strides = array<i32>} : memref<144x512xf32, #tpu.memory_space<vmem>>, vector<16x512xf32>,
    %c16_i32_173 = arith.constant 16 : i32
    %186 = tpu.dynamic_rotate %180 by %c16_i32_173 dim 1 : vector<16x512xf32>, i32 -> vector<16x512xf32>
    %c1_174 = arith.constant 1 : index
    %c0_175 = arith.constant 0 : index
    %c0_176 = arith.constant 0 : index
    %187 = vector.load %arg3[%c1_174, %c0_175, %c0_176] : memref<9x16x512xf32, #tpu.memory_space<vmem>>, vector<1x16x512xf32>
    %188 = vector.shape_cast %187 : vector<1x16x512xf32> to vector<16x512xf32>
    %189 = arith.mulf %186, %188 : vector<16x512xf32>
    %c16_177 = arith.constant 16 : index
    %c0_178 = arith.constant 0 : index
    %190 = vector.load %arg16[%c16_177, %c0_178] : memref<144x512xf32, #tpu.memory_space<vmem>>, vector<16x512xf32>
    tpu.vector_store %arg16[%c16_177, %c0_178], %189 {strides = array<i32>} : memref<144x512xf32, #tpu.memory_space<vmem>>, vector<16x512xf32>,
    %c15_i32_179 = arith.constant 15 : i32
    %191 = tpu.dynamic_rotate %180 by %c15_i32_179 dim 1 : vector<16x512xf32>, i32 -> vector<16x512xf32>
    %c2_180 = arith.constant 2 : index
    %c0_181 = arith.constant 0 : index
    %c0_182 = arith.constant 0 : index
    %192 = vector.load %arg3[%c2_180, %c0_181, %c0_182] : memref<9x16x512xf32, #tpu.memory_space<vmem>>, vector<1x16x512xf32>
    %193 = vector.shape_cast %192 : vector<1x16x512xf32> to vector<16x512xf32>
    %194 = arith.mulf %191, %193 : vector<16x512xf32>
    %c32_183 = arith.constant 32 : index
    %c0_184 = arith.constant 0 : index
    %195 = vector.load %arg16[%c32_183, %c0_184] : memref<144x512xf32, #tpu.memory_space<vmem>>, vector<16x512xf32>
    tpu.vector_store %arg16[%c32_183, %c0_184], %194 {strides = array<i32>} : memref<144x512xf32, #tpu.memory_space<vmem>>, vector<16x512xf32>,
    %c1_i32_185 = arith.constant 1 : i32
    %196 = tpu.dynamic_rotate %180 by %c1_i32_185 dim 1 : vector<16x512xf32>, i32 -> vector<16x512xf32>
    %c3_186 = arith.constant 3 : index
    %c0_187 = arith.constant 0 : index
    %c0_188 = arith.constant 0 : index
    %197 = vector.load %arg3[%c3_186, %c0_187, %c0_188] : memref<9x16x512xf32, #tpu.memory_space<vmem>>, vector<1x16x512xf32>
    %198 = vector.shape_cast %197 : vector<1x16x512xf32> to vector<16x512xf32>
    %199 = arith.mulf %196, %198 : vector<16x512xf32>
    %c48_189 = arith.constant 48 : index
    %c0_190 = arith.constant 0 : index
    %200 = vector.load %arg16[%c48_189, %c0_190] : memref<144x512xf32, #tpu.memory_space<vmem>>, vector<16x512xf32>
    tpu.vector_store %arg16[%c48_189, %c0_190], %199 {strides = array<i32>} : memref<144x512xf32, #tpu.memory_space<vmem>>, vector<16x512xf32>,
    %c4_191 = arith.constant 4 : index
    %c0_192 = arith.constant 0 : index
    %c0_193 = arith.constant 0 : index
    %201 = vector.load %arg3[%c4_191, %c0_192, %c0_193] : memref<9x16x512xf32, #tpu.memory_space<vmem>>, vector<1x16x512xf32>
    %202 = vector.shape_cast %201 : vector<1x16x512xf32> to vector<16x512xf32>
    %203 = arith.mulf %180, %202 : vector<16x512xf32>
    %c64_194 = arith.constant 64 : index
    %c0_195 = arith.constant 0 : index
    %204 = vector.load %arg16[%c64_194, %c0_195] : memref<144x512xf32, #tpu.memory_space<vmem>>, vector<16x512xf32>
    tpu.vector_store %arg16[%c64_194, %c0_195], %203 {strides = array<i32>} : memref<144x512xf32, #tpu.memory_space<vmem>>, vector<16x512xf32>,
    %c511_i32_196 = arith.constant 511 : i32
    %205 = tpu.dynamic_rotate %180 by %c511_i32_196 dim 1 : vector<16x512xf32>, i32 -> vector<16x512xf32>
    %c5_197 = arith.constant 5 : index
    %c0_198 = arith.constant 0 : index
    %c0_199 = arith.constant 0 : index
    %206 = vector.load %arg3[%c5_197, %c0_198, %c0_199] : memref<9x16x512xf32, #tpu.memory_space<vmem>>, vector<1x16x512xf32>
    %207 = vector.shape_cast %206 : vector<1x16x512xf32> to vector<16x512xf32>
    %208 = arith.mulf %205, %207 : vector<16x512xf32>
    %c80_200 = arith.constant 80 : index
    %c0_201 = arith.constant 0 : index
    %209 = vector.load %arg16[%c80_200, %c0_201] : memref<144x512xf32, #tpu.memory_space<vmem>>, vector<16x512xf32>
    tpu.vector_store %arg16[%c80_200, %c0_201], %208 {strides = array<i32>} : memref<144x512xf32, #tpu.memory_space<vmem>>, vector<16x512xf32>,
    %c497_i32_202 = arith.constant 497 : i32
    %210 = tpu.dynamic_rotate %180 by %c497_i32_202 dim 1 : vector<16x512xf32>, i32 -> vector<16x512xf32>
    %c6_203 = arith.constant 6 : index
    %c0_204 = arith.constant 0 : index
    %c0_205 = arith.constant 0 : index
    %211 = vector.load %arg3[%c6_203, %c0_204, %c0_205] : memref<9x16x512xf32, #tpu.memory_space<vmem>>, vector<1x16x512xf32>
    %212 = vector.shape_cast %211 : vector<1x16x512xf32> to vector<16x512xf32>
    %213 = arith.mulf %210, %212 : vector<16x512xf32>
    %c96_206 = arith.constant 96 : index
    %c0_207 = arith.constant 0 : index
    %214 = vector.load %arg16[%c96_206, %c0_207] : memref<144x512xf32, #tpu.memory_space<vmem>>, vector<16x512xf32>
    tpu.vector_store %arg16[%c96_206, %c0_207], %213 {strides = array<i32>} : memref<144x512xf32, #tpu.memory_space<vmem>>, vector<16x512xf32>,
    %c496_i32_208 = arith.constant 496 : i32
    %215 = tpu.dynamic_rotate %180 by %c496_i32_208 dim 1 : vector<16x512xf32>, i32 -> vector<16x512xf32>
    %c7_209 = arith.constant 7 : index
    %c0_210 = arith.constant 0 : index
    %c0_211 = arith.constant 0 : index
    %216 = vector.load %arg3[%c7_209, %c0_210, %c0_211] : memref<9x16x512xf32, #tpu.memory_space<vmem>>, vector<1x16x512xf32>
    %217 = vector.shape_cast %216 : vector<1x16x512xf32> to vector<16x512xf32>
    %218 = arith.mulf %215, %217 : vector<16x512xf32>
    %c112_212 = arith.constant 112 : index
    %c0_213 = arith.constant 0 : index
    %219 = vector.load %arg16[%c112_212, %c0_213] : memref<144x512xf32, #tpu.memory_space<vmem>>, vector<16x512xf32>
    tpu.vector_store %arg16[%c112_212, %c0_213], %218 {strides = array<i32>} : memref<144x512xf32, #tpu.memory_space<vmem>>, vector<16x512xf32>,
    %c495_i32_214 = arith.constant 495 : i32
    %220 = tpu.dynamic_rotate %180 by %c495_i32_214 dim 1 : vector<16x512xf32>, i32 -> vector<16x512xf32>
    %c8_215 = arith.constant 8 : index
    %c0_216 = arith.constant 0 : index
    %c0_217 = arith.constant 0 : index
    %221 = vector.load %arg3[%c8_215, %c0_216, %c0_217] : memref<9x16x512xf32, #tpu.memory_space<vmem>>, vector<1x16x512xf32>
    %222 = vector.shape_cast %221 : vector<1x16x512xf32> to vector<16x512xf32>
    %223 = arith.mulf %220, %222 : vector<16x512xf32>
    %c128_218 = arith.constant 128 : index
    %c0_219 = arith.constant 0 : index
    %224 = vector.load %arg16[%c128_218, %c0_219] : memref<144x512xf32, #tpu.memory_space<vmem>>, vector<16x512xf32>
    tpu.vector_store %arg16[%c128_218, %c0_219], %223 {strides = array<i32>} : memref<144x512xf32, #tpu.memory_space<vmem>>, vector<16x512xf32>,
    %c0_220 = arith.constant 0 : index
    %c0_221 = arith.constant 0 : index
    %225 = vector.load %arg16[%c0_220, %c0_221] : memref<144x512xf32, #tpu.memory_space<vmem>>, vector<144x512xf32>
    %cst_222 = arith.constant dense<0.000000e+00> : vector<64x512xf32>
    %226 = tpu.matmul %179, %225, %cst_222 {dimension_numbers = #tpu.dot_dimension_numbers<[1], [0], [0], [1], [0, 0, 1, 1], [], []>} : vector<64x144xf32>, vector<144x512xf32>, vector<64x512xf32> -> vector<64x512xf32>
    %227 = arith.addf %178, %226 : vector<64x512xf32>
    %c0_223 = arith.constant 0 : index
    %c0_224 = arith.constant 0 : index
    %228 = vector.load %arg9[%c0_223, %c0_224] : memref<64x1xf32, #tpu.memory_space<vmem>>, vector<64x1xf32>
    %229 = vector.broadcast %228 : vector<64x1xf32> to vector<64x512xf32>
    %230 = arith.addf %227, %229 : vector<64x512xf32>
    %231 = vector.extract_strided_slice %230 {offsets = [0, 0], sizes = [16, 512], strides = [1, 1]} : vector<64x512xf32> to vector<16x512xf32>
    %232 = arith.negf %231 : vector<16x512xf32>
    %233 = math.exp %232 : vector<16x512xf32>
    %cst_225 = arith.constant 1.000000e+00 : f32
    %234 = vector.broadcast %cst_225 : f32 to vector<16x512xf32>
    %235 = arith.addf %234, %233 : vector<16x512xf32>
    %236 = arith.divf %234, %235 : vector<16x512xf32>
    %237 = vector.extract_strided_slice %230 {offsets = [16, 0], sizes = [16, 512], strides = [1, 1]} : vector<64x512xf32> to vector<16x512xf32>
    %238 = arith.negf %237 : vector<16x512xf32>
    %239 = math.exp %238 : vector<16x512xf32>
    %cst_226 = arith.constant 1.000000e+00 : f32
    %240 = vector.broadcast %cst_226 : f32 to vector<16x512xf32>
    %241 = arith.addf %240, %239 : vector<16x512xf32>
    %242 = arith.divf %240, %241 : vector<16x512xf32>
    %243 = vector.extract_strided_slice %230 {offsets = [32, 0], sizes = [16, 512], strides = [1, 1]} : vector<64x512xf32> to vector<16x512xf32>
    %244 = arith.negf %243 : vector<16x512xf32>
    %245 = math.exp %244 : vector<16x512xf32>
    %cst_227 = arith.constant 1.000000e+00 : f32
    %246 = vector.broadcast %cst_227 : f32 to vector<16x512xf32>
    %247 = arith.addf %246, %245 : vector<16x512xf32>
    %248 = arith.divf %246, %247 : vector<16x512xf32>
    %249 = vector.extract_strided_slice %230 {offsets = [48, 0], sizes = [16, 512], strides = [1, 1]} : vector<64x512xf32> to vector<16x512xf32>
    %250 = math.tanh %249 : vector<16x512xf32>
    %c0_228 = arith.constant 0 : index
    %c0_229 = arith.constant 0 : index
    %251 = vector.load %arg20[%c0_228, %c0_229] : memref<16x512xf32, #tpu.memory_space<vmem>>, vector<16x512xf32>
    %252 = arith.mulf %242, %251 : vector<16x512xf32>
    %253 = arith.mulf %236, %250 : vector<16x512xf32>
    %254 = arith.addf %252, %253 : vector<16x512xf32>
    %255 = math.tanh %254 : vector<16x512xf32>
    %256 = arith.mulf %248, %255 : vector<16x512xf32>
    %c0_230 = arith.constant 0 : index
    %c0_231 = arith.constant 0 : index
    %257 = vector.load %arg20[%c0_230, %c0_231] : memref<16x512xf32, #tpu.memory_space<vmem>>, vector<16x512xf32>
    tpu.vector_store %arg20[%c0_230, %c0_231], %254 {strides = array<i32>} : memref<16x512xf32, #tpu.memory_space<vmem>>, vector<16x512xf32>,
    %c0_232 = arith.constant 0 : index
    %c0_233 = arith.constant 0 : index
    %258 = vector.load %arg19[%c0_232, %c0_233] : memref<16x512xf32, #tpu.memory_space<vmem>>, vector<16x512xf32>
    tpu.vector_store %arg19[%c0_232, %c0_233], %256 {strides = array<i32>} : memref<16x512xf32, #tpu.memory_space<vmem>>, vector<16x512xf32>,
    %c0_234 = arith.constant 0 : index
    %c0_235 = arith.constant 0 : index
    %259 = vector.load %arg10[%c0_234, %c0_235] : memref<64x144xf32, #tpu.memory_space<vmem>>, vector<64x144xf32>
    %c17_i32_236 = arith.constant 17 : i32
    %260 = tpu.dynamic_rotate %256 by %c17_i32_236 dim 1 : vector<16x512xf32>, i32 -> vector<16x512xf32>
    %c0_237 = arith.constant 0 : index
    %c0_238 = arith.constant 0 : index
    %c0_239 = arith.constant 0 : index
    %261 = vector.load %arg3[%c0_237, %c0_238, %c0_239] : memref<9x16x512xf32, #tpu.memory_space<vmem>>, vector<1x16x512xf32>
    %262 = vector.shape_cast %261 : vector<1x16x512xf32> to vector<16x512xf32>
    %263 = arith.mulf %260, %262 : vector<16x512xf32>
    %c0_240 = arith.constant 0 : index
    %c0_241 = arith.constant 0 : index
    %264 = vector.load %arg16[%c0_240, %c0_241] : memref<144x512xf32, #tpu.memory_space<vmem>>, vector<16x512xf32>
    tpu.vector_store %arg16[%c0_240, %c0_241], %263 {strides = array<i32>} : memref<144x512xf32, #tpu.memory_space<vmem>>, vector<16x512xf32>,
    %c16_i32_242 = arith.constant 16 : i32
    %265 = tpu.dynamic_rotate %256 by %c16_i32_242 dim 1 : vector<16x512xf32>, i32 -> vector<16x512xf32>
    %c1_243 = arith.constant 1 : index
    %c0_244 = arith.constant 0 : index
    %c0_245 = arith.constant 0 : index
    %266 = vector.load %arg3[%c1_243, %c0_244, %c0_245] : memref<9x16x512xf32, #tpu.memory_space<vmem>>, vector<1x16x512xf32>
    %267 = vector.shape_cast %266 : vector<1x16x512xf32> to vector<16x512xf32>
    %268 = arith.mulf %265, %267 : vector<16x512xf32>
    %c16_246 = arith.constant 16 : index
    %c0_247 = arith.constant 0 : index
    %269 = vector.load %arg16[%c16_246, %c0_247] : memref<144x512xf32, #tpu.memory_space<vmem>>, vector<16x512xf32>
    tpu.vector_store %arg16[%c16_246, %c0_247], %268 {strides = array<i32>} : memref<144x512xf32, #tpu.memory_space<vmem>>, vector<16x512xf32>,
    %c15_i32_248 = arith.constant 15 : i32
    %270 = tpu.dynamic_rotate %256 by %c15_i32_248 dim 1 : vector<16x512xf32>, i32 -> vector<16x512xf32>
    %c2_249 = arith.constant 2 : index
    %c0_250 = arith.constant 0 : index
    %c0_251 = arith.constant 0 : index
    %271 = vector.load %arg3[%c2_249, %c0_250, %c0_251] : memref<9x16x512xf32, #tpu.memory_space<vmem>>, vector<1x16x512xf32>
    %272 = vector.shape_cast %271 : vector<1x16x512xf32> to vector<16x512xf32>
    %273 = arith.mulf %270, %272 : vector<16x512xf32>
    %c32_252 = arith.constant 32 : index
    %c0_253 = arith.constant 0 : index
    %274 = vector.load %arg16[%c32_252, %c0_253] : memref<144x512xf32, #tpu.memory_space<vmem>>, vector<16x512xf32>
    tpu.vector_store %arg16[%c32_252, %c0_253], %273 {strides = array<i32>} : memref<144x512xf32, #tpu.memory_space<vmem>>, vector<16x512xf32>,
    %c1_i32_254 = arith.constant 1 : i32
    %275 = tpu.dynamic_rotate %256 by %c1_i32_254 dim 1 : vector<16x512xf32>, i32 -> vector<16x512xf32>
    %c3_255 = arith.constant 3 : index
    %c0_256 = arith.constant 0 : index
    %c0_257 = arith.constant 0 : index
    %276 = vector.load %arg3[%c3_255, %c0_256, %c0_257] : memref<9x16x512xf32, #tpu.memory_space<vmem>>, vector<1x16x512xf32>
    %277 = vector.shape_cast %276 : vector<1x16x512xf32> to vector<16x512xf32>
    %278 = arith.mulf %275, %277 : vector<16x512xf32>
    %c48_258 = arith.constant 48 : index
    %c0_259 = arith.constant 0 : index
    %279 = vector.load %arg16[%c48_258, %c0_259] : memref<144x512xf32, #tpu.memory_space<vmem>>, vector<16x512xf32>
    tpu.vector_store %arg16[%c48_258, %c0_259], %278 {strides = array<i32>} : memref<144x512xf32, #tpu.memory_space<vmem>>, vector<16x512xf32>,
    %c4_260 = arith.constant 4 : index
    %c0_261 = arith.constant 0 : index
    %c0_262 = arith.constant 0 : index
    %280 = vector.load %arg3[%c4_260, %c0_261, %c0_262] : memref<9x16x512xf32, #tpu.memory_space<vmem>>, vector<1x16x512xf32>
    %281 = vector.shape_cast %280 : vector<1x16x512xf32> to vector<16x512xf32>
    %282 = arith.mulf %256, %281 : vector<16x512xf32>
    %c64_263 = arith.constant 64 : index
    %c0_264 = arith.constant 0 : index
    %283 = vector.load %arg16[%c64_263, %c0_264] : memref<144x512xf32, #tpu.memory_space<vmem>>, vector<16x512xf32>
    tpu.vector_store %arg16[%c64_263, %c0_264], %282 {strides = array<i32>} : memref<144x512xf32, #tpu.memory_space<vmem>>, vector<16x512xf32>,
    %c511_i32_265 = arith.constant 511 : i32
    %284 = tpu.dynamic_rotate %256 by %c511_i32_265 dim 1 : vector<16x512xf32>, i32 -> vector<16x512xf32>
    %c5_266 = arith.constant 5 : index
    %c0_267 = arith.constant 0 : index
    %c0_268 = arith.constant 0 : index
    %285 = vector.load %arg3[%c5_266, %c0_267, %c0_268] : memref<9x16x512xf32, #tpu.memory_space<vmem>>, vector<1x16x512xf32>
    %286 = vector.shape_cast %285 : vector<1x16x512xf32> to vector<16x512xf32>
    %287 = arith.mulf %284, %286 : vector<16x512xf32>
    %c80_269 = arith.constant 80 : index
    %c0_270 = arith.constant 0 : index
    %288 = vector.load %arg16[%c80_269, %c0_270] : memref<144x512xf32, #tpu.memory_space<vmem>>, vector<16x512xf32>
    tpu.vector_store %arg16[%c80_269, %c0_270], %287 {strides = array<i32>} : memref<144x512xf32, #tpu.memory_space<vmem>>, vector<16x512xf32>,
    %c497_i32_271 = arith.constant 497 : i32
    %289 = tpu.dynamic_rotate %256 by %c497_i32_271 dim 1 : vector<16x512xf32>, i32 -> vector<16x512xf32>
    %c6_272 = arith.constant 6 : index
    %c0_273 = arith.constant 0 : index
    %c0_274 = arith.constant 0 : index
    %290 = vector.load %arg3[%c6_272, %c0_273, %c0_274] : memref<9x16x512xf32, #tpu.memory_space<vmem>>, vector<1x16x512xf32>
    %291 = vector.shape_cast %290 : vector<1x16x512xf32> to vector<16x512xf32>
    %292 = arith.mulf %289, %291 : vector<16x512xf32>
    %c96_275 = arith.constant 96 : index
    %c0_276 = arith.constant 0 : index
    %293 = vector.load %arg16[%c96_275, %c0_276] : memref<144x512xf32, #tpu.memory_space<vmem>>, vector<16x512xf32>
    tpu.vector_store %arg16[%c96_275, %c0_276], %292 {strides = array<i32>} : memref<144x512xf32, #tpu.memory_space<vmem>>, vector<16x512xf32>,
    %c496_i32_277 = arith.constant 496 : i32
    %294 = tpu.dynamic_rotate %256 by %c496_i32_277 dim 1 : vector<16x512xf32>, i32 -> vector<16x512xf32>
    %c7_278 = arith.constant 7 : index
    %c0_279 = arith.constant 0 : index
    %c0_280 = arith.constant 0 : index
    %295 = vector.load %arg3[%c7_278, %c0_279, %c0_280] : memref<9x16x512xf32, #tpu.memory_space<vmem>>, vector<1x16x512xf32>
    %296 = vector.shape_cast %295 : vector<1x16x512xf32> to vector<16x512xf32>
    %297 = arith.mulf %294, %296 : vector<16x512xf32>
    %c112_281 = arith.constant 112 : index
    %c0_282 = arith.constant 0 : index
    %298 = vector.load %arg16[%c112_281, %c0_282] : memref<144x512xf32, #tpu.memory_space<vmem>>, vector<16x512xf32>
    tpu.vector_store %arg16[%c112_281, %c0_282], %297 {strides = array<i32>} : memref<144x512xf32, #tpu.memory_space<vmem>>, vector<16x512xf32>,
    %c495_i32_283 = arith.constant 495 : i32
    %299 = tpu.dynamic_rotate %256 by %c495_i32_283 dim 1 : vector<16x512xf32>, i32 -> vector<16x512xf32>
    %c8_284 = arith.constant 8 : index
    %c0_285 = arith.constant 0 : index
    %c0_286 = arith.constant 0 : index
    %300 = vector.load %arg3[%c8_284, %c0_285, %c0_286] : memref<9x16x512xf32, #tpu.memory_space<vmem>>, vector<1x16x512xf32>
    %301 = vector.shape_cast %300 : vector<1x16x512xf32> to vector<16x512xf32>
    %302 = arith.mulf %299, %301 : vector<16x512xf32>
    %c128_287 = arith.constant 128 : index
    %c0_288 = arith.constant 0 : index
    %303 = vector.load %arg16[%c128_287, %c0_288] : memref<144x512xf32, #tpu.memory_space<vmem>>, vector<16x512xf32>
    tpu.vector_store %arg16[%c128_287, %c0_288], %302 {strides = array<i32>} : memref<144x512xf32, #tpu.memory_space<vmem>>, vector<16x512xf32>,
    %c0_289 = arith.constant 0 : index
    %c0_290 = arith.constant 0 : index
    %304 = vector.load %arg16[%c0_289, %c0_290] : memref<144x512xf32, #tpu.memory_space<vmem>>, vector<144x512xf32>
    %cst_291 = arith.constant dense<0.000000e+00> : vector<64x512xf32>
    %305 = tpu.matmul %259, %304, %cst_291 {dimension_numbers = #tpu.dot_dimension_numbers<[1], [0], [0], [1], [0, 0, 1, 1], [], []>} : vector<64x144xf32>, vector<144x512xf32>, vector<64x512xf32> -> vector<64x512xf32>
    %c0_292 = arith.constant 0 : index
    %c0_293 = arith.constant 0 : index
    %306 = vector.load %arg11[%c0_292, %c0_293] : memref<64x144xf32, #tpu.memory_space<vmem>>, vector<64x144xf32>
    %c0_294 = arith.constant 0 : index
    %c0_295 = arith.constant 0 : index
    %307 = vector.load %arg21[%c0_294, %c0_295] : memref<16x512xf32, #tpu.memory_space<vmem>>, vector<16x512xf32>
    %c17_i32_296 = arith.constant 17 : i32
    %308 = tpu.dynamic_rotate %307 by %c17_i32_296 dim 1 : vector<16x512xf32>, i32 -> vector<16x512xf32>
    %c0_297 = arith.constant 0 : index
    %c0_298 = arith.constant 0 : index
    %c0_299 = arith.constant 0 : index
    %309 = vector.load %arg3[%c0_297, %c0_298, %c0_299] : memref<9x16x512xf32, #tpu.memory_space<vmem>>, vector<1x16x512xf32>
    %310 = vector.shape_cast %309 : vector<1x16x512xf32> to vector<16x512xf32>
    %311 = arith.mulf %308, %310 : vector<16x512xf32>
    %c0_300 = arith.constant 0 : index
    %c0_301 = arith.constant 0 : index
    %312 = vector.load %arg16[%c0_300, %c0_301] : memref<144x512xf32, #tpu.memory_space<vmem>>, vector<16x512xf32>
    tpu.vector_store %arg16[%c0_300, %c0_301], %311 {strides = array<i32>} : memref<144x512xf32, #tpu.memory_space<vmem>>, vector<16x512xf32>,
    %c16_i32_302 = arith.constant 16 : i32
    %313 = tpu.dynamic_rotate %307 by %c16_i32_302 dim 1 : vector<16x512xf32>, i32 -> vector<16x512xf32>
    %c1_303 = arith.constant 1 : index
    %c0_304 = arith.constant 0 : index
    %c0_305 = arith.constant 0 : index
    %314 = vector.load %arg3[%c1_303, %c0_304, %c0_305] : memref<9x16x512xf32, #tpu.memory_space<vmem>>, vector<1x16x512xf32>
    %315 = vector.shape_cast %314 : vector<1x16x512xf32> to vector<16x512xf32>
    %316 = arith.mulf %313, %315 : vector<16x512xf32>
    %c16_306 = arith.constant 16 : index
    %c0_307 = arith.constant 0 : index
    %317 = vector.load %arg16[%c16_306, %c0_307] : memref<144x512xf32, #tpu.memory_space<vmem>>, vector<16x512xf32>
    tpu.vector_store %arg16[%c16_306, %c0_307], %316 {strides = array<i32>} : memref<144x512xf32, #tpu.memory_space<vmem>>, vector<16x512xf32>,
    %c15_i32_308 = arith.constant 15 : i32
    %318 = tpu.dynamic_rotate %307 by %c15_i32_308 dim 1 : vector<16x512xf32>, i32 -> vector<16x512xf32>
    %c2_309 = arith.constant 2 : index
    %c0_310 = arith.constant 0 : index
    %c0_311 = arith.constant 0 : index
    %319 = vector.load %arg3[%c2_309, %c0_310, %c0_311] : memref<9x16x512xf32, #tpu.memory_space<vmem>>, vector<1x16x512xf32>
    %320 = vector.shape_cast %319 : vector<1x16x512xf32> to vector<16x512xf32>
    %321 = arith.mulf %318, %320 : vector<16x512xf32>
    %c32_312 = arith.constant 32 : index
    %c0_313 = arith.constant 0 : index
    %322 = vector.load %arg16[%c32_312, %c0_313] : memref<144x512xf32, #tpu.memory_space<vmem>>, vector<16x512xf32>
    tpu.vector_store %arg16[%c32_312, %c0_313], %321 {strides = array<i32>} : memref<144x512xf32, #tpu.memory_space<vmem>>, vector<16x512xf32>,
    %c1_i32_314 = arith.constant 1 : i32
    %323 = tpu.dynamic_rotate %307 by %c1_i32_314 dim 1 : vector<16x512xf32>, i32 -> vector<16x512xf32>
    %c3_315 = arith.constant 3 : index
    %c0_316 = arith.constant 0 : index
    %c0_317 = arith.constant 0 : index
    %324 = vector.load %arg3[%c3_315, %c0_316, %c0_317] : memref<9x16x512xf32, #tpu.memory_space<vmem>>, vector<1x16x512xf32>
    %325 = vector.shape_cast %324 : vector<1x16x512xf32> to vector<16x512xf32>
    %326 = arith.mulf %323, %325 : vector<16x512xf32>
    %c48_318 = arith.constant 48 : index
    %c0_319 = arith.constant 0 : index
    %327 = vector.load %arg16[%c48_318, %c0_319] : memref<144x512xf32, #tpu.memory_space<vmem>>, vector<16x512xf32>
    tpu.vector_store %arg16[%c48_318, %c0_319], %326 {strides = array<i32>} : memref<144x512xf32, #tpu.memory_space<vmem>>, vector<16x512xf32>,
    %c4_320 = arith.constant 4 : index
    %c0_321 = arith.constant 0 : index
    %c0_322 = arith.constant 0 : index
    %328 = vector.load %arg3[%c4_320, %c0_321, %c0_322] : memref<9x16x512xf32, #tpu.memory_space<vmem>>, vector<1x16x512xf32>
    %329 = vector.shape_cast %328 : vector<1x16x512xf32> to vector<16x512xf32>
    %330 = arith.mulf %307, %329 : vector<16x512xf32>
    %c64_323 = arith.constant 64 : index
    %c0_324 = arith.constant 0 : index
    %331 = vector.load %arg16[%c64_323, %c0_324] : memref<144x512xf32, #tpu.memory_space<vmem>>, vector<16x512xf32>
    tpu.vector_store %arg16[%c64_323, %c0_324], %330 {strides = array<i32>} : memref<144x512xf32, #tpu.memory_space<vmem>>, vector<16x512xf32>,
    %c511_i32_325 = arith.constant 511 : i32
    %332 = tpu.dynamic_rotate %307 by %c511_i32_325 dim 1 : vector<16x512xf32>, i32 -> vector<16x512xf32>
    %c5_326 = arith.constant 5 : index
    %c0_327 = arith.constant 0 : index
    %c0_328 = arith.constant 0 : index
    %333 = vector.load %arg3[%c5_326, %c0_327, %c0_328] : memref<9x16x512xf32, #tpu.memory_space<vmem>>, vector<1x16x512xf32>
    %334 = vector.shape_cast %333 : vector<1x16x512xf32> to vector<16x512xf32>
    %335 = arith.mulf %332, %334 : vector<16x512xf32>
    %c80_329 = arith.constant 80 : index
    %c0_330 = arith.constant 0 : index
    %336 = vector.load %arg16[%c80_329, %c0_330] : memref<144x512xf32, #tpu.memory_space<vmem>>, vector<16x512xf32>
    tpu.vector_store %arg16[%c80_329, %c0_330], %335 {strides = array<i32>} : memref<144x512xf32, #tpu.memory_space<vmem>>, vector<16x512xf32>,
    %c497_i32_331 = arith.constant 497 : i32
    %337 = tpu.dynamic_rotate %307 by %c497_i32_331 dim 1 : vector<16x512xf32>, i32 -> vector<16x512xf32>
    %c6_332 = arith.constant 6 : index
    %c0_333 = arith.constant 0 : index
    %c0_334 = arith.constant 0 : index
    %338 = vector.load %arg3[%c6_332, %c0_333, %c0_334] : memref<9x16x512xf32, #tpu.memory_space<vmem>>, vector<1x16x512xf32>
    %339 = vector.shape_cast %338 : vector<1x16x512xf32> to vector<16x512xf32>
    %340 = arith.mulf %337, %339 : vector<16x512xf32>
    %c96_335 = arith.constant 96 : index
    %c0_336 = arith.constant 0 : index
    %341 = vector.load %arg16[%c96_335, %c0_336] : memref<144x512xf32, #tpu.memory_space<vmem>>, vector<16x512xf32>
    tpu.vector_store %arg16[%c96_335, %c0_336], %340 {strides = array<i32>} : memref<144x512xf32, #tpu.memory_space<vmem>>, vector<16x512xf32>,
    %c496_i32_337 = arith.constant 496 : i32
    %342 = tpu.dynamic_rotate %307 by %c496_i32_337 dim 1 : vector<16x512xf32>, i32 -> vector<16x512xf32>
    %c7_338 = arith.constant 7 : index
    %c0_339 = arith.constant 0 : index
    %c0_340 = arith.constant 0 : index
    %343 = vector.load %arg3[%c7_338, %c0_339, %c0_340] : memref<9x16x512xf32, #tpu.memory_space<vmem>>, vector<1x16x512xf32>
    %344 = vector.shape_cast %343 : vector<1x16x512xf32> to vector<16x512xf32>
    %345 = arith.mulf %342, %344 : vector<16x512xf32>
    %c112_341 = arith.constant 112 : index
    %c0_342 = arith.constant 0 : index
    %346 = vector.load %arg16[%c112_341, %c0_342] : memref<144x512xf32, #tpu.memory_space<vmem>>, vector<16x512xf32>
    tpu.vector_store %arg16[%c112_341, %c0_342], %345 {strides = array<i32>} : memref<144x512xf32, #tpu.memory_space<vmem>>, vector<16x512xf32>,
    %c495_i32_343 = arith.constant 495 : i32
    %347 = tpu.dynamic_rotate %307 by %c495_i32_343 dim 1 : vector<16x512xf32>, i32 -> vector<16x512xf32>
    %c8_344 = arith.constant 8 : index
    %c0_345 = arith.constant 0 : index
    %c0_346 = arith.constant 0 : index
    %348 = vector.load %arg3[%c8_344, %c0_345, %c0_346] : memref<9x16x512xf32, #tpu.memory_space<vmem>>, vector<1x16x512xf32>
    %349 = vector.shape_cast %348 : vector<1x16x512xf32> to vector<16x512xf32>
    %350 = arith.mulf %347, %349 : vector<16x512xf32>
    %c128_347 = arith.constant 128 : index
    %c0_348 = arith.constant 0 : index
    %351 = vector.load %arg16[%c128_347, %c0_348] : memref<144x512xf32, #tpu.memory_space<vmem>>, vector<16x512xf32>
    tpu.vector_store %arg16[%c128_347, %c0_348], %350 {strides = array<i32>} : memref<144x512xf32, #tpu.memory_space<vmem>>, vector<16x512xf32>,
    %c0_349 = arith.constant 0 : index
    %c0_350 = arith.constant 0 : index
    %352 = vector.load %arg16[%c0_349, %c0_350] : memref<144x512xf32, #tpu.memory_space<vmem>>, vector<144x512xf32>
    %cst_351 = arith.constant dense<0.000000e+00> : vector<64x512xf32>
    %353 = tpu.matmul %306, %352, %cst_351 {dimension_numbers = #tpu.dot_dimension_numbers<[1], [0], [0], [1], [0, 0, 1, 1], [], []>} : vector<64x144xf32>, vector<144x512xf32>, vector<64x512xf32> -> vector<64x512xf32>
    %354 = arith.addf %305, %353 : vector<64x512xf32>
    %c0_352 = arith.constant 0 : index
    %c0_353 = arith.constant 0 : index
    %355 = vector.load %arg12[%c0_352, %c0_353] : memref<64x1xf32, #tpu.memory_space<vmem>>, vector<64x1xf32>
    %356 = vector.broadcast %355 : vector<64x1xf32> to vector<64x512xf32>
    %357 = arith.addf %354, %356 : vector<64x512xf32>
    %358 = vector.extract_strided_slice %357 {offsets = [0, 0], sizes = [16, 512], strides = [1, 1]} : vector<64x512xf32> to vector<16x512xf32>
    %359 = arith.negf %358 : vector<16x512xf32>
    %360 = math.exp %359 : vector<16x512xf32>
    %cst_354 = arith.constant 1.000000e+00 : f32
    %361 = vector.broadcast %cst_354 : f32 to vector<16x512xf32>
    %362 = arith.addf %361, %360 : vector<16x512xf32>
    %363 = arith.divf %361, %362 : vector<16x512xf32>
    %364 = vector.extract_strided_slice %357 {offsets = [16, 0], sizes = [16, 512], strides = [1, 1]} : vector<64x512xf32> to vector<16x512xf32>
    %365 = arith.negf %364 : vector<16x512xf32>
    %366 = math.exp %365 : vector<16x512xf32>
    %cst_355 = arith.constant 1.000000e+00 : f32
    %367 = vector.broadcast %cst_355 : f32 to vector<16x512xf32>
    %368 = arith.addf %367, %366 : vector<16x512xf32>
    %369 = arith.divf %367, %368 : vector<16x512xf32>
    %370 = vector.extract_strided_slice %357 {offsets = [32, 0], sizes = [16, 512], strides = [1, 1]} : vector<64x512xf32> to vector<16x512xf32>
    %371 = arith.negf %370 : vector<16x512xf32>
    %372 = math.exp %371 : vector<16x512xf32>
    %cst_356 = arith.constant 1.000000e+00 : f32
    %373 = vector.broadcast %cst_356 : f32 to vector<16x512xf32>
    %374 = arith.addf %373, %372 : vector<16x512xf32>
    %375 = arith.divf %373, %374 : vector<16x512xf32>
    %376 = vector.extract_strided_slice %357 {offsets = [48, 0], sizes = [16, 512], strides = [1, 1]} : vector<64x512xf32> to vector<16x512xf32>
    %377 = math.tanh %376 : vector<16x512xf32>
    %c0_357 = arith.constant 0 : index
    %c0_358 = arith.constant 0 : index
    %378 = vector.load %arg22[%c0_357, %c0_358] : memref<16x512xf32, #tpu.memory_space<vmem>>, vector<16x512xf32>
    %379 = arith.mulf %369, %378 : vector<16x512xf32>
    %380 = arith.mulf %363, %377 : vector<16x512xf32>
    %381 = arith.addf %379, %380 : vector<16x512xf32>
    %382 = math.tanh %381 : vector<16x512xf32>
    %383 = arith.mulf %375, %382 : vector<16x512xf32>
    %c0_359 = arith.constant 0 : index
    %c0_360 = arith.constant 0 : index
    %384 = vector.load %arg22[%c0_359, %c0_360] : memref<16x512xf32, #tpu.memory_space<vmem>>, vector<16x512xf32>
    tpu.vector_store %arg22[%c0_359, %c0_360], %381 {strides = array<i32>} : memref<16x512xf32, #tpu.memory_space<vmem>>, vector<16x512xf32>,
    %c0_361 = arith.constant 0 : index
    %c0_362 = arith.constant 0 : index
    %385 = vector.load %arg21[%c0_361, %c0_362] : memref<16x512xf32, #tpu.memory_space<vmem>>, vector<16x512xf32>
    tpu.vector_store %arg21[%c0_361, %c0_362], %383 {strides = array<i32>} : memref<16x512xf32, #tpu.memory_space<vmem>>, vector<16x512xf32>,
    %c0_363 = arith.constant 0 : index
    %c0_364 = arith.constant 0 : index
    %c0_365 = arith.constant 0 : index
    %c0_366 = arith.constant 0 : index
    %386 = vector.load %arg13[%c0_363, %c0_364, %c0_365, %c0_366] : memref<1x1x16x512xf32, #tpu.memory_space<vmem>>, vector<1x1x16x512xf32>
    %387 = vector.shape_cast %386 : vector<1x1x16x512xf32> to vector<16x512xf32>
    %388 = vector.shape_cast %383 : vector<16x512xf32> to vector<1x1x16x512xf32>
    tpu.vector_store %arg13[%c0_363, %c0_364, %c0_365, %c0_366], %388 {strides = array<i32>} : memref<1x1x16x512xf32, #tpu.memory_space<vmem>>, vector<1x1x16x512xf32>,
    %c0_367 = arith.constant 0 : index
    %c0_368 = arith.constant 0 : index
    %c0_369 = arith.constant 0 : index
    %389 = vector.load %arg14[%c0_367, %c0_368, %c0_369] : memref<1x16x512xf32, #tpu.memory_space<vmem>>, vector<1x16x512xf32>
    %390 = vector.shape_cast %389 : vector<1x16x512xf32> to vector<16x512xf32>
    %391 = vector.shape_cast %383 : vector<16x512xf32> to vector<1x16x512xf32>
    tpu.vector_store %arg14[%c0_367, %c0_368, %c0_369], %391 {strides = array<i32>} : memref<1x16x512xf32, #tpu.memory_space<vmem>>, vector<1x16x512xf32>,
    %c0_370 = arith.constant 0 : index
    %c0_371 = arith.constant 0 : index
    %c0_372 = arith.constant 0 : index
    %392 = vector.load %arg15[%c0_370, %c0_371, %c0_372] : memref<1x16x512xf32, #tpu.memory_space<vmem>>, vector<1x16x512xf32>
    %393 = vector.shape_cast %392 : vector<1x16x512xf32> to vector<16x512xf32>
    %394 = vector.shape_cast %381 : vector<16x512xf32> to vector<1x16x512xf32>
    tpu.vector_store %arg15[%c0_370, %c0_371, %c0_372], %394 {strides = array<i32>} : memref<1x16x512xf32, #tpu.memory_space<vmem>>, vector<1x16x512xf32>,
    return
  }
  func.func @transform_0(%arg0: i32, %arg1: i32) -> (i32, i32, i32, i32) {
    %c0_i32 = arith.constant 0 : i32
    %c0_i32_0 = arith.constant 0 : i32
    %c0_i32_1 = arith.constant 0 : i32
    return %arg0, %arg1, %c0_i32, %c0_i32_0 : i32, i32, i32, i32
  }
  func.func @transform_1(%arg0: i32, %arg1: i32) -> (i32, i32, i32) {
    %c0_i32 = arith.constant 0 : i32
    %c0_i32_0 = arith.constant 0 : i32
    %c0_i32_1 = arith.constant 0 : i32
    %c0_i32_2 = arith.constant 0 : i32
    return %c0_i32, %c0_i32_0, %c0_i32_1 : i32, i32, i32
  }
  func.func @transform_2(%arg0: i32, %arg1: i32) -> (i32, i32) {
    %c0_i32 = arith.constant 0 : i32
    %c0_i32_0 = arith.constant 0 : i32
    %c0_i32_1 = arith.constant 0 : i32
    return %c0_i32, %c0_i32_0 : i32, i32
  }
  func.func @transform_3(%arg0: i32, %arg1: i32) -> (i32, i32) {
    %c0_i32 = arith.constant 0 : i32
    %c0_i32_0 = arith.constant 0 : i32
    %c0_i32_1 = arith.constant 0 : i32
    return %c0_i32, %c0_i32_0 : i32, i32
  }
  func.func @transform_4(%arg0: i32, %arg1: i32) -> (i32, i32) {
    %c0_i32 = arith.constant 0 : i32
    %c0_i32_0 = arith.constant 0 : i32
    %c0_i32_1 = arith.constant 0 : i32
    return %c0_i32, %c0_i32_0 : i32, i32
  }
  func.func @transform_5(%arg0: i32, %arg1: i32) -> (i32, i32) {
    %c0_i32 = arith.constant 0 : i32
    %c0_i32_0 = arith.constant 0 : i32
    %c0_i32_1 = arith.constant 0 : i32
    return %c0_i32, %c0_i32_0 : i32, i32
  }
  func.func @transform_6(%arg0: i32, %arg1: i32) -> (i32, i32) {
    %c0_i32 = arith.constant 0 : i32
    %c0_i32_0 = arith.constant 0 : i32
    %c0_i32_1 = arith.constant 0 : i32
    return %c0_i32, %c0_i32_0 : i32, i32
  }
  func.func @transform_7(%arg0: i32, %arg1: i32) -> (i32, i32) {
    %c0_i32 = arith.constant 0 : i32
    %c0_i32_0 = arith.constant 0 : i32
    %c0_i32_1 = arith.constant 0 : i32
    return %c0_i32, %c0_i32_0 : i32, i32
  }
  func.func @transform_8(%arg0: i32, %arg1: i32) -> (i32, i32) {
    %c0_i32 = arith.constant 0 : i32
    %c0_i32_0 = arith.constant 0 : i32
    %c0_i32_1 = arith.constant 0 : i32
    return %c0_i32, %c0_i32_0 : i32, i32
  }
  func.func @transform_9(%arg0: i32, %arg1: i32) -> (i32, i32) {
    %c0_i32 = arith.constant 0 : i32
    %c0_i32_0 = arith.constant 0 : i32
    %c0_i32_1 = arith.constant 0 : i32
    return %c0_i32, %c0_i32_0 : i32, i32
  }
  func.func @transform_10(%arg0: i32, %arg1: i32) -> (i32, i32) {
    %c0_i32 = arith.constant 0 : i32
    %c0_i32_0 = arith.constant 0 : i32
    %c0_i32_1 = arith.constant 0 : i32
    return %c0_i32, %c0_i32_0 : i32, i32
  }
  func.func @transform_11(%arg0: i32, %arg1: i32) -> (i32, i32, i32, i32) {
    %c0_i32 = arith.constant 0 : i32
    %c0_i32_0 = arith.constant 0 : i32
    %c0_i32_1 = arith.constant 0 : i32
    return %arg0, %arg1, %c0_i32, %c0_i32_0 : i32, i32, i32, i32
  }
  func.func @transform_12(%arg0: i32, %arg1: i32) -> (i32, i32, i32) {
    %c0_i32 = arith.constant 0 : i32
    %c0_i32_0 = arith.constant 0 : i32
    %c0_i32_1 = arith.constant 0 : i32
    return %arg0, %c0_i32, %c0_i32_0 : i32, i32, i32
  }
  func.func @transform_13(%arg0: i32, %arg1: i32) -> (i32, i32, i32) {
    %c0_i32 = arith.constant 0 : i32
    %c0_i32_0 = arith.constant 0 : i32
    %c0_i32_1 = arith.constant 0 : i32
    return %arg0, %c0_i32, %c0_i32_0 : i32, i32, i32
  }
}

</mosaic_0001>

<bundles_post_ra>
// kernel: convlstm_forward.1
= control target key start
LH: loop header
LB: loop body
LE: loop exit
PB: predicated region body
PF: predicated region fallthrough
CT: control target
= control target key end

     0   :  { %s10651_s0 = inlined_call_operand.vmem [shape: f32[2,8,8,512], index: 0, kind: input, shape index: {}]   ;;  %s10652_s1 = inlined_call_operand.hbm [shape: f32[9,16,512], index: 1, kind: input, shape index: {}]   ;;  %s10653_s2 = inlined_call_operand.vmem [shape: f32[64,72], index: 2, kind: input, shape index: {}]   ;;  %s10654_s3 = inlined_call_operand.vmem [shape: f32[64,144], index: 3, kind: input, shape index: {}]   ;;  %s10655_s4 = inlined_call_operand.vmem [shape: f32[64,1], index: 4, kind: input, shape index: {}]   ;;  %s10656_s5 = inlined_call_operand.vmem [shape: f32[64,144], index: 5, kind: input, shape index: {}]   ;;  %s10657_s6 = inlined_call_operand.vmem [shape: f32[64,144], index: 6, kind: input, shape index: {}]   ;;  %s10658_s7 = inlined_call_operand.vmem [shape: f32[64,1], index: 7, kind: input, shape index: {}]   ;;  %s10659_s8 = inlined_call_operand.vmem [shape: f32[64,144], index: 8, kind: input, shape index: {}]   ;;  %s10660_s9 = inlined_call_operand.vmem [shape: f32[64,144], index: 9, kind: input, shape index: {}]   ;;  %s10661_s10 = inlined_call_operand.vmem [shape: f32[64,1], index: 10, kind: input, shape index: {}]   ;;  %s10662_s11 = inlined_call_operand.vmem [shape: f32[2,8,16,512], index: 11, kind: output, shape index: {0}]   ;;  %s10663_s12 = inlined_call_operand.vmem [shape: f32[2,16,512], index: 12, kind: output, shape index: {1}]   ;;  %s10664_s13 = inlined_call_operand.vmem [shape: f32[2,16,512], index: 13, kind: output, shape index: {2}]  }
   0x1   :  { %10691 = sst [smem:[#allocation24_spill]] %s10652_s1 }
   0x2   :  { %10692 = sst [smem:[#allocation25_spill]] %s10661_s10 }
   0x3   :  { %19 = vsyncpa [#allocation10], 0  ;;  %s7359_s25 = smov 0   ;;  %s7361_s26 = smov 0  }
   0x4   :  { %s7363_s27 = smov 0   ;;  %s7365_s28 = smov 0  }
   0x5   :  { %s7367_s29 = smov 0  }
   0x6 LB: > { %10693 = sst [smem:[#allocation12_spill]] %s7265_s27  ;;  %s5931_s30 = sadd.s32 4294967295, %s7273_s29   ;;  %s7273_s29 = sphi %s7367_s29, %s25_s29   ;;  %s7269_s28 = sphi %s7365_s28, %s10759_s28   ;;  %s7265_s27 = sphi %s7363_s27, %s10758_s27   ;;  %s7261_s26 = sphi %s7361_s26, %s10757_s26   ;;  %s7257_s25 = sphi %s7359_s25, %s10756_s25  }
   0x7   : > { %10694 = sst [smem:[#allocation13_spill]] %s7269_s28  ;;  %s34_s14 = sadd.s32 1, %s7265_s27 }
   0x8   : > { %10695 = sst [smem:[#allocation14_spill]] %s7273_s29  ;;  %p35_p0 = scmp.ge.s32.totalorder %s34_s14, 8 }
   0x9   : > { %s37_s15 = sadd.s32 1, %s7269_s28  ;;  %p5933_p1 = scmp.ge.s32.totalorder %s7273_s29, 1 }
   0xa   : > { %p360_p2 = scmp.lt.s32.totalorder %s7273_s29, 17  ;;  %s10761_s14 = smov (%p35_p0, %s34_s14), 0 }
   0xb   : > { %10696 = sst [smem:[#allocation15_spill]] %s10761_s14  ;;  %s10763_s15 = smov (!%p35_p0, %s37_s15), %s7269_s28 }
   0xc   : > { %p7392_p3 = pnand %p5933_p1, %p360_p2  ;;  %p39_p4 = scmp.ge.s32.totalorder %s10763_s15, 2 }
   0xd   : > { %p7396_p5 = scmp.eq.s32.totalorder %s5931_s30, 0  ;;  %s7275_s18 = smov [#allocation9]  }
   0xe   : > { %s10697_s16 = scalar_select %p7392_p3, 1, 0 }
   0xf   : > { %s10698_s17 = scalar_select %p7396_p5, 1, 0 }
  0x10   : > { %p6613_p6 = pneg %p7392_p3  ;;  %s10765_s15 = smov (%p39_p4, %s10763_s15), 0 }
  0x11   : > { %10699 = sst [smem:[#allocation16_spill]] %s10765_s15  ;;  %s372_s19 = sshll.u32 %s7275_s18, 4  ;;  %s373_s19 = int_to_ptr.vmem [resolvable:$true] %s372_s19 }
  0x12   : > { %p7406_p7 = pnand %p7396_p5, %p6613_p6  ;;  %s10701_s1 = sld [smem:[#allocation24_spill]] }
  0x14   : > { %p7205_p9 = pneg %p7406_p7 }
  0x18   : > { %s7203_s23 = scalar_lea.hbm %s10701_s1, 9216 }
  0x19   : > { %p7204_p8 = scmp.ne.s32.totalorder %s10701_s1, %s7203_s23  ;;  %p7210_p12 = scmp.lt.u32.totalorder %s7203_s23, %s10701_s1 }
  0x1b   : > { %p7206_p10 = pnand %p7205_p9, %p7204_p8 }
  0x1d   : > { %p7207_p11 = pneg %p7206_p10 }
  0x1f   : > { %p7212_p13 = pnand %p7210_p12, %p7207_p11 }
  0x21   : > { %7215 = shalt.err (!%p7212_p13)
}
  0x22   : > { %s7216_s14 = scalar_lea.vmem %s373_s19, 9216  ;;  %p7224_p4 = scmp.lt.s32.totalorder %s373_s19, %s373_s19 }
  0x23   : > { %p7217_p0 = scmp.ne.s32.totalorder %s373_s19, %s7216_s14  ;;  %p7225_p6 = scmp.lt.s32.totalorder %s7216_s14, %s7216_s14 }
  0x25   : > { %p7219_p1 = pnand %p7217_p0, %p7205_p9  ;;  %p7226_p5 = por %p7225_p6, %p7224_p4 }
  0x27   : > { %p7220_p2 = pneg %p7219_p1 }
  0x29   : > { %p7227_p3 = pnand %p7226_p5, %p7220_p2 }
  0x2b   : > { %7230 = shalt.err (!%p7227_p3)
}
  0x2c   : > { %s7276_s21 = smov 512   ;;  %s7277_s22 = smov 32  }
  0x2d   : > { %6616 = dma.hbm_to_vmem [thread:$0]  (!%p7406_p7), %s10701_s1, 9216, %s373_s19, [#allocation10], %s7276_s21, %s7276_s21, %s7277_s22  }
  0x2e   : > { %p10702_p8 = scmp.ne.s32.totalorder %s10697_s16, 0 }
  0x30   : > { %427 = sbr.rel (%p10702_p8) target bundleno = 1781 (0x6f5), region = 64 }
  0x37   : > { %p10703_p10 = scmp.ne.s32.totalorder %s10698_s17, 0 }
  0x39   : > { %7252 = dma.done.wait (%p10703_p10), [#allocation10], 9216  }
  0x3a   : > { %7254 = vsyncadd (%p10703_p10), [#allocation10], 4294958080  ;;  %p489_p3 = scmp.lt.s32.totalorder %s7261_s26, 1  ;;  %p491_p5 = scmp.lt.s32.totalorder %s7257_s25, 7 }
  0x3b   : > { %p5948_p7 = scmp.ne.s32.totalorder %s7257_s25, 0 }
  0x3c   : > { %s10767_s26 = smov (!%p489_p3, %s7261_s26), 1  ;;  %v7278_v0 = vmov (!%p5948_p7), 0.0  }
  0x3d   : > { %s492_s14 = scalar_select %p491_p5, %s7257_s25, 7 }
  0x3e   : > { %s5939_s15 = sshll.u32 %s10767_s26, 5  ;;  %s5942_s20 = sshll.u32 %s10767_s26, 6  ;;  %521 = vst [vmem:[#allocation3] sm:$0xff] (!%p5948_p7), %v7278_v0  ;;  %522 = vst [vmem:[#allocation3 + $0x8] sm:$0xff] (!%p5948_p7), %v7278_v0 }
  0x3f   : > { %s5938_s19 = sshll.u32 %s492_s14, 2  ;;  %s5941_s23 = sshll.u32 %s492_s14, 3  ;;  %523 = vst [vmem:[#allocation3 + $0x10] sm:$0xff] (!%p5948_p7), %v7278_v0  ;;  %524 = vst [vmem:[#allocation3 + $0x18] sm:$0xff] (!%p5948_p7), %v7278_v0 }
  0x40   : > { %s495_s16 = sadd.s32 %s5939_s15, %s5938_s19  ;;  %s504_s18 = sadd.s32 %s5942_s20, %s5941_s23  ;;  %525 = vst [vmem:[#allocation3 + $0x20] sm:$0xff] (!%p5948_p7), %v7278_v0  ;;  %526 = vst [vmem:[#allocation3 + $0x28] sm:$0xff] (!%p5948_p7), %v7278_v0 }
  0x41   : > { %s5940_s21 = sshll.u32 %s495_s16, 3  ;;  %s5943_s22 = sshll.u32 %s504_s18, 3  ;;  %527 = vst [vmem:[#allocation3 + $0x30] sm:$0xff] (!%p5948_p7), %v7278_v0  ;;  %528 = vst [vmem:[#allocation3 + $0x38] sm:$0xff] (!%p5948_p7), %v7278_v0 }
  0x42   : > { %s7439_s17 = scalar_lea.vmem %s10651_s0, %s5940_s21  ;;  %s7444_s27 = scalar_lea.vmem %s10662_s11, %s5943_s22  ;;  %529 = vst [vmem:[#allocation4] sm:$0xff] (!%p5948_p7), %v7278_v0  ;;  %530 = vst [vmem:[#allocation4 + $0x8] sm:$0xff] (!%p5948_p7), %v7278_v0 }
  0x43   : > { %s7449_s26 = scalar_lea.vmem %s10663_s12, %s5942_s20  ;;  %s7454_s19 = scalar_lea.vmem %s10664_s13, %s5942_s20  ;;  %531 = vst [vmem:[#allocation4 + $0x10] sm:$0xff] (!%p5948_p7), %v7278_v0  ;;  %532 = vst [vmem:[#allocation4 + $0x18] sm:$0xff] (!%p5948_p7), %v7278_v0 }
  0x44   : > { %520 = sbr.rel (%p5948_p7) target bundleno = 86 (0x56), region = 72  ;;  %533 = vst [vmem:[#allocation4 + $0x20] sm:$0xff] (!%p5948_p7), %v7278_v0  ;;  %534 = vst [vmem:[#allocation4 + $0x28] sm:$0xff] (!%p5948_p7), %v7278_v0 }
  0x45   : > { %535 = vst [vmem:[#allocation4 + $0x30] sm:$0xff] (!%p5948_p7), %v7278_v0  ;;  %536 = vst [vmem:[#allocation4 + $0x38] sm:$0xff] (!%p5948_p7), %v7278_v0 }
  0x46   : > { %537 = vst [vmem:[#allocation5] sm:$0xff] (!%p5948_p7), %v7278_v0  ;;  %538 = vst [vmem:[#allocation5 + $0x8] sm:$0xff] (!%p5948_p7), %v7278_v0 }
  0x47   : > { %539 = vst [vmem:[#allocation5 + $0x10] sm:$0xff] (!%p5948_p7), %v7278_v0  ;;  %540 = vst [vmem:[#allocation5 + $0x18] sm:$0xff] (!%p5948_p7), %v7278_v0 }
  0x48   : > { %541 = vst [vmem:[#allocation5 + $0x20] sm:$0xff] (!%p5948_p7), %v7278_v0  ;;  %542 = vst [vmem:[#allocation5 + $0x28] sm:$0xff] (!%p5948_p7), %v7278_v0 }
  0x49   : > { %543 = vst [vmem:[#allocation5 + $0x30] sm:$0xff] (!%p5948_p7), %v7278_v0  ;;  %544 = vst [vmem:[#allocation5 + $0x38] sm:$0xff] (!%p5948_p7), %v7278_v0 }
  0x4a   : > { %545 = vst [vmem:[#allocation6] sm:$0xff] (!%p5948_p7), %v7278_v0  ;;  %546 = vst [vmem:[#allocation6 + $0x8] sm:$0xff] (!%p5948_p7), %v7278_v0 }
  0x4b   : > { %547 = vst [vmem:[#allocation6 + $0x10] sm:$0xff] %v7278_v0  ;;  %548 = vst [vmem:[#allocation6 + $0x18] sm:$0xff] %v7278_v0 }
  0x4c   : > { %549 = vst [vmem:[#allocation6 + $0x20] sm:$0xff] %v7278_v0  ;;  %550 = vst [vmem:[#allocation6 + $0x28] sm:$0xff] %v7278_v0 }
  0x4d   : > { %551 = vst [vmem:[#allocation6 + $0x30] sm:$0xff] %v7278_v0  ;;  %552 = vst [vmem:[#allocation6 + $0x38] sm:$0xff] %v7278_v0 }
  0x4e   : > { %553 = vst [vmem:[#allocation7] sm:$0xff] %v7278_v0  ;;  %554 = vst [vmem:[#allocation7 + $0x8] sm:$0xff] %v7278_v0 }
  0x4f   : > { %555 = vst [vmem:[#allocation7 + $0x10] sm:$0xff] %v7278_v0  ;;  %556 = vst [vmem:[#allocation7 + $0x18] sm:$0xff] %v7278_v0 }
  0x50   : > { %557 = vst [vmem:[#allocation7 + $0x20] sm:$0xff] %v7278_v0  ;;  %558 = vst [vmem:[#allocation7 + $0x28] sm:$0xff] %v7278_v0 }
  0x51   : > { %559 = vst [vmem:[#allocation7 + $0x30] sm:$0xff] %v7278_v0  ;;  %560 = vst [vmem:[#allocation7 + $0x38] sm:$0xff] %v7278_v0 }
  0x52   : > { %561 = vst [vmem:[#allocation8] sm:$0xff] %v7278_v0  ;;  %562 = vst [vmem:[#allocation8 + $0x8] sm:$0xff] %v7278_v0 }
  0x53   : > { %563 = vst [vmem:[#allocation8 + $0x10] sm:$0xff] %v7278_v0  ;;  %564 = vst [vmem:[#allocation8 + $0x18] sm:$0xff] %v7278_v0 }
  0x54   : > { %565 = vst [vmem:[#allocation8 + $0x20] sm:$0xff] %v7278_v0  ;;  %566 = vst [vmem:[#allocation8 + $0x28] sm:$0xff] %v7278_v0 }
  0x55   : > { %567 = vst [vmem:[#allocation8 + $0x30] sm:$0xff] %v7278_v0  ;;  %568 = vst [vmem:[#allocation8 + $0x38] sm:$0xff] %v7278_v0 }
  0x56 PF: > { %v7457_v1 = vld [vmem:[#allocation3 + $0x8] sm:$0xff]  ;;  %v7459_v2 = vld [vmem:[#allocation3] sm:$0xff]  ;;  %s7279_s1 = smov 17   ;;  %v7473_v5 = vld [vmem:[#allocation3 + $0x30] sm:$0xff]  ;;  %s7280_s10 = smov 16   ;;  %v589_v9 = vlaneseq  ;;  %vm1343_vm1 = vcmask 130048  }
  0x57   : > { %867 = vrot.lane.b32.xlu1 %v7457_v1, %s7279_s1  ;;  %863 = vrot.lane.b32.xlu0 %v7459_v2, %s7279_s1  ;;  %v7465_v3 = vld [vmem:[#allocation3 + $0x28] sm:$0xff]  ;;  %v7467_v4 = vld [vmem:[#allocation3 + $0x20] sm:$0xff]  ;;  %v7475_v6 = vld [vmem:[#allocation3 + $0x10] sm:$0xff]  ;;  %s7281_s25 = smov 15   ;;  %s7282_s28 = smov 1   ;;  %vm1594_vm9 = vcmask 588800  }
  0x58   : > { %v7481_v7 = vld [vmem:[#allocation3 + $0x38] sm:$0xff]  ;;  %s7283_s29 = smov 127   ;;  %s7284_s20 = smov 113   ;;  %v7585_v10 = vand.u32 127, %v589_v9  ;;  %v7598_v14 = vld [vmem:[#allocation9 + $0x8] sm:$0xff]  ;;  %v7611_v26 = vld [vmem:[#allocation9 + $0x10] sm:$0xff] }
  0x59   : > { %v7483_v8 = vld [vmem:[#allocation3 + $0x18] sm:$0xff]  ;;  %s7285_s23 = smov 112   ;;  %s7286_s16 = smov 111   ;;  %v892_v15 = vld [vmem:[#allocation9 + $0x28] sm:$0xff]  ;;  %v893_v27 = vld [vmem:[#allocation9 + $0x30] sm:$0xff] }
  0x5a   : > { %vm591_vm0 = vcmp.lt.s32.totalorder %v7585_v10, 17  ;;  %v7618_v28 = vld [vmem:[%s7439_s17 + $0x8] sm:$0xff]  ;;  %v7621_v29 = vld [vmem:[%s7439_s17] sm:$0xff]  ;;  %v7625_v32 = vld [vmem:[#allocation9 + $0x18] sm:$0xff]  ;;  %vm616_vm2 = vcmp.lt.s32.totalorder %v7585_v10, 16  ;;  %vm642_vm3 = vcmp.lt.s32.totalorder %v7585_v10, 15 }
  0x5b   : > { %869 = vrot.lane.b32.xlu1 %v7465_v3, %s7279_s1  ;;  %865 = vrot.lane.b32.xlu0 %v7467_v4, %s7279_s1  ;;  %v7623_v30 = vld [vmem:[#allocation9] sm:$0xff]  ;;  %v894_v35 = vld [vmem:[#allocation9 + $0x38] sm:$0xff]  ;;  %v7646_v50 = vld [vmem:[%s7439_s17 + $0x10] sm:$0xff]  ;;  %vm668_vm4 = vcmp.lt.s32.totalorder %v7585_v10, 1  ;;  %vm707_vm5 = vcmp.lt.s32.totalorder %v7585_v10, 127  ;;  %vm733_vm6 = vcmp.lt.s32.totalorder %v7585_v10, 113 }
  0x5c   : > { %v891_v31 = vld [vmem:[#allocation9 + $0x20] sm:$0xff]  ;;  %v7643_v46 = vld [vmem:[%s7439_s17 + $0x18] sm:$0xff]  ;;  %v840_v52 = vld [vmem:[%s10654_s3 + $0x8] sm:$0xff]  ;;  %vm759_vm7 = vcmp.lt.s32.totalorder %v7585_v10, 112  ;;  %vm785_vm8 = vcmp.lt.s32.totalorder %v7585_v10, 111  ;;  %s10748_s30 = sld [smem:[#allocation25_spill]] }
  0x5d   : > { %v940_v54 = vld [vmem:[#allocation9 + $0x68] sm:$0xff]  ;;  %5949 = vmatprep.mubr.msk.f32.mxu0 %vm1343_vm1, %v840_v52  ;;  %5957 = vmatprep.mubr.msk.f32.mxu1 %vm1343_vm1, %v840_v52  ;;  %v941_v9 = vld [vmem:[#allocation9 + $0x70] sm:$0xff]  ;;  %v3940_v10 = vld [vmem:[%s10659_s8 + $0x18] sm:$0xff] }
  0x5e   : > { %v7656_v55 = vld [vmem:[#allocation9 + $0x48] sm:$0xff] }
  0x5f   : > { %873 = vrot.lane.b32.xlu1 %v7473_v5, %s7279_s1  ;;  %871 = vrot.lane.b32.xlu0 %v7475_v6, %s7279_s1 }
  0x63   : > { %877 = vrot.lane.b32.xlu1 %v7481_v7, %s7279_s1  ;;  %875 = vrot.lane.b32.xlu0 %v7483_v8, %s7279_s1 }
  0x67   : > { %913 = vrot.lane.b32.xlu1 %v7467_v4, %s7280_s10  ;;  %911 = vrot.lane.b32.xlu0 %v7459_v2, %s7280_s10 }
  0x6b   : > { %917 = vrot.lane.b32.xlu1 %v7465_v3, %s7280_s10  ;;  %915 = vrot.lane.b32.xlu0 %v7457_v1, %s7280_s10 }
  0x6f   : > { %921 = vrot.lane.b32.xlu1 %v7473_v5, %s7280_s10  ;;  %919 = vrot.lane.b32.xlu0 %v7475_v6, %s7280_s10 }
  0x73   : > { %925 = vrot.lane.b32.xlu1 %v7481_v7, %s7280_s10  ;;  %923 = vrot.lane.b32.xlu0 %v7483_v8, %s7280_s10 }
  0x77   : > { %961 = vrot.lane.b32.xlu1 %v7467_v4, %s7281_s25  ;;  %959 = vrot.lane.b32.xlu0 %v7459_v2, %s7281_s25 }
  0x7b   : > { %965 = vrot.lane.b32.xlu1 %v7465_v3, %s7281_s25  ;;  %963 = vrot.lane.b32.xlu0 %v7457_v1, %s7281_s25 }
  0x7f   : > { %969 = vrot.lane.b32.xlu1 %v7473_v5, %s7281_s25  ;;  %967 = vrot.lane.b32.xlu0 %v7475_v6, %s7281_s25 }
  0x83   : > { %973 = vrot.lane.b32.xlu1 %v7481_v7, %s7281_s25  ;;  %971 = vrot.lane.b32.xlu0 %v7483_v8, %s7281_s25 }
  0x87   : > { %1009 = vrot.lane.b32.xlu1 %v7467_v4, %s7282_s28  ;;  %1007 = vrot.lane.b32.xlu0 %v7459_v2, %s7282_s28 }
  0x8b   : > { %1013 = vrot.lane.b32.xlu1 %v7465_v3, %s7282_s28  ;;  %1011 = vrot.lane.b32.xlu0 %v7457_v1, %s7282_s28 }
  0x8f   : > { %1017 = vrot.lane.b32.xlu1 %v7473_v5, %s7282_s28  ;;  %1015 = vrot.lane.b32.xlu0 %v7475_v6, %s7282_s28 }
  0x93   : > { %1021 = vrot.lane.b32.xlu1 %v7481_v7, %s7282_s28  ;;  %1019 = vrot.lane.b32.xlu0 %v7483_v8, %s7282_s28 }
  0x97   : > { %1081 = vrot.lane.b32.xlu1 %v7467_v4, %s7283_s29  ;;  %1079 = vrot.lane.b32.xlu0 %v7459_v2, %s7283_s29 }
  0x9b   : > { %1085 = vrot.lane.b32.xlu1 %v7465_v3, %s7283_s29  ;;  %1083 = vrot.lane.b32.xlu0 %v7457_v1, %s7283_s29 }
  0x9f   : > { %1089 = vrot.lane.b32.xlu1 %v7473_v5, %s7283_s29  ;;  %1087 = vrot.lane.b32.xlu0 %v7475_v6, %s7283_s29 }
  0xa3   : > { %1093 = vrot.lane.b32.xlu1 %v7481_v7, %s7283_s29  ;;  %1091 = vrot.lane.b32.xlu0 %v7483_v8, %s7283_s29 }
  0xa7   : > { %1129 = vrot.lane.b32.xlu1 %v7467_v4, %s7284_s20  ;;  %1127 = vrot.lane.b32.xlu0 %v7459_v2, %s7284_s20 }
  0xab   : > { %1133 = vrot.lane.b32.xlu1 %v7465_v3, %s7284_s20  ;;  %1131 = vrot.lane.b32.xlu0 %v7457_v1, %s7284_s20 }
  0xaf   : > { %1137 = vrot.lane.b32.xlu1 %v7473_v5, %s7284_s20  ;;  %1135 = vrot.lane.b32.xlu0 %v7475_v6, %s7284_s20 }
  0xb3   : > { %1141 = vrot.lane.b32.xlu1 %v7481_v7, %s7284_s20  ;;  %1139 = vrot.lane.b32.xlu0 %v7483_v8, %s7284_s20 }
  0xb7   : > { %1177 = vrot.lane.b32.xlu1 %v7467_v4, %s7285_s23  ;;  %1175 = vrot.lane.b32.xlu0 %v7459_v2, %s7285_s23 }
  0xbb   : > { %1181 = vrot.lane.b32.xlu1 %v7465_v3, %s7285_s23  ;;  %1179 = vrot.lane.b32.xlu0 %v7457_v1, %s7285_s23 }
  0xbf   : > { %1185 = vrot.lane.b32.xlu1 %v7473_v5, %s7285_s23  ;;  %1183 = vrot.lane.b32.xlu0 %v7475_v6, %s7285_s23 }
  0xc3   : > { %1189 = vrot.lane.b32.xlu1 %v7481_v7, %s7285_s23  ;;  %1187 = vrot.lane.b32.xlu0 %v7483_v8, %s7285_s23 }
  0xc7   : > { %1225 = vrot.lane.b32.xlu1 %v7467_v4, %s7286_s16  ;;  %1223 = vrot.lane.b32.xlu0 %v7459_v2, %s7286_s16 }
  0xc9   : > { %v868_v11 = vpop.permute.xlu1 %867  ;;  %v864_v12 = vpop.permute.xlu0 %863 }
  0xca   : > { %v883_v13 = vsel %vm591_vm0, %v864_v12, %v868_v11 }
  0xcb   : > { %1229 = vrot.lane.b32.xlu1 %v7465_v3, %s7286_s16  ;;  %1227 = vrot.lane.b32.xlu0 %v7457_v1, %s7286_s16  ;;  %v896_v19 = vmul.f32 %v7598_v14, %v883_v13 }
  0xcd   : > { %v870_v16 = vpop.permute.xlu1 %869  ;;  %v866_v17 = vpop.permute.xlu0 %865 }
  0xce   : > { %v884_v18 = vsel %vm591_vm0, %v866_v17, %v870_v16 }
  0xcf   : > { %1233 = vrot.lane.b32.xlu1 %v7473_v5, %s7286_s16  ;;  %1231 = vrot.lane.b32.xlu0 %v7475_v6, %s7286_s16  ;;  %v900_v20 = vmul.f32 %v892_v15, %v884_v18  ;;  %v939_v15 = vld [vmem:[#allocation9 + $0x60] sm:$0xff]  ;;  %v7681_v18 = vld [vmem:[#allocation9 + $0x58] sm:$0xff] }
  0xd1   : > { %v874_v21 = vpop.permute.xlu1 %873  ;;  %v872_v22 = vpop.permute.xlu0 %871  ;;  %v6121_v23 = vpack.c.bf16 %v900_v20, %v896_v19 }
  0xd2   : > { %v882_v24 = vsel %vm591_vm0, %v870_v16, %v874_v21  ;;  %v881_v25 = vsel %vm591_vm0, %v868_v11, %v872_v22  ;;  %v942_v16 = vld [vmem:[#allocation9 + $0x78] sm:$0xff] }
  0xd3   : > { %1237 = vrot.lane.b32.xlu1 %v7481_v7, %s7286_s16  ;;  %1235 = vrot.lane.b32.xlu0 %v7483_v8, %s7286_s16  ;;  %v897_v36 = vmul.f32 %v7611_v26, %v881_v25  ;;  %v901_v37 = vmul.f32 %v893_v27, %v882_v24 }
  0xd4   : > { %6122 = vmatprep.subr.bf16.mxu0 %v6121_v23 }
  0xd5   : > { %v878_v33 = vpop.permute.xlu1 %877  ;;  %v876_v34 = vpop.permute.xlu0 %875  ;;  %v6159_v53 = vpack.c.bf16 %v901_v37, %v897_v36 }
  0xd6   : > { %v886_v38 = vsel %vm591_vm0, %v878_v33, %v866_v17  ;;  %v885_v39 = vsel %vm591_vm0, %v876_v34, %v864_v12  ;;  %v879_v40 = vsel %vm591_vm0, %v872_v22, %v876_v34  ;;  %v880_v41 = vsel %vm591_vm0, %v874_v21, %v878_v33  ;;  %v7671_v12 = vld [vmem:[#allocation9 + $0x50] sm:$0xff]  ;;  %v7679_v17 = vld [vmem:[#allocation9 + $0x40] sm:$0xff] }
  0xd7   : > { %583 = vrot.lane.b32.xlu1 %v7618_v28, %s7279_s1  ;;  %581 = vrot.lane.b32.xlu0 %v7621_v29, %s7279_s1  ;;  %v895_v42 = vmul.f32 %v7623_v30, %v885_v39  ;;  %v899_v43 = vmul.f32 %v891_v31, %v886_v38  ;;  %v898_v44 = vmul.f32 %v7625_v32, %v879_v40 }
  0xd8   : > { %v902_v45 = vmul.f32 %v894_v35, %v880_v41  ;;  %v988_v41 = vld [vmem:[#allocation9 + $0xa8] sm:$0xff] }
  0xd9   : > { %v914_v47 = vpop.permute.xlu1 %913  ;;  %v912_v48 = vpop.permute.xlu0 %911  ;;  %v6123_v49 = vpack.c.bf16 %v899_v43, %v895_v42  ;;  %v7703_v42 = vld [vmem:[#allocation9 + $0x88] sm:$0xff] }
  0xda   : > { %v6157_v51 = vpack.c.bf16 %v902_v45, %v898_v44 }
  0xdb   : > { %6124 = vmatpush1.bf16.msra.mxu0 %v6123_v49  ;;  %587 = vrot.lane.b32.xlu1 %v7643_v46, %s7279_s1 }
  0xdc   : > { %6158 = vmatprep.subr.bf16.mxu1 %v6157_v51  ;;  %585 = vrot.lane.b32.xlu0 %v7646_v50, %s7279_s1 }
  0xdd   : > { %6160 = vmatpush1.bf16.msra.mxu1 %v6159_v53  ;;  %v918_v56 = vpop.permute.xlu1 %917  ;;  %v916_v57 = vpop.permute.xlu0 %915 }
  0xde   : > { %v932_v58 = vsel %vm616_vm2, %v914_v47, %v918_v56  ;;  %v931_v59 = vsel %vm616_vm2, %v912_v48, %v916_v57 }
  0xdf   : > { %v948_v60 = vmul.f32 %v940_v54, %v932_v58  ;;  %v944_v61 = vmul.f32 %v7656_v55, %v931_v59  ;;  %610 = vrot.lane.b32.xlu1 %v7618_v28, %s7280_s10  ;;  %v989_v54 = vld [vmem:[#allocation9 + $0xb0] sm:$0xff]  ;;  %v987_v59 = vld [vmem:[#allocation9 + $0xa0] sm:$0xff] }
  0xe0   : > { %608 = vrot.lane.b32.xlu0 %v7621_v29, %s7280_s10 }
  0xe1   : > { %v922_v62 = vpop.permute.xlu1 %921  ;;  %v920_v63 = vpop.permute.xlu0 %919  ;;  %v6125_v0 = vpack.c.bf16 %v948_v60, %v944_v61  ;;  %v990_v60 = vld [vmem:[#allocation9 + $0xb8] sm:$0xff]  ;;  %v7724_v61 = vld [vmem:[#allocation9 + $0x80] sm:$0xff] }
  0xe2   : > { %v930_v11 = vsel %vm616_vm2, %v918_v56, %v922_v62  ;;  %v929_v13 = vsel %vm616_vm2, %v916_v57, %v920_v63  ;;  %v7716_v57 = vld [vmem:[#allocation9 + $0x90] sm:$0xff] }
  0xe3   : > { %6126 = vmatprep.subr.bf16.mxu0 %v6125_v0  ;;  %614 = vrot.lane.b32.xlu1 %v7643_v46, %s7280_s10  ;;  %v949_v19 = vmul.f32 %v941_v9, %v930_v11  ;;  %v945_v20 = vmul.f32 %v7671_v12, %v929_v13 }
  0xe4   : > { %612 = vrot.lane.b32.xlu0 %v7646_v50, %s7280_s10 }
  0xe5   : > { %v926_v21 = vpop.permute.xlu1 %925  ;;  %v924_v22 = vpop.permute.xlu0 %923  ;;  %v6163_v40 = vpack.c.bf16 %v949_v19, %v945_v20 }
  0xe6   : > { %v928_v23 = vsel %vm616_vm2, %v922_v62, %v926_v21  ;;  %v934_v24 = vsel %vm616_vm2, %v926_v21, %v914_v47  ;;  %v927_v25 = vsel %vm616_vm2, %v920_v63, %v924_v22  ;;  %v933_v27 = vsel %vm616_vm2, %v924_v22, %v912_v48  ;;  %v7726_v62 = vld [vmem:[#allocation9 + $0x98] sm:$0xff] }
  0xe7   : > { %v947_v31 = vmul.f32 %v939_v15, %v934_v24  ;;  %v950_v33 = vmul.f32 %v942_v16, %v928_v23  ;;  %v943_v34 = vmul.f32 %v7679_v17, %v933_v27  ;;  %v946_v35 = vmul.f32 %v7681_v18, %v927_v25  ;;  %636 = vrot.lane.b32.xlu1 %v7618_v28, %s7281_s25 }
  0xe8   : > { %634 = vrot.lane.b32.xlu0 %v7621_v29, %s7281_s25 }
  0xe9   : > { %v962_v36 = vpop.permute.xlu1 %961  ;;  %v960_v37 = vpop.permute.xlu0 %959  ;;  %v6127_v38 = vpack.c.bf16 %v947_v31, %v943_v34  ;;  %v6161_v39 = vpack.c.bf16 %v950_v33, %v946_v35  ;;  %v1036_v34 = vld [vmem:[#allocation9 + $0xe8] sm:$0xff] }
  0xea   : > { %v7748_v35 = vld [vmem:[#allocation9 + $0xc8] sm:$0xff] }
  0xeb   : > { %6128 = vmatpush1.bf16.msra.mxu0 %v6127_v38  ;;  %6162 = vmatprep.subr.bf16.mxu1 %v6161_v39 }
  0xec   : > { %640 = vrot.lane.b32.xlu1 %v7643_v46, %s7281_s25  ;;  %638 = vrot.lane.b32.xlu0 %v7646_v50, %s7281_s25 }
  0xed   : > { %6164 = vmatpush1.bf16.msra.mxu1 %v6163_v40  ;;  %v966_v43 = vpop.permute.xlu1 %965  ;;  %v964_v44 = vpop.permute.xlu0 %963 }
  0xee   : > { %v980_v45 = vsel %vm642_vm3, %v962_v36, %v966_v43  ;;  %v979_v47 = vsel %vm642_vm3, %v960_v37, %v964_v44 }
  0xef   : > { %v996_v48 = vmul.f32 %v988_v41, %v980_v45  ;;  %v992_v49 = vmul.f32 %v7703_v42, %v979_v47 }
  0xf0   : > { %662 = vrot.lane.b32.xlu1 %v7618_v28, %s7282_s28  ;;  %660 = vrot.lane.b32.xlu0 %v7621_v29, %s7282_s28 }
  0xf1   : > { %v970_v51 = vpop.permute.xlu1 %969  ;;  %v968_v52 = vpop.permute.xlu0 %967  ;;  %v6129_v53 = vpack.c.bf16 %v996_v48, %v992_v49  ;;  %v1060_v49 = vld [vmem:[#allocation9 + $0x128] sm:$0xff] }
  0xf2   : > { %v978_v56 = vsel %vm642_vm3, %v966_v43, %v970_v51  ;;  %v977_v58 = vsel %vm642_vm3, %v964_v44, %v968_v52  ;;  %v1037_v43 = vld [vmem:[#allocation9 + $0xf0] sm:$0xff]  ;;  %v7759_v44 = vld [vmem:[#allocation9 + $0x108] sm:$0xff] }
  0xf3   : > { %6130 = vmatprep.subr.bf16.mxu0 %v6129_v53  ;;  %v997_v63 = vmul.f32 %v989_v54, %v978_v56  ;;  %v993_v0 = vmul.f32 %v7716_v57, %v977_v58  ;;  %v7765_v54 = vld [vmem:[#allocation9 + $0xd0] sm:$0xff]  ;;  %v7769_v58 = vld [vmem:[#allocation9 + $0x118] sm:$0xff] }
  0xf4   : > { %666 = vrot.lane.b32.xlu1 %v7643_v46, %s7282_s28  ;;  %664 = vrot.lane.b32.xlu0 %v7646_v50, %s7282_s28 }
  0xf5   : > { %v974_v9 = vpop.permute.xlu1 %973  ;;  %v972_v11 = vpop.permute.xlu0 %971  ;;  %v6167_v33 = vpack.c.bf16 %v997_v63, %v993_v0  ;;  %v1064_v63 = vmul.f32 %v7759_v44, %v7457_v1  ;;  %v1038_v0 = vld [vmem:[#allocation9 + $0xf8] sm:$0xff] }
  0xf6   : > { %v976_v13 = vsel %vm642_vm3, %v970_v51, %v974_v9  ;;  %v982_v15 = vsel %vm642_vm3, %v974_v9, %v962_v36  ;;  %v975_v16 = vsel %vm642_vm3, %v968_v52, %v972_v11  ;;  %v981_v19 = vsel %vm642_vm3, %v972_v11, %v960_v37  ;;  %v7761_v51 = vld [vmem:[#allocation9 + $0x100] sm:$0xff]  ;;  %v7779_v11 = vld [vmem:[#allocation9 + $0xd8] sm:$0xff] }
  0xf7   : > { %v995_v20 = vmul.f32 %v987_v59, %v982_v15  ;;  %v998_v21 = vmul.f32 %v990_v60, %v976_v13  ;;  %v991_v22 = vmul.f32 %v7724_v61, %v981_v19  ;;  %v994_v23 = vmul.f32 %v7726_v62, %v975_v16  ;;  %v1059_v52 = vld [vmem:[#allocation9 + $0x120] sm:$0xff]  ;;  %v1062_v59 = vld [vmem:[#allocation9 + $0x138] sm:$0xff] }
  0xf8   : > { %701 = vrot.lane.b32.xlu1 %v7618_v28, %s7283_s29  ;;  %699 = vrot.lane.b32.xlu0 %v7621_v29, %s7283_s29  ;;  %v1035_v60 = vld [vmem:[#allocation9 + $0xe0] sm:$0xff]  ;;  %v1068_v13 = vmul.f32 %v1060_v49, %v7465_v3  ;;  %v1063_v15 = vmul.f32 %v7761_v51, %v7459_v2  ;;  %v1067_v16 = vmul.f32 %v1059_v52, %v7467_v4 }
  0xf9   : > { %v1010_v24 = vpop.permute.xlu1 %1009  ;;  %v1008_v25 = vpop.permute.xlu0 %1007  ;;  %v6131_v27 = vpack.c.bf16 %v995_v20, %v991_v22  ;;  %v6165_v31 = vpack.c.bf16 %v998_v21, %v994_v23  ;;  %v7777_v9 = vld [vmem:[#allocation9 + $0xc0] sm:$0xff]  ;;  %v1066_v22 = vmul.f32 %v7769_v58, %v7483_v8  ;;  %v1070_v23 = vmul.f32 %v1062_v59, %v7481_v7  ;;  %v1108_v59 = vld [vmem:[#allocation9 + $0x168] sm:$0xff] }
  0xfa   : > { %v1107_v52 = vld [vmem:[#allocation9 + $0x160] sm:$0xff] }
  0xfb   : > { %6132 = vmatpush1.bf16.msra.mxu0 %v6131_v27  ;;  %6166 = vmatprep.subr.bf16.mxu1 %v6165_v31  ;;  %v7797_v31 = vld [vmem:[#allocation9 + $0x110] sm:$0xff] }
  0xfc   : > { %705 = vrot.lane.b32.xlu1 %v7643_v46, %s7283_s29  ;;  %703 = vrot.lane.b32.xlu0 %v7646_v50, %s7283_s29 }
  0xfd   : > { %6168 = vmatpush1.bf16.msra.mxu1 %v6167_v33  ;;  %v1014_v36 = vpop.permute.xlu1 %1013  ;;  %v1012_v37 = vpop.permute.xlu0 %1011  ;;  %v1061_v33 = vld [vmem:[#allocation9 + $0x130] sm:$0xff] }
  0xfe   : > { %v1028_v38 = vsel %vm668_vm4, %v1010_v24, %v1014_v36  ;;  %v1027_v39 = vsel %vm668_vm4, %v1008_v25, %v1012_v37 }
  0xff   : > { %v1044_v40 = vmul.f32 %v1036_v34, %v1028_v38  ;;  %v1040_v41 = vmul.f32 %v7748_v35, %v1027_v39 }
 0x100   : > { %727 = vrot.lane.b32.xlu1 %v7618_v28, %s7284_s20  ;;  %725 = vrot.lane.b32.xlu0 %v7621_v29, %s7284_s20 }
 0x101   : > { %v1018_v45 = vpop.permute.xlu1 %1017  ;;  %v1016_v47 = vpop.permute.xlu0 %1015  ;;  %v6133_v48 = vpack.c.bf16 %v1044_v40, %v1040_v41  ;;  %v1065_v40 = vmul.f32 %v7797_v31, %v7475_v6  ;;  %v1069_v41 = vmul.f32 %v1061_v33, %v7473_v5 }
 0x102   : > { %v1026_v53 = vsel %vm668_vm4, %v1014_v36, %v1018_v45  ;;  %v1025_v56 = vsel %vm668_vm4, %v1012_v37, %v1016_v47 }
 0x103   : > { %6134 = vmatprep.subr.bf16.mxu0 %v6133_v48  ;;  %v1045_v19 = vmul.f32 %v1037_v43, %v1026_v53  ;;  %v1041_v1 = vmul.f32 %v7765_v54, %v1025_v56  ;;  %v6173_v43 = vpack.c.bf16 %v1070_v23, %v1066_v22  ;;  %v6175_v6 = vpack.c.bf16 %v1069_v41, %v1065_v40  ;;  %v7815_v53 = vld [vmem:[#allocation9 + $0x140] sm:$0xff]  ;;  %v7837_v22 = vld [vmem:[#allocation9 + $0x158] sm:$0xff] }
 0x104   : > { %731 = vrot.lane.b32.xlu1 %v7643_v46, %s7284_s20  ;;  %729 = vrot.lane.b32.xlu0 %v7646_v50, %s7284_s20 }
 0x105   : > { %v1022_v20 = vpop.permute.xlu1 %1021  ;;  %v1020_v21 = vpop.permute.xlu0 %1019 }
 0x106   : > { %v1024_v27 = vsel %vm668_vm4, %v1018_v45, %v1022_v20  ;;  %v1030_v3 = vsel %vm668_vm4, %v1022_v20, %v1010_v24  ;;  %v1023_v2 = vsel %vm668_vm4, %v1016_v47, %v1020_v21  ;;  %v1029_v4 = vsel %vm668_vm4, %v1020_v21, %v1008_v25  ;;  %v1109_v20 = vld [vmem:[#allocation9 + $0x170] sm:$0xff] }
 0x107   : > { %v1043_v34 = vmul.f32 %v1035_v60, %v1030_v3  ;;  %v1046_v36 = vmul.f32 %v1038_v0, %v1024_v27  ;;  %v1039_v8 = vmul.f32 %v7777_v9, %v1029_v4  ;;  %v1042_v7 = vmul.f32 %v7779_v11, %v1023_v2  ;;  %v7823_v60 = vld [vmem:[#allocation9 + $0x148] sm:$0xff]  ;;  %v7835_v21 = vld [vmem:[#allocation9 + $0x150] sm:$0xff] }
 0x108   : > { %753 = vrot.lane.b32.xlu1 %v7618_v28, %s7285_s23  ;;  %751 = vrot.lane.b32.xlu0 %v7621_v29, %s7285_s23  ;;  %v6137_v24 = vpack.c.bf16 %v1068_v13, %v1064_v63  ;;  %v6171_v45 = vpack.c.bf16 %v1045_v19, %v1041_v1  ;;  %v6139_v47 = vpack.c.bf16 %v1067_v16, %v1063_v15 }
 0x109   : > { %v1082_v37 = vpop.permute.xlu1 %1081  ;;  %v1080_v38 = vpop.permute.xlu0 %1079  ;;  %v6135_v39 = vpack.c.bf16 %v1043_v34, %v1039_v8  ;;  %v6169_v25 = vpack.c.bf16 %v1046_v36, %v1042_v7 }
 0x10b   : > { %6136 = vmatpush1.bf16.msra.mxu0 %v6135_v39  ;;  %6170 = vmatprep.subr.bf16.mxu1 %v6169_v25 }
 0x10c   : > { %757 = vrot.lane.b32.xlu1 %v7643_v46, %s7285_s23  ;;  %755 = vrot.lane.b32.xlu0 %v7646_v50, %s7285_s23 }
 0x10d   : > { %6172 = vmatpush1.bf16.msra.mxu1 %v6171_v45  ;;  %v1086_v48 = vpop.permute.xlu1 %1085  ;;  %v1084_v49 = vpop.permute.xlu0 %1083  ;;  %6138 = vmatprep.subr.bf16.mxu0 %v6137_v24  ;;  %v7852_v45 = vld [vmem:[#allocation9 + $0x180] sm:$0xff] }
 0x10e   : > { %v1100_v5 = vsel %vm707_vm5, %v1082_v37, %v1086_v48  ;;  %v1099_v56 = vsel %vm707_vm5, %v1080_v38, %v1084_v49  ;;  %6174 = vmatprep.subr.bf16.mxu1 %v6173_v43  ;;  %v1155_v43 = vld [vmem:[#allocation9 + $0x1a0] sm:$0xff] }
 0x10f   : > { %6140 = vmatpush1.bf16.msra.mxu0 %v6139_v47  ;;  %v1115_v63 = vmul.f32 %v1107_v52, %v1100_v5  ;;  %v1111_v0 = vmul.f32 %v7815_v53, %v1099_v56 }
 0x110   : > { %779 = vrot.lane.b32.xlu1 %v7618_v28, %s7286_s16  ;;  %777 = vrot.lane.b32.xlu0 %v7621_v29, %s7286_s16  ;;  %v1110_v29 = vld [vmem:[#allocation9 + $0x178] sm:$0xff] }
 0x111   : > { %v1090_v13 = vpop.permute.xlu1 %1089  ;;  %v1088_v15 = vpop.permute.xlu0 %1087  ;;  %6176 = vmatpush1.bf16.msra.mxu1 %v6175_v6  ;;  %v6143_v2 = vpack.c.bf16 %v1115_v63, %v1111_v0 }
 0x112   : > { %v1098_v16 = vsel %vm707_vm5, %v1086_v48, %v1090_v13  ;;  %v1097_v19 = vsel %vm707_vm5, %v1084_v49, %v1088_v15  ;;  %v1156_v48 = vld [vmem:[#allocation9 + $0x1a8] sm:$0xff] }
 0x113   : > { %v1116_v1 = vmul.f32 %v1108_v59, %v1098_v16  ;;  %v1112_v28 = vmul.f32 %v7823_v60, %v1097_v19  ;;  %v7856_v49 = vld [vmem:[#allocation9 + $0x188] sm:$0xff]  ;;  %v1158_v16 = vld [vmem:[#allocation9 + $0x1b8] sm:$0xff]  ;;  %v7864_v19 = vld [vmem:[#allocation9 + $0x190] sm:$0xff] }
 0x114   : > { %783 = vrot.lane.b32.xlu1 %v7643_v46, %s7286_s16  ;;  %781 = vrot.lane.b32.xlu0 %v7646_v50, %s7286_s16 }
 0x115   : > { %v1094_v23 = vpop.permute.xlu1 %1093  ;;  %v1092_v27 = vpop.permute.xlu0 %1091  ;;  %v6141_v3 = vpack.c.bf16 %v1116_v1, %v1112_v28  ;;  %v7866_v1 = vld [vmem:[#allocation9 + $0x198] sm:$0xff] }
 0x116   : > { %v1096_v4 = vsel %vm707_vm5, %v1090_v13, %v1094_v23  ;;  %v1102_v33 = vsel %vm707_vm5, %v1094_v23, %v1082_v37  ;;  %v1095_v46 = vsel %vm707_vm5, %v1088_v15, %v1092_v27  ;;  %v1101_v50 = vsel %vm707_vm5, %v1092_v27, %v1080_v38  ;;  %v1157_v15 = vld [vmem:[#allocation9 + $0x1b0] sm:$0xff] }
 0x117   : > { %v1117_v34 = vmul.f32 %v1109_v20, %v1096_v4  ;;  %v1118_v36 = vmul.f32 %v1110_v29, %v1102_v33  ;;  %v1113_v8 = vmul.f32 %v7835_v21, %v1095_v46  ;;  %v1114_v7 = vmul.f32 %v7837_v22, %v1101_v50  ;;  %6142 = vmatprep.subr.bf16.mxu0 %v6141_v3 }
 0x118   : > { %6144 = vmatpush1.bf16.msra.mxu0 %v6143_v2 }
 0x119   : > { %v1130_v24 = vpop.permute.xlu1 %1129  ;;  %v1128_v39 = vpop.permute.xlu0 %1127  ;;  %v6177_v25 = vpack.c.bf16 %v1118_v36, %v1114_v7  ;;  %v6179_v40 = vpack.c.bf16 %v1117_v34, %v1113_v8  ;;  %v1845_v36 = vld [vmem:[%s10655_s4] sm:$0xff]  ;;  %v1846_v8 = vld [vmem:[%s10655_s4 + $0x8] sm:$0xff] }
 0x11b   : > { %6178 = vmatprep.subr.bf16.mxu1 %v6177_v25 }
 0x11c   : > { %6180 = vmatpush1.bf16.msra.mxu1 %v6179_v40  ;;  %v7287_v40 = vmov 0  }
 0x11d   : > { %v1134_v37 = vpop.permute.xlu1 %1133  ;;  %v1132_v41 = vpop.permute.xlu0 %1131  ;;  %6673 = vset.pattern.permute.xlu0 %v7287_v40  ;;  %6674 = vset.pattern.permute.xlu1 %v7287_v40 }
 0x11e   : > { %v1148_v38 = vsel %vm733_vm6, %v1130_v24, %v1134_v37  ;;  %v1147_v47 = vsel %vm733_vm6, %v1128_v39, %v1132_v41  ;;  %1855 = vperm.xlu0 %6673, %v1845_v36   ;;  %1860 = vperm.xlu1 %6674, %v1846_v8   ;;  %v1852_v8 = vld [vmem:[%s10655_s4 + $0x38] sm:$0xff] }
 0x11f   : > { %v1163_v6 = vmul.f32 %v1155_v43, %v1148_v38  ;;  %v1159_v52 = vmul.f32 %v7852_v45, %v1147_v47  ;;  %v1203_v47 = vld [vmem:[#allocation9 + $0x1e0] sm:$0xff] }
 0x121   : > { %v1138_v5 = vpop.permute.xlu1 %1137  ;;  %v1136_v56 = vpop.permute.xlu0 %1135  ;;  %v6147_v23 = vpack.c.bf16 %v1163_v6, %v1159_v52  ;;  %v7893_v6 = vld [vmem:[#allocation9 + $0x1c0] sm:$0xff] }
 0x122   : > { %v1146_v59 = vsel %vm733_vm6, %v1134_v37, %v1138_v5  ;;  %v1145_v63 = vsel %vm733_vm6, %v1132_v41, %v1136_v56  ;;  %v1847_v37 = vld [vmem:[%s10655_s4 + $0x10] sm:$0xff]  ;;  %v1848_v41 = vld [vmem:[%s10655_s4 + $0x18] sm:$0xff] }
 0x123   : > { %v1164_v0 = vmul.f32 %v1156_v48, %v1146_v59  ;;  %v1160_v13 = vmul.f32 %v7856_v49, %v1145_v63  ;;  %1865 = vperm.xlu1 %6674, %v1847_v37   ;;  %1870 = vperm.xlu0 %6673, %v1848_v41   ;;  %v1204_v59 = vld [vmem:[#allocation9 + $0x1e8] sm:$0xff] }
 0x124   : > { %v7903_v63 = vld [vmem:[#allocation9 + $0x1c8] sm:$0xff] }
 0x125   : > { %v1142_v28 = vpop.permute.xlu1 %1141  ;;  %v1140_v20 = vpop.permute.xlu0 %1139  ;;  %v6145_v29 = vpack.c.bf16 %v1164_v0, %v1160_v13 }
 0x126   : > { %v1144_v27 = vsel %vm733_vm6, %v1138_v5, %v1142_v28  ;;  %v1150_v3 = vsel %vm733_vm6, %v1142_v28, %v1130_v24  ;;  %v1143_v2 = vsel %vm733_vm6, %v1136_v56, %v1140_v20  ;;  %v1149_v4 = vsel %vm733_vm6, %v1140_v20, %v1128_v39  ;;  %v1849_v5 = vld [vmem:[%s10655_s4 + $0x20] sm:$0xff]  ;;  %v1850_v56 = vld [vmem:[%s10655_s4 + $0x28] sm:$0xff] }
 0x127   : > { %v1165_v33 = vmul.f32 %v1157_v15, %v1144_v27  ;;  %v1166_v46 = vmul.f32 %v1158_v16, %v1150_v3  ;;  %v1161_v50 = vmul.f32 %v7864_v19, %v1143_v2  ;;  %v1162_v34 = vmul.f32 %v7866_v1, %v1149_v4  ;;  %6146 = vmatprep.subr.bf16.mxu0 %v6145_v29  ;;  %v1205_v27 = vld [vmem:[#allocation9 + $0x1f0] sm:$0xff]  ;;  %v1206_v2 = vld [vmem:[#allocation9 + $0x1f8] sm:$0xff] }
 0x128   : > { %6148 = vmatpush1.bf16.msra.mxu0 %v6147_v23  ;;  %1875 = vperm.xlu1 %6674, %v1849_v5   ;;  %v1851_v3 = vld [vmem:[%s10655_s4 + $0x30] sm:$0xff] }
 0x129   : > { %v1178_v7 = vpop.permute.xlu1 %1177  ;;  %v1176_v24 = vpop.permute.xlu0 %1175  ;;  %v6181_v25 = vpack.c.bf16 %v1166_v46, %v1162_v34  ;;  %v6183_v39 = vpack.c.bf16 %v1165_v33, %v1161_v50  ;;  %1880 = vperm.xlu0 %6673, %v1850_v56   ;;  %v7914_v4 = vld [vmem:[#allocation9 + $0x1d0] sm:$0xff]  ;;  %v7916_v33 = vld [vmem:[#allocation9 + $0x1d8] sm:$0xff] }
 0x12b   : > { %6182 = vmatprep.subr.bf16.mxu1 %v6181_v25 }
 0x12c   : > { %6184 = vmatpush1.bf16.msra.mxu1 %v6183_v39  ;;  %1885 = vperm.xlu1 %6674, %v1851_v3   ;;  %v7954_v3 = vld [vmem:[#allocation9 + $0x208] sm:$0xff] }
 0x12d   : > { %v1182_v43 = vpop.permute.xlu1 %1181  ;;  %v1180_v38 = vpop.permute.xlu0 %1179  ;;  %1890 = vperm.xlu0 %6673, %v1852_v8  }
 0x12e   : > { %v1196_v48 = vsel %vm759_vm7, %v1178_v7, %v1182_v43  ;;  %v1195_v52 = vsel %vm759_vm7, %v1176_v24, %v1180_v38 }
 0x12f   : > { %v1211_v0 = vmul.f32 %v1203_v47, %v1196_v48  ;;  %v1207_v13 = vmul.f32 %v7893_v6, %v1195_v52  ;;  %v7931_v48 = vld [vmem:[#allocation5] sm:$0xff] }
 0x130   : > { %2661 = vrot.lane.b32.xlu1 %v7931_v48, %s7279_s1 }
 0x131   : > { %v1186_v15 = vpop.permute.xlu1 %1185  ;;  %v1184_v16 = vpop.permute.xlu0 %1183  ;;  %v6151_v36 = vpack.c.bf16 %v1211_v0, %v1207_v13 }
 0x132   : > { %v1194_v28 = vsel %vm759_vm7, %v1182_v43, %v1186_v15  ;;  %v1193_v20 = vsel %vm759_vm7, %v1180_v38, %v1184_v16 }
 0x133   : > { %v1212_v29 = vmul.f32 %v1204_v59, %v1194_v28  ;;  %v1208_v23 = vmul.f32 %v7903_v63, %v1193_v20  ;;  %v7933_v59 = vld [vmem:[#allocation5 + $0x20] sm:$0xff] }
 0x134   : > { %2663 = vrot.lane.b32.xlu0 %v7933_v59, %s7279_s1  ;;  %v7946_v20 = vld [vmem:[#allocation9 + $0x200] sm:$0xff] }
 0x135   : > { %v1190_v46 = vpop.permute.xlu1 %1189  ;;  %v1188_v50 = vpop.permute.xlu0 %1187  ;;  %v6149_v34 = vpack.c.bf16 %v1212_v29, %v1208_v23  ;;  %v7952_v23 = vld [vmem:[#allocation5 + $0x10] sm:$0xff] }
 0x136   : > { %v1192_v25 = vsel %vm759_vm7, %v1186_v15, %v1190_v46  ;;  %v1198_v39 = vsel %vm759_vm7, %v1190_v46, %v1178_v7  ;;  %v1191_v40 = vsel %vm759_vm7, %v1184_v16, %v1188_v50  ;;  %v1197_v37 = vsel %vm759_vm7, %v1188_v50, %v1176_v24  ;;  %v7938_v24 = vld [vmem:[#allocation5 + $0x8] sm:$0xff]  ;;  %v1251_v16 = vld [vmem:[#allocation9 + $0x220] sm:$0xff] }
 0x137   : > { %v1213_v41 = vmul.f32 %v1205_v27, %v1192_v25  ;;  %v1214_v43 = vmul.f32 %v1206_v2, %v1198_v39  ;;  %v1209_v38 = vmul.f32 %v7914_v4, %v1191_v40  ;;  %v1210_v47 = vmul.f32 %v7916_v33, %v1197_v37  ;;  %6150 = vmatprep.subr.bf16.mxu0 %v6149_v34  ;;  %v7942_v15 = vld [vmem:[#allocation5 + $0x28] sm:$0xff]  ;;  %v1253_v37 = vld [vmem:[#allocation9 + $0x230] sm:$0xff] }
 0x138   : > { %6152 = vmatpush1.bf16.msra.mxu0 %v6151_v36  ;;  %2665 = vrot.lane.b32.xlu1 %v7938_v24, %s7279_s1  ;;  %v1252_v27 = vld [vmem:[#allocation9 + $0x228] sm:$0xff]  ;;  %v7959_v36 = vld [vmem:[#allocation5 + $0x30] sm:$0xff] }
 0x139   : > { %v1226_v52 = vpop.permute.xlu1 %1225  ;;  %v1224_v7 = vpop.permute.xlu0 %1223  ;;  %v6185_v5 = vpack.c.bf16 %v1214_v43, %v1210_v47  ;;  %v6187_v56 = vpack.c.bf16 %v1213_v41, %v1209_v38  ;;  %2667 = vrot.lane.b32.xlu0 %v7942_v15, %s7279_s1  ;;  %v7968_v41 = vld [vmem:[#allocation5 + $0x18] sm:$0xff]  ;;  %v7970_v38 = vld [vmem:[#allocation9 + $0x210] sm:$0xff] }
 0x13a   : > { %v1254_v43 = vld [vmem:[#allocation9 + $0x238] sm:$0xff] }
 0x13b   : > { %6186 = vmatprep.subr.bf16.mxu1 %v6185_v5  ;;  %v7972_v47 = vld [vmem:[#allocation9 + $0x218] sm:$0xff] }
 0x13c   : > { %6188 = vmatpush1.bf16.msra.mxu1 %v6187_v56  ;;  %2669 = vrot.lane.b32.xlu1 %v7952_v23, %s7279_s1 }
 0x13d   : > { %v1230_v0 = vpop.permute.xlu1 %1229  ;;  %v1228_v13 = vpop.permute.xlu0 %1227  ;;  %2671 = vrot.lane.b32.xlu0 %v7959_v36, %s7279_s1 }
 0x13e   : > { %v1244_v28 = vsel %vm785_vm8, %v1226_v52, %v1230_v0  ;;  %v1243_v29 = vsel %vm785_vm8, %v1224_v7, %v1228_v13 }
 0x13f   : > { %v1259_v2 = vmul.f32 %v1251_v16, %v1244_v28  ;;  %v1255_v46 = vmul.f32 %v7946_v20, %v1243_v29  ;;  %v7976_v16 = vld [vmem:[#allocation5 + $0x38] sm:$0xff] }
 0x140   : > { %2673 = vrot.lane.b32.xlu1 %v7968_v41, %s7279_s1 }
 0x141   : > { %v1234_v50 = vpop.permute.xlu1 %1233  ;;  %v1232_v34 = vpop.permute.xlu0 %1231  ;;  %2675 = vrot.lane.b32.xlu0 %v7976_v16, %s7279_s1 }
 0x142   : > { %v1242_v8 = vsel %vm785_vm8, %v1230_v0, %v1234_v50  ;;  %v1241_v25 = vsel %vm785_vm8, %v1228_v13, %v1232_v34  ;;  %v6155_v13 = vpack.c.bf16 %v1259_v2, %v1255_v46 }
 0x143   : > { %v1260_v39 = vmul.f32 %v1252_v27, %v1242_v8  ;;  %v1256_v40 = vmul.f32 %v7954_v3, %v1241_v25 }
 0x144   : > { %2709 = vrot.lane.b32.xlu1 %v7931_v48, %s7280_s10 }
 0x145   : > { %v1238_v5 = vpop.permute.xlu1 %1237  ;;  %v1236_v56 = vpop.permute.xlu0 %1235  ;;  %v6153_v0 = vpack.c.bf16 %v1260_v39, %v1256_v40  ;;  %2711 = vrot.lane.b32.xlu0 %v7933_v59, %s7280_s10 }
 0x146   : > { %v1240_v28 = vsel %vm785_vm8, %v1234_v50, %v1238_v5  ;;  %v1246_v29 = vsel %vm785_vm8, %v1238_v5, %v1226_v52  ;;  %v1239_v27 = vsel %vm785_vm8, %v1232_v34, %v1236_v56  ;;  %v1245_v8 = vsel %vm785_vm8, %v1236_v56, %v1224_v7  ;;  %v839_v52 = vld [vmem:[%s10654_s3] sm:$0xff]  ;;  %v844_v56 = vld [vmem:[%s10654_s3 + $0x28] sm:$0xff] }
 0x147   : > { %v1261_v25 = vmul.f32 %v1253_v37, %v1240_v28  ;;  %v1262_v39 = vmul.f32 %v1254_v43, %v1246_v29  ;;  %v1257_v2 = vmul.f32 %v7970_v38, %v1239_v27  ;;  %v1258_v46 = vmul.f32 %v7972_v47, %v1245_v8  ;;  %6154 = vmatprep.subr.bf16.mxu0 %v6153_v0  ;;  %v842_v37 = vld [vmem:[%s10654_s3 + $0x18] sm:$0xff]  ;;  %v841_v43 = vld [vmem:[%s10654_s3 + $0x10] sm:$0xff] }
 0x148   : > { %6156 = vmatpush1.bf16.msra.mxu0 %v6155_v13  ;;  %2713 = vrot.lane.b32.xlu1 %v7938_v24, %s7280_s10  ;;  %v843_v13 = vld [vmem:[%s10654_s3 + $0x20] sm:$0xff]  ;;  %v846_v27 = vld [vmem:[%s10654_s3 + $0x38] sm:$0xff] }
 0x149   : > { %v584_v50 = vpop.permute.xlu1 %583  ;;  %v582_v7 = vpop.permute.xlu0 %581  ;;  %v6189_v34 = vpack.c.bf16 %v1262_v39, %v1258_v46  ;;  %v6191_v40 = vpack.c.bf16 %v1261_v25, %v1257_v2  ;;  %2715 = vrot.lane.b32.xlu0 %v7942_v15, %s7280_s10 }
 0x14a   : > { %v594_v28 = vsel %vm591_vm0, %v582_v7, %v584_v50 }
 0x14b   : > { %6190 = vmatprep.subr.bf16.mxu1 %v6189_v34  ;;  %1433 = vmatmul.mubr.f32.vlgmr.msra.gmra.mrb[0].mxu0 %v839_v52  ;;  %v601_v46 = vmul.f32 %v7598_v14, %v594_v28 }
 0x14c   : > { %6192 = vmatpush1.bf16.msra.mxu1 %v6191_v40  ;;  %5950 = vmatprep.mubr.msk.f32.mxu0 %vm1343_vm1, %v842_v37 }
 0x14d   : > { %v588_v5 = vpop.permute.xlu1 %587  ;;  %2717 = vrot.lane.b32.xlu1 %v7952_v23, %s7280_s10  ;;  %2719 = vrot.lane.b32.xlu0 %v7959_v36, %s7280_s10 }
 0x14e   : > { %v586_v0 = vpop.permute.xlu0 %585  ;;  %v595_v25 = vsel %vm591_vm0, %v588_v5, %v582_v7  ;;  %v845_v7 = vld [vmem:[%s10654_s3 + $0x30] sm:$0xff] }
 0x14f   : > { %1546 = vmatmul.mubr.f32.vlgmr.msra.gmra.mrb[0].mxu1 %v839_v52  ;;  %1439 = vmatmul.mubr.f32.gmra.mrb[2].mxu0 %v841_v43  ;;  %v593_v39 = vsel %vm591_vm0, %v584_v50, %v586_v0  ;;  %v592_v50 = vsel %vm591_vm0, %v586_v0, %v588_v5  ;;  %v600_v40 = vmul.f32 %v7623_v30, %v595_v25 }
 0x150   : > { %5958 = vmatprep.mubr.msk.f32.mxu1 %vm1343_vm1, %v842_v37  ;;  %5951 = vmatprep.mubr.msk.f32.mxu0 %vm1343_vm1, %v844_v56  ;;  %v602_v14 = vmul.f32 %v7611_v26, %v593_v39  ;;  %v603_v30 = vmul.f32 %v7625_v32, %v592_v50  ;;  %v847_v32 = vld [vmem:[%s10654_s3 + $0x40] sm:$0xff] }
 0x151   : > { %v611_v29 = vpop.permute.xlu1 %610  ;;  %2721 = vrot.lane.b32.xlu1 %v7968_v41, %s7280_s10  ;;  %2723 = vrot.lane.b32.xlu0 %v7976_v16, %s7280_s10 }
 0x152   : > { %v609_v8 = vpop.permute.xlu0 %608 }
 0x153   : > { %v619_v2 = vsel %vm616_vm2, %v609_v8, %v611_v29  ;;  %1552 = vmatmul.mubr.f32.gmra.mrb[2].mxu1 %v841_v43  ;;  %1445 = vmatmul.mubr.f32.gmra.mrb[4].mxu0 %v843_v13 }
 0x154   : > { %v627_v52 = vmul.f32 %v7656_v55, %v619_v2  ;;  %5959 = vmatprep.mubr.msk.f32.mxu1 %vm1343_vm1, %v844_v56  ;;  %5952 = vmatprep.mubr.msk.f32.mxu0 %vm1343_vm1, %v846_v27  ;;  %v848_v56 = vld [vmem:[%s10654_s3 + $0x48] sm:$0xff]  ;;  %v849_v2 = vld [vmem:[%s10654_s3 + $0x50] sm:$0xff] }
 0x155   : > { %v615_v34 = vpop.permute.xlu1 %614  ;;  %2757 = vrot.lane.b32.xlu1 %v7931_v48, %s7281_s25  ;;  %2759 = vrot.lane.b32.xlu0 %v7933_v59, %s7281_s25 }
 0x156   : > { %v620_v55 = vsel %vm616_vm2, %v615_v34, %v609_v8  ;;  %v613_v37 = vpop.permute.xlu0 %612  ;;  %v6193_v43 = vpack.c.bf16 %v627_v52, %v601_v46  ;;  %v852_v46 = vld [vmem:[%s10654_s3 + $0x68] sm:$0xff] }
 0x157   : > { %v626_v5 = vmul.f32 %v7679_v17, %v620_v55  ;;  %v617_v0 = vsel %vm616_vm2, %v613_v37, %v615_v34  ;;  %v618_v26 = vsel %vm616_vm2, %v611_v29, %v613_v37  ;;  %1558 = vmatmul.mubr.f32.gmra.mrb[4].mxu1 %v843_v13  ;;  %1451 = vmatmul.mubr.f32.gmra.mrb[6].mxu0 %v845_v7 }
 0x158   : > { %v628_v28 = vmul.f32 %v7671_v12, %v618_v26  ;;  %v629_v8 = vmul.f32 %v7681_v18, %v617_v0  ;;  %6194 = vmatprep.subr.bf16.mxu0 %v6193_v43  ;;  %5960 = vmatprep.mubr.msk.f32.mxu1 %vm1343_vm1, %v846_v27  ;;  %v850_v12 = vld [vmem:[%s10654_s3 + $0x58] sm:$0xff] }
 0x159   : > { %v6195_v25 = vpack.c.bf16 %v626_v5, %v600_v40  ;;  %v637_v39 = vpop.permute.xlu1 %636  ;;  %5953 = vmatprep.mubr.msk.f32.mxu0 %vm1343_vm1, %v848_v56  ;;  %2761 = vrot.lane.b32.xlu1 %v7938_v24, %s7281_s25  ;;  %v851_v40 = vld [vmem:[%s10654_s3 + $0x60] sm:$0xff]  ;;  %v854_v43 = vld [vmem:[%s10654_s3 + $0x78] sm:$0xff] }
 0x15a   : > { %v6211_v17 = vpack.c.bf16 %v628_v28, %v602_v14  ;;  %v635_v29 = vpop.permute.xlu0 %634  ;;  %v6209_v13 = vpack.c.bf16 %v629_v8, %v603_v30  ;;  %2763 = vrot.lane.b32.xlu0 %v7942_v15, %s7281_s25 }
 0x15b   : > { %6196 = vmatpush1.bf16.msra.mxu0 %v6195_v25  ;;  %1564 = vmatmul.mubr.f32.gmra.mrb[6].mxu1 %v845_v7  ;;  %v645_v52 = vsel %vm642_vm3, %v635_v29, %v637_v39 }
 0x15c   : > { %6210 = vmatprep.subr.bf16.mxu1 %v6209_v13  ;;  %5961 = vmatprep.mubr.msk.f32.mxu1 %vm1343_vm1, %v848_v56  ;;  %v653_v56 = vmul.f32 %v7703_v42, %v645_v52  ;;  %v853_v42 = vld [vmem:[%s10654_s3 + $0x70] sm:$0xff] }
 0x15d   : > { %6212 = vmatpush1.bf16.msra.mxu1 %v6211_v17  ;;  %1457 = vmatmul.mubr.f32.gmra.mrb[8].mxu0 %v847_v32 }
 0x15e   : > { %v641_v18 = vpop.permute.xlu1 %640  ;;  %v639_v27 = vpop.permute.xlu0 %638  ;;  %5954 = vmatprep.mubr.msk.f32.mxu0 %vm1343_vm1, %v850_v12  ;;  %2765 = vrot.lane.b32.xlu1 %v7952_v23, %s7281_s25 }
 0x15f   : > { %1570 = vmatmul.mubr.f32.gmra.mrb[8].mxu1 %v847_v32  ;;  %v646_v7 = vsel %vm642_vm3, %v641_v18, %v635_v29  ;;  %v643_v14 = vsel %vm642_vm3, %v639_v27, %v641_v18  ;;  %v644_v55 = vsel %vm642_vm3, %v637_v39, %v639_v27  ;;  %2767 = vrot.lane.b32.xlu0 %v7959_v36, %s7281_s25  ;;  %v7288_v27 = vmov 0.0  }
 0x160   : > { %5962 = vmatprep.mubr.msk.f32.mxu1 %vm1343_vm1, %v850_v12  ;;  %v652_v0 = vmul.f32 %v7724_v61, %v646_v7  ;;  %v654_v26 = vmul.f32 %v7716_v57, %v644_v55  ;;  %v655_v30 = vmul.f32 %v7726_v62, %v643_v14 }
 0x161   : > { %1463 = vmatmul.mubr.f32.gmra.mrb[10].mxu0 %v849_v2 }
 0x162   : > { %v663_v50 = vpop.permute.xlu1 %662  ;;  %v661_v34 = vpop.permute.xlu0 %660  ;;  %5955 = vmatprep.mubr.msk.f32.mxu0 %vm1343_vm1, %v852_v46  ;;  %2769 = vrot.lane.b32.xlu1 %v7968_v41, %s7281_s25 }
 0x163   : > { %v671_v37 = vsel %vm668_vm4, %v661_v34, %v663_v50  ;;  %1576 = vmatmul.mubr.f32.gmra.mrb[10].mxu1 %v849_v2  ;;  %2771 = vrot.lane.b32.xlu0 %v7976_v16, %s7281_s25 }
 0x164   : > { %v679_v5 = vmul.f32 %v7748_v35, %v671_v37  ;;  %5963 = vmatprep.mubr.msk.f32.mxu1 %vm1343_vm1, %v852_v46  ;;  %v7060_v46 = vld [vmem:[%s7439_s17 + $0x10] sm:$0xff] }
 0x165   : > { %1469 = vmatmul.mubr.f32.gmra.mrb[12].mxu0 %v851_v40  ;;  %v693_v52 = vmul.f32 %v7060_v46, %v7797_v31 }
 0x166   : > { %v667_v28 = vpop.permute.xlu1 %666  ;;  %v665_v8 = vpop.permute.xlu0 %664  ;;  %v6197_v25 = vpack.c.bf16 %v679_v5, %v653_v56  ;;  %5956 = vmatprep.mubr.msk.f32.mxu0 %vm1343_vm1, %v854_v43  ;;  %2805 = vrot.lane.b32.xlu1 %v7931_v48, %s7282_s28 }
 0x167   : > { %v672_v61 = vsel %vm668_vm4, %v667_v28, %v661_v34  ;;  %v669_v57 = vsel %vm668_vm4, %v665_v8, %v667_v28  ;;  %v670_v62 = vsel %vm668_vm4, %v663_v50, %v665_v8  ;;  %1582 = vmatmul.mubr.f32.gmra.mrb[12].mxu1 %v851_v40  ;;  %v7061_v50 = vld [vmem:[%s7439_s17 + $0x8] sm:$0xff]  ;;  %v7062_v40 = vld [vmem:[%s7439_s17 + $0x18] sm:$0xff]  ;;  %2807 = vrot.lane.b32.xlu0 %v7933_v59, %s7282_s28 }
 0x168   : > { %v678_v35 = vmul.f32 %v7777_v9, %v672_v61  ;;  %v680_v39 = vmul.f32 %v7765_v54, %v670_v62  ;;  %v681_v17 = vmul.f32 %v7779_v11, %v669_v57  ;;  %6198 = vmatprep.subr.bf16.mxu0 %v6197_v25  ;;  %5964 = vmatprep.mubr.msk.f32.mxu1 %vm1343_vm1, %v854_v43  ;;  %v7059_v9 = vld [vmem:[%s7439_s17] sm:$0xff] }
 0x169   : > { %1475 = vmatmul.mubr.f32.gmra.mrb[14].mxu0 %v853_v42  ;;  %v691_v11 = vmul.f32 %v7059_v9, %v7761_v51  ;;  %v692_v34 = vmul.f32 %v7061_v50, %v7759_v44  ;;  %v694_v14 = vmul.f32 %v7062_v40, %v7769_v58 }
 0x16a   : > { %v6199_v29 = vpack.c.bf16 %v678_v35, %v652_v0  ;;  %v6215_v13 = vpack.c.bf16 %v680_v39, %v654_v26  ;;  %v702_v32 = vpop.permute.xlu1 %701  ;;  %v700_v12 = vpop.permute.xlu0 %699  ;;  %v6213_v18 = vpack.c.bf16 %v681_v17, %v655_v30  ;;  %1683 = vmatprep.mubr.f32.mxu0 %v7288_v27  ;;  %2809 = vrot.lane.b32.xlu1 %v7938_v24, %s7282_s28 }
 0x16b   : > { %1588 = vmatmul.mubr.f32.gmra.mrb[14].mxu1 %v853_v42  ;;  %v710_v54 = vsel %vm707_vm5, %v700_v12, %v702_v32  ;;  %2811 = vrot.lane.b32.xlu0 %v7942_v15, %s7282_s28 }
 0x16c   : > { %6200 = vmatpush1.bf16.msra.mxu0 %v6199_v29  ;;  %6214 = vmatprep.subr.bf16.mxu1 %v6213_v18  ;;  %v717_v55 = vmul.f32 %v7815_v53, %v710_v54 }
 0x16d   : > { %6216 = vmatpush1.bf16.msra.mxu1 %v6215_v13  ;;  %1796 = vmatprep.mubr.f32.mxu1 %v7288_v27 }
 0x16e   : > { %v706_v2 = vpop.permute.xlu1 %705  ;;  %v704_v7 = vpop.permute.xlu0 %703  ;;  %v6203_v30 = vpack.c.bf16 %v717_v55, %v691_v11  ;;  %2813 = vrot.lane.b32.xlu1 %v7952_v23, %s7282_s28 }
 0x16f   : > { %v711_v37 = vsel %vm707_vm5, %v706_v2, %v700_v12  ;;  %v708_v51 = vsel %vm707_vm5, %v704_v7, %v706_v2  ;;  %v709_v31 = vsel %vm707_vm5, %v702_v32, %v704_v7  ;;  %2815 = vrot.lane.b32.xlu0 %v7959_v36, %s7282_s28 }
 0x170   : > { %v720_v44 = vmul.f32 %v7837_v22, %v711_v37  ;;  %v718_v58 = vmul.f32 %v7823_v60, %v709_v31  ;;  %v719_v43 = vmul.f32 %v7835_v21, %v708_v51  ;;  %v573_v37 = vld [vmem:[%s10653_s2] sm:$0xff]  ;;  %v578_v51 = vld [vmem:[%s10653_s2 + $0x28] sm:$0xff]  ;;  %v579_v31 = vld [vmem:[%s10653_s2 + $0x30] sm:$0xff] }
 0x172   : > { %v6219_v56 = vpack.c.bf16 %v719_v43, %v693_v52  ;;  %v728_v53 = vpop.permute.xlu1 %727  ;;  %v726_v5 = vpop.permute.xlu0 %725  ;;  %v6201_v0 = vpack.c.bf16 %v718_v58, %v692_v34  ;;  %v6217_v26 = vpack.c.bf16 %v720_v44, %v694_v14  ;;  %2817 = vrot.lane.b32.xlu1 %v7968_v41, %s7282_s28  ;;  %v580_v44 = vld [vmem:[%s10653_s2 + $0x38] sm:$0xff] }
 0x173   : > { %2819 = vrot.lane.b32.xlu0 %v7976_v16, %s7282_s28  ;;  %v736_v57 = vsel %vm733_vm6, %v726_v5, %v728_v53 }
 0x174   : > { %6202 = vmatprep.subr.bf16.mxu0 %v6201_v0  ;;  %6218 = vmatprep.subr.bf16.mxu1 %v6217_v26  ;;  %v743_v54 = vmul.f32 %v7852_v45, %v736_v57  ;;  %v2686_v0 = vld [vmem:[#allocation9 + $0x8] sm:$0xff] }
 0x175   : > { %6204 = vmatpush1.bf16.msra.mxu0 %v6203_v30  ;;  %6220 = vmatpush1.bf16.msra.mxu1 %v6219_v56  ;;  %v2690_v30 = vld [vmem:[#allocation9 + $0x28] sm:$0xff] }
 0x176   : > { %v732_v22 = vpop.permute.xlu1 %731  ;;  %v730_v60 = vpop.permute.xlu0 %729  ;;  %2877 = vrot.lane.b32.xlu1 %v7931_v48, %s7283_s29 }
 0x177   : > { %v737_v8 = vsel %vm733_vm6, %v732_v22, %v726_v5  ;;  %v735_v25 = vsel %vm733_vm6, %v728_v53, %v730_v60  ;;  %v734_v61 = vsel %vm733_vm6, %v730_v60, %v732_v22  ;;  %2879 = vrot.lane.b32.xlu0 %v7933_v59, %s7283_s29 }
 0x178   : > { %v746_v62 = vmul.f32 %v7866_v1, %v737_v8  ;;  %v744_v35 = vmul.f32 %v7856_v49, %v735_v25  ;;  %v745_v49 = vmul.f32 %v7864_v19, %v734_v61  ;;  %v2685_v25 = vld [vmem:[#allocation9] sm:$0xff] }
 0x179   : > { %v2689_v61 = vld [vmem:[#allocation9 + $0x20] sm:$0xff] }
 0x17a   : > { %v754_v21 = vpop.permute.xlu1 %753  ;;  %v752_v28 = vpop.permute.xlu0 %751  ;;  %2881 = vrot.lane.b32.xlu1 %v7938_v24, %s7283_s29 }
 0x17b   : > { %v762_v42 = vsel %vm759_vm7, %v752_v28, %v754_v21  ;;  %2883 = vrot.lane.b32.xlu0 %v7942_v15, %s7283_s29 }
 0x17c   : > { %v769_v29 = vmul.f32 %v7893_v6, %v762_v42 }
 0x17e   : > { %v758_v39 = vpop.permute.xlu1 %757  ;;  %v756_v17 = vpop.permute.xlu0 %755  ;;  %v6207_v7 = vpack.c.bf16 %v769_v29, %v743_v54  ;;  %2885 = vrot.lane.b32.xlu1 %v7952_v23, %s7283_s29  ;;  %v2691_v54 = vld [vmem:[#allocation9 + $0x30] sm:$0xff] }
 0x17f   : > { %v763_v13 = vsel %vm759_vm7, %v758_v39, %v752_v28  ;;  %v760_v32 = vsel %vm759_vm7, %v756_v17, %v758_v39  ;;  %v761_v12 = vsel %vm759_vm7, %v754_v21, %v756_v17  ;;  %2887 = vrot.lane.b32.xlu0 %v7959_v36, %s7283_s29  ;;  %v2688_v17 = vld [vmem:[#allocation9 + $0x18] sm:$0xff] }
 0x180   : > { %v772_v1 = vmul.f32 %v7916_v33, %v763_v13  ;;  %v770_v18 = vmul.f32 %v7903_v63, %v761_v12  ;;  %v771_v6 = vmul.f32 %v7914_v4, %v760_v32  ;;  %v2692_v13 = vld [vmem:[#allocation9 + $0x38] sm:$0xff] }
 0x182   : > { %v6223_v9 = vpack.c.bf16 %v771_v6, %v745_v49  ;;  %v780_v11 = vpop.permute.xlu1 %779  ;;  %v778_v2 = vpop.permute.xlu0 %777  ;;  %v6205_v46 = vpack.c.bf16 %v770_v18, %v744_v35  ;;  %v6221_v52 = vpack.c.bf16 %v772_v1, %v746_v62  ;;  %2889 = vrot.lane.b32.xlu1 %v7968_v41, %s7283_s29  ;;  %v2687_v18 = vld [vmem:[#allocation9 + $0x10] sm:$0xff] }
 0x183   : > { %v788_v19 = vsel %vm785_vm8, %v778_v2, %v780_v11  ;;  %2891 = vrot.lane.b32.xlu0 %v7976_v16, %s7283_s29 }
 0x184   : > { %6206 = vmatprep.subr.bf16.mxu0 %v6205_v46  ;;  %6222 = vmatprep.subr.bf16.mxu1 %v6221_v52  ;;  %v795_v55 = vmul.f32 %v7946_v20, %v788_v19  ;;  %v574_v20 = vld [vmem:[%s10653_s2 + $0x8] sm:$0xff] }
 0x185   : > { %6208 = vmatpush1.bf16.msra.mxu0 %v6207_v7  ;;  %6224 = vmatpush1.bf16.msra.mxu1 %v6223_v9 }
 0x186   : > { %v784_v45 = vpop.permute.xlu1 %783  ;;  %v782_v63 = vpop.permute.xlu0 %781  ;;  %2925 = vrot.lane.b32.xlu1 %v7931_v48, %s7284_s20 }
 0x187   : > { %v789_v4 = vsel %vm785_vm8, %v784_v45, %v778_v2  ;;  %v786_v33 = vsel %vm785_vm8, %v782_v63, %v784_v45  ;;  %v787_v50 = vsel %vm785_vm8, %v780_v11, %v782_v63  ;;  %2927 = vrot.lane.b32.xlu0 %v7933_v59, %s7284_s20 }
 0x188   : > { %v797_v34 = vmul.f32 %v7970_v38, %v786_v33  ;;  %v796_v40 = vmul.f32 %v7954_v3, %v787_v50  ;;  %v798_v14 = vmul.f32 %v7972_v47, %v789_v4  ;;  %v575_v3 = vld [vmem:[%s10653_s2 + $0x10] sm:$0xff]  ;;  %v576_v38 = vld [vmem:[%s10653_s2 + $0x18] sm:$0xff]  ;;  %v577_v47 = vld [vmem:[%s10653_s2 + $0x20] sm:$0xff] }
 0x189   : > { %v2734_v50 = vld [vmem:[#allocation9 + $0x48] sm:$0xff] }
 0x18a   : > { %1635 = vmatprep.subr.mxu0 %v796_v40  ;;  %1748 = vmatprep.subr.mxu1 %v798_v14  ;;  %v2738_v40 = vld [vmem:[#allocation9 + $0x68] sm:$0xff] }
 0x18b   : > { %1636 = vmatpush1.msra.mxu0 %v795_v55  ;;  %1749 = vmatpush1.msra.mxu1 %v797_v34  ;;  %v2735_v55 = vld [vmem:[#allocation9 + $0x50] sm:$0xff] }
 0x18c   : > { %5965 = vmatmul.mubr.msk.f32.vlgmr.msra.gmra.mrb[0].mxu0 %vm1594_vm9, %v573_v37  ;;  %5973 = vmatmul.mubr.msk.f32.vlgmr.msra.gmra.mrb[0].mxu1 %vm1594_vm9, %v573_v37 }
 0x18d   : > { %1689 = vmatprep.mubr.f32.mxu0 %v7288_v27  ;;  %1802 = vmatprep.mubr.f32.mxu1 %v7288_v27 }
 0x18e   : > { %2929 = vrot.lane.b32.xlu1 %v7938_v24, %s7284_s20  ;;  %2931 = vrot.lane.b32.xlu0 %v7942_v15, %s7284_s20 }
 0x190   : > { %5966 = vmatmul.mubr.msk.f32.gmra.mrb[2].mxu0 %vm1594_vm9, %v574_v20  ;;  %5974 = vmatmul.mubr.msk.f32.gmra.mrb[2].mxu1 %vm1594_vm9, %v574_v20 }
 0x191   : > { %1695 = vmatprep.mubr.f32.mxu0 %v7288_v27  ;;  %1808 = vmatprep.mubr.f32.mxu1 %v7288_v27 }
 0x192   : > { %2933 = vrot.lane.b32.xlu1 %v7952_v23, %s7284_s20  ;;  %2935 = vrot.lane.b32.xlu0 %v7959_v36, %s7284_s20 }
 0x194   : > { %5967 = vmatmul.mubr.msk.f32.gmra.mrb[4].mxu0 %vm1594_vm9, %v575_v3  ;;  %5975 = vmatmul.mubr.msk.f32.gmra.mrb[4].mxu1 %vm1594_vm9, %v575_v3 }
 0x195   : > { %1701 = vmatprep.mubr.f32.mxu0 %v7288_v27  ;;  %1814 = vmatprep.mubr.f32.mxu1 %v7288_v27 }
 0x196   : > { %2937 = vrot.lane.b32.xlu1 %v7968_v41, %s7284_s20  ;;  %2939 = vrot.lane.b32.xlu0 %v7976_v16, %s7284_s20 }
 0x198   : > { %5968 = vmatmul.mubr.msk.f32.gmra.mrb[6].mxu0 %vm1594_vm9, %v576_v38  ;;  %5976 = vmatmul.mubr.msk.f32.gmra.mrb[6].mxu1 %vm1594_vm9, %v576_v38 }
 0x199   : > { %1707 = vmatprep.mubr.f32.mxu0 %v7288_v27  ;;  %1820 = vmatprep.mubr.f32.mxu1 %v7288_v27 }
 0x19a   : > { %2973 = vrot.lane.b32.xlu1 %v7931_v48, %s7285_s23  ;;  %2975 = vrot.lane.b32.xlu0 %v7933_v59, %s7285_s23 }
 0x19c   : > { %5969 = vmatmul.mubr.msk.f32.gmra.mrb[8].mxu0 %vm1594_vm9, %v577_v47  ;;  %5977 = vmatmul.mubr.msk.f32.gmra.mrb[8].mxu1 %vm1594_vm9, %v577_v47  ;;  %v2739_v47 = vld [vmem:[#allocation9 + $0x70] sm:$0xff] }
 0x19d   : > { %1713 = vmatprep.mubr.f32.mxu0 %v7288_v27  ;;  %1826 = vmatprep.mubr.f32.mxu1 %v7288_v27 }
 0x19e   : > { %2977 = vrot.lane.b32.xlu1 %v7938_v24, %s7285_s23  ;;  %2979 = vrot.lane.b32.xlu0 %v7942_v15, %s7285_s23 }
 0x1a0   : > { %5970 = vmatmul.mubr.msk.f32.gmra.mrb[10].mxu0 %vm1594_vm9, %v578_v51  ;;  %5978 = vmatmul.mubr.msk.f32.gmra.mrb[10].mxu1 %vm1594_vm9, %v578_v51  ;;  %v2733_v51 = vld [vmem:[#allocation9 + $0x40] sm:$0xff] }
 0x1a1   : > { %1719 = vmatprep.mubr.f32.mxu0 %v7288_v27  ;;  %1832 = vmatprep.mubr.f32.mxu1 %v7288_v27 }
 0x1a2   : > { %2981 = vrot.lane.b32.xlu1 %v7952_v23, %s7285_s23  ;;  %2983 = vrot.lane.b32.xlu0 %v7959_v36, %s7285_s23 }
 0x1a4   : > { %5971 = vmatmul.mubr.msk.f32.gmra.mrb[12].mxu0 %vm1594_vm9, %v579_v31  ;;  %5979 = vmatmul.mubr.msk.f32.gmra.mrb[12].mxu1 %vm1594_vm9, %v579_v31  ;;  %v2736_v31 = vld [vmem:[#allocation9 + $0x58] sm:$0xff] }
 0x1a5   : > { %1725 = vmatprep.mubr.f32.mxu0 %v7288_v27  ;;  %1838 = vmatprep.mubr.f32.mxu1 %v7288_v27 }
 0x1a6   : > { %2985 = vrot.lane.b32.xlu1 %v7968_v41, %s7285_s23  ;;  %2987 = vrot.lane.b32.xlu0 %v7976_v16, %s7285_s23 }
 0x1a8   : > { %5972 = vmatmul.mubr.msk.f32.gmra.mrb[14].mxu0 %vm1594_vm9, %v580_v44  ;;  %5980 = vmatmul.mubr.msk.f32.gmra.mrb[14].mxu1 %vm1594_vm9, %v580_v44 }
 0x1aa   : > { %3021 = vrot.lane.b32.xlu1 %v7931_v48, %s7286_s16  ;;  %3023 = vrot.lane.b32.xlu0 %v7933_v59, %s7286_s16  ;;  %v8323_v48 = vpop.permute.xlu0 %1855  ;;  %v8325_v59 = vpop.permute.xlu1 %1860 }
 0x1ae   : > { %3025 = vrot.lane.b32.xlu1 %v7938_v24, %s7286_s16  ;;  %3027 = vrot.lane.b32.xlu0 %v7942_v15, %s7286_s16  ;;  %v8327_v24 = vpop.permute.xlu1 %1865  ;;  %v8329_v27 = vpop.permute.xlu0 %1870 }
 0x1b2   : > { %3029 = vrot.lane.b32.xlu1 %v7952_v23, %s7286_s16  ;;  %3031 = vrot.lane.b32.xlu0 %v7959_v36, %s7286_s16  ;;  %v8331_v15 = vpop.permute.xlu1 %1875  ;;  %v8333_v23 = vpop.permute.xlu0 %1880 }
 0x1b6   : > { %3033 = vrot.lane.b32.xlu1 %v7968_v41, %s7286_s16  ;;  %3035 = vrot.lane.b32.xlu0 %v7976_v16, %s7286_s16  ;;  %v8335_v58 = vpop.permute.xlu1 %1885  ;;  %v8337_v36 = vpop.permute.xlu0 %1890 }
 0x1ba   : > { %v2662_v41 = vpop.permute.xlu1 %2661  ;;  %v2664_v43 = vpop.permute.xlu0 %2663 }
 0x1be   : > { %v2666_v56 = vpop.permute.xlu1 %2665  ;;  %v2668_v16 = vpop.permute.xlu0 %2667 }
 0x1bf   : > { %v2681_v26 = vsel %vm591_vm0, %v2662_v41, %v2666_v56  ;;  %v2682_v22 = vsel %vm591_vm0, %v2664_v43, %v2668_v16 }
 0x1c0   : > { %v2694_v28 = vmul.f32 %v2686_v0, %v2681_v26  ;;  %v2698_v8 = vmul.f32 %v2690_v30, %v2682_v22 }
 0x1c2   : > { %v2670_v53 = vpop.permute.xlu1 %2669  ;;  %v2672_v5 = vpop.permute.xlu0 %2671  ;;  %v6225_v39 = vpack.c.bf16 %v2698_v8, %v2694_v28 }
 0x1c3   : > { %v2679_v6 = vsel %vm591_vm0, %v2666_v56, %v2670_v53  ;;  %v2680_v9 = vsel %vm591_vm0, %v2668_v16, %v2672_v5  ;;  %v2737_v16 = vld [vmem:[#allocation9 + $0x60] sm:$0xff] }
 0x1c4   : > { %6226 = vmatprep.subr.bf16.mxu0 %v6225_v39  ;;  %v2695_v46 = vmul.f32 %v2687_v18, %v2679_v6  ;;  %v2699_v52 = vmul.f32 %v2691_v54, %v2680_v9  ;;  %v2783_v6 = vld [vmem:[#allocation9 + $0x90] sm:$0xff] }
 0x1c5   : > { %v2787_v9 = vld [vmem:[#allocation9 + $0xb0] sm:$0xff] }
 0x1c6   : > { %v2674_v60 = vpop.permute.xlu1 %2673  ;;  %v2676_v21 = vpop.permute.xlu0 %2675  ;;  %v6263_v19 = vpack.c.bf16 %v2699_v52, %v2695_v46  ;;  %v2784_v46 = vld [vmem:[#allocation9 + $0x98] sm:$0xff] }
 0x1c7   : > { %v2683_v42 = vsel %vm591_vm0, %v2674_v60, %v2662_v41  ;;  %v2684_v57 = vsel %vm591_vm0, %v2676_v21, %v2664_v43  ;;  %v2677_v29 = vsel %vm591_vm0, %v2670_v53, %v2674_v60  ;;  %v2678_v32 = vsel %vm591_vm0, %v2672_v5, %v2676_v21  ;;  %v2740_v53 = vld [vmem:[#allocation9 + $0x78] sm:$0xff] }
 0x1c8   : > { %v2693_v62 = vmul.f32 %v2685_v25, %v2683_v42  ;;  %v2697_v35 = vmul.f32 %v2689_v61, %v2684_v57  ;;  %v2696_v11 = vmul.f32 %v2688_v17, %v2677_v29  ;;  %v2700_v2 = vmul.f32 %v2692_v13, %v2678_v32  ;;  %v2782_v17 = vld [vmem:[#allocation9 + $0x88] sm:$0xff] }
 0x1c9   : > { %v2786_v13 = vld [vmem:[#allocation9 + $0xa8] sm:$0xff] }
 0x1ca   : > { %v6227_v12 = vpack.c.bf16 %v2697_v35, %v2693_v62  ;;  %v2710_v49 = vpop.permute.xlu1 %2709  ;;  %v2712_v1 = vpop.permute.xlu0 %2711  ;;  %v6261_v7 = vpack.c.bf16 %v2700_v2, %v2696_v11  ;;  %v2781_v2 = vld [vmem:[#allocation9 + $0x80] sm:$0xff] }
 0x1cc   : > { %6228 = vmatpush1.bf16.msra.mxu0 %v6227_v12  ;;  %6262 = vmatprep.subr.bf16.mxu1 %v6261_v7  ;;  %v2785_v7 = vld [vmem:[#allocation9 + $0xa0] sm:$0xff] }
 0x1cd   : > { %6264 = vmatpush1.bf16.msra.mxu1 %v6263_v19 }
 0x1ce   : > { %v2714_v45 = vpop.permute.xlu1 %2713  ;;  %v2716_v63 = vpop.permute.xlu0 %2715 }
 0x1cf   : > { %v2729_v34 = vsel %vm616_vm2, %v2710_v49, %v2714_v45  ;;  %v2730_v14 = vsel %vm616_vm2, %v2712_v1, %v2716_v63 }
 0x1d0   : > { %v2742_v3 = vmul.f32 %v2734_v50, %v2729_v34  ;;  %v2746_v38 = vmul.f32 %v2738_v40, %v2730_v14 }
 0x1d2   : > { %v2718_v4 = vpop.permute.xlu1 %2717  ;;  %v2720_v33 = vpop.permute.xlu0 %2719  ;;  %v6229_v8 = vpack.c.bf16 %v2746_v38, %v2742_v3 }
 0x1d3   : > { %v2727_v37 = vsel %vm616_vm2, %v2714_v45, %v2718_v4  ;;  %v2728_v20 = vsel %vm616_vm2, %v2716_v63, %v2720_v33 }
 0x1d4   : > { %v2743_v0 = vmul.f32 %v2735_v55, %v2727_v37  ;;  %v2747_v26 = vmul.f32 %v2739_v47, %v2728_v20  ;;  %6230 = vmatprep.subr.bf16.mxu0 %v6229_v8 }
 0x1d6   : > { %v2722_v44 = vpop.permute.xlu1 %2721  ;;  %v2724_v41 = vpop.permute.xlu0 %2723  ;;  %v6267_v57 = vpack.c.bf16 %v2747_v26, %v2743_v0 }
 0x1d7   : > { %v2725_v43 = vsel %vm616_vm2, %v2718_v4, %v2722_v44  ;;  %v2731_v56 = vsel %vm616_vm2, %v2722_v44, %v2710_v49  ;;  %v2726_v5 = vsel %vm616_vm2, %v2720_v33, %v2724_v41  ;;  %v2732_v22 = vsel %vm616_vm2, %v2724_v41, %v2712_v1  ;;  %v2788_v4 = vld [vmem:[#allocation9 + $0xb8] sm:$0xff] }
 0x1d8   : > { %v2741_v30 = vmul.f32 %v2733_v51, %v2731_v56  ;;  %v2744_v60 = vmul.f32 %v2736_v31, %v2725_v43  ;;  %v2745_v21 = vmul.f32 %v2737_v16, %v2732_v22  ;;  %v2748_v28 = vmul.f32 %v2740_v53, %v2726_v5  ;;  %v2830_v56 = vld [vmem:[#allocation9 + $0xc8] sm:$0xff] }
 0x1d9   : > { %v2834_v53 = vld [vmem:[#allocation9 + $0xe8] sm:$0xff] }
 0x1da   : > { %v2758_v25 = vpop.permute.xlu1 %2757  ;;  %v2760_v42 = vpop.permute.xlu0 %2759  ;;  %v6231_v61 = vpack.c.bf16 %v2745_v21, %v2741_v30  ;;  %v6265_v62 = vpack.c.bf16 %v2748_v28, %v2744_v60  ;;  %v2831_v60 = vld [vmem:[#allocation9 + $0xd0] sm:$0xff] }
 0x1db   : > { %v2835_v28 = vld [vmem:[#allocation9 + $0xf0] sm:$0xff] }
 0x1dc   : > { %6232 = vmatpush1.bf16.msra.mxu0 %v6231_v61  ;;  %6266 = vmatprep.subr.bf16.mxu1 %v6265_v62 }
 0x1dd   : > { %6268 = vmatpush1.bf16.msra.mxu1 %v6267_v57  ;;  %v2833_v57 = vld [vmem:[#allocation9 + $0xe0] sm:$0xff] }
 0x1de   : > { %v2762_v35 = vpop.permute.xlu1 %2761  ;;  %v2764_v39 = vpop.permute.xlu0 %2763 }
 0x1df   : > { %v2777_v29 = vsel %vm642_vm3, %v2758_v25, %v2762_v35  ;;  %v2778_v32 = vsel %vm642_vm3, %v2760_v42, %v2764_v39 }
 0x1e0   : > { %v2790_v1 = vmul.f32 %v2782_v17, %v2777_v29  ;;  %v2794_v18 = vmul.f32 %v2786_v13, %v2778_v32  ;;  %v2836_v17 = vld [vmem:[#allocation9 + $0xf8] sm:$0xff] }
 0x1e2   : > { %v2766_v12 = vpop.permute.xlu1 %2765  ;;  %v2768_v49 = vpop.permute.xlu0 %2767  ;;  %v6233_v3 = vpack.c.bf16 %v2794_v18, %v2790_v1 }
 0x1e3   : > { %v2775_v54 = vsel %vm642_vm3, %v2762_v35, %v2766_v12  ;;  %v2776_v11 = vsel %vm642_vm3, %v2764_v39, %v2768_v49 }
 0x1e4   : > { %v2791_v34 = vmul.f32 %v2783_v6, %v2775_v54  ;;  %v2795_v40 = vmul.f32 %v2787_v9, %v2776_v11  ;;  %6234 = vmatprep.subr.bf16.mxu0 %v6233_v3 }
 0x1e6   : > { %v2770_v52 = vpop.permute.xlu1 %2769  ;;  %v2772_v19 = vpop.permute.xlu0 %2771  ;;  %v6271_v31 = vpack.c.bf16 %v2795_v40, %v2791_v34 }
 0x1e7   : > { %v2773_v45 = vsel %vm642_vm3, %v2766_v12, %v2770_v52  ;;  %v2779_v63 = vsel %vm642_vm3, %v2770_v52, %v2758_v25  ;;  %v2774_v33 = vsel %vm642_vm3, %v2768_v49, %v2772_v19  ;;  %v2780_v50 = vsel %vm642_vm3, %v2772_v19, %v2760_v42  ;;  %v2829_v25 = vld [vmem:[#allocation9 + $0xc0] sm:$0xff]  ;;  %v2832_v42 = vld [vmem:[#allocation9 + $0xd8] sm:$0xff] }
 0x1e8   : > { %v2789_v14 = vmul.f32 %v2781_v2, %v2779_v63  ;;  %v2793_v55 = vmul.f32 %v2785_v7, %v2780_v50  ;;  %v2792_v37 = vmul.f32 %v2784_v46, %v2773_v45  ;;  %v2796_v20 = vmul.f32 %v2788_v4, %v2774_v33 }
 0x1ea   : > { %v6235_v38 = vpack.c.bf16 %v2793_v55, %v2789_v14  ;;  %v2806_v47 = vpop.permute.xlu1 %2805  ;;  %v2808_v51 = vpop.permute.xlu0 %2807  ;;  %v6269_v44 = vpack.c.bf16 %v2796_v20, %v2792_v37 }
 0x1ec   : > { %6236 = vmatpush1.bf16.msra.mxu0 %v6235_v38  ;;  %6270 = vmatprep.subr.bf16.mxu1 %v6269_v44 }
 0x1ed   : > { %6272 = vmatpush1.bf16.msra.mxu1 %v6271_v31 }
 0x1ee   : > { %v2810_v41 = vpop.permute.xlu1 %2809  ;;  %v2812_v43 = vpop.permute.xlu0 %2811 }
 0x1ef   : > { %v2825_v16 = vsel %vm668_vm4, %v2806_v47, %v2810_v41  ;;  %v2826_v5 = vsel %vm668_vm4, %v2808_v51, %v2812_v43 }
 0x1f0   : > { %v2838_v30 = vmul.f32 %v2830_v56, %v2825_v16  ;;  %v2842_v22 = vmul.f32 %v2834_v53, %v2826_v5 }
 0x1f2   : > { %v2814_v0 = vpop.permute.xlu1 %2813  ;;  %v2816_v26 = vpop.permute.xlu0 %2815  ;;  %v6237_v54 = vpack.c.bf16 %v2842_v22, %v2838_v30 }
 0x1f3   : > { %v2823_v21 = vsel %vm668_vm4, %v2810_v41, %v2814_v0  ;;  %v2824_v8 = vsel %vm668_vm4, %v2812_v43, %v2816_v26 }
 0x1f4   : > { %v2839_v32 = vmul.f32 %v2831_v60, %v2823_v21  ;;  %v2843_v12 = vmul.f32 %v2835_v28, %v2824_v8  ;;  %6238 = vmatprep.subr.bf16.mxu0 %v6237_v54 }
 0x1f6   : > { %v2818_v61 = vpop.permute.xlu1 %2817  ;;  %v2820_v62 = vpop.permute.xlu0 %2819  ;;  %v6275_v4 = vpack.c.bf16 %v2843_v12, %v2839_v32 }
 0x1f7   : > { %v2821_v35 = vsel %vm668_vm4, %v2814_v0, %v2818_v61  ;;  %v2827_v39 = vsel %vm668_vm4, %v2818_v61, %v2806_v47  ;;  %v2822_v29 = vsel %vm668_vm4, %v2816_v26, %v2820_v62  ;;  %v2828_v13 = vsel %vm668_vm4, %v2820_v62, %v2808_v51 }
 0x1f8   : > { %v2837_v49 = vmul.f32 %v2829_v25, %v2827_v39  ;;  %v2841_v1 = vmul.f32 %v2833_v57, %v2828_v13  ;;  %v2840_v18 = vmul.f32 %v2832_v42, %v2821_v35  ;;  %v2844_v6 = vmul.f32 %v2836_v17, %v2822_v29  ;;  %v2901_v35 = vld [vmem:[#allocation9 + $0x140] sm:$0xff] }
 0x1f9   : > { %v2905_v39 = vld [vmem:[#allocation9 + $0x160] sm:$0xff] }
 0x1fa   : > { %v6239_v9 = vpack.c.bf16 %v2841_v1, %v2837_v49  ;;  %v8403_v11 = vpop.permute.xlu1 %2877  ;;  %v8405_v2 = vpop.permute.xlu0 %2879  ;;  %v6273_v34 = vpack.c.bf16 %v2844_v6, %v2840_v18 }
 0x1fc   : > { %6240 = vmatpush1.bf16.msra.mxu0 %v6239_v9  ;;  %6274 = vmatprep.subr.bf16.mxu1 %v6273_v34 }
 0x1fd   : > { %6276 = vmatpush1.bf16.msra.mxu1 %v6275_v4 }
 0x1fe   : > { %v8411_v55 = vpop.permute.xlu1 %2881  ;;  %v8413_v37 = vpop.permute.xlu0 %2883 }
 0x1ff   : > { %v2897_v25 = vsel %vm707_vm5, %v8403_v11, %v8411_v55  ;;  %v2898_v42 = vsel %vm707_vm5, %v8405_v2, %v8413_v37 }
 0x200   : > { %v8436_v6 = vmul.f32 %v2901_v35, %v2897_v25  ;;  %v8438_v54 = vmul.f32 %v2905_v39, %v2898_v42 }
 0x202   : > { %v2886_v53 = vpop.permute.xlu1 %2885  ;;  %v8419_v5 = vpop.permute.xlu0 %2887 }
 0x203   : > { %v2895_v4 = vsel %vm707_vm5, %v8411_v55, %v2886_v53 }
 0x206   : > { %v2890_v17 = vpop.permute.xlu1 %2889  ;;  %v8433_v29 = vpop.permute.xlu0 %2891 }
 0x25f   : > { %v1798_v46 = vpop.f32.mrb[0].mxu1  ;;  %v1685_v52 = vpop.f32.mrb[0].mxu0 }
 0x260   : > { %v1895_v7 = vadd.f32 %v8323_v48, %v1798_v46  ;;  %v1893_v19 = vadd.f32 %v8323_v48, %v1685_v52  ;;  %v1687_v45 = vpop.f32.mrb[1].mxu0  ;;  %v1800_v63 = vpop.f32.mrb[1].mxu1 }
 0x261   : > { %v1894_v33 = vadd.f32 %v8323_v48, %v1687_v45  ;;  %v1896_v50 = vadd.f32 %v8323_v48, %v1800_v63  ;;  %v8440_v46 = vpop.permute.xlu1 %2925  ;;  %v8442_v52 = vpop.permute.xlu0 %2927  ;;  %v2902_v63 = vld [vmem:[#allocation9 + $0x148] sm:$0xff] }
 0x262   : > { %v5983_v40 = vmul.f32 -1.442695, %v1895_v7  ;;  %v5981_v14 = vmul.f32 -1.442695, %v1893_v19 }
 0x263   : > { %v5982_v20 = vmul.f32 -1.442695, %v1894_v33  ;;  %v5984_v3 = vmul.f32 -1.442695, %v1896_v50  ;;  %v1691_v38 = vpop.f32.mrb[2].mxu0  ;;  %v1804_v47 = vpop.f32.mrb[2].mxu1 }
 0x264   : > { %6675 = vpow2.f32 %v5983_v40  ;;  %v1897_v51 = vadd.f32 %v8325_v59, %v1691_v38  ;;  %v1899_v31 = vadd.f32 %v8325_v59, %v1804_v47  ;;  %v1693_v44 = vpop.f32.mrb[3].mxu0  ;;  %v1806_v41 = vpop.f32.mrb[3].mxu1 }
 0x265   : > { %6677 = vpow2.f32 %v5981_v14  ;;  %v1898_v48 = vadd.f32 %v8325_v59, %v1693_v44  ;;  %v1900_v43 = vadd.f32 %v8325_v59, %v1806_v41  ;;  %v2906_v14 = vld [vmem:[#allocation9 + $0x168] sm:$0xff]  ;;  %v8454_v41 = vmul.f32 %v2902_v63, %v2895_v4 }
 0x266   : > { %6679 = vpow2.f32 %v5982_v20  ;;  %v5985_v56 = vmul.f32 -1.442695, %v1897_v51  ;;  %v5987_v16 = vmul.f32 -1.442695, %v1899_v31  ;;  %v2896_v20 = vsel %vm707_vm5, %v8413_v37, %v8419_v5  ;;  %v8460_v37 = vpop.permute.xlu0 %2931 }
 0x267   : > { %6681 = vpow2.f32 %v5984_v3  ;;  %v5986_v0 = vmul.f32 -1.442695, %v1898_v48  ;;  %v5988_v26 = vmul.f32 -1.442695, %v1900_v43  ;;  %v1697_v30 = vpop.f32.mrb[4].mxu0  ;;  %v1810_v22 = vpop.f32.mrb[4].mxu1  ;;  %v2893_v43 = vsel %vm707_vm5, %v2886_v53, %v2890_v17 }
 0x268   : > { %6683 = vpow2.f32 %v5985_v56  ;;  %v1901_v60 = vadd.f32 %v8327_v24, %v1697_v30  ;;  %v1903_v21 = vadd.f32 %v8327_v24, %v1810_v22  ;;  %v1699_v28 = vpop.f32.mrb[5].mxu0  ;;  %v1812_v8 = vpop.f32.mrb[5].mxu1  ;;  %v2903_v48 = vld [vmem:[#allocation9 + $0x150] sm:$0xff]  ;;  %v8463_v22 = vmul.f32 %v2906_v14, %v2896_v20 }
 0x269   : > { %6685 = vpow2.f32 %v5987_v16  ;;  %v1902_v59 = vadd.f32 %v8327_v24, %v1699_v28  ;;  %v1904_v62 = vadd.f32 %v8327_v24, %v1812_v8  ;;  %v8458_v56 = vpop.permute.xlu1 %2929  ;;  %v2899_v53 = vsel %vm707_vm5, %v2890_v17, %v8403_v11  ;;  %v2907_v20 = vld [vmem:[#allocation9 + $0x170] sm:$0xff] }
 0x26a   : > { %6687 = vpow2.f32 %v5986_v0  ;;  %v5989_v61 = vmul.f32 -1.442695, %v1901_v60  ;;  %v5991_v57 = vmul.f32 -1.442695, %v1903_v21  ;;  %v6245_v31 = vpack.c.bf16 %v8463_v22, %v8454_v41  ;;  %v2949_v22 = vld [vmem:[#allocation9 + $0x180] sm:$0xff] }
 0x26b   : > { %6689 = vpow2.f32 %v5988_v26  ;;  %v1703_v13 = vpop.f32.mrb[6].mxu0  ;;  %v1816_v32 = vpop.f32.mrb[6].mxu1  ;;  %v5990_v12 = vmul.f32 -1.442695, %v1902_v59  ;;  %v5992_v9 = vmul.f32 -1.442695, %v1904_v62  ;;  %v8471_v62 = vmul.f32 %v2903_v48, %v2893_v43 }
 0x26c   : > { %6691 = vpow2.f32 %v5989_v61  ;;  %v1905_v49 = vadd.f32 %v8329_v27, %v1703_v13  ;;  %v1705_v1 = vpop.f32.mrb[7].mxu0  ;;  %v1818_v18 = vpop.f32.mrb[7].mxu1  ;;  %v1907_v47 = vadd.f32 %v8329_v27, %v1816_v32  ;;  %v2904_v32 = vld [vmem:[#allocation9 + $0x158] sm:$0xff] }
 0x26d   : > { %6693 = vpow2.f32 %v5991_v57  ;;  %v1906_v26 = vadd.f32 %v8329_v27, %v1705_v1  ;;  %v1908_v28 = vadd.f32 %v8329_v27, %v1818_v18 }
 0x26e   : > { %v6676_v24 = vpop.eup %6675  ;;  %v5993_v19 = vmul.f32 -1.442695, %v1905_v49  ;;  %6695 = vpow2.f32 %v5990_v12  ;;  %v8469_v61 = vmul.f32 -1.442695, %v1907_v47  ;;  %v8475_v12 = vpop.permute.xlu1 %2933 }
 0x26f   : > { %v6678_v7 = vpop.eup %6677  ;;  %v1709_v45 = vpop.f32.mrb[8].mxu0  ;;  %v1951_v50 = vadd.f32 1.0, %v6676_v24  ;;  %6697 = vpow2.f32 %v5992_v9 }
 0x270   : > { %v6680_v33 = vpop.eup %6679  ;;  %v1822_v34 = vpop.f32.mrb[8].mxu1  ;;  %v1949_v38 = vadd.f32 1.0, %v6678_v7  ;;  %6699 = vpow2.f32 %v5993_v19  ;;  %v1909_v13 = vadd.f32 %v8331_v15, %v1709_v45  ;;  %v5994_v7 = vmul.f32 -1.442695, %v1906_v26 }
 0x271   : > { %v1711_v40 = vpop.f32.mrb[9].mxu0  ;;  %v6682_v3 = vpop.eup %6681  ;;  %v1950_v44 = vadd.f32 1.0, %v6680_v33  ;;  %6701 = vrcp.f32 %v1951_v50  ;;  %v1911_v27 = vadd.f32 %v8331_v15, %v1822_v34  ;;  %v5996_v33 = vmul.f32 -1.442695, %v1908_v28 }
 0x272   : > { %v1824_v51 = vpop.f32.mrb[9].mxu1  ;;  %v6684_v55 = vpop.eup %6683  ;;  %v1952_v0 = vadd.f32 1.0, %v6682_v3  ;;  %6703 = vrcp.f32 %v1949_v38  ;;  %v1910_v1 = vadd.f32 %v8331_v15, %v1711_v40  ;;  %v8490_v34 = vmul.f32 %v2904_v32, %v2899_v53  ;;  %v2908_v3 = vld [vmem:[#allocation9 + $0x178] sm:$0xff] }
 0x273   : > { %v6686_v16 = vpop.eup %6685  ;;  %v1715_v30 = vpop.f32.mrb[10].mxu0  ;;  %v1953_v21 = vadd.f32 1.0, %v6684_v55  ;;  %6705 = vrcp.f32 %v1950_v44  ;;  %v1912_v18 = vadd.f32 %v8331_v15, %v1824_v51  ;;  %v8492_v15 = vmul.f32 -1.442695, %v1909_v13 }
 0x274   : > { %v6688_v60 = vpop.eup %6687  ;;  %v1828_v8 = vpop.f32.mrb[10].mxu1  ;;  %v1955_v42 = vadd.f32 1.0, %v6686_v16  ;;  %6707 = vrcp.f32 %v1952_v0  ;;  %v1913_v19 = vadd.f32 %v8333_v23, %v1715_v30  ;;  %v8494_v14 = vmul.f32 -1.442695, %v1911_v27  ;;  %v7064_v27 = vld [vmem:[#allocation5 + $0x28] sm:$0xff] }
 0x275   : > { %v1717_v59 = vpop.f32.mrb[11].mxu0  ;;  %v6690_v25 = vpop.eup %6689  ;;  %v1954_v39 = vadd.f32 1.0, %v6688_v60  ;;  %6709 = vrcp.f32 %v1953_v21  ;;  %v2894_v38 = vsel %vm707_vm5, %v8419_v5, %v8433_v29  ;;  %v8504_v55 = vmul.f32 -1.442695, %v1910_v1  ;;  %v8552_v1 = vld [vmem:[#allocation9 + $0x138] sm:$0xff] }
 0x276   : > { %v1830_v57 = vpop.f32.mrb[11].mxu1  ;;  %v6692_v35 = vpop.eup %6691  ;;  %v1956_v17 = vadd.f32 1.0, %v6690_v25  ;;  %6711 = vrcp.f32 %v1955_v42  ;;  %v8506_v44 = vmul.f32 -1.442695, %v1912_v18  ;;  %v2900_v16 = vsel %vm707_vm5, %v8433_v29, %v8405_v2  ;;  %v8535_v25 = vld [vmem:[#allocation9 + $0x108] sm:$0xff]  ;;  %v8539_v42 = vld [vmem:[#allocation9 + $0x100] sm:$0xff] }
 0x277   : > { %v8477_v49 = vpop.permute.xlu0 %2935  ;;  %v6694_v11 = vpop.eup %6693  ;;  %v1997_v9 = vadd.f32 1.0, %v6692_v35  ;;  %6713 = vrcp.f32 %v1954_v39  ;;  %v8516_v5 = vmul.f32 -1.442695, %v1913_v19  ;;  %v8519_v26 = vadd.f32 %v8333_v23, %v1828_v8  ;;  %10704 = vst [vmem:[#allocation17_spill] sm:$0xff] %v8535_v25  ;;  %v8537_v8 = vld [vmem:[#allocation9 + $0x128] sm:$0xff]  ;;  %10708 = vst [vmem:[#allocation21_spill] sm:$0xff] %v8552_v1 }
 0x278   : > { %v8481_v24 = vpop.f32.mrb[12].mxu0  ;;  %v8484_v45 = vpop.f32.mrb[12].mxu1  ;;  %v1999_v4 = vadd.f32 1.0, %v6694_v11  ;;  %6715 = vrcp.f32 %v1956_v17  ;;  %v8522_v30 = vadd.f32 %v8333_v23, %v1717_v59  ;;  %v8531_v2 = vadd.f32 %v8333_v23, %v1830_v57  ;;  %10705 = vst [vmem:[#allocation18_spill] sm:$0xff] %v8537_v8  ;;  %v7063_v39 = vld [vmem:[#allocation5 + $0x8] sm:$0xff]  ;;  %v8547_v23 = vld [vmem:[#allocation9 + $0x120] sm:$0xff] }
 0x279   : > { %v8486_v63 = vpop.f32.mrb[13].mxu0  ;;  %v8488_v50 = vpop.f32.mrb[13].mxu1  ;;  %6717 = vrcp.f32 %v1997_v9  ;;  %v8533_v29 = vmul.f32 %v2907_v20, %v2894_v38  ;;  %v8543_v35 = vmul.f32 %v2908_v3, %v2900_v16  ;;  %v2862_v13 = vmul.f32 %v7063_v39, %v8535_v25  ;;  %10706 = vst [vmem:[#allocation19_spill] sm:$0xff] %v8547_v23  ;;  %v7065_v57 = vld [vmem:[#allocation5] sm:$0xff]  ;;  %v8550_v17 = vld [vmem:[#allocation9 + $0x118] sm:$0xff]  ;;  %v8564_v39 = vld [vmem:[#allocation9 + $0x110] sm:$0xff] }
 0x27a   : > { %v6696_v40 = vpop.eup %6695  ;;  %v8500_v47 = vpop.permute.xlu1 %2937  ;;  %6719 = vrcp.f32 %v1999_v4  ;;  %v2866_v32 = vmul.f32 %v7064_v27, %v8537_v8  ;;  %v2861_v11 = vmul.f32 %v7065_v57, %v8539_v42  ;;  %10707 = vst [vmem:[#allocation20_spill] sm:$0xff] %v8550_v17  ;;  %v7066_v4 = vld [vmem:[#allocation5 + $0x20] sm:$0xff]  ;;  %v7067_v20 = vld [vmem:[#allocation5 + $0x18] sm:$0xff]  ;;  %v8570_v8 = vld [vmem:[#allocation9 + $0x130] sm:$0xff] }
 0x27b   : > { %v8502_v51 = vpop.permute.xlu0 %2939  ;;  %v8508_v48 = vpop.f32.mrb[14].mxu0  ;;  %v8528_v53 = vadd.f32 1.0, %v6696_v40  ;;  %6721 = vpow2.f32 %v8469_v61  ;;  %v2865_v40 = vmul.f32 %v7066_v4, %v8547_v23  ;;  %v2864_v3 = vmul.f32 %v7067_v20, %v8550_v17  ;;  %v7068_v38 = vld [vmem:[#allocation5 + $0x38] sm:$0xff]  ;;  %10709 = vst [vmem:[#allocation22_spill] sm:$0xff] %v8570_v8  ;;  %v7069_v61 = vld [vmem:[#allocation5 + $0x10] sm:$0xff] }
 0x27c   : > { %v8510_v43 = vpop.f32.mrb[14].mxu1  ;;  %v6698_v0 = vpop.eup %6697  ;;  %v2868_v16 = vmul.f32 %v7068_v38, %v8552_v1  ;;  %6723 = vpow2.f32 %v5994_v7  ;;  %v6241_v57 = vpack.c.bf16 %v2866_v32, %v2862_v13  ;;  %v2863_v4 = vmul.f32 %v7069_v61, %v8564_v39  ;;  %v7070_v38 = vld [vmem:[#allocation5 + $0x30] sm:$0xff]  ;;  %v2953_v32 = vld [vmem:[#allocation9 + $0x1a0] sm:$0xff] }
 0x27d   : > { %v8524_v60 = vpop.f32.mrb[15].mxu0  ;;  %v8526_v21 = vpop.f32.mrb[15].mxu1  ;;  %6725 = vpow2.f32 %v5996_v33  ;;  %v6243_v20 = vpack.c.bf16 %v2865_v40, %v2861_v11  ;;  %v2867_v1 = vmul.f32 %v7070_v38, %v8570_v8  ;;  %v2000_v7 = vadd.f32 1.0, %v6698_v0  ;;  %v2955_v8 = vld [vmem:[#allocation9 + $0x1b0] sm:$0xff] }
 0x27e   : > { %v6700_v28 = vpop.eup %6699  ;;  %v8554_v18 = vpop.permute.xlu1 %2973  ;;  %v6277_v17 = vpack.c.bf16 %v2868_v16, %v2864_v3  ;;  %6242 = vmatprep.subr.bf16.mxu0 %v6241_v57  ;;  %v6281_v41 = vpack.c.bf16 %v8543_v35, %v8490_v34  ;;  %v2945_v13 = vsel %vm733_vm6, %v8440_v46, %v8458_v56  ;;  %v2946_v33 = vsel %vm733_vm6, %v8442_v52, %v8460_v37  ;;  %v2950_v16 = vld [vmem:[#allocation9 + $0x188] sm:$0xff] }
 0x27f   : > { %v8541_v59 = vpop.eup %6701  ;;  %v8556_v9 = vpop.permute.xlu0 %2975  ;;  %v2001_v3 = vadd.f32 1.0, %v6700_v28  ;;  %6727 = vpow2.f32 %v8492_v15  ;;  %v1917_v34 = vadd.f32 %v8335_v58, %v8481_v24  ;;  %6244 = vmatpush1.bf16.msra.mxu0 %v6243_v20  ;;  %v6279_v35 = vpack.c.bf16 %v2867_v1, %v2863_v4  ;;  %v2954_v57 = vld [vmem:[#allocation9 + $0x1a8] sm:$0xff]  ;;  %v2951_v28 = vld [vmem:[#allocation9 + $0x190] sm:$0xff]  ;;  %v2952_v1 = vld [vmem:[#allocation9 + $0x198] sm:$0xff] }
 0x280   : > { %v8558_v19 = vpop.eup %6703  ;;  %6278 = vmatprep.subr.bf16.mxu1 %v6277_v17  ;;  %6729 = vpow2.f32 %v8494_v14  ;;  %v1919_v38 = vadd.f32 %v8335_v58, %v8484_v45  ;;  %6246 = vmatprep.subr.bf16.mxu0 %v6245_v31  ;;  %v2943_v15 = vsel %vm733_vm6, %v8458_v56, %v8475_v12  ;;  %v2944_v24 = vsel %vm733_vm6, %v8460_v37, %v8477_v49 }
 0x281   : > { %v8566_v27 = vpop.eup %6705  ;;  %6731 = vrcp.f32 %v8528_v53  ;;  %v6283_v14 = vpack.c.bf16 %v8533_v29, %v8471_v62  ;;  %6280 = vmatpush1.bf16.msra.mxu1 %v6279_v35  ;;  %v2957_v31 = vmul.f32 %v2949_v22, %v2945_v13  ;;  %v2961_v45 = vmul.f32 %v2953_v32, %v2946_v33  ;;  %v2956_v22 = vld [vmem:[#allocation9 + $0x1b8] sm:$0xff] }
 0x282   : > { %v8573_v25 = vpop.eup %6707  ;;  %v8588_v11 = vpop.permute.xlu1 %2977  ;;  %6733 = vrcp.f32 %v2000_v7  ;;  %6282 = vmatprep.subr.bf16.mxu1 %v6281_v41  ;;  %v2958_v56 = vmul.f32 %v2950_v16, %v2943_v15  ;;  %v2962_v20 = vmul.f32 %v2954_v57, %v2944_v24  ;;  %v2941_v37 = vsel %vm733_vm6, %v8475_v12, %v8500_v47 }
 0x283   : > { %v8576_v23 = vpop.eup %6709  ;;  %v8590_v40 = vpop.permute.xlu0 %2979  ;;  %6735 = vrcp.f32 %v2001_v3  ;;  %v6003_v29 = vmul.f32 -1.442695, %v8519_v26  ;;  %v10711_v7 = vpack.c.bf16 %v8438_v54, %v8436_v6  ;;  %v2947_v41 = vsel %vm733_vm6, %v8500_v47, %v8440_v46 }
 0x284   : > { %v8592_v0 = vpop.eup %6711  ;;  %v2959_v12 = vmul.f32 %v2951_v28, %v2941_v37  ;;  %6737 = vpow2.f32 %v8504_v55  ;;  %v6002_v13 = vmul.f32 -1.442695, %v8522_v30  ;;  %v2960_v32 = vmul.f32 %v2952_v1, %v2947_v41  ;;  %v2999_v1 = vld [vmem:[#allocation9 + $0x1d0] sm:$0xff] }
 0x285   : > { %v8597_v61 = vpop.eup %6713  ;;  %6248 = vmatpush1.bf16.msra.mxu0 %v10711_v7  ;;  %v2942_v26 = vsel %vm733_vm6, %v8477_v49, %v8502_v51  ;;  %6739 = vtanh.f32 %v1917_v34  ;;  %v6251_v6 = vpack.c.bf16 %v2961_v45, %v2957_v31  ;;  %6284 = vmatpush1.bf16.msra.mxu1 %v6283_v14  ;;  %v2948_v54 = vsel %vm733_vm6, %v8502_v51, %v8442_v52  ;;  %v2077_v49 = vld [vmem:[#allocation4] sm:$0xff] }
 0x286   : > { %v8610_v17 = vpop.eup %6715  ;;  %v2963_v46 = vmul.f32 %v2955_v8, %v2942_v26  ;;  %v6004_v55 = vmul.f32 -1.442695, %v8531_v2  ;;  %6741 = vtanh.f32 %v1919_v38  ;;  %v2964_v30 = vmul.f32 %v2956_v22, %v2948_v54  ;;  %v2997_v38 = vld [vmem:[#allocation9 + $0x1c0] sm:$0xff] }
 0x287   : > { %10710 = vst [vmem:[#allocation23_spill] sm:$0xff] %v8610_v17  ;;  %v6718_v4 = vpop.eup %6717  ;;  %v8619_v17 = vpop.permute.xlu1 %2981  ;;  %v6249_v3 = vpack.c.bf16 %v2962_v20, %v2958_v56  ;;  %6743 = vpow2.f32 %v8506_v44  ;;  %v8647_v34 = vadd.f32 %v8335_v58, %v8486_v63  ;;  %v8651_v52 = vadd.f32 %v8335_v58, %v8488_v50  ;;  %v3001_v44 = vld [vmem:[#allocation9 + $0x1e0] sm:$0xff]  ;;  %v2998_v50 = vld [vmem:[#allocation9 + $0x1c8] sm:$0xff] }
 0x288   : > { %v8621_v53 = vpop.permute.xlu0 %2983  ;;  %v8623_v62 = vpop.eup %6719  ;;  %v6287_v51 = vpack.c.bf16 %v2963_v46, %v2959_v12  ;;  %6745 = vpow2.f32 %v8516_v5  ;;  %v8656_v2 = vadd.f32 %v8337_v36, %v8508_v48  ;;  %v6285_v8 = vpack.c.bf16 %v2964_v30, %v2960_v32  ;;  %v3002_v5 = vld [vmem:[#allocation9 + $0x1e8] sm:$0xff] }
 0x289   : > { %v6722_v33 = vpop.eup %6721  ;;  %6250 = vmatprep.subr.bf16.mxu0 %v6249_v3  ;;  %v2993_v63 = vsel %vm759_vm7, %v8554_v18, %v8588_v11  ;;  %6747 = vpow2.f32 %v6003_v29  ;;  %v2994_v58 = vsel %vm759_vm7, %v8556_v9, %v8590_v40  ;;  %v2991_v48 = vsel %vm759_vm7, %v8588_v11, %v8619_v17  ;;  %v2079_v29 = vld [vmem:[#allocation4 + $0x10] sm:$0xff] }
 0x28a   : > { %v6724_v47 = vpop.eup %6723  ;;  %v2003_v24 = vadd.f32 1.0, %v6722_v33  ;;  %6252 = vmatpush1.bf16.msra.mxu0 %v6251_v6  ;;  %v2085_v14 = vmul.f32 %v6718_v4, %v2077_v49  ;;  %6749 = vpow2.f32 %v6002_v13  ;;  %6286 = vmatprep.subr.bf16.mxu1 %v6285_v8  ;;  %v3005_v7 = vmul.f32 %v2997_v38, %v2993_v63  ;;  %v3000_v4 = vld [vmem:[#allocation9 + $0x1d8] sm:$0xff]  ;;  %v3003_v33 = vld [vmem:[#allocation9 + $0x1f0] sm:$0xff] }
 0x28b   : > { %v2986_v35 = vpop.permute.xlu1 %2985  ;;  %v6726_v57 = vpop.eup %6725  ;;  %v2002_v31 = vadd.f32 1.0, %v6724_v47  ;;  %v3009_v41 = vmul.f32 %v3001_v44, %v2994_v58  ;;  %v2992_v11 = vsel %vm759_vm7, %v8590_v40, %v8621_v53  ;;  %6288 = vmatpush1.bf16.msra.mxu1 %v6287_v51  ;;  %6751 = vpow2.f32 %v6004_v55  ;;  %v3004_v47 = vld [vmem:[#allocation9 + $0x1f8] sm:$0xff] }
 0x28c   : > { %v2988_v16 = vpop.permute.xlu0 %2987  ;;  %v6728_v15 = vpop.eup %6727  ;;  %v2004_v45 = vadd.f32 1.0, %v6726_v57  ;;  %v2989_v12 = vsel %vm759_vm7, %v8619_v17, %v2986_v35  ;;  %v3006_v32 = vmul.f32 %v2998_v50, %v2991_v48  ;;  %v3010_v26 = vmul.f32 %v3002_v5, %v2992_v11 }
 0x28d   : > { %v6730_v28 = vpop.eup %6729  ;;  %v2045_v13 = vadd.f32 1.0, %v6728_v15  ;;  %6753 = vrcp.f32 %v2003_v24  ;;  %v2995_v40 = vsel %vm759_vm7, %v2986_v35, %v8554_v18  ;;  %v3007_v46 = vmul.f32 %v2999_v1, %v2989_v12  ;;  %v3045_v15 = vld [vmem:[#allocation9 + $0x200] sm:$0xff] }
 0x28e   : > { %v8674_v37 = vpop.eup %6731  ;;  %v2047_v54 = vadd.f32 1.0, %v6730_v28  ;;  %v2087_v17 = vmul.f32 %v8623_v62, %v2079_v29  ;;  %6755 = vrcp.f32 %v2002_v31  ;;  %v3008_v3 = vmul.f32 %v3000_v4, %v2995_v40  ;;  %v3046_v28 = vld [vmem:[#allocation9 + $0x208] sm:$0xff] }
 0x28f   : > { %v8670_v56 = vpop.permute.xlu1 %3021  ;;  %v8683_v22 = vpop.eup %6733  ;;  %v2990_v55 = vsel %vm759_vm7, %v8621_v53, %v2988_v16  ;;  %6757 = vrcp.f32 %v2004_v45  ;;  %v6255_v8 = vpack.c.bf16 %v3009_v41, %v3005_v7  ;;  %v2996_v18 = vsel %vm759_vm7, %v2988_v16, %v8556_v9  ;;  %v3049_v16 = vld [vmem:[#allocation9 + $0x220] sm:$0xff]  ;;  %v3050_v7 = vld [vmem:[#allocation9 + $0x228] sm:$0xff] }
 0x290   : > { %v8672_v20 = vpop.permute.xlu0 %3023  ;;  %v8685_v6 = vpop.eup %6735  ;;  %v3011_v35 = vmul.f32 %v3003_v33, %v2990_v55  ;;  %6759 = vrcp.f32 %v2045_v13  ;;  %v3012_v63 = vmul.f32 %v3004_v47, %v2996_v18  ;;  %v6253_v44 = vpack.c.bf16 %v3010_v26, %v3006_v32  ;;  %v3048_v26 = vld [vmem:[#allocation9 + $0x218] sm:$0xff] }
 0x291   : > { %v6738_v30 = vpop.eup %6737  ;;  %6761 = vrcp.f32 %v2047_v54  ;;  %v1923_v9 = vadd.f32 %v8337_v36, %v8510_v43  ;;  %v1922_v29 = vadd.f32 %v8337_v36, %v8524_v60  ;;  %v1924_v43 = vadd.f32 %v8337_v36, %v8526_v21  ;;  %v3047_v21 = vld [vmem:[#allocation9 + $0x210] sm:$0xff]  ;;  %v2080_v18 = vld [vmem:[#allocation4 + $0x18] sm:$0xff] }
 0x292   : > { %v6740_v51 = vpop.eup %6739  ;;  %v6291_v58 = vpack.c.bf16 %v3011_v35, %v3007_v46  ;;  %6763 = vtanh.f32 %v8647_v34  ;;  %6254 = vmatprep.subr.bf16.mxu0 %v6253_v44  ;;  %v2046_v13 = vadd.f32 1.0, %v6738_v30  ;;  %v3051_v54 = vld [vmem:[#allocation9 + $0x230] sm:$0xff]  ;;  %v3052_v30 = vld [vmem:[#allocation9 + $0x238] sm:$0xff] }
 0x293   : > { %v3026_v57 = vpop.permute.xlu1 %3025  ;;  %v6742_v38 = vpop.eup %6741  ;;  %v2093_v62 = vmul.f32 %v6740_v51, %v8558_v19  ;;  %v6289_v19 = vpack.c.bf16 %v3012_v63, %v3008_v3  ;;  %6765 = vtanh.f32 %v8651_v52  ;;  %6256 = vmatpush1.bf16.msra.mxu0 %v6255_v8 }
 0x294   : > { %v3028_v49 = vpop.permute.xlu0 %3027  ;;  %v6744_v24 = vpop.eup %6743  ;;  %v2095_v53 = vmul.f32 %v6742_v38, %v8541_v59  ;;  %v3041_v50 = vsel %vm785_vm8, %v8670_v56, %v3026_v57 }
 0x295   : > { %v6746_v48 = vpop.eup %6745  ;;  %v2101_v5 = vadd.f32 %v2093_v62, %v2085_v14  ;;  %v3053_v14 = vmul.f32 %v3045_v15, %v3041_v50  ;;  %6290 = vmatprep.subr.bf16.mxu1 %v6289_v19  ;;  %v3042_v41 = vsel %vm785_vm8, %v8672_v20, %v3028_v49  ;;  %v2048_v32 = vadd.f32 1.0, %v6744_v24 }
 0x296   : > { %v6748_v1 = vpop.eup %6747  ;;  %v2103_v59 = vadd.f32 %v2095_v53, %v2087_v17  ;;  %v3057_v60 = vmul.f32 %v3049_v16, %v3042_v41  ;;  %6292 = vmatpush1.bf16.msra.mxu1 %v6291_v58  ;;  %v2081_v53 = vld [vmem:[#allocation4 + $0x20] sm:$0xff] }
 0x297   : > { %v3030_v31 = vpop.permute.xlu1 %3029  ;;  %v8708_v34 = vpop.eup %6749  ;;  %6767 = vtanh.f32 %v2101_v5  ;;  %2125 = vst [vmem:[#allocation4] sm:$0xff] %v2101_v5  ;;  %v2051_v58 = vadd.f32 1.0, %v6748_v1 }
 0x298   : > { %v3032_v45 = vpop.permute.xlu0 %3031  ;;  %v3039_v52 = vsel %vm785_vm8, %v3026_v57, %v3030_v31  ;;  %6769 = vtanh.f32 %v2103_v59  ;;  %2127 = vst [vmem:[#allocation4 + $0x10] sm:$0xff] %v2103_v59  ;;  %v6752_v12 = vpop.eup %6751  ;;  %v6259_v47 = vpack.c.bf16 %v3057_v60, %v3053_v14  ;;  %v2078_v57 = vld [vmem:[#allocation4 + $0x8] sm:$0xff]  ;;  %v2084_v59 = vld [vmem:[#allocation4 + $0x38] sm:$0xff] }
 0x299   : > { %v3054_v11 = vmul.f32 %v3046_v28, %v3039_v52  ;;  %v3040_v4 = vsel %vm785_vm8, %v3028_v49, %v3032_v45  ;;  %6771 = vtanh.f32 %v8656_v2  ;;  %v6754_v46 = vpop.eup %6753  ;;  %v2086_v24 = vmul.f32 %v8674_v37, %v2078_v57 }
 0x29a   : > { %v3058_v36 = vmul.f32 %v3050_v7, %v3040_v4  ;;  %6773 = vtanh.f32 %v1923_v9  ;;  %v6756_v55 = vpop.eup %6755  ;;  %v2088_v9 = vmul.f32 %v8683_v22, %v2080_v18  ;;  %v2050_v22 = vadd.f32 1.0, %v8708_v34 }
 0x29b   : > { %v3034_v33 = vpop.permute.xlu1 %3033  ;;  %6775 = vtanh.f32 %v1922_v29  ;;  %v6758_v8 = vpop.eup %6757 }
 0x29c   : > { %v3036_v40 = vpop.permute.xlu0 %3035  ;;  %v3037_v17 = vsel %vm785_vm8, %v3030_v31, %v3034_v33  ;;  %v3043_v3 = vsel %vm785_vm8, %v3034_v33, %v8670_v56  ;;  %6777 = vtanh.f32 %v1924_v43  ;;  %v6257_v62 = vpack.c.bf16 %v3058_v36, %v3054_v11  ;;  %v6760_v63 = vpop.eup %6759 }
 0x29d   : > { %v3055_v2 = vmul.f32 %v3047_v21, %v3037_v17  ;;  %v3056_v49 = vmul.f32 %v3048_v26, %v3043_v3  ;;  %v3038_v51 = vsel %vm785_vm8, %v3032_v45, %v3036_v40  ;;  %v3044_v35 = vsel %vm785_vm8, %v3036_v40, %v8672_v20  ;;  %v6762_v15 = vpop.eup %6761  ;;  %v2083_v20 = vld [vmem:[#allocation4 + $0x30] sm:$0xff]  ;;  %v2082_v45 = vld [vmem:[#allocation4 + $0x28] sm:$0xff] }
 0x29e   : > { %v3059_v38 = vmul.f32 %v3051_v54, %v3038_v51  ;;  %v2049_v56 = vadd.f32 1.0, %v6746_v48  ;;  %v3060_v44 = vmul.f32 %v3052_v30, %v3044_v35  ;;  %6258 = vmatprep.subr.bf16.mxu0 %v6257_v62  ;;  %v6764_v5 = vpop.eup %6763  ;;  %6779 = vrcp.f32 %v2046_v13  ;;  %v10712_v21 = vld [vmem:[#allocation23_spill] sm:$0xff] }
 0x29f   : > { %6260 = vmatpush1.bf16.msra.mxu0 %v6259_v47  ;;  %v6766_v16 = vpop.eup %6765  ;;  %6781 = vrcp.f32 %v2048_v32  ;;  %v2094_v28 = vmul.f32 %v6764_v5, %v8566_v27  ;;  %v2089_v31 = vmul.f32 %v8685_v6, %v2081_v53  ;;  %v2091_v43 = vmul.f32 %v6754_v46, %v2083_v20  ;;  %v10716_v53 = vld [vmem:[#allocation18_spill] sm:$0xff]  ;;  %v10717_v5 = vld [vmem:[#allocation20_spill] sm:$0xff] }
 0x2a0   : > { %v6295_v50 = vpack.c.bf16 %v3059_v38, %v3055_v2  ;;  %v6293_v19 = vpack.c.bf16 %v3060_v44, %v3056_v49  ;;  %6783 = vrcp.f32 %v2049_v56  ;;  %v2096_v37 = vmul.f32 %v6766_v16, %v8573_v25  ;;  %v10713_v38 = vld [vmem:[#allocation19_spill] sm:$0xff]  ;;  %v10714_v56 = vld [vmem:[#allocation22_spill] sm:$0xff] }
 0x2a1   : > { %v6768_v48 = vpop.eup %6767  ;;  %6785 = vrcp.f32 %v2051_v58  ;;  %v2102_v14 = vadd.f32 %v2094_v28, %v2086_v24  ;;  %v2052_v27 = vadd.f32 1.0, %v6752_v12  ;;  %v2090_v60 = vmul.f32 %v6756_v55, %v2082_v45  ;;  %v2637_v45 = vld [vmem:[%s10657_s6] sm:$0xff] }
 0x2a2   : > { %6294 = vmatprep.subr.bf16.mxu1 %v6293_v19  ;;  %v6770_v1 = vpop.eup %6769  ;;  %v8736_v29 = vmul.f32 %v6768_v48, %v6760_v63  ;;  %v2104_v6 = vadd.f32 %v2096_v37, %v2088_v9  ;;  %v2092_v4 = vmul.f32 %v6758_v8, %v2084_v59  ;;  %v10718_v19 = vld [vmem:[#allocation21_spill] sm:$0xff]  ;;  %v2640_v37 = vld [vmem:[%s10657_s6 + $0x18] sm:$0xff]  ;;  %v2642_v59 = vld [vmem:[%s10657_s6 + $0x28] sm:$0xff] }
 0x2a3   : > { %6296 = vmatpush1.bf16.msra.mxu1 %v6295_v50  ;;  %v6772_v7 = vpop.eup %6771  ;;  %v8738_v41 = vmul.f32 %v6770_v1, %v6762_v15  ;;  %6787 = vtanh.f32 %v2102_v14  ;;  %2126 = vst [vmem:[#allocation4 + $0x8] sm:$0xff] %v2102_v14  ;;  %v10715_v15 = vld [vmem:[#allocation17_spill] sm:$0xff]  ;;  %v2639_v1 = vld [vmem:[%s10657_s6 + $0x10] sm:$0xff]  ;;  %v7072_v50 = vld [vmem:[#allocation9 + $0x28] sm:$0xff] }
 0x2a4   : > { %v6774_v52 = vpop.eup %6773  ;;  %2133 = vst [vmem:[#allocation3] sm:$0xff] %v8736_v29  ;;  %v2097_v25 = vmul.f32 %v6772_v7, %v8576_v23  ;;  %2157 = vrot.lane.b32.xlu1 %v8736_v29, %s7279_s1  ;;  %v8746_v34 = vmul.f32 %v8539_v42, %v8736_v29  ;;  %6789 = vtanh.f32 %v2104_v6  ;;  %2128 = vst [vmem:[#allocation4 + $0x18] sm:$0xff] %v2104_v6  ;;  %v2643_v7 = vld [vmem:[%s10657_s6 + $0x30] sm:$0xff]  ;;  %v2648_v6 = vld [vmem:[%s10657_s6 + $0x58] sm:$0xff] }
 0x2a5   : > { %v6776_v11 = vpop.eup %6775  ;;  %2135 = vst [vmem:[#allocation3 + $0x10] sm:$0xff] %v8738_v41  ;;  %v2099_v12 = vmul.f32 %v6774_v52, %v8592_v0  ;;  %v8752_v13 = vmul.f32 %v8564_v39, %v8738_v41  ;;  %6791 = vrcp.f32 %v2050_v22  ;;  %v2641_v22 = vld [vmem:[%s10657_s6 + $0x20] sm:$0xff] }
 0x2a6   : > { %v6778_v23 = vpop.eup %6777  ;;  %v2105_v32 = vadd.f32 %v2097_v25, %v2089_v31  ;;  %v2098_v36 = vmul.f32 %v6776_v11, %v8597_v61  ;;  %6793 = vrcp.f32 %v2052_v27  ;;  %v2638_v31 = vld [vmem:[%s10657_s6 + $0x8] sm:$0xff]  ;;  %v3641_v25 = vld [vmem:[%s10658_s7] sm:$0xff] }
 0x2a7   : > { %v2107_v42 = vadd.f32 %v2099_v12, %v2091_v43  ;;  %v2100_v26 = vmul.f32 %v6778_v23, %v10712_v21  ;;  %6005 = vmatprep.mubr.msk.f32.mxu0 %vm1343_vm1, %v2638_v31  ;;  %6013 = vmatprep.mubr.msk.f32.mxu1 %vm1343_vm1, %v2638_v31  ;;  %v2646_v43 = vld [vmem:[%s10657_s6 + $0x48] sm:$0xff]  ;;  %v2649_v12 = vld [vmem:[%s10657_s6 + $0x60] sm:$0xff]  ;;  %v3643_v23 = vld [vmem:[%s10658_s7 + $0x10] sm:$0xff] }
 0x2a8   : > { %6795 = vtanh.f32 %v2105_v32  ;;  %2129 = vst [vmem:[#allocation4 + $0x20] sm:$0xff] %v2105_v32  ;;  %v2106_v33 = vadd.f32 %v2098_v36, %v2090_v60  ;;  %2165 = vrot.lane.b32.xlu1 %v8738_v41, %s7279_s1  ;;  %v6780_v0 = vpop.eup %6779  ;;  %3230 = vmatmul.mubr.f32.vlgmr.msra.gmra.mrb[16].mxu0 %v2637_v45  ;;  %v2647_v60 = vld [vmem:[%s10657_s6 + $0x50] sm:$0xff]  ;;  %v2650_v11 = vld [vmem:[%s10657_s6 + $0x68] sm:$0xff]  ;;  %v2652_v32 = vld [vmem:[%s10657_s6 + $0x78] sm:$0xff] }
 0x2a9   : > { %6797 = vtanh.f32 %v2107_v42  ;;  %2131 = vst [vmem:[#allocation4 + $0x30] sm:$0xff] %v2107_v42  ;;  %v2108_v39 = vadd.f32 %v2100_v26, %v2092_v4  ;;  %v6782_v54 = vpop.eup %6781  ;;  %3343 = vmatmul.mubr.f32.vlgmr.msra.gmra.mrb[16].mxu1 %v2637_v45  ;;  %6006 = vmatprep.mubr.msk.f32.mxu0 %vm1343_vm1, %v2640_v37  ;;  %v2651_v42 = vld [vmem:[%s10657_s6 + $0x70] sm:$0xff]  ;;  %v2142_v26 = vld [vmem:[%s10656_s5 + $0x8] sm:$0xff] }
 0x2aa   : > { %6799 = vtanh.f32 %v2106_v33  ;;  %2130 = vst [vmem:[#allocation4 + $0x28] sm:$0xff] %v2106_v33  ;;  %v6784_v40 = vpop.eup %6783  ;;  %6014 = vmatprep.mubr.msk.f32.mxu1 %vm1343_vm1, %v2640_v37  ;;  %v3645_v33 = vld [vmem:[%s10658_s7 + $0x20] sm:$0xff]  ;;  %v9057_v31 = vld [vmem:[#allocation7 + $0x8] sm:$0xff] }
 0x2ab   : > { %6801 = vtanh.f32 %v2108_v39  ;;  %2132 = vst [vmem:[#allocation4 + $0x38] sm:$0xff] %v2108_v39  ;;  %v6786_v61 = vpop.eup %6785  ;;  %v9059_v45 = vld [vmem:[#allocation7 + $0x28] sm:$0xff] }
 0x2ac   : > { %2205 = vrot.lane.b32.xlu1 %v8736_v29, %s7280_s10  ;;  %3236 = vmatmul.mubr.f32.gmra.mrb[18].mxu0 %v2639_v1 }
 0x2ad   : > { %v6788_v46 = vpop.eup %6787  ;;  %3349 = vmatmul.mubr.f32.gmra.mrb[18].mxu1 %v2639_v1  ;;  %6007 = vmatprep.mubr.msk.f32.mxu0 %vm1343_vm1, %v2642_v59 }
 0x2ae   : > { %v6790_v47 = vpop.eup %6789  ;;  %v8760_v17 = vmul.f32 %v6788_v46, %v6780_v0  ;;  %6015 = vmatprep.mubr.msk.f32.mxu1 %vm1343_vm1, %v2642_v59  ;;  %v3642_v46 = vld [vmem:[%s10658_s7 + $0x8] sm:$0xff]  ;;  %v9069_v59 = vld [vmem:[#allocation7 + $0x10] sm:$0xff] }
 0x2af   : > { %v6792_v3 = vpop.eup %6791  ;;  %v8762_v30 = vmul.f32 %v6790_v47, %v6782_v54  ;;  %v3647_v54 = vld [vmem:[%s10658_s7 + $0x30] sm:$0xff] }
 0x2b0   : > { %2213 = vrot.lane.b32.xlu1 %v8738_v41, %s7280_s10  ;;  %v6794_v55 = vpop.eup %6793  ;;  %2134 = vst [vmem:[#allocation3 + $0x8] sm:$0xff] %v8760_v17  ;;  %v8784_v24 = vmul.f32 %v10715_v15, %v8760_v17  ;;  %3242 = vmatmul.mubr.f32.gmra.mrb[20].mxu0 %v2641_v22  ;;  %v9045_v15 = vld [vmem:[#allocation7] sm:$0xff] }
 0x2b1   : > { %2136 = vst [vmem:[#allocation3 + $0x18] sm:$0xff] %v8762_v30  ;;  %v8797_v9 = vmul.f32 %v10717_v5, %v8762_v30  ;;  %3355 = vmatmul.mubr.f32.gmra.mrb[20].mxu1 %v2641_v22  ;;  %v9071_v22 = vld [vmem:[#allocation7 + $0x30] sm:$0xff] }
 0x2b2   : > { %v6796_v57 = vpop.eup %6795 }
 0x2b3   : > { %v6798_v2 = vpop.eup %6797  ;;  %v2121_v49 = vmul.f32 %v6796_v57, %v6784_v40  ;;  %v3646_v57 = vld [vmem:[%s10658_s7 + $0x28] sm:$0xff] }
 0x2b4   : > { %v6800_v51 = vpop.eup %6799  ;;  %v2123_v8 = vmul.f32 %v6798_v2, %v6786_v61  ;;  %2253 = vrot.lane.b32.xlu1 %v8736_v29, %s7281_s25 }
 0x2b5   : > { %v6802_v18 = vpop.eup %6801  ;;  %2137 = vst [vmem:[#allocation3 + $0x20] sm:$0xff] %v2121_v49  ;;  %v8770_v35 = vmul.f32 %v6800_v51, %v6792_v3  ;;  %2159 = vrot.lane.b32.xlu0 %v2121_v49, %s7279_s1  ;;  %v8774_v62 = vmul.f32 %v10713_v38, %v2121_v49  ;;  %v3644_v3 = vld [vmem:[%s10658_s7 + $0x18] sm:$0xff] }
 0x2b6   : > { %2139 = vst [vmem:[#allocation3 + $0x30] sm:$0xff] %v2123_v8  ;;  %v8776_v63 = vmul.f32 %v6802_v18, %v6794_v55  ;;  %v8779_v44 = vmul.f32 %v10714_v56, %v2123_v8  ;;  %v3648_v51 = vld [vmem:[%s10658_s7 + $0x38] sm:$0xff] }
 0x2b7   : > { %2138 = vst [vmem:[#allocation3 + $0x28] sm:$0xff] %v8770_v35  ;;  %v8788_v58 = vmul.f32 %v10716_v53, %v8770_v35  ;;  %v9047_v53 = vld [vmem:[#allocation7 + $0x20] sm:$0xff] }
 0x2b8   : > { %2140 = vst [vmem:[#allocation3 + $0x38] sm:$0xff] %v8776_v63  ;;  %2261 = vrot.lane.b32.xlu1 %v8738_v41, %s7281_s25  ;;  %v8801_v16 = vmul.f32 %v10718_v19, %v8776_v63 }
 0x2b9   : > { %2167 = vrot.lane.b32.xlu0 %v2123_v8, %s7279_s1 }
 0x2bc   : > { %2301 = vrot.lane.b32.xlu1 %v8736_v29, %s7282_s28 }
 0x2bd   : > { %2207 = vrot.lane.b32.xlu0 %v2121_v49, %s7280_s10 }
 0x2c0   : > { %2309 = vrot.lane.b32.xlu1 %v8738_v41, %s7282_s28 }
 0x2c1   : > { %2215 = vrot.lane.b32.xlu0 %v2123_v8, %s7280_s10 }
 0x2c4   : > { %2373 = vrot.lane.b32.xlu1 %v8736_v29, %s7283_s29 }
 0x2c5   : > { %2255 = vrot.lane.b32.xlu0 %v2121_v49, %s7281_s25 }
 0x2c8   : > { %2381 = vrot.lane.b32.xlu1 %v8738_v41, %s7283_s29 }
 0x2c9   : > { %2263 = vrot.lane.b32.xlu0 %v2123_v8, %s7281_s25 }
 0x2cc   : > { %2421 = vrot.lane.b32.xlu1 %v8736_v29, %s7284_s20 }
 0x2cd   : > { %2303 = vrot.lane.b32.xlu0 %v2121_v49, %s7282_s28 }
 0x2d0   : > { %2429 = vrot.lane.b32.xlu1 %v8738_v41, %s7284_s20 }
 0x2d1   : > { %2311 = vrot.lane.b32.xlu0 %v2123_v8, %s7282_s28 }
 0x2d4   : > { %2469 = vrot.lane.b32.xlu1 %v8736_v29, %s7285_s23 }
 0x2d5   : > { %2375 = vrot.lane.b32.xlu0 %v2121_v49, %s7283_s29 }
 0x2d8   : > { %2477 = vrot.lane.b32.xlu1 %v8738_v41, %s7285_s23 }
 0x2d9   : > { %2383 = vrot.lane.b32.xlu0 %v2123_v8, %s7283_s29 }
 0x2dc   : > { %2517 = vrot.lane.b32.xlu1 %v8736_v29, %s7286_s16  ;;  %v2644_v29 = vld [vmem:[%s10657_s6 + $0x38] sm:$0xff] }
 0x2dd   : > { %2423 = vrot.lane.b32.xlu0 %v2121_v49, %s7284_s20  ;;  %6008 = vmatprep.mubr.msk.f32.mxu0 %vm1343_vm1, %v2644_v29 }
 0x2de   : > { %6016 = vmatprep.mubr.msk.f32.mxu1 %vm1343_vm1, %v2644_v29  ;;  %3248 = vmatmul.mubr.f32.gmra.mrb[22].mxu0 %v2643_v7 }
 0x2df   : > { %3361 = vmatmul.mubr.f32.gmra.mrb[22].mxu1 %v2643_v7  ;;  %6009 = vmatprep.mubr.msk.f32.mxu0 %vm1343_vm1, %v2646_v43 }
 0x2e0   : > { %2525 = vrot.lane.b32.xlu1 %v8738_v41, %s7286_s16  ;;  %v2645_v41 = vld [vmem:[%s10657_s6 + $0x40] sm:$0xff]  ;;  %6017 = vmatprep.mubr.msk.f32.mxu1 %vm1343_vm1, %v2646_v43  ;;  %v9081_v43 = vld [vmem:[#allocation7 + $0x18] sm:$0xff] }
 0x2e1   : > { %2431 = vrot.lane.b32.xlu0 %v2123_v8, %s7284_s20 }
 0x2e2   : > { %3254 = vmatmul.mubr.f32.gmra.mrb[24].mxu0 %v2645_v41 }
 0x2e3   : > { %3367 = vmatmul.mubr.f32.gmra.mrb[24].mxu1 %v2645_v41  ;;  %6010 = vmatprep.mubr.msk.f32.mxu0 %vm1343_vm1, %v2648_v6  ;;  %v9083_v41 = vld [vmem:[#allocation7 + $0x38] sm:$0xff] }
 0x2e4   : > { %2161 = vrot.lane.b32.xlu1 %v8760_v17, %s7279_s1  ;;  %6018 = vmatprep.mubr.msk.f32.mxu1 %vm1343_vm1, %v2648_v6 }
 0x2e5   : > { %2471 = vrot.lane.b32.xlu0 %v2121_v49, %s7285_s23 }
 0x2e6   : > { %3260 = vmatmul.mubr.f32.gmra.mrb[26].mxu0 %v2647_v60 }
 0x2e7   : > { %3373 = vmatmul.mubr.f32.gmra.mrb[26].mxu1 %v2647_v60  ;;  %6011 = vmatprep.mubr.msk.f32.mxu0 %vm1343_vm1, %v2650_v11 }
 0x2e8   : > { %2169 = vrot.lane.b32.xlu1 %v8762_v30, %s7279_s1  ;;  %6019 = vmatprep.mubr.msk.f32.mxu1 %vm1343_vm1, %v2650_v11 }
 0x2e9   : > { %2479 = vrot.lane.b32.xlu0 %v2123_v8, %s7285_s23 }
 0x2ea   : > { %3266 = vmatmul.mubr.f32.gmra.mrb[28].mxu0 %v2649_v12 }
 0x2eb   : > { %3379 = vmatmul.mubr.f32.gmra.mrb[28].mxu1 %v2649_v12  ;;  %6012 = vmatprep.mubr.msk.f32.mxu0 %vm1343_vm1, %v2652_v32 }
 0x2ec   : > { %2209 = vrot.lane.b32.xlu1 %v8760_v17, %s7280_s10  ;;  %6020 = vmatprep.mubr.msk.f32.mxu1 %vm1343_vm1, %v2652_v32 }
 0x2ed   : > { %2519 = vrot.lane.b32.xlu0 %v2121_v49, %s7286_s16 }
 0x2ee   : > { %3272 = vmatmul.mubr.f32.gmra.mrb[30].mxu0 %v2651_v42 }
 0x2ef   : > { %3385 = vmatmul.mubr.f32.gmra.mrb[30].mxu1 %v2651_v42  ;;  %6021 = vmatprep.mubr.msk.f32.mxu0 %vm1343_vm1, %v2142_v26 }
 0x2f0   : > { %2217 = vrot.lane.b32.xlu1 %v8762_v30, %s7280_s10  ;;  %6029 = vmatprep.mubr.msk.f32.mxu1 %vm1343_vm1, %v2142_v26 }
 0x2f1   : > { %2527 = vrot.lane.b32.xlu0 %v2123_v8, %s7286_s16 }
 0x2f4   : > { %2257 = vrot.lane.b32.xlu1 %v8760_v17, %s7281_s25 }
 0x2f5   : > { %2163 = vrot.lane.b32.xlu0 %v8770_v35, %s7279_s1 }
 0x2f8   : > { %2265 = vrot.lane.b32.xlu1 %v8762_v30, %s7281_s25 }
 0x2f9   : > { %2171 = vrot.lane.b32.xlu0 %v8776_v63, %s7279_s1 }
 0x2fc   : > { %2305 = vrot.lane.b32.xlu1 %v8760_v17, %s7282_s28 }
 0x2fd   : > { %2211 = vrot.lane.b32.xlu0 %v8770_v35, %s7280_s10 }
 0x300   : > { %2313 = vrot.lane.b32.xlu1 %v8762_v30, %s7282_s28 }
 0x301   : > { %2219 = vrot.lane.b32.xlu0 %v8776_v63, %s7280_s10 }
 0x304   : > { %2377 = vrot.lane.b32.xlu1 %v8760_v17, %s7283_s29 }
 0x305   : > { %2259 = vrot.lane.b32.xlu0 %v8770_v35, %s7281_s25 }
 0x308   : > { %2385 = vrot.lane.b32.xlu1 %v8762_v30, %s7283_s29 }
 0x309   : > { %2267 = vrot.lane.b32.xlu0 %v8776_v63, %s7281_s25 }
 0x30c   : > { %2425 = vrot.lane.b32.xlu1 %v8760_v17, %s7284_s20 }
 0x30d   : > { %2307 = vrot.lane.b32.xlu0 %v8770_v35, %s7282_s28 }
 0x310   : > { %2433 = vrot.lane.b32.xlu1 %v8762_v30, %s7284_s20 }
 0x311   : > { %2315 = vrot.lane.b32.xlu0 %v8776_v63, %s7282_s28 }
 0x314   : > { %2473 = vrot.lane.b32.xlu1 %v8760_v17, %s7285_s23 }
 0x315   : > { %2379 = vrot.lane.b32.xlu0 %v8770_v35, %s7283_s29 }
 0x316   : > { %v8915_v14 = vpop.permute.xlu1 %2157 }
 0x318   : > { %2481 = vrot.lane.b32.xlu1 %v8762_v30, %s7285_s23 }
 0x319   : > { %2387 = vrot.lane.b32.xlu0 %v8776_v63, %s7283_s29 }
 0x31a   : > { %v8929_v27 = vpop.permute.xlu1 %2165 }
 0x31c   : > { %2521 = vrot.lane.b32.xlu1 %v8760_v17, %s7286_s16 }
 0x31d   : > { %2427 = vrot.lane.b32.xlu0 %v8770_v35, %s7284_s20 }
 0x31e   : > { %v8943_v52 = vpop.permute.xlu1 %2205 }
 0x320   : > { %2529 = vrot.lane.b32.xlu1 %v8762_v30, %s7286_s16 }
 0x321   : > { %2435 = vrot.lane.b32.xlu0 %v8776_v63, %s7284_s20 }
 0x322   : > { %v8960_v4 = vpop.permute.xlu1 %2213 }
 0x324   : > { %3651 = vperm.xlu1 %6674, %v3641_v25  }
 0x325   : > { %2475 = vrot.lane.b32.xlu0 %v8770_v35, %s7285_s23 }
 0x326   : > { %v8975_v36 = vpop.permute.xlu1 %2253 }
 0x327   : > { %v8982_v21 = vpop.permute.xlu0 %2159 }
 0x328   : > { %3661 = vperm.xlu1 %6674, %v3643_v23  }
 0x329   : > { %2483 = vrot.lane.b32.xlu0 %v8776_v63, %s7285_s23 }
 0x32a   : > { %v8994_v0 = vpop.permute.xlu1 %2261 }
 0x32b   : > { %v8996_v39 = vpop.permute.xlu0 %2167 }
 0x32c   : > { %3671 = vperm.xlu1 %6674, %v3645_v33  }
 0x32d   : > { %2523 = vrot.lane.b32.xlu0 %v8770_v35, %s7286_s16 }
 0x32e   : > { %v9003_v40 = vpop.permute.xlu1 %2301 }
 0x32f   : > { %v9005_v61 = vpop.permute.xlu0 %2207 }
 0x330   : > { %3681 = vperm.xlu1 %6674, %v3647_v54  }
 0x331   : > { %2531 = vrot.lane.b32.xlu0 %v8776_v63, %s7286_s16 }
 0x332   : > { %v9012_v47 = vpop.permute.xlu1 %2309 }
 0x333   : > { %v9014_v17 = vpop.permute.xlu0 %2215 }
 0x334   : > { %4457 = vrot.lane.b32.xlu1 %v9045_v15, %s7279_s1 }
 0x335   : > { %3656 = vperm.xlu0 %6673, %v3642_v46  }
 0x336   : > { %v9019_v30 = vpop.permute.xlu1 %2373 }
 0x337   : > { %v9021_v55 = vpop.permute.xlu0 %2255 }
 0x338   : > { %4461 = vrot.lane.b32.xlu1 %v9057_v31, %s7279_s1 }
 0x339   : > { %3666 = vperm.xlu0 %6673, %v3644_v3   ;;  %v7071_v3 = vld [vmem:[#allocation9 + $0x8] sm:$0xff] }
 0x33a   : > { %v9026_v2 = vpop.permute.xlu1 %2381 }
 0x33b   : > { %v9028_v49 = vpop.permute.xlu0 %2263 }
 0x33c   : > { %4465 = vrot.lane.b32.xlu1 %v9069_v59, %s7279_s1 }
 0x33d   : > { %3676 = vperm.xlu0 %6673, %v3646_v57  }
 0x33e   : > { %v9033_v8 = vpop.permute.xlu1 %2421 }
 0x33f   : > { %v9035_v18 = vpop.permute.xlu0 %2303 }
 0x340   : > { %4469 = vrot.lane.b32.xlu1 %v9081_v43, %s7279_s1 }
 0x341   : > { %3686 = vperm.xlu0 %6673, %v3648_v51  }
 0x342   : > { %v9037_v35 = vpop.permute.xlu1 %2429 }
 0x343   : > { %v9039_v38 = vpop.permute.xlu0 %2311 }
 0x344   : > { %4505 = vrot.lane.b32.xlu1 %v9045_v15, %s7280_s10 }
 0x345   : > { %4459 = vrot.lane.b32.xlu0 %v9047_v53, %s7279_s1 }
 0x346   : > { %v9041_v63 = vpop.permute.xlu1 %2469 }
 0x347   : > { %v9043_v56 = vpop.permute.xlu0 %2375 }
 0x348   : > { %4509 = vrot.lane.b32.xlu1 %v9057_v31, %s7280_s10 }
 0x349   : > { %4463 = vrot.lane.b32.xlu0 %v9059_v45, %s7279_s1 }
 0x34a   : > { %v9049_v5 = vpop.permute.xlu1 %2477 }
 0x34b   : > { %v9055_v19 = vpop.permute.xlu0 %2383 }
 0x34c   : > { %4513 = vrot.lane.b32.xlu1 %v9069_v59, %s7280_s10 }
 0x34d   : > { %4467 = vrot.lane.b32.xlu0 %v9071_v22, %s7279_s1 }
 0x34e   : > { %v9061_v37 = vpop.permute.xlu1 %2517 }
 0x34f   : > { %10719 = vst [vmem:[#allocation23_spill] sm:$0xff] %v9061_v37  ;;  %v9067_v1 = vpop.permute.xlu0 %2423 }
 0x350   : > { %4517 = vrot.lane.b32.xlu1 %v9081_v43, %s7280_s10 }
 0x351   : > { %4471 = vrot.lane.b32.xlu0 %v9083_v41, %s7279_s1 }
 0x352   : > { %v9073_v29 = vpop.permute.xlu1 %2525 }
 0x353   : > { %10720 = vst [vmem:[#allocation19_spill] sm:$0xff] %v9073_v29  ;;  %v9079_v7 = vpop.permute.xlu0 %2431  ;;  %v7075_v29 = vld [vmem:[#allocation9 + $0x18] sm:$0xff] }
 0x354   : > { %4553 = vrot.lane.b32.xlu1 %v9045_v15, %s7281_s25 }
 0x355   : > { %4507 = vrot.lane.b32.xlu0 %v9047_v53, %s7280_s10 }
 0x356   : > { %v2162_v6 = vpop.permute.xlu1 %2161 }
 0x357   : > { %v9089_v60 = vpop.permute.xlu0 %2471  ;;  %v2177_v26 = vsel %vm591_vm0, %v8915_v14, %v2162_v6 }
 0x358   : > { %10721 = vst [vmem:[#allocation22_spill] sm:$0xff] %v9089_v60  ;;  %v2190_v57 = vmul.f32 %v7071_v3, %v2177_v26  ;;  %v7073_v3 = vld [vmem:[#allocation9] sm:$0xff]  ;;  %4557 = vrot.lane.b32.xlu1 %v9057_v31, %s7281_s25 }
 0x359   : > { %4511 = vrot.lane.b32.xlu0 %v9059_v45, %s7280_s10 }
 0x35a   : > { %v2170_v25 = vpop.permute.xlu1 %2169 }
 0x35b   : > { %v9095_v11 = vpop.permute.xlu0 %2479  ;;  %v2179_v51 = vsel %vm591_vm0, %v2170_v25, %v8915_v14  ;;  %v2173_v28 = vsel %vm591_vm0, %v8929_v27, %v2170_v25  ;;  %v2175_v14 = vsel %vm591_vm0, %v2162_v6, %v8929_v27 }
 0x35c   : > { %10722 = vst [vmem:[#allocation17_spill] sm:$0xff] %v9095_v11  ;;  %v2192_v60 = vmul.f32 %v7075_v29, %v2173_v28  ;;  %4561 = vrot.lane.b32.xlu1 %v9069_v59, %s7281_s25 }
 0x35d   : > { %4515 = vrot.lane.b32.xlu0 %v9071_v22, %s7280_s10 }
 0x35e   : > { %v9097_v12 = vpop.permute.xlu1 %2209 }
 0x35f   : > { %v9103_v23 = vpop.permute.xlu0 %2519  ;;  %v2225_v27 = vsel %vm616_vm2, %v8943_v52, %v9097_v12 }
 0x360   : > { %10723 = vst [vmem:[#allocation18_spill] sm:$0xff] %v9103_v23  ;;  %4565 = vrot.lane.b32.xlu1 %v9081_v43, %s7281_s25 }
 0x361   : > { %4519 = vrot.lane.b32.xlu0 %v9083_v41, %s7280_s10 }
 0x362   : > { %v2218_v32 = vpop.permute.xlu1 %2217 }
 0x363   : > { %v9109_v42 = vpop.permute.xlu0 %2527 }
 0x364   : > { %10724 = vst [vmem:[#allocation20_spill] sm:$0xff] %v9109_v42  ;;  %4601 = vrot.lane.b32.xlu1 %v9045_v15, %s7282_s28 }
 0x365   : > { %4555 = vrot.lane.b32.xlu0 %v9047_v53, %s7281_s25 }
 0x366   : > { %v9114_v33 = vpop.permute.xlu1 %2257 }
 0x367   : > { %v2164_v54 = vpop.permute.xlu0 %2163 }
 0x368   : > { %v2178_v46 = vsel %vm591_vm0, %v8982_v21, %v2164_v54  ;;  %v2176_v20 = vsel %vm591_vm0, %v2164_v54, %v8996_v39  ;;  %4605 = vrot.lane.b32.xlu1 %v9057_v31, %s7282_s28 }
 0x369   : > { %v2194_v48 = vmul.f32 %v7072_v50, %v2178_v46  ;;  %v2189_v50 = vmul.f32 %v7073_v3, %v2179_v51  ;;  %v7074_v46 = vld [vmem:[#allocation9 + $0x30] sm:$0xff]  ;;  %4559 = vrot.lane.b32.xlu0 %v9059_v45, %s7281_s25 }
 0x36a   : > { %v9132_v23 = vpop.permute.xlu1 %2265  ;;  %v2195_v42 = vmul.f32 %v7074_v46, %v2176_v20  ;;  %v7078_v20 = vld [vmem:[#allocation9 + $0x10] sm:$0xff] }
 0x36b   : > { %v2172_v26 = vpop.permute.xlu0 %2171  ;;  %v6297_v54 = vpack.c.bf16 %v2194_v48, %v2190_v57  ;;  %v7076_v48 = vld [vmem:[#allocation9 + $0x20] sm:$0xff]  ;;  %v7077_v57 = vld [vmem:[#allocation9 + $0x38] sm:$0xff]  ;;  %v2191_v3 = vmul.f32 %v7078_v20, %v2175_v14  ;;  %v2227_v14 = vsel %vm616_vm2, %v2218_v32, %v8943_v52  ;;  %v2223_v52 = vsel %vm616_vm2, %v9097_v12, %v8960_v4 }
 0x36c   : > { %v2174_v25 = vsel %vm591_vm0, %v8996_v39, %v2172_v26  ;;  %v2180_v37 = vsel %vm591_vm0, %v2172_v26, %v8982_v21  ;;  %v7079_v26 = vld [vmem:[#allocation9 + $0x48] sm:$0xff]  ;;  %4609 = vrot.lane.b32.xlu1 %v9069_v59, %s7282_s28 }
 0x36d   : > { %v2193_v6 = vmul.f32 %v7076_v48, %v2180_v37  ;;  %v2196_v51 = vmul.f32 %v7077_v57, %v2174_v25  ;;  %6298 = vmatprep.subr.bf16.mxu0 %v6297_v54  ;;  %v6335_v29 = vpack.c.bf16 %v2195_v42, %v2191_v3  ;;  %v2238_v11 = vmul.f32 %v7079_v26, %v2225_v27  ;;  %v7080_v25 = vld [vmem:[#allocation9 + $0x68] sm:$0xff]  ;;  %v7086_v26 = vld [vmem:[#allocation9 + $0x50] sm:$0xff] }
 0x36e   : > { %v9151_v46 = vpop.permute.xlu1 %2305  ;;  %4563 = vrot.lane.b32.xlu0 %v9071_v22, %s7281_s25 }
 0x36f   : > { %v6299_v28 = vpack.c.bf16 %v2193_v6, %v2189_v50  ;;  %v2212_v21 = vpop.permute.xlu0 %2211  ;;  %v6333_v39 = vpack.c.bf16 %v2196_v51, %v2192_v60  ;;  %v2221_v60 = vsel %vm616_vm2, %v8960_v4, %v2218_v32  ;;  %v7081_v6 = vld [vmem:[#allocation9 + $0x40] sm:$0xff]  ;;  %v7082_v51 = vld [vmem:[#allocation9 + $0x70] sm:$0xff]  ;;  %v2273_v4 = vsel %vm642_vm3, %v8975_v36, %v9114_v33 }
 0x370   : > { %v2226_v37 = vsel %vm616_vm2, %v9005_v61, %v2212_v21  ;;  %v2224_v54 = vsel %vm616_vm2, %v2212_v21, %v9014_v17  ;;  %v2237_v57 = vmul.f32 %v7081_v6, %v2227_v14  ;;  %v7088_v6 = vld [vmem:[#allocation9 + $0xa8] sm:$0xff]  ;;  %4613 = vrot.lane.b32.xlu1 %v9081_v43, %s7282_s28 }
 0x371   : > { %v2242_v48 = vmul.f32 %v7080_v25, %v2226_v37  ;;  %6300 = vmatpush1.bf16.msra.mxu0 %v6299_v28  ;;  %6334 = vmatprep.subr.bf16.mxu1 %v6333_v39  ;;  %v2243_v32 = vmul.f32 %v7082_v51, %v2224_v54  ;;  %v7083_v28 = vld [vmem:[#allocation9 + $0x58] sm:$0xff]  ;;  %v2239_v37 = vmul.f32 %v7086_v26, %v2223_v52 }
 0x372   : > { %6336 = vmatpush1.bf16.msra.mxu1 %v6335_v29  ;;  %v9169_v42 = vpop.permute.xlu1 %2313  ;;  %v2240_v21 = vmul.f32 %v7083_v28, %v2221_v60  ;;  %v7085_v39 = vld [vmem:[#allocation9 + $0x78] sm:$0xff]  ;;  %4567 = vrot.lane.b32.xlu0 %v9083_v41, %s7281_s25  ;;  %v2275_v52 = vsel %vm642_vm3, %v9132_v23, %v8975_v36  ;;  %v2269_v51 = vsel %vm642_vm3, %v8994_v0, %v9132_v23  ;;  %v7089_v28 = vld [vmem:[#allocation9 + $0x80] sm:$0xff] }
 0x373   : > { %v2220_v50 = vpop.permute.xlu0 %2219  ;;  %v6301_v27 = vpack.c.bf16 %v2242_v48, %v2238_v11  ;;  %v7084_v11 = vld [vmem:[#allocation9 + $0x60] sm:$0xff]  ;;  %v6339_v25 = vpack.c.bf16 %v2243_v32, %v2239_v37  ;;  %v7087_v48 = vld [vmem:[#allocation9 + $0x88] sm:$0xff]  ;;  %v2271_v36 = vsel %vm642_vm3, %v9114_v33, %v8994_v0  ;;  %v7091_v0 = vld [vmem:[#allocation9 + $0x98] sm:$0xff] }
 0x374   : > { %v2222_v20 = vsel %vm616_vm2, %v9014_v17, %v2220_v50  ;;  %v2228_v3 = vsel %vm616_vm2, %v2220_v50, %v9005_v61  ;;  %v2286_v60 = vmul.f32 %v7087_v48, %v2273_v4  ;;  %v7090_v4 = vld [vmem:[#allocation9 + $0xb0] sm:$0xff]  ;;  %v2288_v33 = vmul.f32 %v7091_v0, %v2269_v51  ;;  %v7093_v37 = vld [vmem:[#allocation9 + $0xb8] sm:$0xff]  ;;  %4673 = vrot.lane.b32.xlu1 %v9045_v15, %s7283_s29 }
 0x375   : > { %v2241_v12 = vmul.f32 %v7084_v11, %v2228_v3  ;;  %v2244_v29 = vmul.f32 %v7085_v39, %v2222_v20  ;;  %6302 = vmatprep.subr.bf16.mxu0 %v6301_v27  ;;  %v2321_v39 = vsel %vm668_vm4, %v9003_v40, %v9151_v46  ;;  %v7099_v0 = vld [vmem:[#allocation9 + $0xd8] sm:$0xff] }
 0x376   : > { %v9189_v14 = vpop.permute.xlu1 %2377  ;;  %4603 = vrot.lane.b32.xlu0 %v9047_v53, %s7282_s28 }
 0x377   : > { %v6303_v61 = vpack.c.bf16 %v2241_v12, %v2237_v57  ;;  %v2260_v17 = vpop.permute.xlu0 %2259  ;;  %v6337_v54 = vpack.c.bf16 %v2244_v29, %v2240_v21  ;;  %v2285_v21 = vmul.f32 %v7089_v28, %v2275_v52  ;;  %v7092_v29 = vld [vmem:[#allocation9 + $0xa0] sm:$0xff] }
 0x378   : > { %v2274_v50 = vsel %vm642_vm3, %v9021_v55, %v2260_v17  ;;  %v2272_v27 = vsel %vm642_vm3, %v2260_v17, %v9028_v49  ;;  %v7094_v17 = vld [vmem:[#allocation9 + $0x90] sm:$0xff]  ;;  %4677 = vrot.lane.b32.xlu1 %v9057_v31, %s7283_s29 }
 0x379   : > { %v2290_v57 = vmul.f32 %v7088_v6, %v2274_v50  ;;  %6304 = vmatpush1.bf16.msra.mxu0 %v6303_v61  ;;  %6338 = vmatprep.subr.bf16.mxu1 %v6337_v54  ;;  %v2291_v23 = vmul.f32 %v7090_v4, %v2272_v27  ;;  %v2287_v54 = vmul.f32 %v7094_v17, %v2271_v36 }
 0x37a   : > { %6340 = vmatpush1.bf16.msra.mxu1 %v6339_v25  ;;  %v9215_v3 = vpop.permute.xlu1 %2385  ;;  %4607 = vrot.lane.b32.xlu0 %v9059_v45, %s7282_s28  ;;  %v2323_v27 = vsel %vm668_vm4, %v9169_v42, %v9003_v40  ;;  %v2319_v40 = vsel %vm668_vm4, %v9151_v46, %v9012_v47  ;;  %v7100_v46 = vld [vmem:[#allocation9 + $0xe0] sm:$0xff] }
 0x37b   : > { %v2268_v32 = vpop.permute.xlu0 %2267  ;;  %v6305_v20 = vpack.c.bf16 %v2290_v57, %v2286_v60  ;;  %v6343_v48 = vpack.c.bf16 %v2291_v23, %v2287_v54  ;;  %v7095_v60 = vld [vmem:[#allocation9 + $0xc8] sm:$0xff]  ;;  %v7098_v23 = vld [vmem:[#allocation9 + $0xf0] sm:$0xff] }
 0x37c   : > { %v2270_v11 = vsel %vm642_vm3, %v9028_v49, %v2268_v32  ;;  %v2276_v12 = vsel %vm642_vm3, %v2268_v32, %v9021_v55  ;;  %v2334_v50 = vmul.f32 %v7095_v60, %v2321_v39  ;;  %v7096_v57 = vld [vmem:[#allocation9 + $0xe8] sm:$0xff]  ;;  %v2317_v32 = vsel %vm668_vm4, %v9012_v47, %v9169_v42  ;;  %4681 = vrot.lane.b32.xlu1 %v9069_v59, %s7283_s29 }
 0x37d   : > { %v2289_v26 = vmul.f32 %v7092_v29, %v2276_v12  ;;  %v2292_v61 = vmul.f32 %v7093_v37, %v2270_v11  ;;  %6306 = vmatprep.subr.bf16.mxu0 %v6305_v20  ;;  %v2391_v47 = vsel %vm707_vm5, %v9189_v14, %v9026_v2  ;;  %v7101_v29 = vld [vmem:[#allocation9 + $0xf8] sm:$0xff]  ;;  %v7102_v37 = vld [vmem:[#allocation9 + $0xd0] sm:$0xff] }
 0x37e   : > { %v9243_v36 = vpop.permute.xlu1 %2425  ;;  %4611 = vrot.lane.b32.xlu0 %v9071_v22, %s7282_s28 }
 0x37f   : > { %v6307_v49 = vpack.c.bf16 %v2289_v26, %v2285_v21  ;;  %v2308_v25 = vpop.permute.xlu0 %2307  ;;  %v6341_v55 = vpack.c.bf16 %v2292_v61, %v2288_v33  ;;  %v7097_v21 = vld [vmem:[#allocation9 + $0xc0] sm:$0xff]  ;;  %v2336_v33 = vmul.f32 %v7099_v0, %v2317_v32  ;;  %v2335_v61 = vmul.f32 %v7102_v37, %v2319_v40 }
 0x380   : > { %v2322_v52 = vsel %vm668_vm4, %v9035_v18, %v2308_v25  ;;  %v2320_v6 = vsel %vm668_vm4, %v2308_v25, %v9039_v38  ;;  %v2333_v4 = vmul.f32 %v7097_v21, %v2323_v27  ;;  %v7104_v27 = vld [vmem:[#allocation9 + $0x168] sm:$0xff]  ;;  %v7106_v40 = vld [vmem:[#allocation9 + $0x160] sm:$0xff]  ;;  %v10727_v0 = vpack.c.bf16 %v8774_v62, %v8746_v34  ;;  %4685 = vrot.lane.b32.xlu1 %v9081_v43, %s7283_s29 }
 0x381   : > { %v2338_v51 = vmul.f32 %v7096_v57, %v2322_v52  ;;  %6308 = vmatpush1.bf16.msra.mxu0 %v6307_v49  ;;  %6342 = vmatprep.subr.bf16.mxu1 %v6341_v55  ;;  %v2339_v11 = vmul.f32 %v7098_v23, %v2320_v6  ;;  %v7103_v55 = vld [vmem:[#allocation9 + $0x148] sm:$0xff]  ;;  %v2395_v52 = vsel %vm707_vm5, %v9215_v3, %v9019_v30  ;;  %v7111_v34 = vld [vmem:[#allocation9 + $0x180] sm:$0xff] }
 0x382   : > { %6344 = vmatpush1.bf16.msra.mxu1 %v6343_v48  ;;  %v2434_v49 = vpop.permute.xlu1 %2433  ;;  %4615 = vrot.lane.b32.xlu0 %v9083_v41, %s7282_s28  ;;  %v2406_v48 = vmul.f32 %v7103_v55, %v2391_v47  ;;  %v10725_v57 = vpack.c.bf16 %v8788_v58, %v8784_v24 }
 0x383   : > { %v2316_v20 = vpop.permute.xlu0 %2315  ;;  %v6309_v28 = vpack.c.bf16 %v2338_v51, %v2334_v50  ;;  %v6347_v25 = vpack.c.bf16 %v2339_v11, %v2335_v61  ;;  %v7105_v51 = vld [vmem:[#allocation9 + $0x140] sm:$0xff] }
 0x384   : > { %v2318_v42 = vsel %vm668_vm4, %v9039_v38, %v2316_v20  ;;  %v2324_v12 = vsel %vm668_vm4, %v2316_v20, %v9035_v18  ;;  %v2393_v18 = vsel %vm707_vm5, %v9019_v30, %v9189_v14  ;;  %v2389_v14 = vsel %vm707_vm5, %v9026_v2, %v9215_v3  ;;  %v7107_v30 = vld [vmem:[#allocation9 + $0x150] sm:$0xff]  ;;  %4721 = vrot.lane.b32.xlu1 %v9045_v15, %s7284_s20 }
 0x385   : > { %v2337_v39 = vmul.f32 %v7100_v46, %v2324_v12  ;;  %v2340_v26 = vmul.f32 %v7101_v29, %v2318_v42  ;;  %6310 = vmatprep.subr.bf16.mxu0 %v6309_v28  ;;  %v2405_v32 = vmul.f32 %v7105_v51, %v2393_v18  ;;  %v10726_v2 = vpack.c.bf16 %v8801_v16, %v8797_v9  ;;  %v7109_v16 = vld [vmem:[#allocation9 + $0x170] sm:$0xff]  ;;  %v7110_v42 = vld [vmem:[#allocation9 + $0x178] sm:$0xff]  ;;  %v7114_v18 = vld [vmem:[#allocation9 + $0x1a8] sm:$0xff] }
 0x386   : > { %v2407_v3 = vmul.f32 %v7107_v30, %v2389_v14  ;;  %v2441_v9 = vsel %vm733_vm6, %v9033_v8, %v9243_v36  ;;  %4675 = vrot.lane.b32.xlu0 %v9047_v53, %s7283_s29  ;;  %v7116_v14 = vld [vmem:[#allocation9 + $0x198] sm:$0xff] }
 0x387   : > { %v6311_v38 = vpack.c.bf16 %v2337_v39, %v2333_v4  ;;  %v2380_v17 = vpop.permute.xlu0 %2379  ;;  %v6345_v54 = vpack.c.bf16 %v2340_v26, %v2336_v33  ;;  %v7108_v4 = vld [vmem:[#allocation9 + $0x158] sm:$0xff]  ;;  %v10728_v33 = vpack.c.bf16 %v8779_v44, %v8752_v13  ;;  %v2453_v62 = vmul.f32 %v7111_v34, %v2441_v9  ;;  %v7113_v44 = vld [vmem:[#allocation9 + $0x1a0] sm:$0xff]  ;;  %v7125_v34 = vld [vmem:[#allocation9 + $0x1f0] sm:$0xff] }
 0x388   : > { %v2392_v60 = vsel %vm707_vm5, %v2380_v17, %v9055_v19  ;;  %v2394_v50 = vsel %vm707_vm5, %v9043_v56, %v2380_v17  ;;  %v2408_v23 = vmul.f32 %v7108_v4, %v2395_v52  ;;  %v2437_v17 = vsel %vm733_vm6, %v9037_v35, %v2434_v49  ;;  %4725 = vrot.lane.b32.xlu1 %v9057_v31, %s7284_s20 }
 0x389   : > { %v2410_v6 = vmul.f32 %v7104_v27, %v2392_v60  ;;  %6312 = vmatpush1.bf16.msra.mxu0 %v6311_v38  ;;  %6346 = vmatprep.subr.bf16.mxu1 %v6345_v54  ;;  %v2409_v20 = vmul.f32 %v7106_v40, %v2394_v50  ;;  %v2443_v54 = vsel %vm733_vm6, %v2434_v49, %v9033_v8  ;;  %v7115_v8 = vld [vmem:[#allocation9 + $0x190] sm:$0xff] }
 0x38a   : > { %6314 = vmatprep.subr.bf16.mxu0 %v10725_v57  ;;  %6348 = vmatpush1.bf16.msra.mxu1 %v6347_v25  ;;  %v2455_v49 = vmul.f32 %v7115_v8, %v2437_v17  ;;  %v2456_v52 = vmul.f32 %v7116_v14, %v2443_v54  ;;  %v7117_v27 = vld [vmem:[#allocation9 + $0x1b0] sm:$0xff]  ;;  %v7118_v57 = vld [vmem:[#allocation9 + $0x1b8] sm:$0xff]  ;;  %v7128_v8 = vld [vmem:[#allocation9 + $0x208] sm:$0xff] }
 0x38b   : > { %6350 = vmatprep.subr.bf16.mxu1 %v10726_v2  ;;  %v2388_v28 = vpop.permute.xlu0 %2387  ;;  %v6317_v21 = vpack.c.bf16 %v2410_v6, %v2406_v48  ;;  %v6319_v47 = vpack.c.bf16 %v2409_v20, %v2405_v32  ;;  %4679 = vrot.lane.b32.xlu0 %v9059_v45, %s7283_s29  ;;  %v10729_v2 = vld [vmem:[#allocation17_spill] sm:$0xff] }
 0x38c   : > { %v2390_v24 = vsel %vm707_vm5, %v9055_v19, %v2388_v28  ;;  %v2396_v58 = vsel %vm707_vm5, %v2388_v28, %v9043_v56  ;;  %v2474_v19 = vpop.permute.xlu1 %2473  ;;  %v2439_v56 = vsel %vm733_vm6, %v9243_v36, %v9037_v35  ;;  %v7112_v36 = vld [vmem:[#allocation9 + $0x188] sm:$0xff]  ;;  %v7129_v14 = vld [vmem:[#allocation9 + $0x220] sm:$0xff]  ;;  %4729 = vrot.lane.b32.xlu1 %v9069_v59, %s7284_s20 }
 0x38d   : > { %v2411_v11 = vmul.f32 %v7109_v16, %v2390_v24  ;;  %v2412_v12 = vmul.f32 %v7110_v42, %v2396_v58  ;;  %6316 = vmatpush1.bf16.msra.mxu0 %v10727_v0  ;;  %v2454_v13 = vmul.f32 %v7112_v36, %v2439_v56  ;;  %v7121_v58 = vld [vmem:[#allocation9 + $0x1e0] sm:$0xff]  ;;  %v7122_v16 = vld [vmem:[#allocation9 + $0x1e8] sm:$0xff]  ;;  %v10731_v36 = vld [vmem:[#allocation19_spill] sm:$0xff] }
 0x38e   : > { %6318 = vmatprep.subr.bf16.mxu0 %v6317_v21  ;;  %6352 = vmatpush1.bf16.msra.mxu1 %v10728_v33  ;;  %v10730_v21 = vld [vmem:[#allocation22_spill] sm:$0xff] }
 0x38f   : > { %v6355_v46 = vpack.c.bf16 %v2411_v11, %v2407_v3  ;;  %v2428_v39 = vpop.permute.xlu0 %2427  ;;  %v6353_v29 = vpack.c.bf16 %v2412_v12, %v2408_v23  ;;  %4683 = vrot.lane.b32.xlu0 %v9071_v22, %s7283_s29  ;;  %v7119_v3 = vld [vmem:[#allocation9 + $0x1c0] sm:$0xff]  ;;  %v7120_v23 = vld [vmem:[#allocation9 + $0x1c8] sm:$0xff] }
 0x390   : > { %v2440_v26 = vsel %vm733_vm6, %v2428_v39, %v9079_v7  ;;  %v2442_v37 = vsel %vm733_vm6, %v9067_v1, %v2428_v39  ;;  %v2482_v60 = vpop.permute.xlu1 %2481  ;;  %v7124_v39 = vld [vmem:[#allocation9 + $0x1d8] sm:$0xff]  ;;  %4733 = vrot.lane.b32.xlu1 %v9081_v43, %s7284_s20 }
 0x391   : > { %v2457_v61 = vmul.f32 %v7113_v44, %v2442_v37  ;;  %v2458_v38 = vmul.f32 %v7114_v18, %v2440_v26  ;;  %6320 = vmatpush1.bf16.msra.mxu0 %v6319_v47  ;;  %6354 = vmatprep.subr.bf16.mxu1 %v6353_v29  ;;  %v2485_v12 = vsel %vm759_vm7, %v9049_v5, %v2482_v60  ;;  %v7126_v26 = vld [vmem:[#allocation9 + $0x1f8] sm:$0xff]  ;;  %v10732_v44 = vld [vmem:[#allocation23_spill] sm:$0xff] }
 0x392   : > { %6356 = vmatpush1.bf16.msra.mxu1 %v6355_v46  ;;  %v2491_v0 = vsel %vm759_vm7, %v2482_v60, %v9041_v63 }
 0x393   : > { %v6323_v25 = vpack.c.bf16 %v2457_v61, %v2453_v62  ;;  %v2436_v55 = vpop.permute.xlu0 %2435  ;;  %v6321_v48 = vpack.c.bf16 %v2458_v38, %v2454_v13  ;;  %4687 = vrot.lane.b32.xlu0 %v9083_v41, %s7283_s29  ;;  %v2504_v29 = vmul.f32 %v7124_v39, %v2491_v0  ;;  %v2145_v0 = vld [vmem:[%s10656_s5 + $0x20] sm:$0xff] }
 0x394   : > { %v2438_v50 = vsel %vm733_vm6, %v9079_v7, %v2436_v55  ;;  %v2444_v35 = vsel %vm733_vm6, %v2436_v55, %v9067_v1  ;;  %v2487_v7 = vsel %vm759_vm7, %v2474_v19, %v9049_v5  ;;  %v2489_v1 = vsel %vm759_vm7, %v9041_v63, %v2474_v19  ;;  %v2522_v42 = vpop.permute.xlu1 %2521  ;;  %v7123_v5 = vld [vmem:[#allocation9 + $0x1d0] sm:$0xff]  ;;  %4769 = vrot.lane.b32.xlu1 %v9045_v15, %s7285_s23  ;;  %v2153_v39 = vld [vmem:[%s10656_s5 + $0x60] sm:$0xff] }
 0x395   : > { %v2459_v6 = vmul.f32 %v7117_v27, %v2438_v50  ;;  %v2460_v51 = vmul.f32 %v7118_v57, %v2444_v35  ;;  %6322 = vmatprep.subr.bf16.mxu0 %v6321_v48  ;;  %v2501_v4 = vmul.f32 %v7119_v3, %v2489_v1  ;;  %v2502_v24 = vmul.f32 %v7120_v23, %v2487_v7  ;;  %v10734_v48 = vld [vmem:[#allocation18_spill] sm:$0xff]  ;;  %v7127_v50 = vld [vmem:[#allocation9 + $0x200] sm:$0xff]  ;;  %v7133_v3 = vld [vmem:[#allocation9 + $0x230] sm:$0xff] }
 0x396   : > { %6324 = vmatpush1.bf16.msra.mxu0 %v6323_v25  ;;  %v2503_v63 = vmul.f32 %v7123_v5, %v2485_v12  ;;  %v2535_v13 = vsel %vm785_vm8, %v2522_v42, %v10731_v36  ;;  %v2537_v61 = vsel %vm785_vm8, %v10732_v44, %v2522_v42  ;;  %v10733_v25 = vld [vmem:[#allocation20_spill] sm:$0xff]  ;;  %v7130_v27 = vld [vmem:[#allocation9 + $0x228] sm:$0xff]  ;;  %v2143_v42 = vld [vmem:[%s10656_s5 + $0x10] sm:$0xff] }
 0x397   : > { %v6359_v32 = vpack.c.bf16 %v2459_v6, %v2455_v49  ;;  %v2476_v40 = vpop.permute.xlu0 %2475  ;;  %v6357_v20 = vpack.c.bf16 %v2460_v51, %v2456_v52  ;;  %4723 = vrot.lane.b32.xlu0 %v9047_v53, %s7284_s20  ;;  %v2549_v35 = vmul.f32 %v7127_v50, %v2537_v61  ;;  %v2550_v49 = vmul.f32 %v7128_v8, %v2535_v13  ;;  %v7134_v23 = vld [vmem:[#allocation9 + $0x238] sm:$0xff]  ;;  %v2146_v12 = vld [vmem:[%s10656_s5 + $0x28] sm:$0xff]  ;;  %v2151_v5 = vld [vmem:[%s10656_s5 + $0x50] sm:$0xff] }
 0x398   : > { %v2488_v28 = vsel %vm759_vm7, %v2476_v40, %v10729_v2  ;;  %v2490_v30 = vsel %vm759_vm7, %v10730_v21, %v2476_v40  ;;  %v2530_v38 = vpop.permute.xlu1 %2529  ;;  %4773 = vrot.lane.b32.xlu1 %v9057_v31, %s7285_s23  ;;  %v4482_v61 = vld [vmem:[#allocation9 + $0x8] sm:$0xff] }
 0x399   : > { %v2505_v9 = vmul.f32 %v7121_v58, %v2490_v30  ;;  %v2506_v11 = vmul.f32 %v7122_v16, %v2488_v28  ;;  %6358 = vmatprep.subr.bf16.mxu1 %v6357_v20  ;;  %v2533_v57 = vsel %vm785_vm8, %v10731_v36, %v2530_v38  ;;  %v2539_v51 = vsel %vm785_vm8, %v2530_v38, %v10732_v44  ;;  %v2141_v58 = vld [vmem:[%s10656_s5] sm:$0xff]  ;;  %v4486_v38 = vld [vmem:[#allocation9 + $0x28] sm:$0xff] }
 0x39a   : > { %6360 = vmatpush1.bf16.msra.mxu1 %v6359_v32 }
 0x39b   : > { %v6327_v19 = vpack.c.bf16 %v2505_v9, %v2501_v4  ;;  %v2484_v56 = vpop.permute.xlu0 %2483  ;;  %v6325_v33 = vpack.c.bf16 %v2506_v11, %v2502_v24  ;;  %4727 = vrot.lane.b32.xlu0 %v9059_v45, %s7284_s20  ;;  %v2144_v11 = vld [vmem:[%s10656_s5 + $0x18] sm:$0xff] }
 0x39c   : > { %v2486_v47 = vsel %vm759_vm7, %v10729_v2, %v2484_v56  ;;  %v2492_v46 = vsel %vm759_vm7, %v2484_v56, %v10730_v21  ;;  %v7131_v2 = vld [vmem:[#allocation9 + $0x210] sm:$0xff]  ;;  %v7132_v21 = vld [vmem:[#allocation9 + $0x218] sm:$0xff]  ;;  %4777 = vrot.lane.b32.xlu1 %v9069_v59, %s7285_s23 }
 0x39d   : > { %v2507_v62 = vmul.f32 %v7125_v34, %v2486_v47  ;;  %v2508_v37 = vmul.f32 %v7126_v26, %v2492_v46  ;;  %6326 = vmatprep.subr.bf16.mxu0 %v6325_v33  ;;  %v2551_v28 = vmul.f32 %v7131_v2, %v2533_v57  ;;  %v2552_v30 = vmul.f32 %v7132_v21, %v2539_v51  ;;  %v2147_v56 = vld [vmem:[%s10656_s5 + $0x30] sm:$0xff]  ;;  %v2150_v33 = vld [vmem:[%s10656_s5 + $0x48] sm:$0xff]  ;;  %v2149_v47 = vld [vmem:[%s10656_s5 + $0x40] sm:$0xff] }
 0x39e   : > { %6328 = vmatpush1.bf16.msra.mxu0 %v6327_v19  ;;  %v2148_v19 = vld [vmem:[%s10656_s5 + $0x38] sm:$0xff]  ;;  %v4487_v2 = vld [vmem:[#allocation9 + $0x30] sm:$0xff] }
 0x39f   : > { %v6363_v18 = vpack.c.bf16 %v2507_v62, %v2503_v63  ;;  %v2524_v17 = vpop.permute.xlu0 %2523  ;;  %v6361_v54 = vpack.c.bf16 %v2508_v37, %v2504_v29  ;;  %4731 = vrot.lane.b32.xlu0 %v9071_v22, %s7284_s20  ;;  %v2152_v46 = vld [vmem:[%s10656_s5 + $0x58] sm:$0xff]  ;;  %v2154_v63 = vld [vmem:[%s10656_s5 + $0x68] sm:$0xff] }
 0x3a0   : > { %v2536_v55 = vsel %vm785_vm8, %v2524_v17, %v10733_v25  ;;  %v2538_v60 = vsel %vm785_vm8, %v10734_v48, %v2524_v17  ;;  %4781 = vrot.lane.b32.xlu1 %v9081_v43, %s7285_s23  ;;  %v2156_v29 = vld [vmem:[%s10656_s5 + $0x78] sm:$0xff] }
 0x3a1   : > { %v2553_v52 = vmul.f32 %v7129_v14, %v2538_v60  ;;  %v2554_v6 = vmul.f32 %v7130_v27, %v2536_v55  ;;  %6362 = vmatprep.subr.bf16.mxu1 %v6361_v54  ;;  %v4481_v60 = vld [vmem:[#allocation9] sm:$0xff]  ;;  %v4484_v27 = vld [vmem:[#allocation9 + $0x18] sm:$0xff] }
 0x3a2   : > { %6364 = vmatpush1.bf16.msra.mxu1 %v6363_v18  ;;  %v4488_v57 = vld [vmem:[#allocation9 + $0x38] sm:$0xff] }
 0x3a3   : > { %v6331_v7 = vpack.c.bf16 %v2553_v52, %v2549_v35  ;;  %v2532_v1 = vpop.permute.xlu0 %2531  ;;  %v6329_v32 = vpack.c.bf16 %v2554_v6, %v2550_v49  ;;  %4735 = vrot.lane.b32.xlu0 %v9083_v41, %s7284_s20  ;;  %v4485_v35 = vld [vmem:[#allocation9 + $0x20] sm:$0xff] }
 0x3a4   : > { %v2534_v40 = vsel %vm785_vm8, %v10733_v25, %v2532_v1  ;;  %v2540_v20 = vsel %vm785_vm8, %v2532_v1, %v10734_v48  ;;  %4817 = vrot.lane.b32.xlu1 %v9045_v15, %s7286_s16  ;;  %v2155_v15 = vld [vmem:[%s10656_s5 + $0x70] sm:$0xff] }
 0x3a5   : > { %v2555_v4 = vmul.f32 %v7133_v3, %v2534_v40  ;;  %v2556_v24 = vmul.f32 %v7134_v23, %v2540_v20  ;;  %6330 = vmatprep.subr.bf16.mxu0 %v6329_v32  ;;  %v4483_v40 = vld [vmem:[#allocation9 + $0x10] sm:$0xff] }
 0x3a6   : > { %6332 = vmatpush1.bf16.msra.mxu0 %v6331_v7 }
 0x3a7   : > { %v6367_v9 = vpack.c.bf16 %v2555_v4, %v2551_v28  ;;  %v6365_v16 = vpack.c.bf16 %v2556_v24, %v2552_v30  ;;  %4771 = vrot.lane.b32.xlu0 %v9047_v53, %s7285_s23 }
 0x3a8   : > { %4821 = vrot.lane.b32.xlu1 %v9057_v31, %s7286_s16 }
 0x3a9   : > { %3480 = vmatmul.mubr.f32.vlgmr.msra.gmra.mrb[16].mxu0 %v2141_v58  ;;  %6366 = vmatprep.subr.bf16.mxu1 %v6365_v16 }
 0x3aa   : > { %6368 = vmatpush1.bf16.msra.mxu1 %v6367_v9  ;;  %6022 = vmatprep.mubr.msk.f32.mxu0 %vm1343_vm1, %v2144_v11 }
 0x3ab   : > { %4775 = vrot.lane.b32.xlu0 %v9059_v45, %s7285_s23 }
 0x3ac   : > { %4825 = vrot.lane.b32.xlu1 %v9069_v59, %s7286_s16 }
 0x3ad   : > { %3486 = vmatmul.mubr.f32.gmra.mrb[18].mxu0 %v2143_v42  ;;  %3593 = vmatmul.mubr.f32.vlgmr.msra.gmra.mrb[16].mxu1 %v2141_v58 }
 0x3ae   : > { %6023 = vmatprep.mubr.msk.f32.mxu0 %vm1343_vm1, %v2146_v12  ;;  %6030 = vmatprep.mubr.msk.f32.mxu1 %vm1343_vm1, %v2144_v11 }
 0x3af   : > { %4779 = vrot.lane.b32.xlu0 %v9071_v22, %s7285_s23 }
 0x3b0   : > { %4829 = vrot.lane.b32.xlu1 %v9081_v43, %s7286_s16 }
 0x3b1   : > { %3492 = vmatmul.mubr.f32.gmra.mrb[20].mxu0 %v2145_v0  ;;  %3599 = vmatmul.mubr.f32.gmra.mrb[18].mxu1 %v2143_v42  ;;  %v4530_v42 = vld [vmem:[#allocation9 + $0x48] sm:$0xff] }
 0x3b2   : > { %6031 = vmatprep.mubr.msk.f32.mxu1 %vm1343_vm1, %v2146_v12  ;;  %6024 = vmatprep.mubr.msk.f32.mxu0 %vm1343_vm1, %v2148_v19 }
 0x3b3   : > { %4783 = vrot.lane.b32.xlu0 %v9083_v41, %s7285_s23 }
 0x3b4   : > { %v9506_v31 = vpop.permute.xlu0 %3656 }
 0x3b5   : > { %3498 = vmatmul.mubr.f32.gmra.mrb[22].mxu0 %v2147_v56  ;;  %3605 = vmatmul.mubr.f32.gmra.mrb[20].mxu1 %v2145_v0  ;;  %v4534_v0 = vld [vmem:[#allocation9 + $0x68] sm:$0xff] }
 0x3b6   : > { %6032 = vmatprep.mubr.msk.f32.mxu1 %vm1343_vm1, %v2148_v19  ;;  %6025 = vmatprep.mubr.msk.f32.mxu0 %vm1343_vm1, %v2150_v33 }
 0x3b7   : > { %4819 = vrot.lane.b32.xlu0 %v9047_v53, %s7286_s16  ;;  %v9504_v53 = vpop.permute.xlu1 %3651 }
 0x3b8   : > { %v9510_v59 = vpop.permute.xlu0 %3666 }
 0x3b9   : > { %3504 = vmatmul.mubr.f32.gmra.mrb[24].mxu0 %v2149_v47  ;;  %3611 = vmatmul.mubr.f32.gmra.mrb[22].mxu1 %v2147_v56 }
 0x3ba   : > { %6033 = vmatprep.mubr.msk.f32.mxu1 %vm1343_vm1, %v2150_v33  ;;  %6026 = vmatprep.mubr.msk.f32.mxu0 %vm1343_vm1, %v2152_v46 }
 0x3bb   : > { %4823 = vrot.lane.b32.xlu0 %v9059_v45, %s7286_s16  ;;  %v9508_v45 = vpop.permute.xlu1 %3661 }
 0x3bc   : > { %v9514_v62 = vpop.permute.xlu0 %3676 }
 0x3bd   : > { %3510 = vmatmul.mubr.f32.gmra.mrb[26].mxu0 %v2151_v5  ;;  %3617 = vmatmul.mubr.f32.gmra.mrb[24].mxu1 %v2149_v47 }
 0x3be   : > { %6034 = vmatprep.mubr.msk.f32.mxu1 %vm1343_vm1, %v2152_v46  ;;  %6027 = vmatprep.mubr.msk.f32.mxu0 %vm1343_vm1, %v2154_v63 }
 0x3bf   : > { %4827 = vrot.lane.b32.xlu0 %v9071_v22, %s7286_s16  ;;  %v9512_v34 = vpop.permute.xlu1 %3671 }
 0x3c0   : > { %v9518_v26 = vpop.permute.xlu0 %3686 }
 0x3c1   : > { %3516 = vmatmul.mubr.f32.gmra.mrb[28].mxu0 %v2153_v39  ;;  %3623 = vmatmul.mubr.f32.gmra.mrb[26].mxu1 %v2151_v5  ;;  %v4531_v5 = vld [vmem:[#allocation9 + $0x50] sm:$0xff] }
 0x3c2   : > { %6028 = vmatprep.mubr.msk.f32.mxu0 %vm1343_vm1, %v2156_v29  ;;  %6035 = vmatprep.mubr.msk.f32.mxu1 %vm1343_vm1, %v2154_v63 }
 0x3c3   : > { %4831 = vrot.lane.b32.xlu0 %v9083_v41, %s7286_s16  ;;  %v9516_v22 = vpop.permute.xlu1 %3681 }
 0x3c4   : > { %v4460_v37 = vpop.permute.xlu0 %4459 }
 0x3c5   : > { %3522 = vmatmul.mubr.f32.gmra.mrb[30].mxu0 %v2155_v15  ;;  %3629 = vmatmul.mubr.f32.gmra.mrb[28].mxu1 %v2153_v39  ;;  %v4535_v39 = vld [vmem:[#allocation9 + $0x70] sm:$0xff] }
 0x3c6   : > { %6036 = vmatprep.mubr.msk.f32.mxu1 %vm1343_vm1, %v2156_v29 }
 0x3c7   : > { %v4458_v43 = vpop.permute.xlu1 %4457 }
 0x3c8   : > { %v4464_v41 = vpop.permute.xlu0 %4463 }
 0x3c9   : > { %3635 = vmatmul.mubr.f32.gmra.mrb[30].mxu1 %v2155_v15  ;;  %v4478_v17 = vsel %vm591_vm0, %v4460_v37, %v4464_v41  ;;  %v4529_v15 = vld [vmem:[#allocation9 + $0x40] sm:$0xff] }
 0x3ca   : > { %v4494_v48 = vmul.f32 %v4486_v38, %v4478_v17 }
 0x3cb   : > { %v4462_v36 = vpop.permute.xlu1 %4461 }
 0x3cc   : > { %v4468_v44 = vpop.permute.xlu0 %4467  ;;  %v4477_v18 = vsel %vm591_vm0, %v4458_v43, %v4462_v36 }
 0x3cd   : > { %v4490_v55 = vmul.f32 %v4482_v61, %v4477_v18  ;;  %v4476_v28 = vsel %vm591_vm0, %v4464_v41, %v4468_v44  ;;  %v4536_v61 = vld [vmem:[#allocation9 + $0x78] sm:$0xff] }
 0x3ce   : > { %v4495_v4 = vmul.f32 %v4487_v2, %v4476_v28  ;;  %v4583_v28 = vld [vmem:[#allocation9 + $0xb0] sm:$0xff] }
 0x3cf   : > { %v4466_v13 = vpop.permute.xlu1 %4465  ;;  %v6369_v52 = vpack.c.bf16 %v4494_v48, %v4490_v55 }
 0x3d0   : > { %v4472_v25 = vpop.permute.xlu0 %4471  ;;  %v4475_v20 = vsel %vm591_vm0, %v4462_v36, %v4466_v13  ;;  %v4532_v36 = vld [vmem:[#allocation9 + $0x58] sm:$0xff] }
 0x3d1   : > { %v4480_v8 = vsel %vm591_vm0, %v4472_v25, %v4460_v37  ;;  %v4474_v51 = vsel %vm591_vm0, %v4468_v44, %v4472_v25  ;;  %6370 = vmatprep.subr.bf16.mxu0 %v6369_v52  ;;  %v4491_v3 = vmul.f32 %v4483_v40, %v4475_v20  ;;  %v4533_v44 = vld [vmem:[#allocation9 + $0x60] sm:$0xff]  ;;  %v4579_v20 = vld [vmem:[#allocation9 + $0x90] sm:$0xff] }
 0x3d2   : > { %v4493_v14 = vmul.f32 %v4485_v35, %v4480_v8  ;;  %v4496_v30 = vmul.f32 %v4488_v57, %v4474_v51  ;;  %v4582_v57 = vld [vmem:[#allocation9 + $0xa8] sm:$0xff] }
 0x3d3   : > { %v4470_v54 = vpop.permute.xlu1 %4469  ;;  %v6407_v24 = vpack.c.bf16 %v4495_v4, %v4491_v3  ;;  %v4580_v3 = vld [vmem:[#allocation9 + $0x98] sm:$0xff] }
 0x3d4   : > { %v4479_v50 = vsel %vm591_vm0, %v4470_v54, %v4458_v43  ;;  %v4473_v6 = vsel %vm591_vm0, %v4466_v13, %v4470_v54  ;;  %v4508_v32 = vpop.permute.xlu0 %4507 }
 0x3d5   : > { %v4489_v49 = vmul.f32 %v4481_v60, %v4479_v50  ;;  %v4492_v21 = vmul.f32 %v4484_v27, %v4473_v6  ;;  %v4578_v27 = vld [vmem:[#allocation9 + $0x88] sm:$0xff] }
 0x3d7   : > { %v6371_v7 = vpack.c.bf16 %v4493_v14, %v4489_v49  ;;  %v4506_v1 = vpop.permute.xlu1 %4505  ;;  %v6405_v23 = vpack.c.bf16 %v4496_v30, %v4492_v21  ;;  %v4577_v30 = vld [vmem:[#allocation9 + $0x80] sm:$0xff] }
 0x3d8   : > { %v4512_v9 = vpop.permute.xlu0 %4511 }
 0x3d9   : > { %6372 = vmatpush1.bf16.msra.mxu0 %v6371_v7  ;;  %6406 = vmatprep.subr.bf16.mxu1 %v6405_v23  ;;  %v4526_v19 = vsel %vm616_vm2, %v4508_v32, %v4512_v9  ;;  %v4581_v23 = vld [vmem:[#allocation9 + $0xa0] sm:$0xff] }
 0x3da   : > { %6408 = vmatpush1.bf16.msra.mxu1 %v6407_v24  ;;  %v4542_v46 = vmul.f32 %v4534_v0, %v4526_v19 }
 0x3db   : > { %v4510_v58 = vpop.permute.xlu1 %4509 }
 0x3dc   : > { %v4516_v11 = vpop.permute.xlu0 %4515  ;;  %v4525_v12 = vsel %vm616_vm2, %v4506_v1, %v4510_v58 }
 0x3dd   : > { %v4538_v47 = vmul.f32 %v4530_v42, %v4525_v12  ;;  %v4524_v29 = vsel %vm616_vm2, %v4512_v9, %v4516_v11 }
 0x3de   : > { %v4543_v37 = vmul.f32 %v4535_v39, %v4524_v29 }
 0x3df   : > { %v4514_v16 = vpop.permute.xlu1 %4513  ;;  %v6373_v50 = vpack.c.bf16 %v4542_v46, %v4538_v47 }
 0x3e0   : > { %v4520_v33 = vpop.permute.xlu0 %4519  ;;  %v4523_v63 = vsel %vm616_vm2, %v4510_v58, %v4514_v16 }
 0x3e1   : > { %v4539_v43 = vmul.f32 %v4531_v5, %v4523_v63  ;;  %v4522_v17 = vsel %vm616_vm2, %v4516_v11, %v4520_v33  ;;  %v4528_v54 = vsel %vm616_vm2, %v4520_v33, %v4508_v32  ;;  %6374 = vmatprep.subr.bf16.mxu0 %v6373_v50  ;;  %v4628_v50 = vld [vmem:[#allocation9 + $0xd8] sm:$0xff] }
 0x3e2   : > { %v4541_v25 = vmul.f32 %v4533_v44, %v4528_v54  ;;  %v4544_v55 = vmul.f32 %v4536_v61, %v4522_v17  ;;  %v4627_v54 = vld [vmem:[#allocation9 + $0xd0] sm:$0xff] }
 0x3e3   : > { %v4518_v56 = vpop.permute.xlu1 %4517  ;;  %v6411_v35 = vpack.c.bf16 %v4543_v37, %v4539_v43 }
 0x3e4   : > { %v4521_v41 = vsel %vm616_vm2, %v4514_v16, %v4518_v56  ;;  %v4527_v13 = vsel %vm616_vm2, %v4518_v56, %v4506_v1  ;;  %v4556_v60 = vpop.permute.xlu0 %4555  ;;  %v4584_v16 = vld [vmem:[#allocation9 + $0xb8] sm:$0xff] }
 0x3e5   : > { %v4537_v18 = vmul.f32 %v4529_v15, %v4527_v13  ;;  %v4540_v38 = vmul.f32 %v4532_v36, %v4521_v41  ;;  %v4626_v36 = vld [vmem:[#allocation9 + $0xc8] sm:$0xff] }
 0x3e6   : > { %v4630_v13 = vld [vmem:[#allocation9 + $0xe8] sm:$0xff] }
 0x3e7   : > { %v4554_v48 = vpop.permute.xlu1 %4553  ;;  %v6375_v8 = vpack.c.bf16 %v4541_v25, %v4537_v18  ;;  %v6409_v49 = vpack.c.bf16 %v4544_v55, %v4540_v38  ;;  %v4631_v55 = vld [vmem:[#allocation9 + $0xf0] sm:$0xff] }
 0x3e8   : > { %v4560_v52 = vpop.permute.xlu0 %4559 }
 0x3e9   : > { %6376 = vmatpush1.bf16.msra.mxu0 %v6375_v8  ;;  %6410 = vmatprep.subr.bf16.mxu1 %v6409_v49  ;;  %v4574_v51 = vsel %vm642_vm3, %v4556_v60, %v4560_v52  ;;  %v4629_v8 = vld [vmem:[#allocation9 + $0xe0] sm:$0xff] }
 0x3ea   : > { %6412 = vmatpush1.bf16.msra.mxu1 %v6411_v35  ;;  %v4590_v40 = vmul.f32 %v4582_v57, %v4574_v51 }
 0x3eb   : > { %v4558_v14 = vpop.permute.xlu1 %4557 }
 0x3ec   : > { %v4573_v6 = vsel %vm642_vm3, %v4554_v48, %v4558_v14  ;;  %v4564_v1 = vpop.permute.xlu0 %4563 }
 0x3ed   : > { %v4586_v32 = vmul.f32 %v4578_v27, %v4573_v6  ;;  %v4572_v21 = vsel %vm642_vm3, %v4560_v52, %v4564_v1  ;;  %v4632_v27 = vld [vmem:[#allocation9 + $0xf8] sm:$0xff] }
 0x3ee   : > { %v4591_v0 = vmul.f32 %v4583_v28, %v4572_v21 }
 0x3ef   : > { %v4562_v7 = vpop.permute.xlu1 %4561  ;;  %v6377_v46 = vpack.c.bf16 %v4590_v40, %v4586_v32 }
 0x3f0   : > { %v4571_v2 = vsel %vm642_vm3, %v4558_v14, %v4562_v7  ;;  %v4568_v24 = vpop.permute.xlu0 %4567 }
 0x3f1   : > { %v4570_v11 = vsel %vm642_vm3, %v4564_v1, %v4568_v24  ;;  %v4576_v42 = vsel %vm642_vm3, %v4568_v24, %v4556_v60  ;;  %v4587_v12 = vmul.f32 %v4579_v20, %v4571_v2  ;;  %6378 = vmatprep.subr.bf16.mxu0 %v6377_v46  ;;  %v4625_v60 = vld [vmem:[#allocation9 + $0xc0] sm:$0xff] }
 0x3f2   : > { %v4589_v56 = vmul.f32 %v4581_v23, %v4576_v42  ;;  %v4592_v47 = vmul.f32 %v4584_v16, %v4570_v11 }
 0x3f3   : > { %v4566_v4 = vpop.permute.xlu1 %4565  ;;  %v6415_v29 = vpack.c.bf16 %v4591_v0, %v4587_v12 }
 0x3f4   : > { %v4569_v58 = vsel %vm642_vm3, %v4562_v7, %v4566_v4  ;;  %v4575_v9 = vsel %vm642_vm3, %v4566_v4, %v4554_v48  ;;  %v4604_v39 = vpop.permute.xlu0 %4603 }
 0x3f5   : > { %v4585_v19 = vmul.f32 %v4577_v30, %v4575_v9  ;;  %v4588_v33 = vmul.f32 %v4580_v3, %v4569_v58 }
 0x3f7   : > { %v6379_v5 = vpack.c.bf16 %v4589_v56, %v4585_v19  ;;  %v4602_v63 = vpop.permute.xlu1 %4601  ;;  %v6413_v15 = vpack.c.bf16 %v4592_v47, %v4588_v33 }
 0x3f8   : > { %v4608_v37 = vpop.permute.xlu0 %4607 }
 0x3f9   : > { %6380 = vmatpush1.bf16.msra.mxu0 %v6379_v5  ;;  %6414 = vmatprep.subr.bf16.mxu1 %v6413_v15  ;;  %v4622_v44 = vsel %vm668_vm4, %v4604_v39, %v4608_v37 }
 0x3fa   : > { %6416 = vmatpush1.bf16.msra.mxu1 %v6415_v29  ;;  %v4638_v17 = vmul.f32 %v4630_v13, %v4622_v44 }
 0x3fb   : > { %v4606_v43 = vpop.permute.xlu1 %4605 }
 0x3fc   : > { %v4621_v41 = vsel %vm668_vm4, %v4602_v63, %v4606_v43  ;;  %v4612_v18 = vpop.permute.xlu0 %4611 }
 0x3fd   : > { %v4634_v38 = vmul.f32 %v4626_v36, %v4621_v41  ;;  %v4620_v48 = vsel %vm668_vm4, %v4608_v37, %v4612_v18 }
 0x3fe   : > { %v4639_v7 = vmul.f32 %v4631_v55, %v4620_v48  ;;  %v4697_v55 = vld [vmem:[#allocation9 + $0x140] sm:$0xff] }
 0x3ff   : > { %v4610_v61 = vpop.permute.xlu1 %4609  ;;  %v6381_v2 = vpack.c.bf16 %v4638_v17, %v4634_v38 }
 0x400   : > { %v4619_v25 = vsel %vm668_vm4, %v4606_v43, %v4610_v61  ;;  %v4616_v49 = vpop.permute.xlu0 %4615 }
 0x401   : > { %v4618_v6 = vsel %vm668_vm4, %v4612_v18, %v4616_v49  ;;  %v4624_v57 = vsel %vm668_vm4, %v4616_v49, %v4604_v39  ;;  %v4635_v51 = vmul.f32 %v4627_v54, %v4619_v25  ;;  %6382 = vmatprep.subr.bf16.mxu0 %v6381_v2 }
 0x402   : > { %v4637_v32 = vmul.f32 %v4629_v8, %v4624_v57  ;;  %v4640_v20 = vmul.f32 %v4632_v27, %v4618_v6 }
 0x403   : > { %v4614_v35 = vpop.permute.xlu1 %4613  ;;  %v6419_v24 = vpack.c.bf16 %v4639_v7, %v4635_v51 }
 0x404   : > { %v4617_v14 = vsel %vm668_vm4, %v4610_v61, %v4614_v35  ;;  %v4623_v52 = vsel %vm668_vm4, %v4614_v35, %v4602_v63  ;;  %v9586_v30 = vpop.permute.xlu0 %4675 }
 0x405   : > { %v4633_v1 = vmul.f32 %v4625_v60, %v4623_v52  ;;  %v4636_v40 = vmul.f32 %v4628_v50, %v4617_v14  ;;  %v4701_v60 = vld [vmem:[#allocation9 + $0x160] sm:$0xff] }
 0x407   : > { %v6383_v28 = vpack.c.bf16 %v4637_v32, %v4633_v1  ;;  %v9584_v21 = vpop.permute.xlu1 %4673  ;;  %v6417_v9 = vpack.c.bf16 %v4640_v20, %v4636_v40 }
 0x408   : > { %v9592_v42 = vpop.permute.xlu0 %4679 }
 0x409   : > { %6384 = vmatpush1.bf16.msra.mxu0 %v6383_v28  ;;  %6418 = vmatprep.subr.bf16.mxu1 %v6417_v9  ;;  %v4698_v9 = vld [vmem:[#allocation9 + $0x148] sm:$0xff] }
 0x40a   : > { %6420 = vmatpush1.bf16.msra.mxu1 %v6419_v24 }
 0x40b   : > { %v9590_v11 = vpop.permute.xlu1 %4677 }
 0x40c   : > { %v9598_v43 = vpop.permute.xlu0 %4683  ;;  %v4693_v48 = vsel %vm707_vm5, %v9584_v21, %v9590_v11 }
 0x40d   : > { %v9617_v1 = vmul.f32 %v4697_v55, %v4693_v48 }
 0x40f   : > { %v4682_v15 = vpop.permute.xlu1 %4681 }
 0x410   : > { %v9608_v35 = vpop.permute.xlu0 %4687 }
 0x413   : > { %v4686_v50 = vpop.permute.xlu1 %4685 }
 0x414   : > { %v9623_v20 = vpop.permute.xlu0 %4723 }
 0x417   : > { %v9621_v40 = vpop.permute.xlu1 %4721 }
 0x47c   : > { %v3481_v3 = vpop.f32.mrb[16].mxu0 }
 0x47d   : > { %v3689_v4 = vadd.f32 %v9504_v53, %v3481_v3  ;;  %v3483_v23 = vpop.f32.mrb[17].mxu0 }
 0x47e   : > { %v3690_v58 = vadd.f32 %v9504_v53, %v3483_v23 }
 0x47f   : > { %v6037_v16 = vmul.f32 -1.442695, %v3689_v4 }
 0x480   : > { %v6038_v12 = vmul.f32 -1.442695, %v3690_v58  ;;  %v3487_v0 = vpop.f32.mrb[18].mxu0  ;;  %v3594_v19 = vpop.f32.mrb[16].mxu1 }
 0x481   : > { %v3693_v56 = vadd.f32 %v9506_v31, %v3487_v0  ;;  %v3691_v33 = vadd.f32 %v9504_v53, %v3594_v19  ;;  %v3489_v47 = vpop.f32.mrb[19].mxu0  ;;  %v3596_v46 = vpop.f32.mrb[17].mxu1  ;;  %6803 = vpow2.f32 %v6037_v16  ;;  %v4691_v16 = vsel %vm707_vm5, %v9590_v11, %v4682_v15  ;;  %v4700_v11 = vld [vmem:[#allocation9 + $0x158] sm:$0xff] }
 0x482   : > { %v3694_v5 = vadd.f32 %v9506_v31, %v3489_v47  ;;  %v3692_v63 = vadd.f32 %v9504_v53, %v3596_v46  ;;  %6805 = vpow2.f32 %v6038_v12  ;;  %v4702_v12 = vld [vmem:[#allocation9 + $0x168] sm:$0xff]  ;;  %v4692_v0 = vsel %vm707_vm5, %v9592_v42, %v9598_v43  ;;  %v4699_v47 = vld [vmem:[#allocation9 + $0x150] sm:$0xff] }
 0x483   : > { %v6041_v39 = vmul.f32 -1.442695, %v3693_v56  ;;  %v6039_v29 = vmul.f32 -1.442695, %v3691_v33  ;;  %v4689_v46 = vsel %vm707_vm5, %v4682_v15, %v4686_v50  ;;  %v9646_v15 = vmul.f32 %v4702_v12, %v4692_v0 }
 0x484   : > { %v6042_v37 = vmul.f32 -1.442695, %v3694_v5  ;;  %v6040_v36 = vmul.f32 -1.442695, %v3692_v63  ;;  %v3493_v41 = vpop.f32.mrb[20].mxu0  ;;  %v3600_v13 = vpop.f32.mrb[18].mxu1 }
 0x485   : > { %6807 = vpow2.f32 %v6041_v39  ;;  %v3697_v44 = vadd.f32 %v9508_v45, %v3493_v41  ;;  %v3695_v61 = vadd.f32 %v9506_v31, %v3600_v13  ;;  %v3495_v18 = vpop.f32.mrb[21].mxu0  ;;  %v3602_v38 = vpop.f32.mrb[19].mxu1  ;;  %v9644_v13 = vmul.f32 %v4698_v9, %v4691_v16  ;;  %v4703_v16 = vld [vmem:[#allocation9 + $0x170] sm:$0xff] }
 0x486   : > { %6809 = vpow2.f32 %v6039_v29  ;;  %v3698_v53 = vadd.f32 %v9508_v45, %v3495_v18  ;;  %v3696_v17 = vadd.f32 %v9506_v31, %v3602_v38  ;;  %v4694_v31 = vsel %vm707_vm5, %v9586_v30, %v9592_v42  ;;  %v9642_v42 = vpop.permute.xlu0 %4727 }
 0x487   : > { %6811 = vpow2.f32 %v6042_v37  ;;  %v6045_v54 = vmul.f32 -1.442695, %v3697_v44  ;;  %v6043_v25 = vmul.f32 -1.442695, %v3695_v61  ;;  %v9619_v32 = vmul.f32 %v4701_v60, %v4694_v31  ;;  %v9640_v37 = vpop.permute.xlu1 %4725 }
 0x488   : > { %6813 = vpow2.f32 %v6040_v36  ;;  %v6046_v8 = vmul.f32 -1.442695, %v3698_v53  ;;  %v6044_v49 = vmul.f32 -1.442695, %v3696_v17  ;;  %v3499_v14 = vpop.f32.mrb[22].mxu0  ;;  %v3606_v52 = vpop.f32.mrb[20].mxu1  ;;  %v4695_v29 = vsel %vm707_vm5, %v4686_v50, %v9584_v21 }
 0x489   : > { %6815 = vpow2.f32 %v6045_v54  ;;  %v3701_v27 = vadd.f32 %v9510_v59, %v3499_v14  ;;  %v3699_v6 = vadd.f32 %v9508_v45, %v3606_v52  ;;  %v3501_v57 = vpop.f32.mrb[23].mxu0  ;;  %v3608_v51 = vpop.f32.mrb[21].mxu1  ;;  %v9649_v21 = vmul.f32 %v4699_v47, %v4689_v46 }
 0x48a   : > { %6817 = vpow2.f32 %v6043_v25  ;;  %v3702_v7 = vadd.f32 %v9510_v59, %v3501_v57  ;;  %v3700_v56 = vadd.f32 %v9508_v45, %v3608_v51  ;;  %v9653_v48 = vmul.f32 %v4700_v11, %v4695_v29  ;;  %v9662_v52 = vpop.permute.xlu0 %4731 }
 0x48b   : > { %6819 = vpow2.f32 %v6046_v8  ;;  %v6804_v2 = vpop.eup %6803  ;;  %v6049_v28 = vmul.f32 -1.442695, %v3701_v27  ;;  %v6047_v23 = vmul.f32 -1.442695, %v3699_v6  ;;  %v9660_v14 = vpop.permute.xlu1 %4729 }
 0x48c   : > { %6821 = vpow2.f32 %v6044_v49  ;;  %v3505_v3 = vpop.f32.mrb[24].mxu0  ;;  %v6806_v4 = vpop.eup %6805  ;;  %v6050_v19 = vmul.f32 -1.442695, %v3702_v7  ;;  %v3745_v63 = vadd.f32 1.0, %v6804_v2  ;;  %v9651_v25 = vmul.f32 -1.442695, %v3700_v56 }
 0x48d   : > { %v3612_v24 = vpop.f32.mrb[22].mxu1  ;;  %v3507_v58 = vpop.f32.mrb[25].mxu0  ;;  %v3746_v36 = vadd.f32 1.0, %v6806_v4  ;;  %6823 = vpow2.f32 %v6049_v28  ;;  %v3705_v18 = vadd.f32 %v9512_v34, %v3505_v3  ;;  %v4690_v49 = vsel %vm707_vm5, %v9598_v43, %v9608_v35  ;;  %v9682_v56 = vld [vmem:[#allocation9 + $0x108] sm:$0xff] }
 0x48e   : > { %v3614_v33 = vpop.f32.mrb[23].mxu1  ;;  %6825 = vpow2.f32 %v6047_v23  ;;  %v3703_v8 = vadd.f32 %v9510_v59, %v3612_v24  ;;  %v3706_v6 = vadd.f32 %v9512_v34, %v3507_v58  ;;  %10735 = vst [vmem:[#allocation21_spill] sm:$0xff] %v9682_v56  ;;  %v9686_v47 = vpop.permute.xlu0 %4735 }
 0x48f   : > { %v6808_v5 = vpop.eup %6807  ;;  %6827 = vpow2.f32 %v6050_v19  ;;  %v3704_v57 = vadd.f32 %v9510_v59, %v3614_v33  ;;  %v9668_v28 = vmul.f32 -1.442695, %v3705_v18  ;;  %v9684_v33 = vpop.permute.xlu1 %4733 }
 0x490   : > { %v6810_v45 = vpop.eup %6809  ;;  %v3511_v41 = vpop.f32.mrb[26].mxu0  ;;  %v3749_v61 = vadd.f32 1.0, %v6808_v5  ;;  %6829 = vrcp.f32 %v3745_v63  ;;  %v9679_v0 = vmul.f32 -1.442695, %v3703_v8  ;;  %v9688_v46 = vmul.f32 -1.442695, %v3706_v6 }
 0x491   : > { %v6812_v44 = vpop.eup %6811  ;;  %v3618_v38 = vpop.f32.mrb[24].mxu1  ;;  %v3747_v54 = vadd.f32 1.0, %v6810_v45  ;;  %6831 = vrcp.f32 %v3746_v36  ;;  %v3709_v43 = vadd.f32 %v9514_v62, %v3511_v41  ;;  %v9690_v5 = vmul.f32 -1.442695, %v3704_v57  ;;  %v9723_v6 = vld [vmem:[#allocation9 + $0x118] sm:$0xff] }
 0x492   : > { %v3513_v53 = vpop.f32.mrb[27].mxu0  ;;  %v6814_v17 = vpop.eup %6813  ;;  %v3750_v50 = vadd.f32 1.0, %v6812_v44  ;;  %6833 = vrcp.f32 %v3749_v61  ;;  %v3707_v58 = vadd.f32 %v9512_v34, %v3618_v38  ;;  %v4704_v44 = vld [vmem:[#allocation9 + $0x178] sm:$0xff]  ;;  %v9706_v61 = vmul.f32 %v4703_v16, %v4690_v49  ;;  %v9720_v49 = vld [vmem:[#allocation9 + $0x120] sm:$0xff]  ;;  %10737 = vst [vmem:[#allocation22_spill] sm:$0xff] %v9723_v6 }
 0x493   : > { %v3620_v55 = vpop.f32.mrb[25].mxu1  ;;  %v6816_v60 = vpop.eup %6815  ;;  %v3748_v27 = vadd.f32 1.0, %v6814_v17  ;;  %6835 = vrcp.f32 %v3747_v54  ;;  %v3710_v59 = vadd.f32 %v9514_v62, %v3513_v53  ;;  %v9700_v45 = vmul.f32 -1.442695, %v3709_v43  ;;  %v9712_v17 = vld [vmem:[#allocation9 + $0x128] sm:$0xff]  ;;  %v9715_v54 = vld [vmem:[#allocation9 + $0x100] sm:$0xff] }
 0x494   : > { %v6818_v31 = vpop.eup %6817  ;;  %v9666_v51 = vpop.f32.mrb[28].mxu0  ;;  %v3793_v2 = vadd.f32 1.0, %v6816_v60  ;;  %6837 = vrcp.f32 %v3750_v50  ;;  %v3708_v19 = vadd.f32 %v9512_v34, %v3620_v55  ;;  %v4696_v34 = vsel %vm707_vm5, %v9608_v35, %v9586_v30  ;;  %10736 = vst [vmem:[#allocation17_spill] sm:$0xff] %v9712_v17  ;;  %v7135_v30 = vld [vmem:[#allocation7 + $0x8] sm:$0xff]  ;;  %v7139_v16 = vld [vmem:[#allocation7 + $0x18] sm:$0xff] }
 0x495   : > { %v6820_v7 = vpop.eup %6819  ;;  %v9671_v3 = vpop.f32.mrb[26].mxu1  ;;  %v3751_v24 = vadd.f32 1.0, %v6818_v31  ;;  %6839 = vrcp.f32 %v3748_v27  ;;  %v9708_v38 = vmul.f32 -1.442695, %v3707_v58  ;;  %v9710_v53 = vmul.f32 -1.442695, %v3710_v59 }
 0x496   : > { %v9673_v4 = vpop.f32.mrb[29].mxu0  ;;  %v6822_v23 = vpop.eup %6821  ;;  %v3794_v12 = vadd.f32 1.0, %v6820_v7  ;;  %6841 = vrcp.f32 %v3793_v2  ;;  %v4658_v35 = vmul.f32 %v7135_v30, %v9682_v56  ;;  %v9717_v60 = vmul.f32 -1.442695, %v3708_v19  ;;  %v7136_v50 = vld [vmem:[#allocation7 + $0x28] sm:$0xff]  ;;  %v7137_v31 = vld [vmem:[#allocation7] sm:$0xff] }
 0x497   : > { %v9677_v9 = vpop.f32.mrb[27].mxu1  ;;  %v3752_v29 = vadd.f32 1.0, %v6822_v23  ;;  %v6824_v18 = vpop.eup %6823  ;;  %6843 = vrcp.f32 %v3751_v24  ;;  %v4662_v8 = vmul.f32 %v7136_v50, %v9712_v17  ;;  %v4657_v27 = vmul.f32 %v7137_v31, %v9715_v54  ;;  %v7138_v24 = vld [vmem:[#allocation7 + $0x20] sm:$0xff]  ;;  %v9735_v59 = vld [vmem:[#allocation9 + $0x138] sm:$0xff] }
 0x498   : > { %v9692_v63 = vpop.f32.mrb[30].mxu0  ;;  %v9694_v11 = vpop.f32.mrb[28].mxu1  ;;  %6845 = vrcp.f32 %v3794_v12  ;;  %v9732_v23 = vmul.f32 %v4704_v44, %v4696_v34  ;;  %v4661_v58 = vmul.f32 %v7138_v24, %v9720_v49  ;;  %10738 = vst [vmem:[#allocation19_spill] sm:$0xff] %v9735_v59  ;;  %v4660_v12 = vmul.f32 %v7139_v16, %v9723_v6  ;;  %v9748_v16 = vld [vmem:[#allocation9 + $0x110] sm:$0xff] }
 0x499   : > { %v9702_v36 = vpop.f32.mrb[31].mxu0  ;;  %v9704_v41 = vpop.f32.mrb[29].mxu1  ;;  %6847 = vpow2.f32 %v9651_v25  ;;  %v3797_v30 = vadd.f32 1.0, %v6824_v18  ;;  %v6385_v31 = vpack.c.bf16 %v4662_v8, %v4658_v35  ;;  %v7140_v25 = vld [vmem:[#allocation7 + $0x38] sm:$0xff]  ;;  %v6389_v17 = vpack.c.bf16 %v9646_v15, %v9644_v13  ;;  %v9750_v6 = vld [vmem:[#allocation9 + $0x130] sm:$0xff] }
 0x49a   : > { %v6826_v55 = vpop.eup %6825  ;;  %v9725_v57 = vpop.permute.xlu1 %4769  ;;  %6849 = vrcp.f32 %v3752_v29  ;;  %v4664_v39 = vmul.f32 %v7140_v25, %v9735_v59  ;;  %v6387_v24 = vpack.c.bf16 %v4661_v58, %v4657_v27  ;;  %10739 = vst [vmem:[#allocation23_spill] sm:$0xff] %v9750_v6  ;;  %v7141_v8 = vld [vmem:[#allocation7 + $0x10] sm:$0xff]  ;;  %v6425_v15 = vpack.c.bf16 %v9732_v23, %v9653_v48  ;;  %v4749_v58 = vld [vmem:[#allocation9 + $0x1a0] sm:$0xff] }
 0x49b   : > { %v9727_v7 = vpop.permute.xlu0 %4771  ;;  %v6828_v2 = vpop.eup %6827  ;;  %v3795_v44 = vadd.f32 1.0, %v6826_v55  ;;  %6851 = vpow2.f32 %v9668_v28  ;;  %6386 = vmatprep.subr.bf16.mxu0 %v6385_v31  ;;  %v4659_v25 = vmul.f32 %v7141_v8, %v9748_v16  ;;  %v7142_v59 = vld [vmem:[#allocation7 + $0x30] sm:$0xff]  ;;  %v3711_v48 = vadd.f32 %v9514_v62, %v9671_v3 }
 0x49c   : > { %v9730_v43 = vpop.f32.mrb[30].mxu1  ;;  %v9738_v19 = vpop.eup %6829  ;;  %v3798_v18 = vadd.f32 1.0, %v6828_v2  ;;  %v6421_v35 = vpack.c.bf16 %v4664_v39, %v4660_v12  ;;  %v4663_v55 = vmul.f32 %v7142_v59, %v9750_v6  ;;  %6853 = vpow2.f32 %v9679_v0  ;;  %6388 = vmatpush1.bf16.msra.mxu0 %v6387_v24  ;;  %v4745_v2 = vld [vmem:[#allocation9 + $0x180] sm:$0xff]  ;;  %v4746_v12 = vld [vmem:[#allocation9 + $0x188] sm:$0xff]  ;;  %v4747_v3 = vld [vmem:[#allocation9 + $0x190] sm:$0xff] }
 0x49d   : > { %v9740_v50 = vpop.f32.mrb[31].mxu1  ;;  %v9743_v34 = vpop.eup %6831  ;;  %v4741_v39 = vsel %vm733_vm6, %v9621_v40, %v9640_v37  ;;  %v4742_v59 = vsel %vm733_vm6, %v9623_v20, %v9642_v42  ;;  %6855 = vrcp.f32 %v3797_v30  ;;  %v3713_v0 = vadd.f32 %v9516_v22, %v9666_v51  ;;  %6390 = vmatprep.subr.bf16.mxu0 %v6389_v17  ;;  %v4750_v24 = vld [vmem:[#allocation9 + $0x1a8] sm:$0xff]  ;;  %v4748_v17 = vld [vmem:[#allocation9 + $0x198] sm:$0xff] }
 0x49e   : > { %v9752_v29 = vpop.eup %6833  ;;  %v9756_v28 = vpop.permute.xlu1 %4773  ;;  %6422 = vmatprep.subr.bf16.mxu1 %v6421_v35  ;;  %v6423_v23 = vpack.c.bf16 %v4663_v55, %v4659_v25  ;;  %6857 = vpow2.f32 %v9688_v46  ;;  %v6427_v6 = vpack.c.bf16 %v9706_v61, %v9649_v21  ;;  %v4739_v30 = vsel %vm733_vm6, %v9640_v37, %v9660_v14 }
 0x49f   : > { %v9758_v27 = vpop.permute.xlu0 %4775  ;;  %v9760_v13 = vpop.eup %6835  ;;  %v4740_v51 = vsel %vm733_vm6, %v9642_v42, %v9662_v52  ;;  %6859 = vrcp.f32 %v3795_v44  ;;  %v4753_v46 = vmul.f32 %v4745_v2, %v4741_v39  ;;  %v4757_v25 = vmul.f32 %v4749_v58, %v4742_v59  ;;  %v4751_v39 = vld [vmem:[#allocation9 + $0x1b0] sm:$0xff]  ;;  %v4752_v58 = vld [vmem:[#allocation9 + $0x1b8] sm:$0xff] }
 0x4a0   : > { %v9773_v31 = vpop.eup %6837  ;;  %6424 = vmatpush1.bf16.msra.mxu1 %v6423_v23  ;;  %v4754_v55 = vmul.f32 %v4746_v12, %v4739_v30  ;;  %6861 = vrcp.f32 %v3798_v18  ;;  %v10740_v37 = vpack.c.bf16 %v9619_v32, %v9617_v1  ;;  %v4758_v42 = vmul.f32 %v4750_v24, %v4740_v51 }
 0x4a1   : > { %v9779_v8 = vpop.eup %6839  ;;  %6426 = vmatprep.subr.bf16.mxu1 %v6425_v15  ;;  %v4737_v44 = vsel %vm733_vm6, %v9660_v14, %v9684_v33  ;;  %v4743_v2 = vsel %vm733_vm6, %v9684_v33, %v9621_v40  ;;  %6863 = vpow2.f32 %v9690_v5  ;;  %v3714_v1 = vadd.f32 %v9516_v22, %v9673_v4 }
 0x4a2   : > { %v9792_v35 = vpop.eup %6841  ;;  %v9794_v21 = vpop.permute.xlu1 %4777  ;;  %6392 = vmatpush1.bf16.msra.mxu0 %v10740_v37  ;;  %v4755_v32 = vmul.f32 %v4747_v3, %v4737_v44  ;;  %v4756_v18 = vmul.f32 %v4748_v17, %v4743_v2  ;;  %6865 = vtanh.f32 %v3713_v0  ;;  %v3712_v14 = vadd.f32 %v9514_v62, %v9677_v9  ;;  %v4797_v17 = vld [vmem:[#allocation9 + $0x1e0] sm:$0xff]  ;;  %v4798_v37 = vld [vmem:[#allocation9 + $0x1e8] sm:$0xff] }
 0x4a3   : > { %v9796_v61 = vpop.permute.xlu0 %4779  ;;  %v9798_v56 = vpop.eup %6843  ;;  %v4738_v40 = vsel %vm733_vm6, %v9662_v52, %v9686_v47  ;;  %v4744_v33 = vsel %vm733_vm6, %v9686_v47, %v9623_v20  ;;  %6867 = vpow2.f32 %v9700_v45  ;;  %v6395_v4 = vpack.c.bf16 %v4757_v25, %v4753_v46  ;;  %v4793_v45 = vld [vmem:[#allocation9 + $0x1c0] sm:$0xff]  ;;  %v4794_v25 = vld [vmem:[#allocation9 + $0x1c8] sm:$0xff] }
 0x4a4   : > { %v9811_v59 = vpop.eup %6845  ;;  %6428 = vmatpush1.bf16.msra.mxu1 %v6427_v6  ;;  %v4759_v12 = vmul.f32 %v4751_v39, %v4738_v40  ;;  %v4760_v0 = vmul.f32 %v4752_v58, %v4744_v33  ;;  %6869 = vpow2.f32 %v9708_v38  ;;  %v6059_v24 = vmul.f32 -1.442695, %v3711_v48  ;;  %v3873_v39 = vld [vmem:[#allocation6] sm:$0xff]  ;;  %v4795_v58 = vld [vmem:[#allocation9 + $0x1d0] sm:$0xff] }
 0x4a5   : > { %v6848_v15 = vpop.eup %6847  ;;  %v6393_v52 = vpack.c.bf16 %v4758_v42, %v4754_v55  ;;  %6871 = vpow2.f32 %v9710_v53  ;;  %v6060_v3 = vmul.f32 -1.442695, %v3712_v14  ;;  %v4789_v6 = vsel %vm759_vm7, %v9725_v57, %v9756_v28  ;;  %v4796_v14 = vld [vmem:[#allocation9 + $0x1d8] sm:$0xff] }
 0x4a6   : > { %v9826_v5 = vpop.eup %6849  ;;  %v4782_v23 = vpop.permute.xlu1 %4781  ;;  %v3796_v30 = vadd.f32 1.0, %v6848_v15  ;;  %v6431_v51 = vpack.c.bf16 %v4759_v12, %v4755_v32  ;;  %v6429_v20 = vpack.c.bf16 %v4760_v0, %v4756_v18  ;;  %6873 = vtanh.f32 %v3714_v1  ;;  %v4800_v12 = vld [vmem:[#allocation9 + $0x1f8] sm:$0xff] }
 0x4a7   : > { %v4784_v62 = vpop.permute.xlu0 %4783  ;;  %v6852_v9 = vpop.eup %6851  ;;  %6394 = vmatprep.subr.bf16.mxu0 %v6393_v52  ;;  %v4790_v38 = vsel %vm759_vm7, %v9727_v7, %v9758_v27  ;;  %6875 = vpow2.f32 %v9717_v60  ;;  %v3717_v46 = vadd.f32 %v9518_v26, %v9692_v63  ;;  %v4787_v55 = vsel %vm759_vm7, %v9756_v28, %v9794_v21 }
 0x4a8   : > { %v6854_v47 = vpop.eup %6853  ;;  %v3841_v53 = vadd.f32 1.0, %v6852_v9  ;;  %6396 = vmatpush1.bf16.msra.mxu0 %v6395_v4  ;;  %6430 = vmatprep.subr.bf16.mxu1 %v6429_v20  ;;  %6877 = vpow2.f32 %v6059_v24  ;;  %v9854_v60 = vadd.f32 %v9516_v22, %v9694_v11  ;;  %v9858_v63 = vadd.f32 %v9518_v26, %v9702_v36  ;;  %v4799_v4 = vld [vmem:[#allocation9 + $0x1f0] sm:$0xff]  ;;  %v3874_v24 = vld [vmem:[#allocation6 + $0x8] sm:$0xff] }
 0x4a9   : > { %v9839_v48 = vpop.eup %6855  ;;  %v4788_v28 = vsel %vm759_vm7, %v9758_v27, %v9796_v61  ;;  %6432 = vmatpush1.bf16.msra.mxu1 %v6431_v51  ;;  %6879 = vrcp.f32 %v3796_v30  ;;  %v3799_v32 = vadd.f32 1.0, %v6854_v47  ;;  %v4801_v18 = vmul.f32 %v4793_v45, %v4789_v6 }
 0x4aa   : > { %v9848_v42 = vpop.permute.xlu1 %4817  ;;  %v6858_v2 = vpop.eup %6857  ;;  %v4805_v15 = vmul.f32 %v4797_v17, %v4790_v38  ;;  %v4802_v40 = vmul.f32 %v4794_v25, %v4787_v55  ;;  %v4806_v33 = vmul.f32 %v4798_v37, %v4788_v28  ;;  %v4785_v36 = vsel %vm759_vm7, %v9794_v21, %v4782_v23  ;;  %v4845_v37 = vld [vmem:[#allocation9 + $0x220] sm:$0xff] }
 0x4ab   : > { %v9850_v44 = vpop.permute.xlu0 %4819  ;;  %v9864_v1 = vpop.eup %6859  ;;  %v4791_v27 = vsel %vm759_vm7, %v4782_v23, %v9725_v57  ;;  %v3881_v9 = vmul.f32 %v9792_v35, %v3873_v39  ;;  %6881 = vrcp.f32 %v3841_v53  ;;  %v3842_v52 = vadd.f32 1.0, %v6858_v2  ;;  %v4841_v53 = vld [vmem:[#allocation9 + $0x200] sm:$0xff]  ;;  %v4842_v39 = vld [vmem:[#allocation9 + $0x208] sm:$0xff] }
 0x4ac   : > { %v9866_v11 = vpop.eup %6861  ;;  %v4803_v30 = vmul.f32 %v4795_v58, %v4785_v36  ;;  %6883 = vpow2.f32 %v6060_v3  ;;  %v4804_v45 = vmul.f32 %v4796_v14, %v4791_v27  ;;  %v4786_v21 = vsel %vm759_vm7, %v9796_v61, %v4784_v62  ;;  %v4846_v36 = vld [vmem:[#allocation9 + $0x228] sm:$0xff] }
 0x4ad   : > { %v6864_v0 = vpop.eup %6863  ;;  %v4792_v57 = vsel %vm759_vm7, %v4784_v62, %v9727_v7  ;;  %v6399_v6 = vpack.c.bf16 %v4805_v15, %v4801_v18  ;;  %v4807_v17 = vmul.f32 %v4799_v4, %v4786_v21  ;;  %v3882_v3 = vmul.f32 %v9811_v59, %v3874_v24 }
 0x4ae   : > { %v4822_v51 = vpop.permute.xlu1 %4821  ;;  %v6866_v47 = vpop.eup %6865  ;;  %v4808_v38 = vmul.f32 %v4800_v12, %v4792_v57  ;;  %6885 = vrcp.f32 %v3799_v32  ;;  %v6397_v55 = vpack.c.bf16 %v4806_v33, %v4802_v40  ;;  %v3800_v62 = vadd.f32 1.0, %v6864_v0 }
 0x4af   : > { %v4824_v20 = vpop.permute.xlu0 %4823  ;;  %v9881_v23 = vpop.eup %6867  ;;  %v3889_v35 = vmul.f32 %v6866_v47, %v9738_v19  ;;  %v4837_v61 = vsel %vm785_vm8, %v9848_v42, %v4822_v51  ;;  %6887 = vtanh.f32 %v3717_v46  ;;  %v6435_v19 = vpack.c.bf16 %v4807_v17, %v4803_v30  ;;  %v9923_v47 = vld [vmem:[#allocation9 + $0x238] sm:$0xff] }
 0x4b0   : > { %v9884_v25 = vpop.eup %6869  ;;  %6889 = vrcp.f32 %v3842_v52  ;;  %6398 = vmatprep.subr.bf16.mxu0 %v6397_v55  ;;  %v6433_v59 = vpack.c.bf16 %v4808_v38, %v4804_v45  ;;  %v4849_v32 = vmul.f32 %v4841_v53, %v4837_v61  ;;  %v4838_v15 = vsel %vm785_vm8, %v9850_v44, %v4824_v20  ;;  %10742 = vst [vmem:[#allocation18_spill] sm:$0xff] %v9923_v47 }
 0x4b1   : > { %v9890_v7 = vpop.eup %6871  ;;  %v3897_v2 = vadd.f32 %v3889_v35, %v3881_v9  ;;  %6400 = vmatpush1.bf16.msra.mxu0 %v6399_v6  ;;  %v4853_v46 = vmul.f32 %v4845_v37, %v4838_v15  ;;  %v3716_v4 = vadd.f32 %v9516_v22, %v9704_v41  ;;  %v3719_v24 = vadd.f32 %v9518_v26, %v9730_v43  ;;  %v9914_v22 = vld [vmem:[#allocation9 + $0x218] sm:$0xff]  ;;  %v9921_v43 = vld [vmem:[#allocation9 + $0x230] sm:$0xff] }
 0x4b2   : > { %v4826_v28 = vpop.permute.xlu1 %4825  ;;  %v6874_v18 = vpop.eup %6873  ;;  %6434 = vmatprep.subr.bf16.mxu1 %v6433_v59  ;;  %v3720_v52 = vadd.f32 %v9518_v26, %v9740_v50  ;;  %10741 = vst [vmem:[#allocation20_spill] sm:$0xff] %v9921_v43  ;;  %v3877_v50 = vld [vmem:[#allocation6 + $0x20] sm:$0xff]  ;;  %v3845_v38 = vadd.f32 1.0, %v9881_v23  ;;  %v3875_v37 = vld [vmem:[#allocation6 + $0x10] sm:$0xff]  ;;  %v3876_v15 = vld [vmem:[#allocation6 + $0x18] sm:$0xff] }
 0x4b3   : > { %v4828_v58 = vpop.permute.xlu0 %4827  ;;  %v6876_v14 = vpop.eup %6875  ;;  %6891 = vtanh.f32 %v3897_v2  ;;  %3921 = vst [vmem:[#allocation6] sm:$0xff] %v3897_v2  ;;  %v3890_v40 = vmul.f32 %v6874_v18, %v9743_v34  ;;  %v4835_v33 = vsel %vm785_vm8, %v4822_v51, %v4826_v28  ;;  %6436 = vmatpush1.bf16.msra.mxu1 %v6435_v19  ;;  %v6403_v45 = vpack.c.bf16 %v4853_v46, %v4849_v32  ;;  %v3878_v19 = vld [vmem:[#allocation6 + $0x28] sm:$0xff] }
 0x4b4   : > { %v9898_v27 = vpop.eup %6877  ;;  %6893 = vtanh.f32 %v9854_v60  ;;  %v4850_v12 = vmul.f32 %v4842_v39, %v4835_v33  ;;  %v4836_v0 = vsel %vm785_vm8, %v4824_v20, %v4828_v58  ;;  %v9912_v60 = vld [vmem:[#allocation9 + $0x210] sm:$0xff]  ;;  %v3885_v61 = vmul.f32 %v9839_v48, %v3877_v50 }
 0x4b5   : > { %v9905_v9 = vpop.eup %6879  ;;  %v3898_v34 = vadd.f32 %v3890_v40, %v3882_v3  ;;  %6895 = vtanh.f32 %v9858_v63  ;;  %v4854_v51 = vmul.f32 %v4846_v36, %v4836_v0  ;;  %v3883_v59 = vmul.f32 %v9864_v1, %v3875_v37  ;;  %v3879_v33 = vld [vmem:[#allocation6 + $0x30] sm:$0xff] }
 0x4b6   : > { %v4830_v41 = vpop.permute.xlu1 %4829  ;;  %6897 = vrcp.f32 %v3800_v62  ;;  %v6882_v26 = vpop.eup %6881  ;;  %v3843_v62 = vadd.f32 1.0, %v9884_v25  ;;  %v3844_v48 = vadd.f32 1.0, %v6876_v14  ;;  %v3886_v25 = vmul.f32 %v9866_v11, %v3878_v19 }
 0x4b7   : > { %v4832_v30 = vpop.permute.xlu0 %4831  ;;  %v4833_v20 = vsel %vm785_vm8, %v4826_v28, %v4830_v41  ;;  %v4839_v63 = vsel %vm785_vm8, %v4830_v41, %v9848_v42  ;;  %6899 = vtanh.f32 %v3898_v34  ;;  %3922 = vst [vmem:[#allocation6 + $0x8] sm:$0xff] %v3898_v34  ;;  %v6884_v35 = vpop.eup %6883  ;;  %v6401_v17 = vpack.c.bf16 %v4854_v51, %v4850_v12 }
 0x4b8   : > { %v4851_v21 = vmul.f32 %v9912_v60, %v4833_v20  ;;  %v4852_v57 = vmul.f32 %v9914_v22, %v4839_v63  ;;  %6901 = vtanh.f32 %v3716_v4  ;;  %v4834_v6 = vsel %vm785_vm8, %v4828_v58, %v4832_v30  ;;  %v6886_v55 = vpop.eup %6885  ;;  %v3880_v4 = vld [vmem:[#allocation6 + $0x38] sm:$0xff] }
 0x4b9   : > { %v4840_v42 = vsel %vm785_vm8, %v4832_v30, %v9850_v44  ;;  %6903 = vtanh.f32 %v3719_v24  ;;  %v4855_v53 = vmul.f32 %v9921_v43, %v4834_v6  ;;  %6402 = vmatprep.subr.bf16.mxu0 %v6401_v17  ;;  %v6888_v2 = vpop.eup %6887  ;;  %v3846_v44 = vadd.f32 1.0, %v9890_v7 }
 0x4ba   : > { %v4856_v3 = vmul.f32 %v9923_v47, %v4840_v42  ;;  %6905 = vtanh.f32 %v3720_v52  ;;  %6404 = vmatpush1.bf16.msra.mxu0 %v6403_v45  ;;  %v6890_v28 = vpop.eup %6889  ;;  %v3893_v58 = vmul.f32 %v6888_v2, %v9752_v29  ;;  %v3884_v14 = vmul.f32 %v9905_v9, %v3876_v15  ;;  %v10744_v2 = vld [vmem:[#allocation17_spill] sm:$0xff]  ;;  %v7152_v47 = vld [vmem:[#allocation9 + $0x50] sm:$0xff] }
 0x4bb   : > { %v6439_v39 = vpack.c.bf16 %v4855_v53, %v4851_v21  ;;  %6907 = vrcp.f32 %v3845_v38  ;;  %v3847_v12 = vadd.f32 1.0, %v9898_v27  ;;  %v3848_v52 = vadd.f32 1.0, %v6884_v35 }
 0x4bc   : > { %v6437_v23 = vpack.c.bf16 %v4856_v3, %v4852_v57  ;;  %6909 = vrcp.f32 %v3843_v62  ;;  %v3901_v7 = vadd.f32 %v3893_v58, %v3885_v61 }
 0x4bd   : > { %v6892_v18 = vpop.eup %6891  ;;  %6911 = vrcp.f32 %v3846_v44 }
 0x4be   : > { %6438 = vmatprep.subr.bf16.mxu1 %v6437_v23  ;;  %v6894_v32 = vpop.eup %6893  ;;  %v9941_v40 = vmul.f32 %v6892_v18, %v6882_v26  ;;  %6913 = vtanh.f32 %v3901_v7  ;;  %3925 = vst [vmem:[#allocation6 + $0x20] sm:$0xff] %v3901_v7  ;;  %v10745_v18 = vld [vmem:[#allocation23_spill] sm:$0xff] }
 0x4bf   : > { %6440 = vmatpush1.bf16.msra.mxu1 %v6439_v39  ;;  %v6896_v46 = vpop.eup %6895  ;;  %v3891_v29 = vmul.f32 %v6894_v32, %v9760_v13  ;;  %6915 = vrcp.f32 %v3844_v48  ;;  %v3887_v13 = vmul.f32 %v6886_v55, %v3879_v33  ;;  %v10746_v48 = vld [vmem:[#allocation22_spill] sm:$0xff] }
 0x4c0   : > { %v6898_v36 = vpop.eup %6897  ;;  %3929 = vst [vmem:[#allocation5] sm:$0xff] %v9941_v40  ;;  %v3894_v1 = vmul.f32 %v6896_v46, %v9773_v31  ;;  %3953 = vrot.lane.b32.xlu1 %v9941_v40, %s7279_s1  ;;  %v4434_v33 = vld [vmem:[%s10660_s9 + $0x8] sm:$0xff] }
 0x4c1   : > { %v6900_v11 = vpop.eup %6899  ;;  %v3899_v0 = vadd.f32 %v3891_v29, %v3883_v59  ;;  %v3888_v51 = vmul.f32 %v6898_v36, %v3880_v4  ;;  %6061 = vmatprep.mubr.msk.f32.mxu0 %vm1343_vm1, %v4434_v33  ;;  %6069 = vmatprep.mubr.msk.f32.mxu1 %vm1343_vm1, %v4434_v33  ;;  %v4436_v29 = vld [vmem:[%s10660_s9 + $0x18] sm:$0xff]  ;;  %v4435_v36 = vld [vmem:[%s10660_s9 + $0x10] sm:$0xff]  ;;  %v4438_v4 = vld [vmem:[%s10660_s9 + $0x28] sm:$0xff] }
 0x4c2   : > { %v6902_v34 = vpop.eup %6901  ;;  %v9950_v24 = vmul.f32 %v6900_v11, %v6890_v28  ;;  %v3902_v41 = vadd.f32 %v3894_v1, %v3886_v25  ;;  %v10747_v25 = vld [vmem:[#allocation19_spill] sm:$0xff]  ;;  %v4437_v1 = vld [vmem:[%s10660_s9 + $0x20] sm:$0xff]  ;;  %v4440_v11 = vld [vmem:[%s10660_s9 + $0x38] sm:$0xff] }
 0x4c3   : > { %v6904_v30 = vpop.eup %6903  ;;  %6917 = vtanh.f32 %v3899_v0  ;;  %3923 = vst [vmem:[#allocation6 + $0x10] sm:$0xff] %v3899_v0  ;;  %v3892_v31 = vmul.f32 %v6902_v34, %v9779_v8  ;;  %v4441_v0 = vld [vmem:[%s10660_s9 + $0x40] sm:$0xff]  ;;  %v4444_v34 = vld [vmem:[%s10660_s9 + $0x58] sm:$0xff] }
 0x4c4   : > { %v6906_v20 = vpop.eup %6905  ;;  %3930 = vst [vmem:[#allocation5 + $0x8] sm:$0xff] %v9950_v24  ;;  %6919 = vtanh.f32 %v3902_v41  ;;  %3926 = vst [vmem:[#allocation6 + $0x28] sm:$0xff] %v3902_v41  ;;  %v3895_v27 = vmul.f32 %v6904_v30, %v9798_v56  ;;  %v4446_v41 = vld [vmem:[%s10660_s9 + $0x68] sm:$0xff]  ;;  %v4445_v30 = vld [vmem:[%s10660_s9 + $0x60] sm:$0xff] }
 0x4c5   : > { %6921 = vrcp.f32 %v3847_v12  ;;  %v3900_v9 = vadd.f32 %v3892_v31, %v3884_v14  ;;  %v3896_v63 = vmul.f32 %v6906_v20, %v9826_v5  ;;  %v6908_v50 = vpop.eup %6907  ;;  %v9959_v5 = vmul.f32 %v9715_v54, %v9941_v40  ;;  %v4439_v14 = vld [vmem:[%s10660_s9 + $0x30] sm:$0xff]  ;;  %v4442_v12 = vld [vmem:[%s10660_s9 + $0x48] sm:$0xff]  ;;  %v4448_v31 = vld [vmem:[%s10660_s9 + $0x78] sm:$0xff] }
 0x4c6   : > { %6923 = vrcp.f32 %v3848_v52  ;;  %v3903_v26 = vadd.f32 %v3895_v27, %v3887_v13  ;;  %v6910_v21 = vpop.eup %6909  ;;  %v4443_v13 = vld [vmem:[%s10660_s9 + $0x50] sm:$0xff] }
 0x4c7   : > { %6925 = vtanh.f32 %v3900_v9  ;;  %3924 = vst [vmem:[#allocation6 + $0x18] sm:$0xff] %v3900_v9  ;;  %v3904_v45 = vadd.f32 %v3896_v63, %v3888_v51  ;;  %v6912_v8 = vpop.eup %6911  ;;  %v4447_v27 = vld [vmem:[%s10660_s9 + $0x70] sm:$0xff]  ;;  %v3938_v9 = vld [vmem:[%s10659_s8 + $0x8] sm:$0xff] }
 0x4c8   : > { %6927 = vtanh.f32 %v3903_v26  ;;  %3927 = vst [vmem:[#allocation6 + $0x30] sm:$0xff] %v3903_v26  ;;  %v6914_v57 = vpop.eup %6913 }
 0x4c9   : > { %6929 = vtanh.f32 %v3904_v45  ;;  %3928 = vst [vmem:[#allocation6 + $0x38] sm:$0xff] %v3904_v45  ;;  %v6916_v35 = vpop.eup %6915  ;;  %v3917_v6 = vmul.f32 %v6914_v57, %v6908_v50  ;;  %v5438_v57 = vld [vmem:[%s10748_s30 + $0x8] sm:$0xff] }
 0x4cb   : > { %3933 = vst [vmem:[#allocation5 + $0x20] sm:$0xff] %v3917_v6  ;;  %3955 = vrot.lane.b32.xlu0 %v3917_v6, %s7279_s1  ;;  %v9962_v42 = vmul.f32 %v9720_v49, %v3917_v6  ;;  %v10743_v49 = vld [vmem:[#allocation21_spill] sm:$0xff] }
 0x4cc   : > { %v9975_v62 = vmul.f32 %v10743_v49, %v9950_v24 }
 0x4cd   : > { %v6918_v56 = vpop.eup %6917 }
 0x4ce   : > { %v6920_v17 = vpop.eup %6919  ;;  %v3915_v38 = vmul.f32 %v6918_v56, %v6910_v21  ;;  %v5439_v21 = vld [vmem:[%s10748_s30 + $0x10] sm:$0xff] }
 0x4cf   : > { %v6922_v53 = vpop.eup %6921  ;;  %v9964_v3 = vmul.f32 %v6920_v17, %v6912_v8  ;;  %v5440_v17 = vld [vmem:[%s10748_s30 + $0x18] sm:$0xff] }
 0x4d0   : > { %v6924_v61 = vpop.eup %6923  ;;  %3931 = vst [vmem:[#allocation5 + $0x10] sm:$0xff] %v3915_v38  ;;  %3961 = vrot.lane.b32.xlu1 %v3915_v38, %s7279_s1  ;;  %v9970_v37 = vmul.f32 %v9748_v16, %v3915_v38  ;;  %v7147_v16 = vld [vmem:[#allocation9] sm:$0xff] }
 0x4d1   : > { %v6926_v54 = vpop.eup %6925  ;;  %3934 = vst [vmem:[#allocation5 + $0x28] sm:$0xff] %v9964_v3  ;;  %v9979_v19 = vmul.f32 %v10744_v2, %v9964_v3  ;;  %v5444_v2 = vld [vmem:[%s10748_s30 + $0x38] sm:$0xff] }
 0x4d2   : > { %v6928_v44 = vpop.eup %6927  ;;  %v9981_v39 = vmul.f32 %v6926_v54, %v6916_v35 }
 0x4d3   : > { %v6930_v23 = vpop.eup %6929  ;;  %v3919_v28 = vmul.f32 %v6928_v44, %v6922_v53  ;;  %v5443_v53 = vld [vmem:[%s10748_s30 + $0x30] sm:$0xff] }
 0x4d4   : > { %3932 = vst [vmem:[#allocation5 + $0x18] sm:$0xff] %v9981_v39  ;;  %v9986_v58 = vmul.f32 %v6930_v23, %v6924_v61  ;;  %4001 = vrot.lane.b32.xlu1 %v9941_v40, %s7280_s10  ;;  %v9997_v32 = vmul.f32 %v10746_v48, %v9981_v39  ;;  %v5442_v61 = vld [vmem:[%s10748_s30 + $0x28] sm:$0xff] }
 0x4d5   : > { %3935 = vst [vmem:[#allocation5 + $0x30] sm:$0xff] %v3919_v28  ;;  %3963 = vrot.lane.b32.xlu0 %v3919_v28, %s7279_s1  ;;  %v9992_v59 = vmul.f32 %v10745_v18, %v3919_v28 }
 0x4d6   : > { %3936 = vst [vmem:[#allocation5 + $0x38] sm:$0xff] %v9986_v58  ;;  %v10001_v15 = vmul.f32 %v10747_v25, %v9986_v58 }
 0x4d8   : > { %4009 = vrot.lane.b32.xlu1 %v3915_v38, %s7280_s10 }
 0x4d9   : > { %4003 = vrot.lane.b32.xlu0 %v3917_v6, %s7280_s10 }
 0x4dc   : > { %4049 = vrot.lane.b32.xlu1 %v9941_v40, %s7281_s25 }
 0x4dd   : > { %4011 = vrot.lane.b32.xlu0 %v3919_v28, %s7280_s10 }
 0x4e0   : > { %4057 = vrot.lane.b32.xlu1 %v3915_v38, %s7281_s25 }
 0x4e1   : > { %4051 = vrot.lane.b32.xlu0 %v3917_v6, %s7281_s25 }
 0x4e4   : > { %4097 = vrot.lane.b32.xlu1 %v9941_v40, %s7282_s28 }
 0x4e5   : > { %4059 = vrot.lane.b32.xlu0 %v3919_v28, %s7281_s25 }
 0x4e8   : > { %4105 = vrot.lane.b32.xlu1 %v3915_v38, %s7282_s28 }
 0x4e9   : > { %4099 = vrot.lane.b32.xlu0 %v3917_v6, %s7282_s28 }
 0x4ec   : > { %4169 = vrot.lane.b32.xlu1 %v9941_v40, %s7283_s29 }
 0x4ed   : > { %4107 = vrot.lane.b32.xlu0 %v3919_v28, %s7282_s28 }
 0x4f0   : > { %4177 = vrot.lane.b32.xlu1 %v3915_v38, %s7283_s29 }
 0x4f1   : > { %4171 = vrot.lane.b32.xlu0 %v3917_v6, %s7283_s29 }
 0x4f4   : > { %4217 = vrot.lane.b32.xlu1 %v9941_v40, %s7284_s20 }
 0x4f5   : > { %4179 = vrot.lane.b32.xlu0 %v3919_v28, %s7283_s29 }
 0x4f8   : > { %4225 = vrot.lane.b32.xlu1 %v3915_v38, %s7284_s20 }
 0x4f9   : > { %4219 = vrot.lane.b32.xlu0 %v3917_v6, %s7284_s20 }
 0x4fc   : > { %4265 = vrot.lane.b32.xlu1 %v9941_v40, %s7285_s23 }
 0x4fd   : > { %4227 = vrot.lane.b32.xlu0 %v3919_v28, %s7284_s20 }
 0x500   : > { %4273 = vrot.lane.b32.xlu1 %v3915_v38, %s7285_s23 }
 0x501   : > { %4267 = vrot.lane.b32.xlu0 %v3917_v6, %s7285_s23 }
 0x504   : > { %4313 = vrot.lane.b32.xlu1 %v9941_v40, %s7286_s16  ;;  %v4433_v40 = vld [vmem:[%s10660_s9] sm:$0xff] }
 0x505   : > { %4275 = vrot.lane.b32.xlu0 %v3919_v28, %s7285_s23  ;;  %5026 = vmatmul.mubr.f32.vlgmr.msra.gmra.mrb[32].mxu0 %v4433_v40 }
 0x506   : > { %5139 = vmatmul.mubr.f32.vlgmr.msra.gmra.mrb[32].mxu1 %v4433_v40  ;;  %6062 = vmatprep.mubr.msk.f32.mxu0 %vm1343_vm1, %v4436_v29 }
 0x507   : > { %6070 = vmatprep.mubr.msk.f32.mxu1 %vm1343_vm1, %v4436_v29 }
 0x508   : > { %4321 = vrot.lane.b32.xlu1 %v3915_v38, %s7286_s16 }
 0x509   : > { %4315 = vrot.lane.b32.xlu0 %v3917_v6, %s7286_s16  ;;  %5032 = vmatmul.mubr.f32.gmra.mrb[34].mxu0 %v4435_v36  ;;  %v5441_v6 = vld [vmem:[%s10748_s30 + $0x20] sm:$0xff] }
 0x50a   : > { %5145 = vmatmul.mubr.f32.gmra.mrb[34].mxu1 %v4435_v36  ;;  %6063 = vmatprep.mubr.msk.f32.mxu0 %vm1343_vm1, %v4438_v4 }
 0x50b   : > { %6071 = vmatprep.mubr.msk.f32.mxu1 %vm1343_vm1, %v4438_v4 }
 0x50c   : > { %3957 = vrot.lane.b32.xlu1 %v9950_v24, %s7279_s1 }
 0x50d   : > { %4323 = vrot.lane.b32.xlu0 %v3919_v28, %s7286_s16  ;;  %5038 = vmatmul.mubr.f32.gmra.mrb[36].mxu0 %v4437_v1 }
 0x50e   : > { %5151 = vmatmul.mubr.f32.gmra.mrb[36].mxu1 %v4437_v1  ;;  %6064 = vmatprep.mubr.msk.f32.mxu0 %vm1343_vm1, %v4440_v11 }
 0x50f   : > { %6072 = vmatprep.mubr.msk.f32.mxu1 %vm1343_vm1, %v4440_v11 }
 0x510   : > { %3965 = vrot.lane.b32.xlu1 %v9981_v39, %s7279_s1 }
 0x511   : > { %3959 = vrot.lane.b32.xlu0 %v9964_v3, %s7279_s1  ;;  %5044 = vmatmul.mubr.f32.gmra.mrb[38].mxu0 %v4439_v14 }
 0x512   : > { %5157 = vmatmul.mubr.f32.gmra.mrb[38].mxu1 %v4439_v14  ;;  %6065 = vmatprep.mubr.msk.f32.mxu0 %vm1343_vm1, %v4442_v12 }
 0x513   : > { %6073 = vmatprep.mubr.msk.f32.mxu1 %vm1343_vm1, %v4442_v12 }
 0x514   : > { %4005 = vrot.lane.b32.xlu1 %v9950_v24, %s7280_s10 }
 0x515   : > { %3967 = vrot.lane.b32.xlu0 %v9986_v58, %s7279_s1  ;;  %5050 = vmatmul.mubr.f32.gmra.mrb[40].mxu0 %v4441_v0 }
 0x516   : > { %5163 = vmatmul.mubr.f32.gmra.mrb[40].mxu1 %v4441_v0  ;;  %6066 = vmatprep.mubr.msk.f32.mxu0 %vm1343_vm1, %v4444_v34 }
 0x517   : > { %6074 = vmatprep.mubr.msk.f32.mxu1 %vm1343_vm1, %v4444_v34 }
 0x518   : > { %4013 = vrot.lane.b32.xlu1 %v9981_v39, %s7280_s10 }
 0x519   : > { %4007 = vrot.lane.b32.xlu0 %v9964_v3, %s7280_s10  ;;  %5056 = vmatmul.mubr.f32.gmra.mrb[42].mxu0 %v4443_v13 }
 0x51a   : > { %5169 = vmatmul.mubr.f32.gmra.mrb[42].mxu1 %v4443_v13  ;;  %6067 = vmatprep.mubr.msk.f32.mxu0 %vm1343_vm1, %v4446_v41 }
 0x51b   : > { %6075 = vmatprep.mubr.msk.f32.mxu1 %vm1343_vm1, %v4446_v41 }
 0x51c   : > { %4053 = vrot.lane.b32.xlu1 %v9950_v24, %s7281_s25 }
 0x51d   : > { %4015 = vrot.lane.b32.xlu0 %v9986_v58, %s7280_s10  ;;  %5062 = vmatmul.mubr.f32.gmra.mrb[44].mxu0 %v4445_v30 }
 0x51e   : > { %5175 = vmatmul.mubr.f32.gmra.mrb[44].mxu1 %v4445_v30  ;;  %6068 = vmatprep.mubr.msk.f32.mxu0 %vm1343_vm1, %v4448_v31 }
 0x51f   : > { %6076 = vmatprep.mubr.msk.f32.mxu1 %vm1343_vm1, %v4448_v31 }
 0x520   : > { %4061 = vrot.lane.b32.xlu1 %v9981_v39, %s7281_s25 }
 0x521   : > { %4055 = vrot.lane.b32.xlu0 %v9964_v3, %s7281_s25  ;;  %5068 = vmatmul.mubr.f32.gmra.mrb[46].mxu0 %v4447_v27 }
 0x522   : > { %5181 = vmatmul.mubr.f32.gmra.mrb[46].mxu1 %v4447_v27  ;;  %6077 = vmatprep.mubr.msk.f32.mxu0 %vm1343_vm1, %v3938_v9  ;;  %v7143_v27 = vld [vmem:[#allocation9 + $0x8] sm:$0xff] }
 0x523   : > { %6085 = vmatprep.mubr.msk.f32.mxu1 %vm1343_vm1, %v3938_v9 }
 0x524   : > { %4101 = vrot.lane.b32.xlu1 %v9950_v24, %s7282_s28 }
 0x525   : > { %4063 = vrot.lane.b32.xlu0 %v9986_v58, %s7281_s25 }
 0x528   : > { %4109 = vrot.lane.b32.xlu1 %v9981_v39, %s7282_s28 }
 0x529   : > { %4103 = vrot.lane.b32.xlu0 %v9964_v3, %s7282_s28 }
 0x52c   : > { %4173 = vrot.lane.b32.xlu1 %v9950_v24, %s7283_s29 }
 0x52d   : > { %4111 = vrot.lane.b32.xlu0 %v9986_v58, %s7282_s28 }
 0x530   : > { %4181 = vrot.lane.b32.xlu1 %v9981_v39, %s7283_s29 }
 0x531   : > { %4175 = vrot.lane.b32.xlu0 %v9964_v3, %s7283_s29 }
 0x532   : > { %v10136_v52 = vpop.permute.xlu1 %3953 }
 0x534   : > { %4221 = vrot.lane.b32.xlu1 %v9950_v24, %s7284_s20 }
 0x535   : > { %4183 = vrot.lane.b32.xlu0 %v9986_v58, %s7283_s29 }
 0x538   : > { %4229 = vrot.lane.b32.xlu1 %v9981_v39, %s7284_s20 }
 0x539   : > { %4223 = vrot.lane.b32.xlu0 %v9964_v3, %s7284_s20 }
 0x53c   : > { %4269 = vrot.lane.b32.xlu1 %v9950_v24, %s7285_s23 }
 0x53d   : > { %4231 = vrot.lane.b32.xlu0 %v9986_v58, %s7284_s20  ;;  %v10152_v51 = vpop.permute.xlu0 %3955 }
 0x540   : > { %4277 = vrot.lane.b32.xlu1 %v9981_v39, %s7285_s23 }
 0x541   : > { %4271 = vrot.lane.b32.xlu0 %v9964_v3, %s7285_s23 }
 0x542   : > { %v10157_v20 = vpop.permute.xlu1 %3961 }
 0x544   : > { %4317 = vrot.lane.b32.xlu1 %v9950_v24, %s7286_s16  ;;  %v5437_v24 = vld [vmem:[%s10748_s30] sm:$0xff] }
 0x545   : > { %4279 = vrot.lane.b32.xlu0 %v9986_v58, %s7285_s23 }
 0x546   : > { %v10173_v63 = vpop.permute.xlu1 %4001 }
 0x547   : > { %v10175_v26 = vpop.permute.xlu0 %3963 }
 0x548   : > { %4325 = vrot.lane.b32.xlu1 %v9981_v39, %s7286_s16 }
 0x549   : > { %4319 = vrot.lane.b32.xlu0 %v9964_v3, %s7286_s16 }
 0x54a   : > { %v10184_v50 = vpop.permute.xlu1 %4009 }
 0x54b   : > { %v10186_v45 = vpop.permute.xlu0 %4003 }
 0x54c   : > { %5447 = vperm.xlu1 %6674, %v5437_v24  }
 0x54d   : > { %4327 = vrot.lane.b32.xlu0 %v9986_v58, %s7286_s16 }
 0x54e   : > { %v10193_v8 = vpop.permute.xlu1 %4049 }
 0x54f   : > { %v10198_v35 = vpop.permute.xlu0 %4011 }
 0x550   : > { %5457 = vperm.xlu1 %6674, %v5439_v21  }
 0x551   : > { %5452 = vperm.xlu0 %6673, %v5438_v57   ;;  %v7144_v57 = vld [vmem:[#allocation9 + $0x10] sm:$0xff] }
 0x552   : > { %v10203_v56 = vpop.permute.xlu1 %4057 }
 0x553   : > { %v10208_v38 = vpop.permute.xlu0 %4051 }
 0x554   : > { %5467 = vperm.xlu1 %6674, %v5441_v6  }
 0x555   : > { %5462 = vperm.xlu0 %6673, %v5440_v17  }
 0x556   : > { %v10213_v3 = vpop.permute.xlu1 %4097 }
 0x557   : > { %v10218_v54 = vpop.permute.xlu0 %4059 }
 0x558   : > { %5477 = vperm.xlu1 %6674, %v5443_v53   ;;  %v7145_v53 = vld [vmem:[#allocation9 + $0x28] sm:$0xff] }
 0x559   : > { %5472 = vperm.xlu0 %6673, %v5442_v61  }
 0x55a   : > { %v10220_v49 = vpop.permute.xlu1 %4105 }
 0x55b   : > { %v10225_v44 = vpop.permute.xlu0 %4099 }
 0x55d   : > { %5482 = vperm.xlu0 %6673, %v5444_v2   ;;  %v7146_v2 = vld [vmem:[#allocation9 + $0x30] sm:$0xff] }
 0x55e   : > { %v10227_v39 = vpop.permute.xlu1 %4169 }
 0x55f   : > { %v10229_v23 = vpop.permute.xlu0 %4107 }
 0x562   : > { %v10231_v28 = vpop.permute.xlu1 %4177 }
 0x563   : > { %v10233_v58 = vpop.permute.xlu0 %4171 }
 0x566   : > { %v10235_v18 = vpop.permute.xlu1 %4217 }
 0x567   : > { %v10237_v48 = vpop.permute.xlu0 %4179 }
 0x56a   : > { %v10239_v25 = vpop.permute.xlu1 %4225 }
 0x56b   : > { %v10241_v33 = vpop.permute.xlu0 %4219 }
 0x56e   : > { %v10243_v40 = vpop.permute.xlu1 %4265 }
 0x56f   : > { %v10245_v29 = vpop.permute.xlu0 %4227 }
 0x572   : > { %v10247_v36 = vpop.permute.xlu1 %4273 }
 0x573   : > { %v10249_v4 = vpop.permute.xlu0 %4267 }
 0x576   : > { %v10251_v1 = vpop.permute.xlu1 %4313 }
 0x577   : > { %v10253_v11 = vpop.permute.xlu0 %4275 }
 0x57a   : > { %v10255_v14 = vpop.permute.xlu1 %4321 }
 0x57b   : > { %v10257_v12 = vpop.permute.xlu0 %4315 }
 0x57e   : > { %v3958_v0 = vpop.permute.xlu1 %3957 }
 0x57f   : > { %v10259_v34 = vpop.permute.xlu0 %4323  ;;  %v3973_v13 = vsel %vm591_vm0, %v10136_v52, %v3958_v0  ;;  %v3971_v41 = vsel %vm591_vm0, %v3958_v0, %v10157_v20 }
 0x580   : > { %v3986_v9 = vmul.f32 %v7143_v27, %v3973_v13  ;;  %v3987_v6 = vmul.f32 %v7144_v57, %v3971_v41  ;;  %v7150_v57 = vld [vmem:[#allocation9 + $0x38] sm:$0xff] }
 0x582   : > { %v3966_v30 = vpop.permute.xlu1 %3965 }
 0x583   : > { %v3960_v31 = vpop.permute.xlu0 %3959  ;;  %v3975_v17 = vsel %vm591_vm0, %v3966_v30, %v10136_v52  ;;  %v3969_v13 = vsel %vm591_vm0, %v10157_v20, %v3966_v30 }
 0x584   : > { %v3972_v24 = vsel %vm591_vm0, %v3960_v31, %v10175_v26  ;;  %v3974_v21 = vsel %vm591_vm0, %v10152_v51, %v3960_v31  ;;  %v3985_v31 = vmul.f32 %v7147_v16, %v3975_v17 }
 0x585   : > { %v3990_v61 = vmul.f32 %v7145_v53, %v3974_v21  ;;  %v3991_v0 = vmul.f32 %v7146_v2, %v3972_v24  ;;  %v7148_v21 = vld [vmem:[#allocation9 + $0x18] sm:$0xff]  ;;  %v7151_v53 = vld [vmem:[#allocation9 + $0x48] sm:$0xff] }
 0x586   : > { %v4006_v27 = vpop.permute.xlu1 %4005  ;;  %v3988_v20 = vmul.f32 %v7148_v21, %v3969_v13 }
 0x587   : > { %v6479_v7 = vpack.c.bf16 %v3991_v0, %v3987_v6  ;;  %v3968_v55 = vpop.permute.xlu0 %3967  ;;  %v6441_v46 = vpack.c.bf16 %v3990_v61, %v3986_v9  ;;  %v4021_v41 = vsel %vm616_vm2, %v10173_v63, %v4006_v27  ;;  %v4019_v30 = vsel %vm616_vm2, %v4006_v27, %v10184_v50  ;;  %v7149_v9 = vld [vmem:[#allocation9 + $0x20] sm:$0xff]  ;;  %v7153_v27 = vld [vmem:[#allocation9 + $0x68] sm:$0xff] }
 0x588   : > { %v3970_v52 = vsel %vm591_vm0, %v10175_v26, %v3968_v55  ;;  %v3976_v24 = vsel %vm591_vm0, %v3968_v55, %v10152_v51  ;;  %v4034_v61 = vmul.f32 %v7151_v53, %v4021_v41  ;;  %v4035_v43 = vmul.f32 %v7152_v47, %v4019_v30  ;;  %v7154_v41 = vld [vmem:[#allocation9 + $0x70] sm:$0xff]  ;;  %v7158_v53 = vld [vmem:[#allocation9 + $0x78] sm:$0xff] }
 0x589   : > { %v3989_v16 = vmul.f32 %v7149_v9, %v3976_v24  ;;  %v3992_v6 = vmul.f32 %v7150_v57, %v3970_v52  ;;  %6442 = vmatprep.subr.bf16.mxu0 %v6441_v46  ;;  %v7156_v9 = vld [vmem:[#allocation9 + $0x58] sm:$0xff] }
 0x58a   : > { %v4014_v17 = vpop.permute.xlu1 %4013 }
 0x58b   : > { %v6443_v2 = vpack.c.bf16 %v3989_v16, %v3985_v31  ;;  %v4008_v26 = vpop.permute.xlu0 %4007  ;;  %v6477_v0 = vpack.c.bf16 %v3992_v6, %v3988_v20  ;;  %v4017_v55 = vsel %vm616_vm2, %v10184_v50, %v4014_v17  ;;  %v4023_v13 = vsel %vm616_vm2, %v4014_v17, %v10173_v63  ;;  %v7155_v20 = vld [vmem:[#allocation9 + $0x40] sm:$0xff] }
 0x58c   : > { %v4020_v51 = vsel %vm616_vm2, %v4008_v26, %v10198_v35  ;;  %v4022_v46 = vsel %vm616_vm2, %v10186_v45, %v4008_v26  ;;  %v4033_v30 = vmul.f32 %v7155_v20, %v4023_v13  ;;  %v4036_v16 = vmul.f32 %v7156_v9, %v4017_v55  ;;  %v7157_v6 = vld [vmem:[#allocation9 + $0x60] sm:$0xff]  ;;  %v7159_v55 = vld [vmem:[#allocation9 + $0x88] sm:$0xff] }
 0x58d   : > { %v4038_v31 = vmul.f32 %v7153_v27, %v4022_v46  ;;  %v4039_v47 = vmul.f32 %v7154_v41, %v4020_v51  ;;  %6444 = vmatpush1.bf16.msra.mxu0 %v6443_v2  ;;  %6478 = vmatprep.subr.bf16.mxu1 %v6477_v0  ;;  %v7161_v41 = vld [vmem:[#allocation9 + $0xa8] sm:$0xff] }
 0x58e   : > { %6480 = vmatpush1.bf16.msra.mxu1 %v6479_v7  ;;  %v4054_v50 = vpop.permute.xlu1 %4053 }
 0x58f   : > { %v6483_v52 = vpack.c.bf16 %v4039_v47, %v4035_v43  ;;  %v4016_v24 = vpop.permute.xlu0 %4015  ;;  %v6445_v21 = vpack.c.bf16 %v4038_v31, %v4034_v61  ;;  %v4067_v7 = vsel %vm642_vm3, %v4054_v50, %v10203_v56  ;;  %v4069_v43 = vsel %vm642_vm3, %v10193_v8, %v4054_v50  ;;  %v7162_v50 = vld [vmem:[#allocation9 + $0xb0] sm:$0xff] }
 0x590   : > { %v4018_v57 = vsel %vm616_vm2, %v10198_v35, %v4016_v24  ;;  %v4024_v63 = vsel %vm616_vm2, %v4016_v24, %v10186_v45  ;;  %v4082_v51 = vmul.f32 %v7159_v55, %v4069_v43  ;;  %v7160_v45 = vld [vmem:[#allocation9 + $0x90] sm:$0xff]  ;;  %v7164_v43 = vld [vmem:[#allocation9 + $0x98] sm:$0xff] }
 0x591   : > { %v4037_v17 = vmul.f32 %v7157_v6, %v4024_v63  ;;  %v4040_v61 = vmul.f32 %v7158_v53, %v4018_v57  ;;  %6446 = vmatprep.subr.bf16.mxu0 %v6445_v21  ;;  %v4083_v46 = vmul.f32 %v7160_v45, %v4067_v7  ;;  %v7163_v57 = vld [vmem:[#allocation9 + $0x80] sm:$0xff]  ;;  %v7166_v53 = vld [vmem:[#allocation9 + $0xb8] sm:$0xff] }
 0x592   : > { %v4062_v2 = vpop.permute.xlu1 %4061 }
 0x593   : > { %v6447_v26 = vpack.c.bf16 %v4037_v17, %v4033_v30  ;;  %v4056_v35 = vpop.permute.xlu0 %4055  ;;  %v6481_v0 = vpack.c.bf16 %v4040_v61, %v4036_v16  ;;  %v4071_v31 = vsel %vm642_vm3, %v4062_v2, %v10193_v8  ;;  %v4065_v21 = vsel %vm642_vm3, %v10203_v56, %v4062_v2 }
 0x594   : > { %v4068_v13 = vsel %vm642_vm3, %v4056_v35, %v10218_v54  ;;  %v4070_v27 = vsel %vm642_vm3, %v10208_v38, %v4056_v35  ;;  %v4081_v63 = vmul.f32 %v7163_v57, %v4071_v31  ;;  %v4084_v6 = vmul.f32 %v7164_v43, %v4065_v21 }
 0x595   : > { %v4086_v47 = vmul.f32 %v7161_v41, %v4070_v27  ;;  %v4087_v24 = vmul.f32 %v7162_v50, %v4068_v13  ;;  %6448 = vmatpush1.bf16.msra.mxu0 %v6447_v26  ;;  %6482 = vmatprep.subr.bf16.mxu1 %v6481_v0  ;;  %v7169_v27 = vld [vmem:[#allocation9 + $0xe8] sm:$0xff]  ;;  %v7170_v41 = vld [vmem:[#allocation9 + $0xf0] sm:$0xff] }
 0x596   : > { %6484 = vmatpush1.bf16.msra.mxu1 %v6483_v52  ;;  %v4102_v20 = vpop.permute.xlu1 %4101  ;;  %v7165_v52 = vld [vmem:[#allocation9 + $0xa0] sm:$0xff] }
 0x597   : > { %v6487_v30 = vpack.c.bf16 %v4087_v24, %v4083_v46  ;;  %v4064_v9 = vpop.permute.xlu0 %4063  ;;  %v6449_v16 = vpack.c.bf16 %v4086_v47, %v4082_v51  ;;  %v4117_v56 = vsel %vm668_vm4, %v10213_v3, %v4102_v20  ;;  %v4115_v2 = vsel %vm668_vm4, %v4102_v20, %v10220_v49  ;;  %v7168_v46 = vld [vmem:[#allocation9 + $0xd0] sm:$0xff] }
 0x598   : > { %v4066_v8 = vsel %vm642_vm3, %v10218_v54, %v4064_v9  ;;  %v4072_v7 = vsel %vm642_vm3, %v4064_v9, %v10208_v38  ;;  %v7167_v38 = vld [vmem:[#allocation9 + $0xc8] sm:$0xff]  ;;  %v4131_v13 = vmul.f32 %v7168_v46, %v4115_v2 }
 0x599   : > { %v4085_v17 = vmul.f32 %v7165_v52, %v4072_v7  ;;  %v4088_v61 = vmul.f32 %v7166_v53, %v4066_v8  ;;  %6450 = vmatprep.subr.bf16.mxu0 %v6449_v16  ;;  %v4130_v55 = vmul.f32 %v7167_v38, %v4117_v56  ;;  %v7171_v8 = vld [vmem:[#allocation9 + $0xc0] sm:$0xff]  ;;  %v7176_v38 = vld [vmem:[#allocation9 + $0x168] sm:$0xff] }
 0x59a   : > { %v4110_v54 = vpop.permute.xlu1 %4109 }
 0x59b   : > { %v6451_v26 = vpack.c.bf16 %v4085_v17, %v4081_v63  ;;  %v4104_v35 = vpop.permute.xlu0 %4103  ;;  %v6485_v0 = vpack.c.bf16 %v4088_v61, %v4084_v6  ;;  %v4113_v50 = vsel %vm668_vm4, %v10220_v49, %v4110_v54  ;;  %v4119_v24 = vsel %vm668_vm4, %v4110_v54, %v10213_v3  ;;  %v7172_v49 = vld [vmem:[#allocation9 + $0xd8] sm:$0xff]  ;;  %v7173_v6 = vld [vmem:[#allocation9 + $0xe0] sm:$0xff] }
 0x59c   : > { %v4116_v51 = vsel %vm668_vm4, %v4104_v35, %v10229_v23  ;;  %v4118_v45 = vsel %vm668_vm4, %v10225_v44, %v4104_v35  ;;  %v4129_v7 = vmul.f32 %v7171_v8, %v4119_v24  ;;  %v4132_v43 = vmul.f32 %v7172_v49, %v4113_v50  ;;  %v7174_v3 = vld [vmem:[#allocation9 + $0xf8] sm:$0xff]  ;;  %v7179_v24 = vld [vmem:[#allocation9 + $0x150] sm:$0xff] }
 0x59d   : > { %v4134_v31 = vmul.f32 %v7169_v27, %v4118_v45  ;;  %v4135_v47 = vmul.f32 %v7170_v41, %v4116_v51  ;;  %6452 = vmatpush1.bf16.msra.mxu0 %v6451_v26  ;;  %6486 = vmatprep.subr.bf16.mxu1 %v6485_v0  ;;  %v7175_v26 = vld [vmem:[#allocation9 + $0x148] sm:$0xff]  ;;  %v10749_v45 = vpack.c.bf16 %v9979_v19, %v9975_v62  ;;  %v7180_v19 = vld [vmem:[#allocation9 + $0x158] sm:$0xff] }
 0x59e   : > { %6488 = vmatpush1.bf16.msra.mxu1 %v6487_v30  ;;  %v4174_v21 = vpop.permute.xlu1 %4173 }
 0x59f   : > { %v6491_v20 = vpack.c.bf16 %v4135_v47, %v4131_v13  ;;  %v4112_v9 = vpop.permute.xlu0 %4111  ;;  %v6453_v16 = vpack.c.bf16 %v4134_v31, %v4130_v55  ;;  %v4187_v52 = vsel %vm707_vm5, %v4174_v21, %v10231_v28  ;;  %v7177_v13 = vld [vmem:[#allocation9 + $0x160] sm:$0xff]  ;;  %v10750_v31 = vpack.c.bf16 %v10001_v15, %v9997_v32  ;;  %v7181_v15 = vld [vmem:[#allocation9 + $0x170] sm:$0xff] }
 0x5a0   : > { %v4114_v57 = vsel %vm668_vm4, %v10229_v23, %v4112_v9  ;;  %v4120_v63 = vsel %vm668_vm4, %v4112_v9, %v10225_v44  ;;  %v4189_v44 = vsel %vm707_vm5, %v10227_v39, %v4174_v21  ;;  %v4202_v35 = vmul.f32 %v7175_v26, %v4187_v52  ;;  %v7178_v47 = vld [vmem:[#allocation9 + $0x140] sm:$0xff] }
 0x5a1   : > { %v4133_v56 = vmul.f32 %v7173_v6, %v4120_v63  ;;  %v4136_v30 = vmul.f32 %v7174_v3, %v4114_v57  ;;  %6454 = vmatprep.subr.bf16.mxu0 %v6453_v16  ;;  %v4201_v50 = vmul.f32 %v7178_v47, %v4189_v44  ;;  %v7182_v16 = vld [vmem:[#allocation9 + $0x178] sm:$0xff]  ;;  %v10751_v63 = vpack.c.bf16 %v9962_v42, %v9959_v5 }
 0x5a2   : > { %v4182_v17 = vpop.permute.xlu1 %4181 }
 0x5a3   : > { %v6455_v53 = vpack.c.bf16 %v4133_v56, %v4129_v7  ;;  %v4176_v23 = vpop.permute.xlu0 %4175  ;;  %v6489_v61 = vpack.c.bf16 %v4136_v30, %v4132_v43  ;;  %v4185_v0 = vsel %vm707_vm5, %v10231_v28, %v4182_v17  ;;  %v4191_v51 = vsel %vm707_vm5, %v4182_v17, %v10227_v39  ;;  %v7183_v56 = vld [vmem:[#allocation9 + $0x180] sm:$0xff]  ;;  %v7184_v30 = vld [vmem:[#allocation9 + $0x188] sm:$0xff] }
 0x5a4   : > { %v4188_v2 = vsel %vm707_vm5, %v4176_v23, %v10237_v48  ;;  %v4190_v54 = vsel %vm707_vm5, %v10233_v58, %v4176_v23  ;;  %v4203_v21 = vmul.f32 %v7179_v24, %v4185_v0  ;;  %v7185_v17 = vld [vmem:[#allocation9 + $0x1a0] sm:$0xff] }
 0x5a5   : > { %v4206_v55 = vmul.f32 %v7176_v38, %v4188_v2  ;;  %6456 = vmatpush1.bf16.msra.mxu0 %v6455_v53  ;;  %6490 = vmatprep.subr.bf16.mxu1 %v6489_v61  ;;  %v4205_v27 = vmul.f32 %v7177_v13, %v4190_v54  ;;  %v7187_v38 = vld [vmem:[#allocation9 + $0x190] sm:$0xff]  ;;  %v7191_v24 = vld [vmem:[#allocation9 + $0x1c0] sm:$0xff] }
 0x5a6   : > { %6458 = vmatprep.subr.bf16.mxu0 %v10749_v45  ;;  %6492 = vmatpush1.bf16.msra.mxu1 %v6491_v20  ;;  %v4222_v46 = vpop.permute.xlu1 %4221  ;;  %v4204_v20 = vmul.f32 %v7180_v19, %v4191_v51  ;;  %v7189_v45 = vld [vmem:[#allocation9 + $0x1b0] sm:$0xff]  ;;  %v7193_v19 = vld [vmem:[#allocation9 + $0x1e0] sm:$0xff] }
 0x5a7   : > { %6494 = vmatprep.subr.bf16.mxu1 %v10750_v31  ;;  %v4184_v28 = vpop.permute.xlu0 %4183  ;;  %v6461_v41 = vpack.c.bf16 %v4206_v55, %v4202_v35  ;;  %v4237_v32 = vsel %vm733_vm6, %v10235_v18, %v4222_v46  ;;  %v6463_v7 = vpack.c.bf16 %v4205_v27, %v4201_v50 }
 0x5a8   : > { %v4186_v39 = vsel %vm707_vm5, %v10237_v48, %v4184_v28  ;;  %v4192_v62 = vsel %vm707_vm5, %v4184_v28, %v10233_v58  ;;  %v4235_v48 = vsel %vm733_vm6, %v4222_v46, %v10239_v25  ;;  %v10752_v58 = vpack.c.bf16 %v9992_v59, %v9970_v37  ;;  %v7186_v59 = vld [vmem:[#allocation9 + $0x1a8] sm:$0xff] }
 0x5a9   : > { %v4207_v9 = vmul.f32 %v7181_v15, %v4186_v39  ;;  %v4208_v57 = vmul.f32 %v7182_v16, %v4192_v62  ;;  %6460 = vmatpush1.bf16.msra.mxu0 %v10751_v63  ;;  %v4249_v3 = vmul.f32 %v7183_v56, %v4237_v32  ;;  %v4250_v52 = vmul.f32 %v7184_v30, %v4235_v48  ;;  %v7192_v39 = vld [vmem:[#allocation9 + $0x1c8] sm:$0xff]  ;;  %v7197_v56 = vld [vmem:[#allocation9 + $0x1f0] sm:$0xff] }
 0x5aa   : > { %6462 = vmatprep.subr.bf16.mxu0 %v6461_v41  ;;  %6496 = vmatpush1.bf16.msra.mxu1 %v10752_v58  ;;  %v4230_v8 = vpop.permute.xlu1 %4229  ;;  %v7194_v32 = vld [vmem:[#allocation9 + $0x1e8] sm:$0xff] }
 0x5ab   : > { %v6499_v49 = vpack.c.bf16 %v4207_v9, %v4203_v21  ;;  %v4224_v43 = vpop.permute.xlu0 %4223  ;;  %v6497_v6 = vpack.c.bf16 %v4208_v57, %v4204_v20  ;;  %v4233_v23 = vsel %vm733_vm6, %v10239_v25, %v4230_v8  ;;  %v4239_v61 = vsel %vm733_vm6, %v4230_v8, %v10235_v18  ;;  %v7188_v25 = vld [vmem:[#allocation9 + $0x198] sm:$0xff] }
 0x5ac   : > { %v4236_v5 = vsel %vm733_vm6, %v4224_v43, %v10245_v29  ;;  %v4238_v42 = vsel %vm733_vm6, %v10241_v33, %v4224_v43  ;;  %v4251_v55 = vmul.f32 %v7187_v38, %v4233_v23  ;;  %v4252_v51 = vmul.f32 %v7188_v25, %v4239_v61  ;;  %v7190_v18 = vld [vmem:[#allocation9 + $0x1b8] sm:$0xff]  ;;  %v7200_v61 = vld [vmem:[#allocation9 + $0x208] sm:$0xff] }
 0x5ad   : > { %v4253_v37 = vmul.f32 %v7185_v17, %v4238_v42  ;;  %v4254_v53 = vmul.f32 %v7186_v59, %v4236_v5  ;;  %6464 = vmatpush1.bf16.msra.mxu0 %v6463_v7  ;;  %6498 = vmatprep.subr.bf16.mxu1 %v6497_v6 }
 0x5ae   : > { %6500 = vmatpush1.bf16.msra.mxu1 %v6499_v49  ;;  %v4270_v44 = vpop.permute.xlu1 %4269  ;;  %v7195_v49 = vld [vmem:[#allocation9 + $0x1d0] sm:$0xff] }
 0x5af   : > { %v6467_v2 = vpack.c.bf16 %v4253_v37, %v4249_v3  ;;  %v4232_v54 = vpop.permute.xlu0 %4231  ;;  %v6465_v26 = vpack.c.bf16 %v4254_v53, %v4250_v52  ;;  %v4283_v27 = vsel %vm759_vm7, %v4270_v44, %v10247_v36  ;;  %v7199_v53 = vld [vmem:[#allocation9 + $0x200] sm:$0xff] }
 0x5b0   : > { %v4234_v35 = vsel %vm733_vm6, %v10245_v29, %v4232_v54  ;;  %v4240_v0 = vsel %vm733_vm6, %v4232_v54, %v10241_v33  ;;  %v4285_v29 = vsel %vm759_vm7, %v10243_v40, %v4270_v44  ;;  %v4298_v62 = vmul.f32 %v7192_v39, %v4283_v27  ;;  %v3950_v39 = vld [vmem:[%s10659_s8 + $0x68] sm:$0xff] }
 0x5b1   : > { %v4255_v46 = vmul.f32 %v7189_v45, %v4234_v35  ;;  %v4256_v13 = vmul.f32 %v7190_v18, %v4240_v0  ;;  %6466 = vmatprep.subr.bf16.mxu0 %v6465_v26  ;;  %v4297_v21 = vmul.f32 %v7191_v24, %v4285_v29  ;;  %v7202_v26 = vld [vmem:[#allocation9 + $0x228] sm:$0xff]  ;;  %v3948_v24 = vld [vmem:[%s10659_s8 + $0x58] sm:$0xff] }
 0x5b2   : > { %6468 = vmatpush1.bf16.msra.mxu0 %v6467_v2  ;;  %v4278_v31 = vpop.permute.xlu1 %4277  ;;  %v7201_v2 = vld [vmem:[#allocation9 + $0x220] sm:$0xff]  ;;  %v10754_v29 = vld [vmem:[#allocation18_spill] sm:$0xff] }
 0x5b3   : > { %v6503_v33 = vpack.c.bf16 %v4255_v46, %v4251_v55  ;;  %v4272_v28 = vpop.permute.xlu0 %4271  ;;  %v6501_v41 = vpack.c.bf16 %v4256_v13, %v4252_v51  ;;  %v4281_v9 = vsel %vm759_vm7, %v10247_v36, %v4278_v31  ;;  %v4287_v16 = vsel %vm759_vm7, %v4278_v31, %v10243_v40  ;;  %v7196_v36 = vld [vmem:[#allocation9 + $0x1d8] sm:$0xff]  ;;  %v3937_v31 = vld [vmem:[%s10659_s8] sm:$0xff] }
 0x5b4   : > { %v4284_v47 = vsel %vm759_vm7, %v4272_v28, %v10253_v11  ;;  %v4286_v50 = vsel %vm759_vm7, %v10249_v4, %v4272_v28  ;;  %v4299_v43 = vmul.f32 %v7195_v49, %v4281_v9  ;;  %v4300_v6 = vmul.f32 %v7196_v36, %v4287_v16  ;;  %v7198_v40 = vld [vmem:[#allocation9 + $0x1f8] sm:$0xff] }
 0x5b5   : > { %v4301_v20 = vmul.f32 %v7193_v19, %v4286_v50  ;;  %v4302_v15 = vmul.f32 %v7194_v32, %v4284_v47  ;;  %6502 = vmatprep.subr.bf16.mxu1 %v6501_v41  ;;  %v10753_v13 = vld [vmem:[#allocation20_spill] sm:$0xff]  ;;  %v3943_v41 = vld [vmem:[%s10659_s8 + $0x30] sm:$0xff]  ;;  %v3946_v47 = vld [vmem:[%s10659_s8 + $0x48] sm:$0xff] }
 0x5b6   : > { %6504 = vmatpush1.bf16.msra.mxu1 %v6503_v33  ;;  %v4318_v57 = vpop.permute.xlu1 %4317  ;;  %v3944_v28 = vld [vmem:[%s10659_s8 + $0x38] sm:$0xff]  ;;  %v3945_v50 = vld [vmem:[%s10659_s8 + $0x40] sm:$0xff] }
 0x5b7   : > { %v6471_v63 = vpack.c.bf16 %v4301_v20, %v4297_v21  ;;  %v4280_v48 = vpop.permute.xlu0 %4279  ;;  %v6469_v58 = vpack.c.bf16 %v4302_v15, %v4298_v62  ;;  %v4331_v42 = vsel %vm785_vm8, %v4318_v57, %v10255_v14  ;;  %v3947_v21 = vld [vmem:[%s10659_s8 + $0x50] sm:$0xff]  ;;  %v3949_v62 = vld [vmem:[%s10659_s8 + $0x60] sm:$0xff]  ;;  %v3952_v19 = vld [vmem:[%s10659_s8 + $0x78] sm:$0xff] }
 0x5b8   : > { %v4282_v8 = vsel %vm759_vm7, %v10253_v11, %v4280_v48  ;;  %v4288_v7 = vsel %vm759_vm7, %v4280_v48, %v10249_v4  ;;  %v4333_v11 = vsel %vm785_vm8, %v10251_v1, %v4318_v57  ;;  %v4346_v44 = vmul.f32 %v7200_v61, %v4331_v42  ;;  %v3951_v20 = vld [vmem:[%s10659_s8 + $0x70] sm:$0xff] }
 0x5b9   : > { %v4303_v3 = vmul.f32 %v7197_v56, %v4282_v8  ;;  %v4304_v5 = vmul.f32 %v7198_v40, %v4288_v7  ;;  %6470 = vmatprep.subr.bf16.mxu0 %v6469_v58  ;;  %v4345_v23 = vmul.f32 %v7199_v53, %v4333_v11 }
 0x5ba   : > { %6472 = vmatpush1.bf16.msra.mxu0 %v6471_v63  ;;  %v4326_v4 = vpop.permute.xlu1 %4325 }
 0x5bb   : > { %v6507_v30 = vpack.c.bf16 %v4303_v3, %v4299_v43  ;;  %v4320_v52 = vpop.permute.xlu0 %4319  ;;  %v6505_v17 = vpack.c.bf16 %v4304_v5, %v4300_v6  ;;  %v4329_v0 = vsel %vm785_vm8, %v10255_v14, %v4326_v4  ;;  %v4335_v38 = vsel %vm785_vm8, %v4326_v4, %v10251_v1 }
 0x5bc   : > { %v4332_v37 = vsel %vm785_vm8, %v4320_v52, %v10259_v34  ;;  %v4334_v59 = vsel %vm785_vm8, %v10257_v12, %v4320_v52  ;;  %v4347_v18 = vmul.f32 %v9912_v60, %v4329_v0  ;;  %v4348_v14 = vmul.f32 %v9914_v22, %v4335_v38  ;;  %v3939_v60 = vld [vmem:[%s10659_s8 + $0x10] sm:$0xff]  ;;  %v3942_v22 = vld [vmem:[%s10659_s8 + $0x28] sm:$0xff] }
 0x5bd   : > { %v4349_v54 = vmul.f32 %v7201_v2, %v4334_v59  ;;  %v4350_v35 = vmul.f32 %v7202_v26, %v4332_v37  ;;  %6506 = vmatprep.subr.bf16.mxu1 %v6505_v17 }
 0x5be   : > { %6508 = vmatpush1.bf16.msra.mxu1 %v6507_v30 }
 0x5bf   : > { %v6475_v55 = vpack.c.bf16 %v4349_v54, %v4345_v23  ;;  %v4328_v25 = vpop.permute.xlu0 %4327  ;;  %v6473_v51 = vpack.c.bf16 %v4350_v35, %v4346_v44 }
 0x5c0   : > { %v4330_v45 = vsel %vm785_vm8, %v10259_v34, %v4328_v25  ;;  %v4336_v46 = vsel %vm785_vm8, %v4328_v25, %v10257_v12  ;;  %v3941_v12 = vld [vmem:[%s10659_s8 + $0x20] sm:$0xff] }
 0x5c1   : > { %v4351_v27 = vmul.f32 %v10753_v13, %v4330_v45  ;;  %v4352_v1 = vmul.f32 %v10754_v29, %v4336_v46  ;;  %6474 = vmatprep.subr.bf16.mxu0 %v6473_v51 }
 0x5c2   : > { %6476 = vmatpush1.bf16.msra.mxu0 %v6475_v55 }
 0x5c3   : > { %v6511_v33 = vpack.c.bf16 %v4351_v27, %v4347_v18  ;;  %v6509_v34 = vpack.c.bf16 %v4352_v1, %v4348_v14 }
 0x5c5   : > { %5276 = vmatmul.mubr.f32.vlgmr.msra.gmra.mrb[32].mxu0 %v3937_v31  ;;  %6510 = vmatprep.subr.bf16.mxu1 %v6509_v34 }
 0x5c6   : > { %6512 = vmatpush1.bf16.msra.mxu1 %v6511_v33  ;;  %6078 = vmatprep.mubr.msk.f32.mxu0 %vm1343_vm1, %v3940_v10 }
 0x5c9   : > { %5282 = vmatmul.mubr.f32.gmra.mrb[34].mxu0 %v3939_v60  ;;  %5389 = vmatmul.mubr.f32.vlgmr.msra.gmra.mrb[32].mxu1 %v3937_v31 }
 0x5ca   : > { %6079 = vmatprep.mubr.msk.f32.mxu0 %vm1343_vm1, %v3942_v22  ;;  %6086 = vmatprep.mubr.msk.f32.mxu1 %vm1343_vm1, %v3940_v10 }
 0x5cb   : > { %v5448_v32 = vpop.permute.xlu1 %5447 }
 0x5cd   : > { %5288 = vmatmul.mubr.f32.gmra.mrb[36].mxu0 %v3941_v12  ;;  %5395 = vmatmul.mubr.f32.gmra.mrb[34].mxu1 %v3939_v60 }
 0x5ce   : > { %6087 = vmatprep.mubr.msk.f32.mxu1 %vm1343_vm1, %v3942_v22  ;;  %6080 = vmatprep.mubr.msk.f32.mxu0 %vm1343_vm1, %v3944_v28 }
 0x5cf   : > { %v10528_v40 = vpop.permute.xlu1 %5457 }
 0x5d0   : > { %v5453_v63 = vpop.permute.xlu0 %5452 }
 0x5d1   : > { %5294 = vmatmul.mubr.f32.gmra.mrb[38].mxu0 %v3943_v41  ;;  %5401 = vmatmul.mubr.f32.gmra.mrb[36].mxu1 %v3941_v12 }
 0x5d2   : > { %6088 = vmatprep.mubr.msk.f32.mxu1 %vm1343_vm1, %v3944_v28  ;;  %6081 = vmatprep.mubr.msk.f32.mxu0 %vm1343_vm1, %v3946_v47 }
 0x5d4   : > { %v10532_v38 = vpop.permute.xlu0 %5462 }
 0x5d5   : > { %5300 = vmatmul.mubr.f32.gmra.mrb[40].mxu0 %v3945_v50  ;;  %5407 = vmatmul.mubr.f32.gmra.mrb[38].mxu1 %v3943_v41 }
 0x5d6   : > { %6089 = vmatprep.mubr.msk.f32.mxu1 %vm1343_vm1, %v3946_v47  ;;  %6082 = vmatprep.mubr.msk.f32.mxu0 %vm1343_vm1, %v3948_v24 }
 0x5d9   : > { %5306 = vmatmul.mubr.f32.gmra.mrb[42].mxu0 %v3947_v21  ;;  %5413 = vmatmul.mubr.f32.gmra.mrb[40].mxu1 %v3945_v50 }
 0x5da   : > { %6090 = vmatprep.mubr.msk.f32.mxu1 %vm1343_vm1, %v3948_v24  ;;  %6083 = vmatprep.mubr.msk.f32.mxu0 %vm1343_vm1, %v3950_v39 }
 0x5dd   : > { %5312 = vmatmul.mubr.f32.gmra.mrb[44].mxu0 %v3949_v62  ;;  %5419 = vmatmul.mubr.f32.gmra.mrb[42].mxu1 %v3947_v21 }
 0x5de   : > { %6084 = vmatprep.mubr.msk.f32.mxu0 %vm1343_vm1, %v3952_v19  ;;  %6091 = vmatprep.mubr.msk.f32.mxu1 %vm1343_vm1, %v3950_v39 }
 0x5e1   : > { %5318 = vmatmul.mubr.f32.gmra.mrb[46].mxu0 %v3951_v20  ;;  %5425 = vmatmul.mubr.f32.gmra.mrb[44].mxu1 %v3949_v62 }
 0x5e2   : > { %6092 = vmatprep.mubr.msk.f32.mxu1 %vm1343_vm1, %v3952_v19 }
 0x5e5   : > { %5431 = vmatmul.mubr.f32.gmra.mrb[46].mxu1 %v3951_v20 }
 0x698   : > { %v5277_v15 = vpop.f32.mrb[32].mxu0 }
 0x699   : > { %v5485_v9 = vadd.f32 %v5448_v32, %v5277_v15  ;;  %v5279_v16 = vpop.f32.mrb[33].mxu0 }
 0x69a   : > { %v5486_v57 = vadd.f32 %v5448_v32, %v5279_v16  ;;  %v5468_v16 = vpop.permute.xlu1 %5467 }
 0x69b   : > { %v6093_v48 = vmul.f32 -1.442695, %v5485_v9 }
 0x69c   : > { %v5283_v58 = vpop.f32.mrb[34].mxu0  ;;  %v5390_v8 = vpop.f32.mrb[32].mxu1  ;;  %v6094_v7 = vmul.f32 -1.442695, %v5486_v57 }
 0x69d   : > { %v5489_v49 = vadd.f32 %v5453_v63, %v5283_v58  ;;  %v5487_v43 = vadd.f32 %v5448_v32, %v5390_v8  ;;  %v5285_v36 = vpop.f32.mrb[35].mxu0  ;;  %v5392_v6 = vpop.f32.mrb[33].mxu1  ;;  %6931 = vpow2.f32 %v6093_v48 }
 0x69e   : > { %v5490_v56 = vadd.f32 %v5453_v63, %v5285_v36  ;;  %v5488_v3 = vadd.f32 %v5448_v32, %v5392_v6  ;;  %6933 = vpow2.f32 %v6094_v7 }
 0x69f   : > { %v6097_v5 = vmul.f32 -1.442695, %v5489_v49  ;;  %v6095_v42 = vmul.f32 -1.442695, %v5487_v43 }
 0x6a0   : > { %v5289_v11 = vpop.f32.mrb[36].mxu0  ;;  %v5396_v30 = vpop.f32.mrb[34].mxu1  ;;  %v6098_v4 = vmul.f32 -1.442695, %v5490_v56  ;;  %v6096_v53 = vmul.f32 -1.442695, %v5488_v3 }
 0x6a1   : > { %v5493_v52 = vadd.f32 %v10528_v40, %v5289_v11  ;;  %v5491_v17 = vadd.f32 %v5453_v63, %v5396_v30  ;;  %v5291_v37 = vpop.f32.mrb[37].mxu0  ;;  %v5398_v59 = vpop.f32.mrb[35].mxu1  ;;  %6935 = vpow2.f32 %v6097_v5 }
 0x6a2   : > { %v5494_v61 = vadd.f32 %v10528_v40, %v5291_v37  ;;  %6937 = vpow2.f32 %v6095_v42  ;;  %v5492_v26 = vadd.f32 %v5453_v63, %v5398_v59 }
 0x6a3   : > { %v6101_v23 = vmul.f32 -1.442695, %v5493_v52  ;;  %v6099_v44 = vmul.f32 -1.442695, %v5491_v17  ;;  %6939 = vpow2.f32 %v6098_v4 }
 0x6a4   : > { %v5295_v2 = vpop.f32.mrb[38].mxu0  ;;  %v5402_v54 = vpop.f32.mrb[36].mxu1  ;;  %6941 = vpow2.f32 %v6096_v53  ;;  %v6102_v55 = vmul.f32 -1.442695, %v5494_v61  ;;  %v6100_v46 = vmul.f32 -1.442695, %v5492_v26 }
 0x6a5   : > { %v5297_v35 = vpop.f32.mrb[39].mxu0  ;;  %v5404_v0 = vpop.f32.mrb[37].mxu1  ;;  %6943 = vpow2.f32 %v6101_v23  ;;  %v5497_v25 = vadd.f32 %v10532_v38, %v5295_v2  ;;  %v5495_v51 = vadd.f32 %v10528_v40, %v5402_v54 }
 0x6a6   : > { %6945 = vpow2.f32 %v6099_v44  ;;  %v5498_v31 = vadd.f32 %v10532_v38, %v5297_v35  ;;  %v5496_v63 = vadd.f32 %v10528_v40, %v5404_v0  ;;  %v5473_v26 = vpop.permute.xlu0 %5472 }
 0x6a7   : > { %v6932_v13 = vpop.eup %6931  ;;  %6947 = vpow2.f32 %v6102_v55  ;;  %v6105_v1 = vmul.f32 -1.442695, %v5497_v25  ;;  %v6103_v33 = vmul.f32 -1.442695, %v5495_v51  ;;  %v10573_v55 = vpop.permute.xlu1 %5477 }
 0x6a8   : > { %v5301_v45 = vpop.f32.mrb[40].mxu0  ;;  %v5408_v18 = vpop.f32.mrb[38].mxu1  ;;  %v5541_v60 = vadd.f32 1.0, %v6932_v13  ;;  %6949 = vpow2.f32 %v6100_v46  ;;  %v6106_v24 = vmul.f32 -1.442695, %v5498_v31 }
 0x6a9   : > { %v5303_v14 = vpop.f32.mrb[41].mxu0  ;;  %v10536_v27 = vpop.f32.mrb[39].mxu1  ;;  %6951 = vpow2.f32 %v6105_v1  ;;  %v5501_v8 = vadd.f32 %v5468_v16, %v5301_v45  ;;  %v5499_v56 = vadd.f32 %v10532_v38, %v5408_v18  ;;  %v6104_v40 = vmul.f32 -1.442695, %v5496_v63 }
 0x6aa   : > { %v6934_v29 = vpop.eup %6933  ;;  %6953 = vpow2.f32 %v6103_v33  ;;  %v5502_v30 = vadd.f32 %v5468_v16, %v5303_v14  ;;  %v5500_v2 = vadd.f32 %v10532_v38, %v10536_v27  ;;  %v5483_v63 = vpop.permute.xlu0 %5482 }
 0x6ab   : > { %v6936_v10 = vpop.eup %6935  ;;  %v5542_v41 = vadd.f32 1.0, %v6934_v29  ;;  %6955 = vrcp.f32 %v5541_v60  ;;  %v6109_v11 = vmul.f32 -1.442695, %v5501_v8  ;;  %v6107_v37 = vmul.f32 -1.442695, %v5499_v56 }
 0x6ac   : > { %v10539_v34 = vpop.f32.mrb[42].mxu0  ;;  %v10541_v22 = vpop.f32.mrb[40].mxu1  ;;  %v5545_v39 = vadd.f32 1.0, %v6936_v10  ;;  %v6110_v44 = vmul.f32 -1.442695, %v5502_v30 }
 0x6ad   : > { %v10543_v12 = vpop.f32.mrb[43].mxu0  ;;  %v6938_v28 = vpop.eup %6937  ;;  %6957 = vrcp.f32 %v5542_v41  ;;  %v5505_v51 = vadd.f32 %v5473_v26, %v10539_v34  ;;  %v6108_v38 = vmul.f32 -1.442695, %v5500_v2  ;;  %v5503_v14 = vadd.f32 %v5468_v16, %v10541_v22 }
 0x6ae   : > { %v10545_v47 = vpop.f32.mrb[41].mxu1  ;;  %v6940_v50 = vpop.eup %6939  ;;  %v5543_v20 = vadd.f32 1.0, %v6938_v28  ;;  %6959 = vpow2.f32 %v6106_v24  ;;  %v5506_v29 = vadd.f32 %v5473_v26, %v10543_v12 }
 0x6af   : > { %v6942_v21 = vpop.eup %6941  ;;  %v5546_v57 = vadd.f32 1.0, %v6940_v50  ;;  %6961 = vrcp.f32 %v5545_v39  ;;  %v6113_v31 = vmul.f32 -1.442695, %v5505_v51  ;;  %v5504_v33 = vadd.f32 %v5468_v16, %v10545_v47 }
 0x6b0   : > { %v5313_v62 = vpop.f32.mrb[44].mxu0  ;;  %v6944_v19 = vpop.eup %6943  ;;  %v5544_v58 = vadd.f32 1.0, %v6942_v21  ;;  %6963 = vrcp.f32 %v5543_v20  ;;  %v6111_v28 = vmul.f32 -1.442695, %v5503_v14  ;;  %v6114_v12 = vmul.f32 -1.442695, %v5506_v29 }
 0x6b1   : > { %v10547_v32 = vpop.f32.mrb[42].mxu1  ;;  %v10549_v15 = vpop.f32.mrb[45].mxu0  ;;  %v5589_v7 = vadd.f32 1.0, %v6944_v19  ;;  %6965 = vrcp.f32 %v5546_v57  ;;  %v5509_v46 = vadd.f32 %v10573_v55, %v5313_v62  ;;  %v6112_v24 = vmul.f32 -1.442695, %v5504_v33 }
 0x6b2   : > { %v6946_v9 = vpop.eup %6945  ;;  %v10552_v48 = vpop.f32.mrb[43].mxu1  ;;  %6967 = vrcp.f32 %v5544_v58  ;;  %v5507_v10 = vadd.f32 %v5473_v26, %v10547_v32  ;;  %v5510_v60 = vadd.f32 %v10573_v55, %v10549_v15  ;;  %v5669_v32 = vld [vmem:[#allocation8] sm:$0xff] }
 0x6b3   : > { %v6948_v36 = vpop.eup %6947  ;;  %v5547_v6 = vadd.f32 1.0, %v6946_v9  ;;  %6969 = vrcp.f32 %v5589_v7  ;;  %v5508_v21 = vadd.f32 %v5473_v26, %v10552_v48 }
 0x6b4   : > { %v10554_v49 = vpop.f32.mrb[46].mxu0  ;;  %v10556_v43 = vpop.f32.mrb[44].mxu1  ;;  %v5590_v4 = vadd.f32 1.0, %v6948_v36  ;;  %v6115_v39 = vmul.f32 -1.442695, %v5507_v10 }
 0x6b5   : > { %v10559_v3 = vpop.f32.mrb[47].mxu0  ;;  %v10561_v5 = vpop.f32.mrb[45].mxu1  ;;  %6971 = vrcp.f32 %v5547_v6  ;;  %v6116_v16 = vmul.f32 -1.442695, %v5508_v21  ;;  %v5513_v7 = vadd.f32 %v5483_v63, %v10554_v49  ;;  %v5670_v6 = vld [vmem:[#allocation8 + $0x8] sm:$0xff]  ;;  %v5511_v30 = vadd.f32 %v10573_v55, %v10556_v43 }
 0x6b6   : > { %v6950_v42 = vpop.eup %6949  ;;  %6973 = vpow2.f32 %v6104_v40  ;;  %v5514_v49 = vadd.f32 %v5483_v63, %v10559_v3  ;;  %v5512_v43 = vadd.f32 %v10573_v55, %v10561_v5 }
 0x6b7   : > { %v6952_v17 = vpop.eup %6951  ;;  %v5548_v23 = vadd.f32 1.0, %v6950_v42  ;;  %6975 = vpow2.f32 %v6109_v11 }
 0x6b8   : > { %v10563_v52 = vpop.f32.mrb[46].mxu1  ;;  %v6954_v53 = vpop.eup %6953  ;;  %6977 = vrcp.f32 %v5590_v4  ;;  %v5593_v35 = vadd.f32 1.0, %v6952_v17 }
 0x6b9   : > { %v10565_v59 = vpop.f32.mrb[47].mxu1  ;;  %v10567_v61 = vpop.eup %6955  ;;  %v5591_v25 = vadd.f32 1.0, %v6954_v53  ;;  %6979 = vpow2.f32 %v6107_v37  ;;  %v5515_v3 = vadd.f32 %v5483_v63, %v10563_v52 }
 0x6ba   : > { %v10571_v54 = vpop.eup %6957  ;;  %6981 = vrcp.f32 %v5548_v23 }
 0x6bb   : > { %v6960_v0 = vpop.eup %6959  ;;  %6983 = vpow2.f32 %v6110_v44 }
 0x6bc   : > { %v10576_v45 = vpop.eup %6961  ;;  %6985 = vrcp.f32 %v5593_v35  ;;  %v5594_v27 = vadd.f32 1.0, %v6960_v0 }
 0x6bd   : > { %v10579_v18 = vpop.eup %6963  ;;  %6987 = vrcp.f32 %v5591_v25  ;;  %v5516_v25 = vadd.f32 %v5483_v63, %v10565_v59 }
 0x6be   : > { %v10582_v13 = vpop.eup %6965  ;;  %6989 = vtanh.f32 %v5509_v46  ;;  %v5673_v46 = vld [vmem:[#allocation8 + $0x20] sm:$0xff] }
 0x6bf   : > { %v10585_v1 = vpop.eup %6967  ;;  %6991 = vpow2.f32 %v6108_v38 }
 0x6c0   : > { %v6970_v34 = vpop.eup %6969  ;;  %6993 = vrcp.f32 %v5594_v27  ;;  %v5671_v27 = vld [vmem:[#allocation8 + $0x10] sm:$0xff] }
 0x6c1   : > { %v10591_v22 = vpop.eup %6971  ;;  %6995 = vpow2.f32 %v6113_v31  ;;  %v5677_v48 = vmul.f32 %v6970_v34, %v5669_v32  ;;  %v5674_v31 = vld [vmem:[#allocation8 + $0x28] sm:$0xff] }
 0x6c2   : > { %v6974_v41 = vpop.eup %6973  ;;  %6997 = vtanh.f32 %v5510_v60 }
 0x6c3   : > { %v6976_v50 = vpop.eup %6975  ;;  %v5592_v19 = vadd.f32 1.0, %v6974_v41  ;;  %6999 = vpow2.f32 %v6111_v28 }
 0x6c4   : > { %v6978_v47 = vpop.eup %6977  ;;  %v5637_v15 = vadd.f32 1.0, %v6976_v50  ;;  %7001 = vpow2.f32 %v6114_v12  ;;  %v5672_v50 = vld [vmem:[#allocation8 + $0x18] sm:$0xff] }
 0x6c5   : > { %v6980_v62 = vpop.eup %6979  ;;  %7003 = vpow2.f32 %v6112_v24  ;;  %v5678_v17 = vmul.f32 %v6978_v47, %v5670_v6 }
 0x6c6   : > { %v10594_v20 = vpop.eup %6981  ;;  %v5595_v58 = vadd.f32 1.0, %v6980_v62  ;;  %7005 = vpow2.f32 %v6115_v39  ;;  %v5675_v39 = vld [vmem:[#allocation8 + $0x30] sm:$0xff] }
 0x6c7   : > { %v6984_v9 = vpop.eup %6983  ;;  %7007 = vrcp.f32 %v5592_v19 }
 0x6c8   : > { %v6986_v57 = vpop.eup %6985  ;;  %7009 = vrcp.f32 %v5637_v15  ;;  %v5638_v56 = vadd.f32 1.0, %v6984_v9 }
 0x6c9   : > { %v6988_v8 = vpop.eup %6987  ;;  %7011 = vpow2.f32 %v6116_v16  ;;  %v5681_v55 = vmul.f32 %v6986_v57, %v5673_v46 }
 0x6ca   : > { %v6990_v36 = vpop.eup %6989  ;;  %7013 = vrcp.f32 %v5595_v58  ;;  %v5679_v60 = vmul.f32 %v6988_v8, %v5671_v27 }
 0x6cb   : > { %v6992_v40 = vpop.eup %6991  ;;  %v5685_v42 = vmul.f32 %v6990_v36, %v10567_v61  ;;  %7015 = vtanh.f32 %v5513_v7 }
 0x6cc   : > { %v6994_v11 = vpop.eup %6993  ;;  %7017 = vrcp.f32 %v5638_v56  ;;  %v5596_v23 = vadd.f32 1.0, %v6992_v40 }
 0x6cd   : > { %v6996_v4 = vpop.eup %6995  ;;  %v5693_v37 = vadd.f32 %v5685_v42, %v5677_v48  ;;  %v5682_v12 = vmul.f32 %v6994_v11, %v5674_v31 }
 0x6ce   : > { %v6998_v53 = vpop.eup %6997  ;;  %v5641_v14 = vadd.f32 1.0, %v6996_v4 }
 0x6cf   : > { %v7000_v44 = vpop.eup %6999  ;;  %7019 = vtanh.f32 %v5693_v37  ;;  %5717 = vst [vmem:[#allocation8] sm:$0xff] %v5693_v37  ;;  %5749 = vst [vmem:[%s7454_s19] sm:$0xff] %v5693_v37  ;;  %v5686_v61 = vmul.f32 %v6998_v53, %v10571_v54 }
 0x6d0   : > { %v7002_v2 = vpop.eup %7001  ;;  %7021 = vtanh.f32 %v5511_v30  ;;  %v5639_v29 = vadd.f32 1.0, %v7000_v44 }
 0x6d1   : > { %v7004_v26 = vpop.eup %7003  ;;  %v5694_v35 = vadd.f32 %v5686_v61, %v5678_v17  ;;  %7023 = vtanh.f32 %v5514_v49  ;;  %v5642_v33 = vadd.f32 1.0, %v7002_v2 }
 0x6d2   : > { %v7006_v0 = vpop.eup %7005  ;;  %7025 = vrcp.f32 %v5596_v23  ;;  %v5640_v28 = vadd.f32 1.0, %v7004_v26 }
 0x6d3   : > { %v7008_v51 = vpop.eup %7007  ;;  %7027 = vtanh.f32 %v5694_v35  ;;  %5718 = vst [vmem:[#allocation8 + $0x8] sm:$0xff] %v5694_v35  ;;  %5750 = vst [vmem:[%s7454_s19 + $0x8] sm:$0xff] %v5694_v35  ;;  %v5643_v16 = vadd.f32 1.0, %v7006_v0 }
 0x6d4   : > { %v7010_v54 = vpop.eup %7009  ;;  %7029 = vtanh.f32 %v5512_v43  ;;  %v5680_v9 = vmul.f32 %v7008_v51, %v5672_v50 }
 0x6d5   : > { %v7012_v38 = vpop.eup %7011  ;;  %7031 = vtanh.f32 %v5515_v3 }
 0x6d6   : > { %v7014_v5 = vpop.eup %7013  ;;  %7033 = vtanh.f32 %v5516_v25  ;;  %v5644_v8 = vadd.f32 1.0, %v7012_v38 }
 0x6d7   : > { %v7016_v52 = vpop.eup %7015  ;;  %7035 = vrcp.f32 %v5641_v14 }
 0x6d8   : > { %v7018_v34 = vpop.eup %7017  ;;  %v5689_v59 = vmul.f32 %v7016_v52, %v10576_v45  ;;  %7037 = vrcp.f32 %v5639_v29  ;;  %v5676_v45 = vld [vmem:[#allocation8 + $0x38] sm:$0xff] }
 0x6d9   : > { %v7020_v10 = vpop.eup %7019  ;;  %7039 = vrcp.f32 %v5642_v33 }
 0x6da   : > { %v7022_v41 = vpop.eup %7021  ;;  %v5709_v24 = vmul.f32 %v7020_v10, %v7010_v54  ;;  %v5697_v21 = vadd.f32 %v5689_v59, %v5681_v55 }
 0x6db   : > { %v7024_v47 = vpop.eup %7023  ;;  %v5687_v62 = vmul.f32 %v7022_v41, %v10579_v18  ;;  %v5683_v18 = vmul.f32 %v7014_v5, %v5675_v39 }
 0x6dc   : > { %v7026_v19 = vpop.eup %7025  ;;  %5725 = vst [vmem:[#allocation7] sm:$0xff] %v5709_v24  ;;  %5733 = vst [vmem:[%s7444_s27] sm:$0xff] %v5709_v24  ;;  %7041 = vtanh.f32 %v5697_v21  ;;  %v5690_v32 = vmul.f32 %v7024_v47, %v10582_v13 }
 0x6dd   : > { %5741 = vst [vmem:[%s7449_s26] sm:$0xff] %v5709_v24  ;;  %5721 = vst [vmem:[#allocation8 + $0x20] sm:$0xff] %v5697_v21  ;;  %v7028_v15 = vpop.eup %7027  ;;  %7043 = vrcp.f32 %v5640_v28  ;;  %v5695_v57 = vadd.f32 %v5687_v62, %v5679_v60  ;;  %v5684_v36 = vmul.f32 %v7026_v19, %v5676_v45 }
 0x6de   : > { %5753 = vst [vmem:[%s7454_s19 + $0x20] sm:$0xff] %v5697_v21  ;;  %v7030_v63 = vpop.eup %7029  ;;  %v5710_v58 = vmul.f32 %v7028_v15, %v7018_v34  ;;  %v5698_v48 = vadd.f32 %v5690_v32, %v5682_v12 }
 0x6df   : > { %v7032_v7 = vpop.eup %7031  ;;  %7045 = vtanh.f32 %v5695_v57  ;;  %5719 = vst [vmem:[#allocation8 + $0x10] sm:$0xff] %v5695_v57  ;;  %5751 = vst [vmem:[%s7454_s19 + $0x10] sm:$0xff] %v5695_v57  ;;  %v5688_v13 = vmul.f32 %v7030_v63, %v10585_v1 }
 0x6e0   : > { %v7034_v6 = vpop.eup %7033  ;;  %5726 = vst [vmem:[#allocation7 + $0x8] sm:$0xff] %v5710_v58  ;;  %5734 = vst [vmem:[%s7444_s27 + $0x8] sm:$0xff] %v5710_v58  ;;  %7047 = vtanh.f32 %v5698_v48  ;;  %v5691_v56 = vmul.f32 %v7032_v7, %v10591_v22 }
 0x6e1   : > { %5742 = vst [vmem:[%s7449_s26 + $0x8] sm:$0xff] %v5710_v58  ;;  %5722 = vst [vmem:[#allocation8 + $0x28] sm:$0xff] %v5698_v48  ;;  %7049 = vrcp.f32 %v5643_v16  ;;  %v5696_v40 = vadd.f32 %v5688_v13, %v5680_v9  ;;  %v5692_v42 = vmul.f32 %v7034_v6, %v10594_v20  ;;  %v7036_v30 = vpop.eup %7035 }
 0x6e2   : > { %5754 = vst [vmem:[%s7454_s19 + $0x28] sm:$0xff] %v5698_v48  ;;  %7051 = vrcp.f32 %v5644_v8  ;;  %v5699_v11 = vadd.f32 %v5691_v56, %v5683_v18  ;;  %v7038_v4 = vpop.eup %7037 }
 0x6e3   : > { %7053 = vtanh.f32 %v5696_v40  ;;  %5720 = vst [vmem:[#allocation8 + $0x18] sm:$0xff] %v5696_v40  ;;  %5752 = vst [vmem:[%s7454_s19 + $0x18] sm:$0xff] %v5696_v40  ;;  %v5700_v1 = vadd.f32 %v5692_v42, %v5684_v36  ;;  %v7040_v17 = vpop.eup %7039 }
 0x6e4   : > { %7055 = vtanh.f32 %v5699_v11  ;;  %5723 = vst [vmem:[#allocation8 + $0x30] sm:$0xff] %v5699_v11  ;;  %5755 = vst [vmem:[%s7454_s19 + $0x30] sm:$0xff] %v5699_v11 }
 0x6e5   : > { %7057 = vtanh.f32 %v5700_v1  ;;  %5724 = vst [vmem:[#allocation8 + $0x38] sm:$0xff] %v5700_v1  ;;  %5756 = vst [vmem:[%s7454_s19 + $0x38] sm:$0xff] %v5700_v1 }
 0x6e6   : > { %v7042_v22 = vpop.eup %7041 }
 0x6e7   : > { %v7044_v20 = vpop.eup %7043  ;;  %v5713_v37 = vmul.f32 %v7042_v22, %v7036_v30 }
 0x6e9   : > { %v7046_v49 = vpop.eup %7045  ;;  %5729 = vst [vmem:[#allocation7 + $0x20] sm:$0xff] %v5713_v37  ;;  %5737 = vst [vmem:[%s7444_s27 + $0x20] sm:$0xff] %v5713_v37 }
 0x6ea   : > { %5745 = vst [vmem:[%s7449_s26 + $0x20] sm:$0xff] %v5713_v37  ;;  %v7048_v53 = vpop.eup %7047  ;;  %v5711_v23 = vmul.f32 %v7046_v49, %v7038_v4 }
 0x6eb   : > { %v7050_v44 = vpop.eup %7049  ;;  %v5714_v61 = vmul.f32 %v7048_v53, %v7040_v17 }
 0x6ec   : > { %v7052_v2 = vpop.eup %7051  ;;  %5727 = vst [vmem:[#allocation7 + $0x10] sm:$0xff] %v5711_v23  ;;  %5735 = vst [vmem:[%s7444_s27 + $0x10] sm:$0xff] %v5711_v23 }
 0x6ed   : > { %5743 = vst [vmem:[%s7449_s26 + $0x10] sm:$0xff] %v5711_v23  ;;  %v7054_v43 = vpop.eup %7053  ;;  %5730 = vst [vmem:[#allocation7 + $0x28] sm:$0xff] %v5714_v61 }
 0x6ee   : > { %5738 = vst [vmem:[%s7444_s27 + $0x28] sm:$0xff] %v5714_v61  ;;  %5746 = vst [vmem:[%s7449_s26 + $0x28] sm:$0xff] %v5714_v61  ;;  %v7056_v26 = vpop.eup %7055  ;;  %v5712_v35 = vmul.f32 %v7054_v43, %v7044_v20 }
 0x6ef   : > { %v7058_v3 = vpop.eup %7057  ;;  %v5715_v0 = vmul.f32 %v7056_v26, %v7050_v44 }
 0x6f0   : > { %5728 = vst [vmem:[#allocation7 + $0x18] sm:$0xff] %v5712_v35  ;;  %5736 = vst [vmem:[%s7444_s27 + $0x18] sm:$0xff] %v5712_v35  ;;  %v5716_v25 = vmul.f32 %v7058_v3, %v7052_v2 }
 0x6f1   : > { %5744 = vst [vmem:[%s7449_s26 + $0x18] sm:$0xff] %v5712_v35  ;;  %5731 = vst [vmem:[#allocation7 + $0x30] sm:$0xff] %v5715_v0 }
 0x6f2   : > { %5739 = vst [vmem:[%s7444_s27 + $0x30] sm:$0xff] %v5715_v0  ;;  %5747 = vst [vmem:[%s7449_s26 + $0x30] sm:$0xff] %v5715_v0 }
 0x6f3   : > { %5732 = vst [vmem:[#allocation7 + $0x38] sm:$0xff] %v5716_v25  ;;  %5740 = vst [vmem:[%s7444_s27 + $0x38] sm:$0xff] %v5716_v25 }
 0x6f4   : > { %5748 = vst [vmem:[%s7449_s26 + $0x38] sm:$0xff] %v5716_v25 }
 0x6f5 PF: > { %s10755_s19 = sld [smem:[#allocation14_spill]]  ;;  %s10756_s25 = sld [smem:[#allocation12_spill]] }
 0x6f6   : > { %s10757_s26 = sld [smem:[#allocation13_spill]]  ;;  %s10758_s27 = sld [smem:[#allocation15_spill]] }
 0x6f7   : > { %s10759_s28 = sld [smem:[#allocation16_spill]] }
 0x6fb   : > { %s25_s29 = sadd.s32 1, %s10755_s19  }
 0x6fc   : > { %p22_p9 = scmp.ge.s32.totalorder %s25_s29, 18  }
 0x6fe   :  { %24 = sbr.rel (!%p22_p9) target bundleno = 6 (0x6), region = 135 }
 0x705   :  { %5818 = vsyncpa [#allocation10], 1 }
 0x706   :  { %5820 = vsyncpa [#allocation10 + $0x1], 1 }

</bundles_post_ra>
